<compile_context>
chip_gen: v6e
topology: v6e:2x2x1
jax: 0.10.0
libtpu: 0.0.40
codegen_flags: <defaults>
</compile_context>

<pallas_src>
import jax
import jax.numpy as jnp
from jax.experimental import pallas as pl
from jax.experimental.pallas import tpu as pltpu

# ----------------------------- model sizes ----------------------------------
SRC_VOCAB = 32
TRG_VOCAB = 32          # decoder.output_dim
ENC_EMB = 16
DEC_EMB = 16
ENC_HID = 32
DEC_HID = 32
PAD_IDX = 1
SOS_IDX = 2
EOS_IDX = 3

BATCH = 2
SRC_LEN = 8
TRG_LEN = 8


def _spec(shape):
    nd = len(shape)
    return pl.BlockSpec(shape, lambda i, _nd=nd: (0,) * _nd)


# ----------------------------- Pallas kernel ---------------------------------
def _gru_step(gi_t, h, whh, bhh, H):
    # PyTorch GRU gate order (r, z, n);  h' = (1 - z) * n + z * h
    gh = jnp.dot(h, whh, preferred_element_type=jnp.float32) + bhh
    r = jax.nn.sigmoid(gi_t[:, :H] + gh[:, :H])
    z = jax.nn.sigmoid(gi_t[:, H:2 * H] + gh[:, H:2 * H])
    n = jnp.tanh(gi_t[:, 2 * H:] + r * gh[:, 2 * H:])
    return (1.0 - z) * n + z * h


def seq2seq_kernel(src_sb_ref, src_col_ref, trg0_ref,
                   wenc_in_ref, benc_in_ref, whh_f_ref, bhh_f_ref,
                   whh_b_ref, bhh_b_ref, wfc_f_ref, wfc_b_ref, fc_b_ref,
                   wa_e_ref, attn_ba_ref, wa_h_ref, v_ref,
                   wA_ref, bA_ref, wB_ref,
                   out_ref, attn_ref,
                   enc_buf, x_buf):
    f32 = jnp.float32
    S, BP = src_sb_ref.shape
    H = whh_f_ref.shape[0]
    DH = wa_h_ref.shape[0]
    T, _, V = out_ref.shape
    SV = wenc_in_ref.shape[0]

    # ---------------- encoder: one-hot embed + input projection (1 GEMM) -----
    src_col = src_col_ref[...]                                    # [S*BP, 1] int32
    oh_src = (jax.lax.broadcasted_iota(jnp.int32, (S * BP, SV), 1)
              == src_col).astype(f32)                             # [S*BP, SV]
    gi_all = (jnp.dot(oh_src, wenc_in_ref[...], preferred_element_type=f32)
              + benc_in_ref[...]).reshape(S, BP, 6 * H)           # fwd|bwd gates

    mask = (src_sb_ref[...] != PAD_IDX)                           # [S, BP] bool

    whh_f = whh_f_ref[...]
    bhh_f = bhh_f_ref[...]
    whh_b = whh_b_ref[...]
    bhh_b = bhh_b_ref[...]

    # bidirectional GRU recurrences -> lane-concatenated enc_buf [S, BP, 2H]
    h_f = jnp.zeros((BP, H), f32)
    for t in range(S):
        h_f = _gru_step(gi_all[t, :, :3 * H], h_f, whh_f, bhh_f, H)
        enc_buf[t, :, :H] = h_f
    h_b = jnp.zeros((BP, H), f32)
    for t in range(S - 1, -1, -1):
        h_b = _gru_step(gi_all[t, :, 3 * H:], h_b, whh_b, bhh_b, H)
        enc_buf[t, :, H:] = h_b

    enc = enc_buf[...]                                            # [S, BP, 2H]

    # attention enc-side projection (constant over decode steps) — one GEMM
    part_e = (jnp.dot(enc.reshape(S * BP, 2 * H), wa_e_ref[...],
                      preferred_element_type=f32)
              + attn_ba_ref[...]).reshape(S, BP, DH)

    # initial decoder hidden = tanh(Linear(cat(h_fwd_final, h_bwd_final)))
    hidden = jnp.tanh(
        jnp.dot(h_f, wfc_f_ref[...], preferred_element_type=f32)
        + jnp.dot(h_b, wfc_b_ref[...], preferred_element_type=f32)
        + fc_b_ref[...])
    part_h = jnp.dot(hidden, wa_h_ref[...], preferred_element_type=f32)

    # ---------------- decoder: T-1 greedy steps, 2 MXU dots per step ---------
    v = v_ref[...]                                                # [1, DH]
    bias_A = bA_ref[...]                                          # [1, 6DH+V]

    coli = jax.lax.broadcasted_iota(jnp.int32, (BP, V), 1)
    colf = coli.astype(f32)
    onehot = (coli == trg0_ref[...]).astype(f32)                  # <sos> one-hot

    out_ref[0] = jnp.zeros((BP, V), f32)                          # matches reference
    attn_ref[0] = jnp.zeros((S, BP), f32)

    for t in range(1, T):                                         # static unroll
        # --- attention (enc-side projection precomputed) ---
        energy = jnp.tanh(part_e + part_h[None, :, :])            # [S, BP, DH]
        scores = jnp.sum(energy * v[None, :, :], axis=-1)         # [S, BP]
        scores = jnp.where(mask, scores, -1e10)                   # masked_fill
        scores = scores - jnp.max(scores, axis=0, keepdims=True)
        e = jnp.exp(scores)
        a = e * pl.reciprocal(jnp.sum(e, axis=0, keepdims=True), approx=True)
        w = jnp.sum(a[:, :, None] * enc, axis=0)                  # [BP, 2H]

        # --- dot A: [onehot | weighted | hidden] @ W_A -> gi | pred_part | gh
        x_buf[:, :V] = onehot
        x_buf[:, V:V + 2 * H] = w
        x_buf[:, V + 2 * H:] = hidden
        gg = jnp.dot(x_buf[...], wA_ref[...],
                     preferred_element_type=f32) + bias_A         # [BP, 6DH+V]
        gi = gg[:, :3 * DH]
        pred_part = gg[:, 3 * DH:3 * DH + V]
        gh = gg[:, 3 * DH + V:]

        # --- GRU cell ---
        r = jax.nn.sigmoid(gi[:, :DH] + gh[:, :DH])
        z = jax.nn.sigmoid(gi[:, DH:2 * DH] + gh[:, DH:2 * DH])
        n = jnp.tanh(gi[:, 2 * DH:] + r * gh[:, 2 * DH:])
        hidden = (1.0 - z) * n + z * hidden

        # --- dot B: pred hidden-part + next step's attention part_h ---
        hb2 = jnp.dot(hidden, wB_ref[...], preferred_element_type=f32)  # [BP, V+DH]
        pred = pred_part + hb2[:, :V]
        part_h = hb2[:, V:]

        out_ref[t] = pred
        attn_ref[t] = a

        # --- greedy feedback (teacher_forcing_ratio = 0): argmax -> one-hot ---
        mx = jnp.max(pred, axis=1, keepdims=True)
        idx = jnp.min(jnp.where(pred >= mx, colf, jnp.float32(V)),
                      axis=1, keepdims=True)                      # first argmax
        onehot = (colf == idx).astype(f32)


# ----------------------------- Pallas wrapper --------------------------------
def pallas_seq2seq(src_sb, src_col, trg0_col, W, T):
    S, BP = src_sb.shape
    H = W["whh_f"].shape[0]
    DH = W["wa_h"].shape[0]
    V = W["w_B"].shape[1] - DH
    args = (src_sb, src_col, trg0_col,
            W["w_enc_in"], W["b_enc_in"], W["whh_f"], W["bhh_f"],
            W["whh_b"], W["bhh_b"], W["wfc_f"], W["wfc_b"], W["fc_b"],
            W["wa_e"], W["attn_ba"], W["wa_h"], W["attn_v"],
            W["w_A"], W["b_A"], W["w_B"])
    out_shapes = (jax.ShapeDtypeStruct((T, BP, V), jnp.float32),   # logits per step
                  jax.ShapeDtypeStruct((T, S, BP), jnp.float32))   # attention (seq-major)
    return pl.pallas_call(
        seq2seq_kernel,
        grid=(1,),
        in_specs=[_spec(a.shape) for a in args],
        out_specs=[_spec(s.shape) for s in out_shapes],
        out_shape=out_shapes,
        scratch_shapes=[pltpu.VMEM((S, BP, 2 * H), jnp.float32),        # enc outputs
                        pltpu.VMEM((BP, V + 2 * H + DH), jnp.float32)],  # fused GEMM operand
        compiler_params=pltpu.CompilerParams(
            dimension_semantics=("arbitrary",)),
    )(*args)


# ----------------------------- parameters ------------------------------------
def init_params(key):
    ks = iter(jax.random.split(key, 32))

    def w(shape):
        return jax.random.normal(next(ks), shape, jnp.float32) * 0.1

    p = {
        # encoder
        "enc_emb": w((SRC_VOCAB, ENC_EMB)),
        "enc_wih_f": w((ENC_EMB, 3 * ENC_HID)), "enc_whh_f": w((ENC_HID, 3 * ENC_HID)),
        "enc_bih_f": w((1, 3 * ENC_HID)), "enc_bhh_f": w((1, 3 * ENC_HID)),
        "enc_wih_b": w((ENC_EMB, 3 * ENC_HID)), "enc_whh_b": w((ENC_HID, 3 * ENC_HID)),
        "enc_bih_b": w((1, 3 * ENC_HID)), "enc_bhh_b": w((1, 3 * ENC_HID)),
        "enc_fc_w": w((2 * ENC_HID, DEC_HID)), "enc_fc_b": w((1, DEC_HID)),
        # attention (Linear(DH + 2*EH -> DH) split into hidden-part / enc-part)
        "attn_wa_h": w((DEC_HID, DEC_HID)), "attn_wa_e": w((2 * ENC_HID, DEC_HID)),
        "attn_ba": w((1, DEC_HID)), "attn_v": w((1, DEC_HID)),
        # decoder
        "dec_emb": w((TRG_VOCAB, DEC_EMB)),
        "dec_wih": w((DEC_EMB + 2 * ENC_HID, 3 * DEC_HID)),
        "dec_whh": w((DEC_HID, 3 * DEC_HID)),
        "dec_bih": w((1, 3 * DEC_HID)), "dec_bhh": w((1, 3 * DEC_HID)),
        "dec_fc_w": w((DEC_HID + 2 * ENC_HID + DEC_EMB, TRG_VOCAB)),
        "dec_fc_b": w((1, TRG_VOCAB)),
    }
    return p


def pack_params(p):
    """One-time host-side weight packing (all concats / embedding folds hoisted
    out of the per-call path).  Mathematically exact: one-hot @ (E @ W) equals
    (one-hot @ E) @ W since one-hot row selection is exact."""
    H, DH, DE, V = ENC_HID, DEC_HID, DEC_EMB, TRG_VOCAB
    wih, whh, fcw, emb = p["dec_wih"], p["dec_whh"], p["dec_fc_w"], p["dec_emb"]

    # decoder fused dot-A weight: rows = [onehot(V) | weighted(2H) | hidden(DH)],
    # cols = [gi(3DH) | pred_partial(V) | gh(3DH)]
    rows_oh = jnp.concatenate(
        [emb @ wih[:DE], emb @ fcw[DH + 2 * H:], jnp.zeros((V, 3 * DH), jnp.float32)], axis=1)
    rows_w = jnp.concatenate(
        [wih[DE:], fcw[DH:DH + 2 * H], jnp.zeros((2 * H, 3 * DH), jnp.float32)], axis=1)
    rows_h = jnp.concatenate(
        [jnp.zeros((DH, 3 * DH), jnp.float32), jnp.zeros((DH, V), jnp.float32), whh], axis=1)
    w_A = jnp.concatenate([rows_oh, rows_w, rows_h], axis=0)          # [V+2H+DH, 6DH+V]
    b_A = jnp.concatenate([p["dec_bih"], p["dec_fc_b"], p["dec_bhh"]], axis=1)
    w_B = jnp.concatenate([fcw[:DH], p["attn_wa_h"]], axis=1)         # [DH, V+DH]

    return {
        # encoder: embedding folded into the (fwd|bwd) GRU input projection
        "w_enc_in": p["enc_emb"] @ jnp.concatenate([p["enc_wih_f"], p["enc_wih_b"]], axis=1),
        "b_enc_in": jnp.concatenate([p["enc_bih_f"], p["enc_bih_b"]], axis=1),
        "whh_f": p["enc_whh_f"], "bhh_f": p["enc_bhh_f"],
        "whh_b": p["enc_whh_b"], "bhh_b": p["enc_bhh_b"],
        "wfc_f": p["enc_fc_w"][:H], "wfc_b": p["enc_fc_w"][H:], "fc_b": p["enc_fc_b"],
        # attention
        "wa_e": p["attn_wa_e"], "attn_ba": p["attn_ba"],
        "wa_h": p["attn_wa_h"], "attn_v": p["attn_v"],
        # decoder fused weights
        "w_A": w_A, "b_A": b_A, "w_B": w_B,
    }


# ----------------------------- forward pass ----------------------------------
@jax.jit
def seq2seq_forward(packed, src, src_len, trg):
    # TODO(synk): teacher_forcing_ratio fixed at 0.0 (no in-kernel RNG to mirror
    #             random.random()); always greedy argmax feedback, as in inference.
    # TODO(synk): pack_padded_sequence skipped; all src_len == S here (no padding).
    S, B = src.shape
    T = trg.shape[0]

    # pad batch to a multiple of 8 (sublane count); padded columns are masked
    # inside the kernel and sliced off below.
    BP = -(-B // 8) * 8
    src_p = jnp.pad(src, ((0, 0), (0, BP - B)), constant_values=PAD_IDX)
    trg0 = jnp.pad(trg[0:1, :], ((0, 0), (0, BP - B)), constant_values=SOS_IDX)

    src_col = src_p.reshape(S * BP, 1)       # tokens with (s,b) on sublanes (for one-hot)
    trg0_col = trg0.reshape(BP, 1)           # <sos> tokens, one per sublane

    outs, attn_sb = pallas_seq2seq(src_p, src_col, trg0_col, packed, T)

    outputs = outs[:, :B, :]                                     # [T, B, V]
    attentions = jnp.transpose(attn_sb, (0, 2, 1))[:, :B, :]     # [T, B, S]
    return outputs, attentions


# ----------------------------- driver -----------------------------------------
if __name__ == "__main__":
    key = jax.random.PRNGKey(0)
    k_param, k_src, k_trg = jax.random.split(key, 3)

    params = init_params(k_param)
    packed = pack_params(params)             # one-time weight packing

    # tokens >= 4 so no <pad>/<sos>/<eos> inside the source sentence
    src = jax.random.randint(k_src, (SRC_LEN, BATCH), 4, SRC_VOCAB, dtype=jnp.int32)
    src_len = jnp.full((BATCH,), SRC_LEN, dtype=jnp.int32)
    trg = jax.random.randint(k_trg, (TRG_LEN, BATCH), 4, TRG_VOCAB, dtype=jnp.int32)
    trg = trg.at[0, :].set(SOS_IDX)

    outputs, attentions = seq2seq_forward(packed, src, src_len, trg)
    jax.block_until_ready((outputs, attentions))

    assert outputs.shape == (TRG_LEN, BATCH, TRG_VOCAB)
    assert attentions.shape == (TRG_LEN, BATCH, SRC_LEN)
    assert bool(jnp.all(jnp.isfinite(outputs))) and bool(jnp.all(jnp.isfinite(attentions)))
    print("KERNEL_OK")
</pallas_src>

<mosaic_0001>
module attributes {stable_mosaic.version = 11 : i64} {
  func.func @seq2seq_kernel(%arg0: i32, %arg1: memref<8x8xi32, #tpu.memory_space<vmem>>, %arg2: memref<64x1xi32, #tpu.memory_space<vmem>>, %arg3: memref<8x1xi32, #tpu.memory_space<vmem>>, %arg4: memref<32x192xf32, #tpu.memory_space<vmem>>, %arg5: memref<1x192xf32, #tpu.memory_space<vmem>>, %arg6: memref<32x96xf32, #tpu.memory_space<vmem>>, %arg7: memref<1x96xf32, #tpu.memory_space<vmem>>, %arg8: memref<32x96xf32, #tpu.memory_space<vmem>>, %arg9: memref<1x96xf32, #tpu.memory_space<vmem>>, %arg10: memref<32x32xf32, #tpu.memory_space<vmem>>, %arg11: memref<32x32xf32, #tpu.memory_space<vmem>>, %arg12: memref<1x32xf32, #tpu.memory_space<vmem>>, %arg13: memref<64x32xf32, #tpu.memory_space<vmem>>, %arg14: memref<1x32xf32, #tpu.memory_space<vmem>>, %arg15: memref<32x32xf32, #tpu.memory_space<vmem>>, %arg16: memref<1x32xf32, #tpu.memory_space<vmem>>, %arg17: memref<128x224xf32, #tpu.memory_space<vmem>>, %arg18: memref<1x224xf32, #tpu.memory_space<vmem>>, %arg19: memref<32x64xf32, #tpu.memory_space<vmem>>, %arg20: memref<8x8x32xf32, #tpu.memory_space<vmem>>, %arg21: memref<8x8x8xf32, #tpu.memory_space<vmem>>, %arg22: memref<8x8x64xf32, #tpu.memory_space<vmem>>, %arg23: memref<8x128xf32, #tpu.memory_space<vmem>>) attributes {dimension_semantics = [#tpu.dimension_semantics<arbitrary>], iteration_bounds = array<i64: 1>, scalar_prefetch = 0 : i64, scratch_operands = 2 : i64, tpu.core_type = #tpu.core_type<tc>, window_params = [{pipeline_mode = #tpu.pipeline_mode<synchronous>, transform_indices = @transform_0, window_bounds = array<i64: 8, 8>}, {pipeline_mode = #tpu.pipeline_mode<synchronous>, transform_indices = @transform_1, window_bounds = array<i64: 64, 1>}, {pipeline_mode = #tpu.pipeline_mode<synchronous>, transform_indices = @transform_2, window_bounds = array<i64: 8, 1>}, {pipeline_mode = #tpu.pipeline_mode<synchronous>, transform_indices = @transform_3, window_bounds = array<i64: 32, 192>}, {pipeline_mode = #tpu.pipeline_mode<synchronous>, transform_indices = @transform_4, window_bounds = array<i64: 1, 192>}, {pipeline_mode = #tpu.pipeline_mode<synchronous>, transform_indices = @transform_5, window_bounds = array<i64: 32, 96>}, {pipeline_mode = #tpu.pipeline_mode<synchronous>, transform_indices = @transform_6, window_bounds = array<i64: 1, 96>}, {pipeline_mode = #tpu.pipeline_mode<synchronous>, transform_indices = @transform_7, window_bounds = array<i64: 32, 96>}, {pipeline_mode = #tpu.pipeline_mode<synchronous>, transform_indices = @transform_8, window_bounds = array<i64: 1, 96>}, {pipeline_mode = #tpu.pipeline_mode<synchronous>, transform_indices = @transform_9, window_bounds = array<i64: 32, 32>}, {pipeline_mode = #tpu.pipeline_mode<synchronous>, transform_indices = @transform_10, window_bounds = array<i64: 32, 32>}, {pipeline_mode = #tpu.pipeline_mode<synchronous>, transform_indices = @transform_11, window_bounds = array<i64: 1, 32>}, {pipeline_mode = #tpu.pipeline_mode<synchronous>, transform_indices = @transform_12, window_bounds = array<i64: 64, 32>}, {pipeline_mode = #tpu.pipeline_mode<synchronous>, transform_indices = @transform_13, window_bounds = array<i64: 1, 32>}, {pipeline_mode = #tpu.pipeline_mode<synchronous>, transform_indices = @transform_14, window_bounds = array<i64: 32, 32>}, {pipeline_mode = #tpu.pipeline_mode<synchronous>, transform_indices = @transform_15, window_bounds = array<i64: 1, 32>}, {pipeline_mode = #tpu.pipeline_mode<synchronous>, transform_indices = @transform_16, window_bounds = array<i64: 128, 224>}, {pipeline_mode = #tpu.pipeline_mode<synchronous>, transform_indices = @transform_17, window_bounds = array<i64: 1, 224>}, {pipeline_mode = #tpu.pipeline_mode<synchronous>, transform_indices = @transform_18, window_bounds = array<i64: 32, 64>}, {pipeline_mode = #tpu.pipeline_mode<synchronous>, transform_indices = @transform_19, window_bounds = array<i64: 8, 8, 32>}, {pipeline_mode = #tpu.pipeline_mode<synchronous>, transform_indices = @transform_20, window_bounds = array<i64: 8, 8, 8>}]} {
    %c0 = arith.constant 0 : index
    %c0_0 = arith.constant 0 : index
    %0 = vector.load %arg2[%c0, %c0_0] : memref<64x1xi32, #tpu.memory_space<vmem>>, vector<64x1xi32>
    %1 = tpu.iota {dimensions = array<i32: 1>} : vector<64x32xi32>
    %2 = vector.broadcast %0 : vector<64x1xi32> to vector<64x32xi32>
    %3 = arith.cmpi eq, %1, %2 : vector<64x32xi32>
    %4 = arith.extui %3 : vector<64x32xi1> to vector<64x32xi32>
    %5 = arith.sitofp %4 : vector<64x32xi32> to vector<64x32xf32>
    %c0_1 = arith.constant 0 : index
    %c0_2 = arith.constant 0 : index
    %6 = vector.load %arg4[%c0_1, %c0_2] : memref<32x192xf32, #tpu.memory_space<vmem>>, vector<32x192xf32>
    %cst = arith.constant dense<0.000000e+00> : vector<64x192xf32>
    %7 = tpu.matmul %5, %6, %cst {dimension_numbers = #tpu.dot_dimension_numbers<[1], [0], [0], [1], [0, 0, 1, 1], [], []>} : vector<64x32xf32>, vector<32x192xf32>, vector<64x192xf32> -> vector<64x192xf32>
    %c0_3 = arith.constant 0 : index
    %c0_4 = arith.constant 0 : index
    %8 = vector.load %arg5[%c0_3, %c0_4] : memref<1x192xf32, #tpu.memory_space<vmem>>, vector<1x192xf32>
    %9 = vector.broadcast %8 : vector<1x192xf32> to vector<64x192xf32>
    %10 = arith.addf %7, %9 : vector<64x192xf32>
    %11 = vector.shape_cast %10 : vector<64x192xf32> to vector<8x8x192xf32>
    %c0_5 = arith.constant 0 : index
    %c0_6 = arith.constant 0 : index
    %12 = vector.load %arg1[%c0_5, %c0_6] : memref<8x8xi32, #tpu.memory_space<vmem>>, vector<8x8xi32>
    %c1_i32 = arith.constant 1 : i32
    %13 = vector.broadcast %c1_i32 : i32 to vector<8x8xi32>
    %14 = arith.cmpi ne, %12, %13 : vector<8x8xi32>
    %c0_7 = arith.constant 0 : index
    %c0_8 = arith.constant 0 : index
    %15 = vector.load %arg6[%c0_7, %c0_8] : memref<32x96xf32, #tpu.memory_space<vmem>>, vector<32x96xf32>
    %c0_9 = arith.constant 0 : index
    %c0_10 = arith.constant 0 : index
    %16 = vector.load %arg7[%c0_9, %c0_10] : memref<1x96xf32, #tpu.memory_space<vmem>>, vector<1x96xf32>
    %c0_11 = arith.constant 0 : index
    %c0_12 = arith.constant 0 : index
    %17 = vector.load %arg8[%c0_11, %c0_12] : memref<32x96xf32, #tpu.memory_space<vmem>>, vector<32x96xf32>
    %c0_13 = arith.constant 0 : index
    %c0_14 = arith.constant 0 : index
    %18 = vector.load %arg9[%c0_13, %c0_14] : memref<1x96xf32, #tpu.memory_space<vmem>>, vector<1x96xf32>
    %cst_15 = arith.constant 0.000000e+00 : f32
    %19 = vector.broadcast %cst_15 : f32 to vector<8x32xf32>
    %20 = vector.extract_strided_slice %11 {offsets = [0, 0, 0], sizes = [1, 8, 96], strides = [1, 1, 1]} : vector<8x8x192xf32> to vector<1x8x96xf32>
    %21 = vector.shape_cast %20 : vector<1x8x96xf32> to vector<8x96xf32>
    %cst_16 = arith.constant dense<0.000000e+00> : vector<8x96xf32>
    %22 = tpu.matmul %19, %15, %cst_16 {dimension_numbers = #tpu.dot_dimension_numbers<[1], [0], [0], [1], [0, 0, 1, 1], [], []>} : vector<8x32xf32>, vector<32x96xf32>, vector<8x96xf32> -> vector<8x96xf32>
    %23 = vector.broadcast %16 : vector<1x96xf32> to vector<8x96xf32>
    %24 = arith.addf %22, %23 : vector<8x96xf32>
    %25 = vector.extract_strided_slice %21 {offsets = [0, 0], sizes = [8, 32], strides = [1, 1]} : vector<8x96xf32> to vector<8x32xf32>
    %26 = vector.extract_strided_slice %24 {offsets = [0, 0], sizes = [8, 32], strides = [1, 1]} : vector<8x96xf32> to vector<8x32xf32>
    %27 = arith.addf %25, %26 : vector<8x32xf32>
    %28 = arith.negf %27 : vector<8x32xf32>
    %29 = math.exp %28 : vector<8x32xf32>
    %cst_17 = arith.constant 1.000000e+00 : f32
    %30 = vector.broadcast %cst_17 : f32 to vector<8x32xf32>
    %31 = arith.addf %30, %29 : vector<8x32xf32>
    %32 = arith.divf %30, %31 : vector<8x32xf32>
    %33 = vector.extract_strided_slice %21 {offsets = [0, 32], sizes = [8, 32], strides = [1, 1]} : vector<8x96xf32> to vector<8x32xf32>
    %34 = vector.extract_strided_slice %24 {offsets = [0, 32], sizes = [8, 32], strides = [1, 1]} : vector<8x96xf32> to vector<8x32xf32>
    %35 = arith.addf %33, %34 : vector<8x32xf32>
    %36 = arith.negf %35 : vector<8x32xf32>
    %37 = math.exp %36 : vector<8x32xf32>
    %cst_18 = arith.constant 1.000000e+00 : f32
    %38 = vector.broadcast %cst_18 : f32 to vector<8x32xf32>
    %39 = arith.addf %38, %37 : vector<8x32xf32>
    %40 = arith.divf %38, %39 : vector<8x32xf32>
    %41 = vector.extract_strided_slice %21 {offsets = [0, 64], sizes = [8, 32], strides = [1, 1]} : vector<8x96xf32> to vector<8x32xf32>
    %42 = vector.extract_strided_slice %24 {offsets = [0, 64], sizes = [8, 32], strides = [1, 1]} : vector<8x96xf32> to vector<8x32xf32>
    %43 = arith.mulf %32, %42 : vector<8x32xf32>
    %44 = arith.addf %41, %43 : vector<8x32xf32>
    %45 = math.tanh %44 : vector<8x32xf32>
    %cst_19 = arith.constant 1.000000e+00 : f32
    %46 = vector.broadcast %cst_19 : f32 to vector<8x32xf32>
    %47 = arith.subf %46, %40 : vector<8x32xf32>
    %48 = arith.mulf %47, %45 : vector<8x32xf32>
    %49 = arith.mulf %40, %19 : vector<8x32xf32>
    %50 = arith.addf %48, %49 : vector<8x32xf32>
    %c0_20 = arith.constant 0 : index
    %c0_21 = arith.constant 0 : index
    %c0_22 = arith.constant 0 : index
    %51 = vector.load %arg22[%c0_20, %c0_21, %c0_22] : memref<8x8x64xf32, #tpu.memory_space<vmem>>, vector<1x8x32xf32>
    %52 = vector.shape_cast %51 : vector<1x8x32xf32> to vector<8x32xf32>
    %53 = vector.shape_cast %50 : vector<8x32xf32> to vector<1x8x32xf32>
    tpu.vector_store %arg22[%c0_20, %c0_21, %c0_22], %53 {strides = array<i32>} : memref<8x8x64xf32, #tpu.memory_space<vmem>>, vector<1x8x32xf32>,
    %54 = vector.extract_strided_slice %11 {offsets = [1, 0, 0], sizes = [1, 8, 96], strides = [1, 1, 1]} : vector<8x8x192xf32> to vector<1x8x96xf32>
    %55 = vector.shape_cast %54 : vector<1x8x96xf32> to vector<8x96xf32>
    %cst_23 = arith.constant dense<0.000000e+00> : vector<8x96xf32>
    %56 = tpu.matmul %50, %15, %cst_23 {dimension_numbers = #tpu.dot_dimension_numbers<[1], [0], [0], [1], [0, 0, 1, 1], [], []>} : vector<8x32xf32>, vector<32x96xf32>, vector<8x96xf32> -> vector<8x96xf32>
    %57 = vector.broadcast %16 : vector<1x96xf32> to vector<8x96xf32>
    %58 = arith.addf %56, %57 : vector<8x96xf32>
    %59 = vector.extract_strided_slice %55 {offsets = [0, 0], sizes = [8, 32], strides = [1, 1]} : vector<8x96xf32> to vector<8x32xf32>
    %60 = vector.extract_strided_slice %58 {offsets = [0, 0], sizes = [8, 32], strides = [1, 1]} : vector<8x96xf32> to vector<8x32xf32>
    %61 = arith.addf %59, %60 : vector<8x32xf32>
    %62 = arith.negf %61 : vector<8x32xf32>
    %63 = math.exp %62 : vector<8x32xf32>
    %cst_24 = arith.constant 1.000000e+00 : f32
    %64 = vector.broadcast %cst_24 : f32 to vector<8x32xf32>
    %65 = arith.addf %64, %63 : vector<8x32xf32>
    %66 = arith.divf %64, %65 : vector<8x32xf32>
    %67 = vector.extract_strided_slice %55 {offsets = [0, 32], sizes = [8, 32], strides = [1, 1]} : vector<8x96xf32> to vector<8x32xf32>
    %68 = vector.extract_strided_slice %58 {offsets = [0, 32], sizes = [8, 32], strides = [1, 1]} : vector<8x96xf32> to vector<8x32xf32>
    %69 = arith.addf %67, %68 : vector<8x32xf32>
    %70 = arith.negf %69 : vector<8x32xf32>
    %71 = math.exp %70 : vector<8x32xf32>
    %cst_25 = arith.constant 1.000000e+00 : f32
    %72 = vector.broadcast %cst_25 : f32 to vector<8x32xf32>
    %73 = arith.addf %72, %71 : vector<8x32xf32>
    %74 = arith.divf %72, %73 : vector<8x32xf32>
    %75 = vector.extract_strided_slice %55 {offsets = [0, 64], sizes = [8, 32], strides = [1, 1]} : vector<8x96xf32> to vector<8x32xf32>
    %76 = vector.extract_strided_slice %58 {offsets = [0, 64], sizes = [8, 32], strides = [1, 1]} : vector<8x96xf32> to vector<8x32xf32>
    %77 = arith.mulf %66, %76 : vector<8x32xf32>
    %78 = arith.addf %75, %77 : vector<8x32xf32>
    %79 = math.tanh %78 : vector<8x32xf32>
    %cst_26 = arith.constant 1.000000e+00 : f32
    %80 = vector.broadcast %cst_26 : f32 to vector<8x32xf32>
    %81 = arith.subf %80, %74 : vector<8x32xf32>
    %82 = arith.mulf %81, %79 : vector<8x32xf32>
    %83 = arith.mulf %74, %50 : vector<8x32xf32>
    %84 = arith.addf %82, %83 : vector<8x32xf32>
    %c1 = arith.constant 1 : index
    %c0_27 = arith.constant 0 : index
    %c0_28 = arith.constant 0 : index
    %85 = vector.load %arg22[%c1, %c0_27, %c0_28] : memref<8x8x64xf32, #tpu.memory_space<vmem>>, vector<1x8x32xf32>
    %86 = vector.shape_cast %85 : vector<1x8x32xf32> to vector<8x32xf32>
    %87 = vector.shape_cast %84 : vector<8x32xf32> to vector<1x8x32xf32>
    tpu.vector_store %arg22[%c1, %c0_27, %c0_28], %87 {strides = array<i32>} : memref<8x8x64xf32, #tpu.memory_space<vmem>>, vector<1x8x32xf32>,
    %88 = vector.extract_strided_slice %11 {offsets = [2, 0, 0], sizes = [1, 8, 96], strides = [1, 1, 1]} : vector<8x8x192xf32> to vector<1x8x96xf32>
    %89 = vector.shape_cast %88 : vector<1x8x96xf32> to vector<8x96xf32>
    %cst_29 = arith.constant dense<0.000000e+00> : vector<8x96xf32>
    %90 = tpu.matmul %84, %15, %cst_29 {dimension_numbers = #tpu.dot_dimension_numbers<[1], [0], [0], [1], [0, 0, 1, 1], [], []>} : vector<8x32xf32>, vector<32x96xf32>, vector<8x96xf32> -> vector<8x96xf32>
    %91 = vector.broadcast %16 : vector<1x96xf32> to vector<8x96xf32>
    %92 = arith.addf %90, %91 : vector<8x96xf32>
    %93 = vector.extract_strided_slice %89 {offsets = [0, 0], sizes = [8, 32], strides = [1, 1]} : vector<8x96xf32> to vector<8x32xf32>
    %94 = vector.extract_strided_slice %92 {offsets = [0, 0], sizes = [8, 32], strides = [1, 1]} : vector<8x96xf32> to vector<8x32xf32>
    %95 = arith.addf %93, %94 : vector<8x32xf32>
    %96 = arith.negf %95 : vector<8x32xf32>
    %97 = math.exp %96 : vector<8x32xf32>
    %cst_30 = arith.constant 1.000000e+00 : f32
    %98 = vector.broadcast %cst_30 : f32 to vector<8x32xf32>
    %99 = arith.addf %98, %97 : vector<8x32xf32>
    %100 = arith.divf %98, %99 : vector<8x32xf32>
    %101 = vector.extract_strided_slice %89 {offsets = [0, 32], sizes = [8, 32], strides = [1, 1]} : vector<8x96xf32> to vector<8x32xf32>
    %102 = vector.extract_strided_slice %92 {offsets = [0, 32], sizes = [8, 32], strides = [1, 1]} : vector<8x96xf32> to vector<8x32xf32>
    %103 = arith.addf %101, %102 : vector<8x32xf32>
    %104 = arith.negf %103 : vector<8x32xf32>
    %105 = math.exp %104 : vector<8x32xf32>
    %cst_31 = arith.constant 1.000000e+00 : f32
    %106 = vector.broadcast %cst_31 : f32 to vector<8x32xf32>
    %107 = arith.addf %106, %105 : vector<8x32xf32>
    %108 = arith.divf %106, %107 : vector<8x32xf32>
    %109 = vector.extract_strided_slice %89 {offsets = [0, 64], sizes = [8, 32], strides = [1, 1]} : vector<8x96xf32> to vector<8x32xf32>
    %110 = vector.extract_strided_slice %92 {offsets = [0, 64], sizes = [8, 32], strides = [1, 1]} : vector<8x96xf32> to vector<8x32xf32>
    %111 = arith.mulf %100, %110 : vector<8x32xf32>
    %112 = arith.addf %109, %111 : vector<8x32xf32>
    %113 = math.tanh %112 : vector<8x32xf32>
    %cst_32 = arith.constant 1.000000e+00 : f32
    %114 = vector.broadcast %cst_32 : f32 to vector<8x32xf32>
    %115 = arith.subf %114, %108 : vector<8x32xf32>
    %116 = arith.mulf %115, %113 : vector<8x32xf32>
    %117 = arith.mulf %108, %84 : vector<8x32xf32>
    %118 = arith.addf %116, %117 : vector<8x32xf32>
    %c2 = arith.constant 2 : index
    %c0_33 = arith.constant 0 : index
    %c0_34 = arith.constant 0 : index
    %119 = vector.load %arg22[%c2, %c0_33, %c0_34] : memref<8x8x64xf32, #tpu.memory_space<vmem>>, vector<1x8x32xf32>
    %120 = vector.shape_cast %119 : vector<1x8x32xf32> to vector<8x32xf32>
    %121 = vector.shape_cast %118 : vector<8x32xf32> to vector<1x8x32xf32>
    tpu.vector_store %arg22[%c2, %c0_33, %c0_34], %121 {strides = array<i32>} : memref<8x8x64xf32, #tpu.memory_space<vmem>>, vector<1x8x32xf32>,
    %122 = vector.extract_strided_slice %11 {offsets = [3, 0, 0], sizes = [1, 8, 96], strides = [1, 1, 1]} : vector<8x8x192xf32> to vector<1x8x96xf32>
    %123 = vector.shape_cast %122 : vector<1x8x96xf32> to vector<8x96xf32>
    %cst_35 = arith.constant dense<0.000000e+00> : vector<8x96xf32>
    %124 = tpu.matmul %118, %15, %cst_35 {dimension_numbers = #tpu.dot_dimension_numbers<[1], [0], [0], [1], [0, 0, 1, 1], [], []>} : vector<8x32xf32>, vector<32x96xf32>, vector<8x96xf32> -> vector<8x96xf32>
    %125 = vector.broadcast %16 : vector<1x96xf32> to vector<8x96xf32>
    %126 = arith.addf %124, %125 : vector<8x96xf32>
    %127 = vector.extract_strided_slice %123 {offsets = [0, 0], sizes = [8, 32], strides = [1, 1]} : vector<8x96xf32> to vector<8x32xf32>
    %128 = vector.extract_strided_slice %126 {offsets = [0, 0], sizes = [8, 32], strides = [1, 1]} : vector<8x96xf32> to vector<8x32xf32>
    %129 = arith.addf %127, %128 : vector<8x32xf32>
    %130 = arith.negf %129 : vector<8x32xf32>
    %131 = math.exp %130 : vector<8x32xf32>
    %cst_36 = arith.constant 1.000000e+00 : f32
    %132 = vector.broadcast %cst_36 : f32 to vector<8x32xf32>
    %133 = arith.addf %132, %131 : vector<8x32xf32>
    %134 = arith.divf %132, %133 : vector<8x32xf32>
    %135 = vector.extract_strided_slice %123 {offsets = [0, 32], sizes = [8, 32], strides = [1, 1]} : vector<8x96xf32> to vector<8x32xf32>
    %136 = vector.extract_strided_slice %126 {offsets = [0, 32], sizes = [8, 32], strides = [1, 1]} : vector<8x96xf32> to vector<8x32xf32>
    %137 = arith.addf %135, %136 : vector<8x32xf32>
    %138 = arith.negf %137 : vector<8x32xf32>
    %139 = math.exp %138 : vector<8x32xf32>
    %cst_37 = arith.constant 1.000000e+00 : f32
    %140 = vector.broadcast %cst_37 : f32 to vector<8x32xf32>
    %141 = arith.addf %140, %139 : vector<8x32xf32>
    %142 = arith.divf %140, %141 : vector<8x32xf32>
    %143 = vector.extract_strided_slice %123 {offsets = [0, 64], sizes = [8, 32], strides = [1, 1]} : vector<8x96xf32> to vector<8x32xf32>
    %144 = vector.extract_strided_slice %126 {offsets = [0, 64], sizes = [8, 32], strides = [1, 1]} : vector<8x96xf32> to vector<8x32xf32>
    %145 = arith.mulf %134, %144 : vector<8x32xf32>
    %146 = arith.addf %143, %145 : vector<8x32xf32>
    %147 = math.tanh %146 : vector<8x32xf32>
    %cst_38 = arith.constant 1.000000e+00 : f32
    %148 = vector.broadcast %cst_38 : f32 to vector<8x32xf32>
    %149 = arith.subf %148, %142 : vector<8x32xf32>
    %150 = arith.mulf %149, %147 : vector<8x32xf32>
    %151 = arith.mulf %142, %118 : vector<8x32xf32>
    %152 = arith.addf %150, %151 : vector<8x32xf32>
    %c3 = arith.constant 3 : index
    %c0_39 = arith.constant 0 : index
    %c0_40 = arith.constant 0 : index
    %153 = vector.load %arg22[%c3, %c0_39, %c0_40] : memref<8x8x64xf32, #tpu.memory_space<vmem>>, vector<1x8x32xf32>
    %154 = vector.shape_cast %153 : vector<1x8x32xf32> to vector<8x32xf32>
    %155 = vector.shape_cast %152 : vector<8x32xf32> to vector<1x8x32xf32>
    tpu.vector_store %arg22[%c3, %c0_39, %c0_40], %155 {strides = array<i32>} : memref<8x8x64xf32, #tpu.memory_space<vmem>>, vector<1x8x32xf32>,
    %156 = vector.extract_strided_slice %11 {offsets = [4, 0, 0], sizes = [1, 8, 96], strides = [1, 1, 1]} : vector<8x8x192xf32> to vector<1x8x96xf32>
    %157 = vector.shape_cast %156 : vector<1x8x96xf32> to vector<8x96xf32>
    %cst_41 = arith.constant dense<0.000000e+00> : vector<8x96xf32>
    %158 = tpu.matmul %152, %15, %cst_41 {dimension_numbers = #tpu.dot_dimension_numbers<[1], [0], [0], [1], [0, 0, 1, 1], [], []>} : vector<8x32xf32>, vector<32x96xf32>, vector<8x96xf32> -> vector<8x96xf32>
    %159 = vector.broadcast %16 : vector<1x96xf32> to vector<8x96xf32>
    %160 = arith.addf %158, %159 : vector<8x96xf32>
    %161 = vector.extract_strided_slice %157 {offsets = [0, 0], sizes = [8, 32], strides = [1, 1]} : vector<8x96xf32> to vector<8x32xf32>
    %162 = vector.extract_strided_slice %160 {offsets = [0, 0], sizes = [8, 32], strides = [1, 1]} : vector<8x96xf32> to vector<8x32xf32>
    %163 = arith.addf %161, %162 : vector<8x32xf32>
    %164 = arith.negf %163 : vector<8x32xf32>
    %165 = math.exp %164 : vector<8x32xf32>
    %cst_42 = arith.constant 1.000000e+00 : f32
    %166 = vector.broadcast %cst_42 : f32 to vector<8x32xf32>
    %167 = arith.addf %166, %165 : vector<8x32xf32>
    %168 = arith.divf %166, %167 : vector<8x32xf32>
    %169 = vector.extract_strided_slice %157 {offsets = [0, 32], sizes = [8, 32], strides = [1, 1]} : vector<8x96xf32> to vector<8x32xf32>
    %170 = vector.extract_strided_slice %160 {offsets = [0, 32], sizes = [8, 32], strides = [1, 1]} : vector<8x96xf32> to vector<8x32xf32>
    %171 = arith.addf %169, %170 : vector<8x32xf32>
    %172 = arith.negf %171 : vector<8x32xf32>
    %173 = math.exp %172 : vector<8x32xf32>
    %cst_43 = arith.constant 1.000000e+00 : f32
    %174 = vector.broadcast %cst_43 : f32 to vector<8x32xf32>
    %175 = arith.addf %174, %173 : vector<8x32xf32>
    %176 = arith.divf %174, %175 : vector<8x32xf32>
    %177 = vector.extract_strided_slice %157 {offsets = [0, 64], sizes = [8, 32], strides = [1, 1]} : vector<8x96xf32> to vector<8x32xf32>
    %178 = vector.extract_strided_slice %160 {offsets = [0, 64], sizes = [8, 32], strides = [1, 1]} : vector<8x96xf32> to vector<8x32xf32>
    %179 = arith.mulf %168, %178 : vector<8x32xf32>
    %180 = arith.addf %177, %179 : vector<8x32xf32>
    %181 = math.tanh %180 : vector<8x32xf32>
    %cst_44 = arith.constant 1.000000e+00 : f32
    %182 = vector.broadcast %cst_44 : f32 to vector<8x32xf32>
    %183 = arith.subf %182, %176 : vector<8x32xf32>
    %184 = arith.mulf %183, %181 : vector<8x32xf32>
    %185 = arith.mulf %176, %152 : vector<8x32xf32>
    %186 = arith.addf %184, %185 : vector<8x32xf32>
    %c4 = arith.constant 4 : index
    %c0_45 = arith.constant 0 : index
    %c0_46 = arith.constant 0 : index
    %187 = vector.load %arg22[%c4, %c0_45, %c0_46] : memref<8x8x64xf32, #tpu.memory_space<vmem>>, vector<1x8x32xf32>
    %188 = vector.shape_cast %187 : vector<1x8x32xf32> to vector<8x32xf32>
    %189 = vector.shape_cast %186 : vector<8x32xf32> to vector<1x8x32xf32>
    tpu.vector_store %arg22[%c4, %c0_45, %c0_46], %189 {strides = array<i32>} : memref<8x8x64xf32, #tpu.memory_space<vmem>>, vector<1x8x32xf32>,
    %190 = vector.extract_strided_slice %11 {offsets = [5, 0, 0], sizes = [1, 8, 96], strides = [1, 1, 1]} : vector<8x8x192xf32> to vector<1x8x96xf32>
    %191 = vector.shape_cast %190 : vector<1x8x96xf32> to vector<8x96xf32>
    %cst_47 = arith.constant dense<0.000000e+00> : vector<8x96xf32>
    %192 = tpu.matmul %186, %15, %cst_47 {dimension_numbers = #tpu.dot_dimension_numbers<[1], [0], [0], [1], [0, 0, 1, 1], [], []>} : vector<8x32xf32>, vector<32x96xf32>, vector<8x96xf32> -> vector<8x96xf32>
    %193 = vector.broadcast %16 : vector<1x96xf32> to vector<8x96xf32>
    %194 = arith.addf %192, %193 : vector<8x96xf32>
    %195 = vector.extract_strided_slice %191 {offsets = [0, 0], sizes = [8, 32], strides = [1, 1]} : vector<8x96xf32> to vector<8x32xf32>
    %196 = vector.extract_strided_slice %194 {offsets = [0, 0], sizes = [8, 32], strides = [1, 1]} : vector<8x96xf32> to vector<8x32xf32>
    %197 = arith.addf %195, %196 : vector<8x32xf32>
    %198 = arith.negf %197 : vector<8x32xf32>
    %199 = math.exp %198 : vector<8x32xf32>
    %cst_48 = arith.constant 1.000000e+00 : f32
    %200 = vector.broadcast %cst_48 : f32 to vector<8x32xf32>
    %201 = arith.addf %200, %199 : vector<8x32xf32>
    %202 = arith.divf %200, %201 : vector<8x32xf32>
    %203 = vector.extract_strided_slice %191 {offsets = [0, 32], sizes = [8, 32], strides = [1, 1]} : vector<8x96xf32> to vector<8x32xf32>
    %204 = vector.extract_strided_slice %194 {offsets = [0, 32], sizes = [8, 32], strides = [1, 1]} : vector<8x96xf32> to vector<8x32xf32>
    %205 = arith.addf %203, %204 : vector<8x32xf32>
    %206 = arith.negf %205 : vector<8x32xf32>
    %207 = math.exp %206 : vector<8x32xf32>
    %cst_49 = arith.constant 1.000000e+00 : f32
    %208 = vector.broadcast %cst_49 : f32 to vector<8x32xf32>
    %209 = arith.addf %208, %207 : vector<8x32xf32>
    %210 = arith.divf %208, %209 : vector<8x32xf32>
    %211 = vector.extract_strided_slice %191 {offsets = [0, 64], sizes = [8, 32], strides = [1, 1]} : vector<8x96xf32> to vector<8x32xf32>
    %212 = vector.extract_strided_slice %194 {offsets = [0, 64], sizes = [8, 32], strides = [1, 1]} : vector<8x96xf32> to vector<8x32xf32>
    %213 = arith.mulf %202, %212 : vector<8x32xf32>
    %214 = arith.addf %211, %213 : vector<8x32xf32>
    %215 = math.tanh %214 : vector<8x32xf32>
    %cst_50 = arith.constant 1.000000e+00 : f32
    %216 = vector.broadcast %cst_50 : f32 to vector<8x32xf32>
    %217 = arith.subf %216, %210 : vector<8x32xf32>
    %218 = arith.mulf %217, %215 : vector<8x32xf32>
    %219 = arith.mulf %210, %186 : vector<8x32xf32>
    %220 = arith.addf %218, %219 : vector<8x32xf32>
    %c5 = arith.constant 5 : index
    %c0_51 = arith.constant 0 : index
    %c0_52 = arith.constant 0 : index
    %221 = vector.load %arg22[%c5, %c0_51, %c0_52] : memref<8x8x64xf32, #tpu.memory_space<vmem>>, vector<1x8x32xf32>
    %222 = vector.shape_cast %221 : vector<1x8x32xf32> to vector<8x32xf32>
    %223 = vector.shape_cast %220 : vector<8x32xf32> to vector<1x8x32xf32>
    tpu.vector_store %arg22[%c5, %c0_51, %c0_52], %223 {strides = array<i32>} : memref<8x8x64xf32, #tpu.memory_space<vmem>>, vector<1x8x32xf32>,
    %224 = vector.extract_strided_slice %11 {offsets = [6, 0, 0], sizes = [1, 8, 96], strides = [1, 1, 1]} : vector<8x8x192xf32> to vector<1x8x96xf32>
    %225 = vector.shape_cast %224 : vector<1x8x96xf32> to vector<8x96xf32>
    %cst_53 = arith.constant dense<0.000000e+00> : vector<8x96xf32>
    %226 = tpu.matmul %220, %15, %cst_53 {dimension_numbers = #tpu.dot_dimension_numbers<[1], [0], [0], [1], [0, 0, 1, 1], [], []>} : vector<8x32xf32>, vector<32x96xf32>, vector<8x96xf32> -> vector<8x96xf32>
    %227 = vector.broadcast %16 : vector<1x96xf32> to vector<8x96xf32>
    %228 = arith.addf %226, %227 : vector<8x96xf32>
    %229 = vector.extract_strided_slice %225 {offsets = [0, 0], sizes = [8, 32], strides = [1, 1]} : vector<8x96xf32> to vector<8x32xf32>
    %230 = vector.extract_strided_slice %228 {offsets = [0, 0], sizes = [8, 32], strides = [1, 1]} : vector<8x96xf32> to vector<8x32xf32>
    %231 = arith.addf %229, %230 : vector<8x32xf32>
    %232 = arith.negf %231 : vector<8x32xf32>
    %233 = math.exp %232 : vector<8x32xf32>
    %cst_54 = arith.constant 1.000000e+00 : f32
    %234 = vector.broadcast %cst_54 : f32 to vector<8x32xf32>
    %235 = arith.addf %234, %233 : vector<8x32xf32>
    %236 = arith.divf %234, %235 : vector<8x32xf32>
    %237 = vector.extract_strided_slice %225 {offsets = [0, 32], sizes = [8, 32], strides = [1, 1]} : vector<8x96xf32> to vector<8x32xf32>
    %238 = vector.extract_strided_slice %228 {offsets = [0, 32], sizes = [8, 32], strides = [1, 1]} : vector<8x96xf32> to vector<8x32xf32>
    %239 = arith.addf %237, %238 : vector<8x32xf32>
    %240 = arith.negf %239 : vector<8x32xf32>
    %241 = math.exp %240 : vector<8x32xf32>
    %cst_55 = arith.constant 1.000000e+00 : f32
    %242 = vector.broadcast %cst_55 : f32 to vector<8x32xf32>
    %243 = arith.addf %242, %241 : vector<8x32xf32>
    %244 = arith.divf %242, %243 : vector<8x32xf32>
    %245 = vector.extract_strided_slice %225 {offsets = [0, 64], sizes = [8, 32], strides = [1, 1]} : vector<8x96xf32> to vector<8x32xf32>
    %246 = vector.extract_strided_slice %228 {offsets = [0, 64], sizes = [8, 32], strides = [1, 1]} : vector<8x96xf32> to vector<8x32xf32>
    %247 = arith.mulf %236, %246 : vector<8x32xf32>
    %248 = arith.addf %245, %247 : vector<8x32xf32>
    %249 = math.tanh %248 : vector<8x32xf32>
    %cst_56 = arith.constant 1.000000e+00 : f32
    %250 = vector.broadcast %cst_56 : f32 to vector<8x32xf32>
    %251 = arith.subf %250, %244 : vector<8x32xf32>
    %252 = arith.mulf %251, %249 : vector<8x32xf32>
    %253 = arith.mulf %244, %220 : vector<8x32xf32>
    %254 = arith.addf %252, %253 : vector<8x32xf32>
    %c6 = arith.constant 6 : index
    %c0_57 = arith.constant 0 : index
    %c0_58 = arith.constant 0 : index
    %255 = vector.load %arg22[%c6, %c0_57, %c0_58] : memref<8x8x64xf32, #tpu.memory_space<vmem>>, vector<1x8x32xf32>
    %256 = vector.shape_cast %255 : vector<1x8x32xf32> to vector<8x32xf32>
    %257 = vector.shape_cast %254 : vector<8x32xf32> to vector<1x8x32xf32>
    tpu.vector_store %arg22[%c6, %c0_57, %c0_58], %257 {strides = array<i32>} : memref<8x8x64xf32, #tpu.memory_space<vmem>>, vector<1x8x32xf32>,
    %258 = vector.extract_strided_slice %11 {offsets = [7, 0, 0], sizes = [1, 8, 96], strides = [1, 1, 1]} : vector<8x8x192xf32> to vector<1x8x96xf32>
    %259 = vector.shape_cast %258 : vector<1x8x96xf32> to vector<8x96xf32>
    %cst_59 = arith.constant dense<0.000000e+00> : vector<8x96xf32>
    %260 = tpu.matmul %254, %15, %cst_59 {dimension_numbers = #tpu.dot_dimension_numbers<[1], [0], [0], [1], [0, 0, 1, 1], [], []>} : vector<8x32xf32>, vector<32x96xf32>, vector<8x96xf32> -> vector<8x96xf32>
    %261 = vector.broadcast %16 : vector<1x96xf32> to vector<8x96xf32>
    %262 = arith.addf %260, %261 : vector<8x96xf32>
    %263 = vector.extract_strided_slice %259 {offsets = [0, 0], sizes = [8, 32], strides = [1, 1]} : vector<8x96xf32> to vector<8x32xf32>
    %264 = vector.extract_strided_slice %262 {offsets = [0, 0], sizes = [8, 32], strides = [1, 1]} : vector<8x96xf32> to vector<8x32xf32>
    %265 = arith.addf %263, %264 : vector<8x32xf32>
    %266 = arith.negf %265 : vector<8x32xf32>
    %267 = math.exp %266 : vector<8x32xf32>
    %cst_60 = arith.constant 1.000000e+00 : f32
    %268 = vector.broadcast %cst_60 : f32 to vector<8x32xf32>
    %269 = arith.addf %268, %267 : vector<8x32xf32>
    %270 = arith.divf %268, %269 : vector<8x32xf32>
    %271 = vector.extract_strided_slice %259 {offsets = [0, 32], sizes = [8, 32], strides = [1, 1]} : vector<8x96xf32> to vector<8x32xf32>
    %272 = vector.extract_strided_slice %262 {offsets = [0, 32], sizes = [8, 32], strides = [1, 1]} : vector<8x96xf32> to vector<8x32xf32>
    %273 = arith.addf %271, %272 : vector<8x32xf32>
    %274 = arith.negf %273 : vector<8x32xf32>
    %275 = math.exp %274 : vector<8x32xf32>
    %cst_61 = arith.constant 1.000000e+00 : f32
    %276 = vector.broadcast %cst_61 : f32 to vector<8x32xf32>
    %277 = arith.addf %276, %275 : vector<8x32xf32>
    %278 = arith.divf %276, %277 : vector<8x32xf32>
    %279 = vector.extract_strided_slice %259 {offsets = [0, 64], sizes = [8, 32], strides = [1, 1]} : vector<8x96xf32> to vector<8x32xf32>
    %280 = vector.extract_strided_slice %262 {offsets = [0, 64], sizes = [8, 32], strides = [1, 1]} : vector<8x96xf32> to vector<8x32xf32>
    %281 = arith.mulf %270, %280 : vector<8x32xf32>
    %282 = arith.addf %279, %281 : vector<8x32xf32>
    %283 = math.tanh %282 : vector<8x32xf32>
    %cst_62 = arith.constant 1.000000e+00 : f32
    %284 = vector.broadcast %cst_62 : f32 to vector<8x32xf32>
    %285 = arith.subf %284, %278 : vector<8x32xf32>
    %286 = arith.mulf %285, %283 : vector<8x32xf32>
    %287 = arith.mulf %278, %254 : vector<8x32xf32>
    %288 = arith.addf %286, %287 : vector<8x32xf32>
    %c7 = arith.constant 7 : index
    %c0_63 = arith.constant 0 : index
    %c0_64 = arith.constant 0 : index
    %289 = vector.load %arg22[%c7, %c0_63, %c0_64] : memref<8x8x64xf32, #tpu.memory_space<vmem>>, vector<1x8x32xf32>
    %290 = vector.shape_cast %289 : vector<1x8x32xf32> to vector<8x32xf32>
    %291 = vector.shape_cast %288 : vector<8x32xf32> to vector<1x8x32xf32>
    tpu.vector_store %arg22[%c7, %c0_63, %c0_64], %291 {strides = array<i32>} : memref<8x8x64xf32, #tpu.memory_space<vmem>>, vector<1x8x32xf32>,
    %cst_65 = arith.constant 0.000000e+00 : f32
    %292 = vector.broadcast %cst_65 : f32 to vector<8x32xf32>
    %293 = vector.extract_strided_slice %11 {offsets = [7, 0, 96], sizes = [1, 8, 96], strides = [1, 1, 1]} : vector<8x8x192xf32> to vector<1x8x96xf32>
    %294 = vector.shape_cast %293 : vector<1x8x96xf32> to vector<8x96xf32>
    %cst_66 = arith.constant dense<0.000000e+00> : vector<8x96xf32>
    %295 = tpu.matmul %292, %17, %cst_66 {dimension_numbers = #tpu.dot_dimension_numbers<[1], [0], [0], [1], [0, 0, 1, 1], [], []>} : vector<8x32xf32>, vector<32x96xf32>, vector<8x96xf32> -> vector<8x96xf32>
    %296 = vector.broadcast %18 : vector<1x96xf32> to vector<8x96xf32>
    %297 = arith.addf %295, %296 : vector<8x96xf32>
    %298 = vector.extract_strided_slice %294 {offsets = [0, 0], sizes = [8, 32], strides = [1, 1]} : vector<8x96xf32> to vector<8x32xf32>
    %299 = vector.extract_strided_slice %297 {offsets = [0, 0], sizes = [8, 32], strides = [1, 1]} : vector<8x96xf32> to vector<8x32xf32>
    %300 = arith.addf %298, %299 : vector<8x32xf32>
    %301 = arith.negf %300 : vector<8x32xf32>
    %302 = math.exp %301 : vector<8x32xf32>
    %cst_67 = arith.constant 1.000000e+00 : f32
    %303 = vector.broadcast %cst_67 : f32 to vector<8x32xf32>
    %304 = arith.addf %303, %302 : vector<8x32xf32>
    %305 = arith.divf %303, %304 : vector<8x32xf32>
    %306 = vector.extract_strided_slice %294 {offsets = [0, 32], sizes = [8, 32], strides = [1, 1]} : vector<8x96xf32> to vector<8x32xf32>
    %307 = vector.extract_strided_slice %297 {offsets = [0, 32], sizes = [8, 32], strides = [1, 1]} : vector<8x96xf32> to vector<8x32xf32>
    %308 = arith.addf %306, %307 : vector<8x32xf32>
    %309 = arith.negf %308 : vector<8x32xf32>
    %310 = math.exp %309 : vector<8x32xf32>
    %cst_68 = arith.constant 1.000000e+00 : f32
    %311 = vector.broadcast %cst_68 : f32 to vector<8x32xf32>
    %312 = arith.addf %311, %310 : vector<8x32xf32>
    %313 = arith.divf %311, %312 : vector<8x32xf32>
    %314 = vector.extract_strided_slice %294 {offsets = [0, 64], sizes = [8, 32], strides = [1, 1]} : vector<8x96xf32> to vector<8x32xf32>
    %315 = vector.extract_strided_slice %297 {offsets = [0, 64], sizes = [8, 32], strides = [1, 1]} : vector<8x96xf32> to vector<8x32xf32>
    %316 = arith.mulf %305, %315 : vector<8x32xf32>
    %317 = arith.addf %314, %316 : vector<8x32xf32>
    %318 = math.tanh %317 : vector<8x32xf32>
    %cst_69 = arith.constant 1.000000e+00 : f32
    %319 = vector.broadcast %cst_69 : f32 to vector<8x32xf32>
    %320 = arith.subf %319, %313 : vector<8x32xf32>
    %321 = arith.mulf %320, %318 : vector<8x32xf32>
    %322 = arith.mulf %313, %292 : vector<8x32xf32>
    %323 = arith.addf %321, %322 : vector<8x32xf32>
    %c7_70 = arith.constant 7 : index
    %c0_71 = arith.constant 0 : index
    %c32 = arith.constant 32 : index
    %324 = vector.load %arg22[%c7_70, %c0_71, %c32] : memref<8x8x64xf32, #tpu.memory_space<vmem>>, vector<1x8x32xf32>
    %325 = vector.shape_cast %324 : vector<1x8x32xf32> to vector<8x32xf32>
    %326 = vector.shape_cast %323 : vector<8x32xf32> to vector<1x8x32xf32>
    tpu.vector_store %arg22[%c7_70, %c0_71, %c32], %326 {strides = array<i32>} : memref<8x8x64xf32, #tpu.memory_space<vmem>>, vector<1x8x32xf32>,
    %327 = vector.extract_strided_slice %11 {offsets = [6, 0, 96], sizes = [1, 8, 96], strides = [1, 1, 1]} : vector<8x8x192xf32> to vector<1x8x96xf32>
    %328 = vector.shape_cast %327 : vector<1x8x96xf32> to vector<8x96xf32>
    %cst_72 = arith.constant dense<0.000000e+00> : vector<8x96xf32>
    %329 = tpu.matmul %323, %17, %cst_72 {dimension_numbers = #tpu.dot_dimension_numbers<[1], [0], [0], [1], [0, 0, 1, 1], [], []>} : vector<8x32xf32>, vector<32x96xf32>, vector<8x96xf32> -> vector<8x96xf32>
    %330 = vector.broadcast %18 : vector<1x96xf32> to vector<8x96xf32>
    %331 = arith.addf %329, %330 : vector<8x96xf32>
    %332 = vector.extract_strided_slice %328 {offsets = [0, 0], sizes = [8, 32], strides = [1, 1]} : vector<8x96xf32> to vector<8x32xf32>
    %333 = vector.extract_strided_slice %331 {offsets = [0, 0], sizes = [8, 32], strides = [1, 1]} : vector<8x96xf32> to vector<8x32xf32>
    %334 = arith.addf %332, %333 : vector<8x32xf32>
    %335 = arith.negf %334 : vector<8x32xf32>
    %336 = math.exp %335 : vector<8x32xf32>
    %cst_73 = arith.constant 1.000000e+00 : f32
    %337 = vector.broadcast %cst_73 : f32 to vector<8x32xf32>
    %338 = arith.addf %337, %336 : vector<8x32xf32>
    %339 = arith.divf %337, %338 : vector<8x32xf32>
    %340 = vector.extract_strided_slice %328 {offsets = [0, 32], sizes = [8, 32], strides = [1, 1]} : vector<8x96xf32> to vector<8x32xf32>
    %341 = vector.extract_strided_slice %331 {offsets = [0, 32], sizes = [8, 32], strides = [1, 1]} : vector<8x96xf32> to vector<8x32xf32>
    %342 = arith.addf %340, %341 : vector<8x32xf32>
    %343 = arith.negf %342 : vector<8x32xf32>
    %344 = math.exp %343 : vector<8x32xf32>
    %cst_74 = arith.constant 1.000000e+00 : f32
    %345 = vector.broadcast %cst_74 : f32 to vector<8x32xf32>
    %346 = arith.addf %345, %344 : vector<8x32xf32>
    %347 = arith.divf %345, %346 : vector<8x32xf32>
    %348 = vector.extract_strided_slice %328 {offsets = [0, 64], sizes = [8, 32], strides = [1, 1]} : vector<8x96xf32> to vector<8x32xf32>
    %349 = vector.extract_strided_slice %331 {offsets = [0, 64], sizes = [8, 32], strides = [1, 1]} : vector<8x96xf32> to vector<8x32xf32>
    %350 = arith.mulf %339, %349 : vector<8x32xf32>
    %351 = arith.addf %348, %350 : vector<8x32xf32>
    %352 = math.tanh %351 : vector<8x32xf32>
    %cst_75 = arith.constant 1.000000e+00 : f32
    %353 = vector.broadcast %cst_75 : f32 to vector<8x32xf32>
    %354 = arith.subf %353, %347 : vector<8x32xf32>
    %355 = arith.mulf %354, %352 : vector<8x32xf32>
    %356 = arith.mulf %347, %323 : vector<8x32xf32>
    %357 = arith.addf %355, %356 : vector<8x32xf32>
    %c6_76 = arith.constant 6 : index
    %c0_77 = arith.constant 0 : index
    %c32_78 = arith.constant 32 : index
    %358 = vector.load %arg22[%c6_76, %c0_77, %c32_78] : memref<8x8x64xf32, #tpu.memory_space<vmem>>, vector<1x8x32xf32>
    %359 = vector.shape_cast %358 : vector<1x8x32xf32> to vector<8x32xf32>
    %360 = vector.shape_cast %357 : vector<8x32xf32> to vector<1x8x32xf32>
    tpu.vector_store %arg22[%c6_76, %c0_77, %c32_78], %360 {strides = array<i32>} : memref<8x8x64xf32, #tpu.memory_space<vmem>>, vector<1x8x32xf32>,
    %361 = vector.extract_strided_slice %11 {offsets = [5, 0, 96], sizes = [1, 8, 96], strides = [1, 1, 1]} : vector<8x8x192xf32> to vector<1x8x96xf32>
    %362 = vector.shape_cast %361 : vector<1x8x96xf32> to vector<8x96xf32>
    %cst_79 = arith.constant dense<0.000000e+00> : vector<8x96xf32>
    %363 = tpu.matmul %357, %17, %cst_79 {dimension_numbers = #tpu.dot_dimension_numbers<[1], [0], [0], [1], [0, 0, 1, 1], [], []>} : vector<8x32xf32>, vector<32x96xf32>, vector<8x96xf32> -> vector<8x96xf32>
    %364 = vector.broadcast %18 : vector<1x96xf32> to vector<8x96xf32>
    %365 = arith.addf %363, %364 : vector<8x96xf32>
    %366 = vector.extract_strided_slice %362 {offsets = [0, 0], sizes = [8, 32], strides = [1, 1]} : vector<8x96xf32> to vector<8x32xf32>
    %367 = vector.extract_strided_slice %365 {offsets = [0, 0], sizes = [8, 32], strides = [1, 1]} : vector<8x96xf32> to vector<8x32xf32>
    %368 = arith.addf %366, %367 : vector<8x32xf32>
    %369 = arith.negf %368 : vector<8x32xf32>
    %370 = math.exp %369 : vector<8x32xf32>
    %cst_80 = arith.constant 1.000000e+00 : f32
    %371 = vector.broadcast %cst_80 : f32 to vector<8x32xf32>
    %372 = arith.addf %371, %370 : vector<8x32xf32>
    %373 = arith.divf %371, %372 : vector<8x32xf32>
    %374 = vector.extract_strided_slice %362 {offsets = [0, 32], sizes = [8, 32], strides = [1, 1]} : vector<8x96xf32> to vector<8x32xf32>
    %375 = vector.extract_strided_slice %365 {offsets = [0, 32], sizes = [8, 32], strides = [1, 1]} : vector<8x96xf32> to vector<8x32xf32>
    %376 = arith.addf %374, %375 : vector<8x32xf32>
    %377 = arith.negf %376 : vector<8x32xf32>
    %378 = math.exp %377 : vector<8x32xf32>
    %cst_81 = arith.constant 1.000000e+00 : f32
    %379 = vector.broadcast %cst_81 : f32 to vector<8x32xf32>
    %380 = arith.addf %379, %378 : vector<8x32xf32>
    %381 = arith.divf %379, %380 : vector<8x32xf32>
    %382 = vector.extract_strided_slice %362 {offsets = [0, 64], sizes = [8, 32], strides = [1, 1]} : vector<8x96xf32> to vector<8x32xf32>
    %383 = vector.extract_strided_slice %365 {offsets = [0, 64], sizes = [8, 32], strides = [1, 1]} : vector<8x96xf32> to vector<8x32xf32>
    %384 = arith.mulf %373, %383 : vector<8x32xf32>
    %385 = arith.addf %382, %384 : vector<8x32xf32>
    %386 = math.tanh %385 : vector<8x32xf32>
    %cst_82 = arith.constant 1.000000e+00 : f32
    %387 = vector.broadcast %cst_82 : f32 to vector<8x32xf32>
    %388 = arith.subf %387, %381 : vector<8x32xf32>
    %389 = arith.mulf %388, %386 : vector<8x32xf32>
    %390 = arith.mulf %381, %357 : vector<8x32xf32>
    %391 = arith.addf %389, %390 : vector<8x32xf32>
    %c5_83 = arith.constant 5 : index
    %c0_84 = arith.constant 0 : index
    %c32_85 = arith.constant 32 : index
    %392 = vector.load %arg22[%c5_83, %c0_84, %c32_85] : memref<8x8x64xf32, #tpu.memory_space<vmem>>, vector<1x8x32xf32>
    %393 = vector.shape_cast %392 : vector<1x8x32xf32> to vector<8x32xf32>
    %394 = vector.shape_cast %391 : vector<8x32xf32> to vector<1x8x32xf32>
    tpu.vector_store %arg22[%c5_83, %c0_84, %c32_85], %394 {strides = array<i32>} : memref<8x8x64xf32, #tpu.memory_space<vmem>>, vector<1x8x32xf32>,
    %395 = vector.extract_strided_slice %11 {offsets = [4, 0, 96], sizes = [1, 8, 96], strides = [1, 1, 1]} : vector<8x8x192xf32> to vector<1x8x96xf32>
    %396 = vector.shape_cast %395 : vector<1x8x96xf32> to vector<8x96xf32>
    %cst_86 = arith.constant dense<0.000000e+00> : vector<8x96xf32>
    %397 = tpu.matmul %391, %17, %cst_86 {dimension_numbers = #tpu.dot_dimension_numbers<[1], [0], [0], [1], [0, 0, 1, 1], [], []>} : vector<8x32xf32>, vector<32x96xf32>, vector<8x96xf32> -> vector<8x96xf32>
    %398 = vector.broadcast %18 : vector<1x96xf32> to vector<8x96xf32>
    %399 = arith.addf %397, %398 : vector<8x96xf32>
    %400 = vector.extract_strided_slice %396 {offsets = [0, 0], sizes = [8, 32], strides = [1, 1]} : vector<8x96xf32> to vector<8x32xf32>
    %401 = vector.extract_strided_slice %399 {offsets = [0, 0], sizes = [8, 32], strides = [1, 1]} : vector<8x96xf32> to vector<8x32xf32>
    %402 = arith.addf %400, %401 : vector<8x32xf32>
    %403 = arith.negf %402 : vector<8x32xf32>
    %404 = math.exp %403 : vector<8x32xf32>
    %cst_87 = arith.constant 1.000000e+00 : f32
    %405 = vector.broadcast %cst_87 : f32 to vector<8x32xf32>
    %406 = arith.addf %405, %404 : vector<8x32xf32>
    %407 = arith.divf %405, %406 : vector<8x32xf32>
    %408 = vector.extract_strided_slice %396 {offsets = [0, 32], sizes = [8, 32], strides = [1, 1]} : vector<8x96xf32> to vector<8x32xf32>
    %409 = vector.extract_strided_slice %399 {offsets = [0, 32], sizes = [8, 32], strides = [1, 1]} : vector<8x96xf32> to vector<8x32xf32>
    %410 = arith.addf %408, %409 : vector<8x32xf32>
    %411 = arith.negf %410 : vector<8x32xf32>
    %412 = math.exp %411 : vector<8x32xf32>
    %cst_88 = arith.constant 1.000000e+00 : f32
    %413 = vector.broadcast %cst_88 : f32 to vector<8x32xf32>
    %414 = arith.addf %413, %412 : vector<8x32xf32>
    %415 = arith.divf %413, %414 : vector<8x32xf32>
    %416 = vector.extract_strided_slice %396 {offsets = [0, 64], sizes = [8, 32], strides = [1, 1]} : vector<8x96xf32> to vector<8x32xf32>
    %417 = vector.extract_strided_slice %399 {offsets = [0, 64], sizes = [8, 32], strides = [1, 1]} : vector<8x96xf32> to vector<8x32xf32>
    %418 = arith.mulf %407, %417 : vector<8x32xf32>
    %419 = arith.addf %416, %418 : vector<8x32xf32>
    %420 = math.tanh %419 : vector<8x32xf32>
    %cst_89 = arith.constant 1.000000e+00 : f32
    %421 = vector.broadcast %cst_89 : f32 to vector<8x32xf32>
    %422 = arith.subf %421, %415 : vector<8x32xf32>
    %423 = arith.mulf %422, %420 : vector<8x32xf32>
    %424 = arith.mulf %415, %391 : vector<8x32xf32>
    %425 = arith.addf %423, %424 : vector<8x32xf32>
    %c4_90 = arith.constant 4 : index
    %c0_91 = arith.constant 0 : index
    %c32_92 = arith.constant 32 : index
    %426 = vector.load %arg22[%c4_90, %c0_91, %c32_92] : memref<8x8x64xf32, #tpu.memory_space<vmem>>, vector<1x8x32xf32>
    %427 = vector.shape_cast %426 : vector<1x8x32xf32> to vector<8x32xf32>
    %428 = vector.shape_cast %425 : vector<8x32xf32> to vector<1x8x32xf32>
    tpu.vector_store %arg22[%c4_90, %c0_91, %c32_92], %428 {strides = array<i32>} : memref<8x8x64xf32, #tpu.memory_space<vmem>>, vector<1x8x32xf32>,
    %429 = vector.extract_strided_slice %11 {offsets = [3, 0, 96], sizes = [1, 8, 96], strides = [1, 1, 1]} : vector<8x8x192xf32> to vector<1x8x96xf32>
    %430 = vector.shape_cast %429 : vector<1x8x96xf32> to vector<8x96xf32>
    %cst_93 = arith.constant dense<0.000000e+00> : vector<8x96xf32>
    %431 = tpu.matmul %425, %17, %cst_93 {dimension_numbers = #tpu.dot_dimension_numbers<[1], [0], [0], [1], [0, 0, 1, 1], [], []>} : vector<8x32xf32>, vector<32x96xf32>, vector<8x96xf32> -> vector<8x96xf32>
    %432 = vector.broadcast %18 : vector<1x96xf32> to vector<8x96xf32>
    %433 = arith.addf %431, %432 : vector<8x96xf32>
    %434 = vector.extract_strided_slice %430 {offsets = [0, 0], sizes = [8, 32], strides = [1, 1]} : vector<8x96xf32> to vector<8x32xf32>
    %435 = vector.extract_strided_slice %433 {offsets = [0, 0], sizes = [8, 32], strides = [1, 1]} : vector<8x96xf32> to vector<8x32xf32>
    %436 = arith.addf %434, %435 : vector<8x32xf32>
    %437 = arith.negf %436 : vector<8x32xf32>
    %438 = math.exp %437 : vector<8x32xf32>
    %cst_94 = arith.constant 1.000000e+00 : f32
    %439 = vector.broadcast %cst_94 : f32 to vector<8x32xf32>
    %440 = arith.addf %439, %438 : vector<8x32xf32>
    %441 = arith.divf %439, %440 : vector<8x32xf32>
    %442 = vector.extract_strided_slice %430 {offsets = [0, 32], sizes = [8, 32], strides = [1, 1]} : vector<8x96xf32> to vector<8x32xf32>
    %443 = vector.extract_strided_slice %433 {offsets = [0, 32], sizes = [8, 32], strides = [1, 1]} : vector<8x96xf32> to vector<8x32xf32>
    %444 = arith.addf %442, %443 : vector<8x32xf32>
    %445 = arith.negf %444 : vector<8x32xf32>
    %446 = math.exp %445 : vector<8x32xf32>
    %cst_95 = arith.constant 1.000000e+00 : f32
    %447 = vector.broadcast %cst_95 : f32 to vector<8x32xf32>
    %448 = arith.addf %447, %446 : vector<8x32xf32>
    %449 = arith.divf %447, %448 : vector<8x32xf32>
    %450 = vector.extract_strided_slice %430 {offsets = [0, 64], sizes = [8, 32], strides = [1, 1]} : vector<8x96xf32> to vector<8x32xf32>
    %451 = vector.extract_strided_slice %433 {offsets = [0, 64], sizes = [8, 32], strides = [1, 1]} : vector<8x96xf32> to vector<8x32xf32>
    %452 = arith.mulf %441, %451 : vector<8x32xf32>
    %453 = arith.addf %450, %452 : vector<8x32xf32>
    %454 = math.tanh %453 : vector<8x32xf32>
    %cst_96 = arith.constant 1.000000e+00 : f32
    %455 = vector.broadcast %cst_96 : f32 to vector<8x32xf32>
    %456 = arith.subf %455, %449 : vector<8x32xf32>
    %457 = arith.mulf %456, %454 : vector<8x32xf32>
    %458 = arith.mulf %449, %425 : vector<8x32xf32>
    %459 = arith.addf %457, %458 : vector<8x32xf32>
    %c3_97 = arith.constant 3 : index
    %c0_98 = arith.constant 0 : index
    %c32_99 = arith.constant 32 : index
    %460 = vector.load %arg22[%c3_97, %c0_98, %c32_99] : memref<8x8x64xf32, #tpu.memory_space<vmem>>, vector<1x8x32xf32>
    %461 = vector.shape_cast %460 : vector<1x8x32xf32> to vector<8x32xf32>
    %462 = vector.shape_cast %459 : vector<8x32xf32> to vector<1x8x32xf32>
    tpu.vector_store %arg22[%c3_97, %c0_98, %c32_99], %462 {strides = array<i32>} : memref<8x8x64xf32, #tpu.memory_space<vmem>>, vector<1x8x32xf32>,
    %463 = vector.extract_strided_slice %11 {offsets = [2, 0, 96], sizes = [1, 8, 96], strides = [1, 1, 1]} : vector<8x8x192xf32> to vector<1x8x96xf32>
    %464 = vector.shape_cast %463 : vector<1x8x96xf32> to vector<8x96xf32>
    %cst_100 = arith.constant dense<0.000000e+00> : vector<8x96xf32>
    %465 = tpu.matmul %459, %17, %cst_100 {dimension_numbers = #tpu.dot_dimension_numbers<[1], [0], [0], [1], [0, 0, 1, 1], [], []>} : vector<8x32xf32>, vector<32x96xf32>, vector<8x96xf32> -> vector<8x96xf32>
    %466 = vector.broadcast %18 : vector<1x96xf32> to vector<8x96xf32>
    %467 = arith.addf %465, %466 : vector<8x96xf32>
    %468 = vector.extract_strided_slice %464 {offsets = [0, 0], sizes = [8, 32], strides = [1, 1]} : vector<8x96xf32> to vector<8x32xf32>
    %469 = vector.extract_strided_slice %467 {offsets = [0, 0], sizes = [8, 32], strides = [1, 1]} : vector<8x96xf32> to vector<8x32xf32>
    %470 = arith.addf %468, %469 : vector<8x32xf32>
    %471 = arith.negf %470 : vector<8x32xf32>
    %472 = math.exp %471 : vector<8x32xf32>
    %cst_101 = arith.constant 1.000000e+00 : f32
    %473 = vector.broadcast %cst_101 : f32 to vector<8x32xf32>
    %474 = arith.addf %473, %472 : vector<8x32xf32>
    %475 = arith.divf %473, %474 : vector<8x32xf32>
    %476 = vector.extract_strided_slice %464 {offsets = [0, 32], sizes = [8, 32], strides = [1, 1]} : vector<8x96xf32> to vector<8x32xf32>
    %477 = vector.extract_strided_slice %467 {offsets = [0, 32], sizes = [8, 32], strides = [1, 1]} : vector<8x96xf32> to vector<8x32xf32>
    %478 = arith.addf %476, %477 : vector<8x32xf32>
    %479 = arith.negf %478 : vector<8x32xf32>
    %480 = math.exp %479 : vector<8x32xf32>
    %cst_102 = arith.constant 1.000000e+00 : f32
    %481 = vector.broadcast %cst_102 : f32 to vector<8x32xf32>
    %482 = arith.addf %481, %480 : vector<8x32xf32>
    %483 = arith.divf %481, %482 : vector<8x32xf32>
    %484 = vector.extract_strided_slice %464 {offsets = [0, 64], sizes = [8, 32], strides = [1, 1]} : vector<8x96xf32> to vector<8x32xf32>
    %485 = vector.extract_strided_slice %467 {offsets = [0, 64], sizes = [8, 32], strides = [1, 1]} : vector<8x96xf32> to vector<8x32xf32>
    %486 = arith.mulf %475, %485 : vector<8x32xf32>
    %487 = arith.addf %484, %486 : vector<8x32xf32>
    %488 = math.tanh %487 : vector<8x32xf32>
    %cst_103 = arith.constant 1.000000e+00 : f32
    %489 = vector.broadcast %cst_103 : f32 to vector<8x32xf32>
    %490 = arith.subf %489, %483 : vector<8x32xf32>
    %491 = arith.mulf %490, %488 : vector<8x32xf32>
    %492 = arith.mulf %483, %459 : vector<8x32xf32>
    %493 = arith.addf %491, %492 : vector<8x32xf32>
    %c2_104 = arith.constant 2 : index
    %c0_105 = arith.constant 0 : index
    %c32_106 = arith.constant 32 : index
    %494 = vector.load %arg22[%c2_104, %c0_105, %c32_106] : memref<8x8x64xf32, #tpu.memory_space<vmem>>, vector<1x8x32xf32>
    %495 = vector.shape_cast %494 : vector<1x8x32xf32> to vector<8x32xf32>
    %496 = vector.shape_cast %493 : vector<8x32xf32> to vector<1x8x32xf32>
    tpu.vector_store %arg22[%c2_104, %c0_105, %c32_106], %496 {strides = array<i32>} : memref<8x8x64xf32, #tpu.memory_space<vmem>>, vector<1x8x32xf32>,
    %497 = vector.extract_strided_slice %11 {offsets = [1, 0, 96], sizes = [1, 8, 96], strides = [1, 1, 1]} : vector<8x8x192xf32> to vector<1x8x96xf32>
    %498 = vector.shape_cast %497 : vector<1x8x96xf32> to vector<8x96xf32>
    %cst_107 = arith.constant dense<0.000000e+00> : vector<8x96xf32>
    %499 = tpu.matmul %493, %17, %cst_107 {dimension_numbers = #tpu.dot_dimension_numbers<[1], [0], [0], [1], [0, 0, 1, 1], [], []>} : vector<8x32xf32>, vector<32x96xf32>, vector<8x96xf32> -> vector<8x96xf32>
    %500 = vector.broadcast %18 : vector<1x96xf32> to vector<8x96xf32>
    %501 = arith.addf %499, %500 : vector<8x96xf32>
    %502 = vector.extract_strided_slice %498 {offsets = [0, 0], sizes = [8, 32], strides = [1, 1]} : vector<8x96xf32> to vector<8x32xf32>
    %503 = vector.extract_strided_slice %501 {offsets = [0, 0], sizes = [8, 32], strides = [1, 1]} : vector<8x96xf32> to vector<8x32xf32>
    %504 = arith.addf %502, %503 : vector<8x32xf32>
    %505 = arith.negf %504 : vector<8x32xf32>
    %506 = math.exp %505 : vector<8x32xf32>
    %cst_108 = arith.constant 1.000000e+00 : f32
    %507 = vector.broadcast %cst_108 : f32 to vector<8x32xf32>
    %508 = arith.addf %507, %506 : vector<8x32xf32>
    %509 = arith.divf %507, %508 : vector<8x32xf32>
    %510 = vector.extract_strided_slice %498 {offsets = [0, 32], sizes = [8, 32], strides = [1, 1]} : vector<8x96xf32> to vector<8x32xf32>
    %511 = vector.extract_strided_slice %501 {offsets = [0, 32], sizes = [8, 32], strides = [1, 1]} : vector<8x96xf32> to vector<8x32xf32>
    %512 = arith.addf %510, %511 : vector<8x32xf32>
    %513 = arith.negf %512 : vector<8x32xf32>
    %514 = math.exp %513 : vector<8x32xf32>
    %cst_109 = arith.constant 1.000000e+00 : f32
    %515 = vector.broadcast %cst_109 : f32 to vector<8x32xf32>
    %516 = arith.addf %515, %514 : vector<8x32xf32>
    %517 = arith.divf %515, %516 : vector<8x32xf32>
    %518 = vector.extract_strided_slice %498 {offsets = [0, 64], sizes = [8, 32], strides = [1, 1]} : vector<8x96xf32> to vector<8x32xf32>
    %519 = vector.extract_strided_slice %501 {offsets = [0, 64], sizes = [8, 32], strides = [1, 1]} : vector<8x96xf32> to vector<8x32xf32>
    %520 = arith.mulf %509, %519 : vector<8x32xf32>
    %521 = arith.addf %518, %520 : vector<8x32xf32>
    %522 = math.tanh %521 : vector<8x32xf32>
    %cst_110 = arith.constant 1.000000e+00 : f32
    %523 = vector.broadcast %cst_110 : f32 to vector<8x32xf32>
    %524 = arith.subf %523, %517 : vector<8x32xf32>
    %525 = arith.mulf %524, %522 : vector<8x32xf32>
    %526 = arith.mulf %517, %493 : vector<8x32xf32>
    %527 = arith.addf %525, %526 : vector<8x32xf32>
    %c1_111 = arith.constant 1 : index
    %c0_112 = arith.constant 0 : index
    %c32_113 = arith.constant 32 : index
    %528 = vector.load %arg22[%c1_111, %c0_112, %c32_113] : memref<8x8x64xf32, #tpu.memory_space<vmem>>, vector<1x8x32xf32>
    %529 = vector.shape_cast %528 : vector<1x8x32xf32> to vector<8x32xf32>
    %530 = vector.shape_cast %527 : vector<8x32xf32> to vector<1x8x32xf32>
    tpu.vector_store %arg22[%c1_111, %c0_112, %c32_113], %530 {strides = array<i32>} : memref<8x8x64xf32, #tpu.memory_space<vmem>>, vector<1x8x32xf32>,
    %531 = vector.extract_strided_slice %11 {offsets = [0, 0, 96], sizes = [1, 8, 96], strides = [1, 1, 1]} : vector<8x8x192xf32> to vector<1x8x96xf32>
    %532 = vector.shape_cast %531 : vector<1x8x96xf32> to vector<8x96xf32>
    %cst_114 = arith.constant dense<0.000000e+00> : vector<8x96xf32>
    %533 = tpu.matmul %527, %17, %cst_114 {dimension_numbers = #tpu.dot_dimension_numbers<[1], [0], [0], [1], [0, 0, 1, 1], [], []>} : vector<8x32xf32>, vector<32x96xf32>, vector<8x96xf32> -> vector<8x96xf32>
    %534 = vector.broadcast %18 : vector<1x96xf32> to vector<8x96xf32>
    %535 = arith.addf %533, %534 : vector<8x96xf32>
    %536 = vector.extract_strided_slice %532 {offsets = [0, 0], sizes = [8, 32], strides = [1, 1]} : vector<8x96xf32> to vector<8x32xf32>
    %537 = vector.extract_strided_slice %535 {offsets = [0, 0], sizes = [8, 32], strides = [1, 1]} : vector<8x96xf32> to vector<8x32xf32>
    %538 = arith.addf %536, %537 : vector<8x32xf32>
    %539 = arith.negf %538 : vector<8x32xf32>
    %540 = math.exp %539 : vector<8x32xf32>
    %cst_115 = arith.constant 1.000000e+00 : f32
    %541 = vector.broadcast %cst_115 : f32 to vector<8x32xf32>
    %542 = arith.addf %541, %540 : vector<8x32xf32>
    %543 = arith.divf %541, %542 : vector<8x32xf32>
    %544 = vector.extract_strided_slice %532 {offsets = [0, 32], sizes = [8, 32], strides = [1, 1]} : vector<8x96xf32> to vector<8x32xf32>
    %545 = vector.extract_strided_slice %535 {offsets = [0, 32], sizes = [8, 32], strides = [1, 1]} : vector<8x96xf32> to vector<8x32xf32>
    %546 = arith.addf %544, %545 : vector<8x32xf32>
    %547 = arith.negf %546 : vector<8x32xf32>
    %548 = math.exp %547 : vector<8x32xf32>
    %cst_116 = arith.constant 1.000000e+00 : f32
    %549 = vector.broadcast %cst_116 : f32 to vector<8x32xf32>
    %550 = arith.addf %549, %548 : vector<8x32xf32>
    %551 = arith.divf %549, %550 : vector<8x32xf32>
    %552 = vector.extract_strided_slice %532 {offsets = [0, 64], sizes = [8, 32], strides = [1, 1]} : vector<8x96xf32> to vector<8x32xf32>
    %553 = vector.extract_strided_slice %535 {offsets = [0, 64], sizes = [8, 32], strides = [1, 1]} : vector<8x96xf32> to vector<8x32xf32>
    %554 = arith.mulf %543, %553 : vector<8x32xf32>
    %555 = arith.addf %552, %554 : vector<8x32xf32>
    %556 = math.tanh %555 : vector<8x32xf32>
    %cst_117 = arith.constant 1.000000e+00 : f32
    %557 = vector.broadcast %cst_117 : f32 to vector<8x32xf32>
    %558 = arith.subf %557, %551 : vector<8x32xf32>
    %559 = arith.mulf %558, %556 : vector<8x32xf32>
    %560 = arith.mulf %551, %527 : vector<8x32xf32>
    %561 = arith.addf %559, %560 : vector<8x32xf32>
    %c0_118 = arith.constant 0 : index
    %c0_119 = arith.constant 0 : index
    %c32_120 = arith.constant 32 : index
    %562 = vector.load %arg22[%c0_118, %c0_119, %c32_120] : memref<8x8x64xf32, #tpu.memory_space<vmem>>, vector<1x8x32xf32>
    %563 = vector.shape_cast %562 : vector<1x8x32xf32> to vector<8x32xf32>
    %564 = vector.shape_cast %561 : vector<8x32xf32> to vector<1x8x32xf32>
    tpu.vector_store %arg22[%c0_118, %c0_119, %c32_120], %564 {strides = array<i32>} : memref<8x8x64xf32, #tpu.memory_space<vmem>>, vector<1x8x32xf32>,
    %c0_121 = arith.constant 0 : index
    %c0_122 = arith.constant 0 : index
    %c0_123 = arith.constant 0 : index
    %565 = vector.load %arg22[%c0_121, %c0_122, %c0_123] : memref<8x8x64xf32, #tpu.memory_space<vmem>>, vector<8x8x64xf32>
    %566 = vector.shape_cast %565 : vector<8x8x64xf32> to vector<64x64xf32>
    %c0_124 = arith.constant 0 : index
    %c0_125 = arith.constant 0 : index
    %567 = vector.load %arg13[%c0_124, %c0_125] : memref<64x32xf32, #tpu.memory_space<vmem>>, vector<64x32xf32>
    %cst_126 = arith.constant dense<0.000000e+00> : vector<64x32xf32>
    %568 = tpu.matmul %566, %567, %cst_126 {dimension_numbers = #tpu.dot_dimension_numbers<[1], [0], [0], [1], [0, 0, 1, 1], [], []>} : vector<64x64xf32>, vector<64x32xf32>, vector<64x32xf32> -> vector<64x32xf32>
    %c0_127 = arith.constant 0 : index
    %c0_128 = arith.constant 0 : index
    %569 = vector.load %arg14[%c0_127, %c0_128] : memref<1x32xf32, #tpu.memory_space<vmem>>, vector<1x32xf32>
    %570 = vector.broadcast %569 : vector<1x32xf32> to vector<64x32xf32>
    %571 = arith.addf %568, %570 : vector<64x32xf32>
    %572 = vector.shape_cast %571 : vector<64x32xf32> to vector<8x8x32xf32>
    %c0_129 = arith.constant 0 : index
    %c0_130 = arith.constant 0 : index
    %573 = vector.load %arg10[%c0_129, %c0_130] : memref<32x32xf32, #tpu.memory_space<vmem>>, vector<32x32xf32>
    %cst_131 = arith.constant dense<0.000000e+00> : vector<8x32xf32>
    %574 = tpu.matmul %288, %573, %cst_131 {dimension_numbers = #tpu.dot_dimension_numbers<[1], [0], [0], [1], [0, 0, 1, 1], [], []>} : vector<8x32xf32>, vector<32x32xf32>, vector<8x32xf32> -> vector<8x32xf32>
    %c0_132 = arith.constant 0 : index
    %c0_133 = arith.constant 0 : index
    %575 = vector.load %arg11[%c0_132, %c0_133] : memref<32x32xf32, #tpu.memory_space<vmem>>, vector<32x32xf32>
    %cst_134 = arith.constant dense<0.000000e+00> : vector<8x32xf32>
    %576 = tpu.matmul %561, %575, %cst_134 {dimension_numbers = #tpu.dot_dimension_numbers<[1], [0], [0], [1], [0, 0, 1, 1], [], []>} : vector<8x32xf32>, vector<32x32xf32>, vector<8x32xf32> -> vector<8x32xf32>
    %577 = arith.addf %574, %576 : vector<8x32xf32>
    %c0_135 = arith.constant 0 : index
    %c0_136 = arith.constant 0 : index
    %578 = vector.load %arg12[%c0_135, %c0_136] : memref<1x32xf32, #tpu.memory_space<vmem>>, vector<1x32xf32>
    %579 = vector.broadcast %578 : vector<1x32xf32> to vector<8x32xf32>
    %580 = arith.addf %577, %579 : vector<8x32xf32>
    %581 = math.tanh %580 : vector<8x32xf32>
    %c0_137 = arith.constant 0 : index
    %c0_138 = arith.constant 0 : index
    %582 = vector.load %arg15[%c0_137, %c0_138] : memref<32x32xf32, #tpu.memory_space<vmem>>, vector<32x32xf32>
    %cst_139 = arith.constant dense<0.000000e+00> : vector<8x32xf32>
    %583 = tpu.matmul %581, %582, %cst_139 {dimension_numbers = #tpu.dot_dimension_numbers<[1], [0], [0], [1], [0, 0, 1, 1], [], []>} : vector<8x32xf32>, vector<32x32xf32>, vector<8x32xf32> -> vector<8x32xf32>
    %c0_140 = arith.constant 0 : index
    %c0_141 = arith.constant 0 : index
    %584 = vector.load %arg16[%c0_140, %c0_141] : memref<1x32xf32, #tpu.memory_space<vmem>>, vector<1x32xf32>
    %c0_142 = arith.constant 0 : index
    %c0_143 = arith.constant 0 : index
    %585 = vector.load %arg18[%c0_142, %c0_143] : memref<1x224xf32, #tpu.memory_space<vmem>>, vector<1x224xf32>
    %586 = tpu.iota {dimensions = array<i32: 1>} : vector<8x32xi32>
    %587 = arith.sitofp %586 : vector<8x32xi32> to vector<8x32xf32>
    %c0_144 = arith.constant 0 : index
    %c0_145 = arith.constant 0 : index
    %588 = vector.load %arg3[%c0_144, %c0_145] : memref<8x1xi32, #tpu.memory_space<vmem>>, vector<8x1xi32>
    %589 = vector.broadcast %588 : vector<8x1xi32> to vector<8x32xi32>
    %590 = arith.cmpi eq, %586, %589 : vector<8x32xi32>
    %591 = arith.extui %590 : vector<8x32xi1> to vector<8x32xi32>
    %592 = arith.sitofp %591 : vector<8x32xi32> to vector<8x32xf32>
    %cst_146 = arith.constant 0.000000e+00 : f32
    %593 = vector.broadcast %cst_146 : f32 to vector<8x32xf32>
    %c0_147 = arith.constant 0 : index
    %c0_148 = arith.constant 0 : index
    %c0_149 = arith.constant 0 : index
    %594 = vector.load %arg20[%c0_147, %c0_148, %c0_149] : memref<8x8x32xf32, #tpu.memory_space<vmem>>, vector<1x8x32xf32>
    %595 = vector.shape_cast %594 : vector<1x8x32xf32> to vector<8x32xf32>
    %596 = vector.shape_cast %593 : vector<8x32xf32> to vector<1x8x32xf32>
    tpu.vector_store %arg20[%c0_147, %c0_148, %c0_149], %596 {strides = array<i32>} : memref<8x8x32xf32, #tpu.memory_space<vmem>>, vector<1x8x32xf32>,
    %cst_150 = arith.constant 0.000000e+00 : f32
    %597 = vector.broadcast %cst_150 : f32 to vector<8x8xf32>
    %c0_151 = arith.constant 0 : index
    %c0_152 = arith.constant 0 : index
    %c0_153 = arith.constant 0 : index
    %598 = vector.load %arg21[%c0_151, %c0_152, %c0_153] : memref<8x8x8xf32, #tpu.memory_space<vmem>>, vector<1x8x8xf32>
    %599 = vector.shape_cast %598 : vector<1x8x8xf32> to vector<8x8xf32>
    %600 = vector.shape_cast %597 : vector<8x8xf32> to vector<1x8x8xf32>
    tpu.vector_store %arg21[%c0_151, %c0_152, %c0_153], %600 {strides = array<i32>} : memref<8x8x8xf32, #tpu.memory_space<vmem>>, vector<1x8x8xf32>,
    %601 = vector.shape_cast %583 : vector<8x32xf32> to vector<1x8x32xf32>
    %602 = vector.broadcast %601 : vector<1x8x32xf32> to vector<8x8x32xf32>
    %603 = arith.addf %572, %602 : vector<8x8x32xf32>
    %604 = math.tanh %603 : vector<8x8x32xf32>
    %605 = vector.shape_cast %584 : vector<1x32xf32> to vector<1x1x32xf32>
    %606 = vector.broadcast %605 : vector<1x1x32xf32> to vector<8x8x32xf32>
    %607 = arith.mulf %604, %606 : vector<8x8x32xf32>
    %cst_154 = arith.constant dense<0.000000e+00> : vector<8x8xf32>
    %608 = vector.multi_reduction <add>, %607, %cst_154 [2] : vector<8x8x32xf32> to vector<8x8xf32>
    %cst_155 = arith.constant -1.000000e+10 : f32
    %609 = vector.broadcast %cst_155 : f32 to vector<8x8xf32>
    %610 = arith.select %14, %608, %609 : vector<8x8xi1>, vector<8x8xf32>
    %cst_156 = arith.constant dense<0xFF800000> : vector<8xf32>
    %611 = vector.multi_reduction <maximumf>, %610, %cst_156 [0] : vector<8x8xf32> to vector<8xf32>
    %612 = vector.shape_cast %611 : vector<8xf32> to vector<1x8xf32>
    %613 = vector.broadcast %612 : vector<1x8xf32> to vector<8x8xf32>
    %614 = arith.subf %610, %613 : vector<8x8xf32>
    %615 = math.exp %614 : vector<8x8xf32>
    %cst_157 = arith.constant dense<0.000000e+00> : vector<8xf32>
    %616 = vector.multi_reduction <add>, %615, %cst_157 [0] : vector<8x8xf32> to vector<8xf32>
    %617 = vector.shape_cast %616 : vector<8xf32> to vector<1x8xf32>
    %618 = tpu.reciprocal %617 {approx = true} : vector<1x8xf32> -> vector<1x8xf32>
    %619 = vector.broadcast %618 : vector<1x8xf32> to vector<8x8xf32>
    %620 = arith.mulf %615, %619 : vector<8x8xf32>
    %621 = vector.shape_cast %620 : vector<8x8xf32> to vector<8x8x1xf32>
    %622 = vector.broadcast %621 : vector<8x8x1xf32> to vector<8x8x64xf32>
    %623 = arith.mulf %622, %565 : vector<8x8x64xf32>
    %cst_158 = arith.constant dense<0.000000e+00> : vector<8x64xf32>
    %624 = vector.multi_reduction <add>, %623, %cst_158 [0] : vector<8x8x64xf32> to vector<8x64xf32>
    %c0_159 = arith.constant 0 : index
    %c0_160 = arith.constant 0 : index
    %625 = vector.load %arg23[%c0_159, %c0_160] : memref<8x128xf32, #tpu.memory_space<vmem>>, vector<8x32xf32>
    tpu.vector_store %arg23[%c0_159, %c0_160], %592 {strides = array<i32>} : memref<8x128xf32, #tpu.memory_space<vmem>>, vector<8x32xf32>,
    %c0_161 = arith.constant 0 : index
    %c32_162 = arith.constant 32 : index
    %626 = vector.load %arg23[%c0_161, %c32_162] : memref<8x128xf32, #tpu.memory_space<vmem>>, vector<8x64xf32>
    tpu.vector_store %arg23[%c0_161, %c32_162], %624 {strides = array<i32>} : memref<8x128xf32, #tpu.memory_space<vmem>>, vector<8x64xf32>,
    %c0_163 = arith.constant 0 : index
    %c96 = arith.constant 96 : index
    %627 = vector.load %arg23[%c0_163, %c96] : memref<8x128xf32, #tpu.memory_space<vmem>>, vector<8x32xf32>
    tpu.vector_store %arg23[%c0_163, %c96], %581 {strides = array<i32>} : memref<8x128xf32, #tpu.memory_space<vmem>>, vector<8x32xf32>,
    %c0_164 = arith.constant 0 : index
    %c0_165 = arith.constant 0 : index
    %628 = vector.load %arg23[%c0_164, %c0_165] : memref<8x128xf32, #tpu.memory_space<vmem>>, vector<8x128xf32>
    %c0_166 = arith.constant 0 : index
    %c0_167 = arith.constant 0 : index
    %629 = vector.load %arg17[%c0_166, %c0_167] : memref<128x224xf32, #tpu.memory_space<vmem>>, vector<128x224xf32>
    %cst_168 = arith.constant dense<0.000000e+00> : vector<8x224xf32>
    %630 = tpu.matmul %628, %629, %cst_168 {dimension_numbers = #tpu.dot_dimension_numbers<[1], [0], [0], [1], [0, 0, 1, 1], [], []>} : vector<8x128xf32>, vector<128x224xf32>, vector<8x224xf32> -> vector<8x224xf32>
    %631 = vector.broadcast %585 : vector<1x224xf32> to vector<8x224xf32>
    %632 = arith.addf %630, %631 : vector<8x224xf32>
    %633 = vector.extract_strided_slice %632 {offsets = [0, 0], sizes = [8, 96], strides = [1, 1]} : vector<8x224xf32> to vector<8x96xf32>
    %634 = vector.extract_strided_slice %632 {offsets = [0, 96], sizes = [8, 32], strides = [1, 1]} : vector<8x224xf32> to vector<8x32xf32>
    %635 = vector.extract_strided_slice %632 {offsets = [0, 128], sizes = [8, 96], strides = [1, 1]} : vector<8x224xf32> to vector<8x96xf32>
    %636 = vector.extract_strided_slice %633 {offsets = [0, 0], sizes = [8, 32], strides = [1, 1]} : vector<8x96xf32> to vector<8x32xf32>
    %637 = vector.extract_strided_slice %635 {offsets = [0, 0], sizes = [8, 32], strides = [1, 1]} : vector<8x96xf32> to vector<8x32xf32>
    %638 = arith.addf %636, %637 : vector<8x32xf32>
    %639 = arith.negf %638 : vector<8x32xf32>
    %640 = math.exp %639 : vector<8x32xf32>
    %cst_169 = arith.constant 1.000000e+00 : f32
    %641 = vector.broadcast %cst_169 : f32 to vector<8x32xf32>
    %642 = arith.addf %641, %640 : vector<8x32xf32>
    %643 = arith.divf %641, %642 : vector<8x32xf32>
    %644 = vector.extract_strided_slice %633 {offsets = [0, 32], sizes = [8, 32], strides = [1, 1]} : vector<8x96xf32> to vector<8x32xf32>
    %645 = vector.extract_strided_slice %635 {offsets = [0, 32], sizes = [8, 32], strides = [1, 1]} : vector<8x96xf32> to vector<8x32xf32>
    %646 = arith.addf %644, %645 : vector<8x32xf32>
    %647 = arith.negf %646 : vector<8x32xf32>
    %648 = math.exp %647 : vector<8x32xf32>
    %cst_170 = arith.constant 1.000000e+00 : f32
    %649 = vector.broadcast %cst_170 : f32 to vector<8x32xf32>
    %650 = arith.addf %649, %648 : vector<8x32xf32>
    %651 = arith.divf %649, %650 : vector<8x32xf32>
    %652 = vector.extract_strided_slice %633 {offsets = [0, 64], sizes = [8, 32], strides = [1, 1]} : vector<8x96xf32> to vector<8x32xf32>
    %653 = vector.extract_strided_slice %635 {offsets = [0, 64], sizes = [8, 32], strides = [1, 1]} : vector<8x96xf32> to vector<8x32xf32>
    %654 = arith.mulf %643, %653 : vector<8x32xf32>
    %655 = arith.addf %652, %654 : vector<8x32xf32>
    %656 = math.tanh %655 : vector<8x32xf32>
    %cst_171 = arith.constant 1.000000e+00 : f32
    %657 = vector.broadcast %cst_171 : f32 to vector<8x32xf32>
    %658 = arith.subf %657, %651 : vector<8x32xf32>
    %659 = arith.mulf %658, %656 : vector<8x32xf32>
    %660 = arith.mulf %651, %581 : vector<8x32xf32>
    %661 = arith.addf %659, %660 : vector<8x32xf32>
    %c0_172 = arith.constant 0 : index
    %c0_173 = arith.constant 0 : index
    %662 = vector.load %arg19[%c0_172, %c0_173] : memref<32x64xf32, #tpu.memory_space<vmem>>, vector<32x64xf32>
    %cst_174 = arith.constant dense<0.000000e+00> : vector<8x64xf32>
    %663 = tpu.matmul %661, %662, %cst_174 {dimension_numbers = #tpu.dot_dimension_numbers<[1], [0], [0], [1], [0, 0, 1, 1], [], []>} : vector<8x32xf32>, vector<32x64xf32>, vector<8x64xf32> -> vector<8x64xf32>
    %664 = vector.extract_strided_slice %663 {offsets = [0, 0], sizes = [8, 32], strides = [1, 1]} : vector<8x64xf32> to vector<8x32xf32>
    %665 = arith.addf %634, %664 : vector<8x32xf32>
    %666 = vector.extract_strided_slice %663 {offsets = [0, 32], sizes = [8, 32], strides = [1, 1]} : vector<8x64xf32> to vector<8x32xf32>
    %c1_175 = arith.constant 1 : index
    %c0_176 = arith.constant 0 : index
    %c0_177 = arith.constant 0 : index
    %667 = vector.load %arg20[%c1_175, %c0_176, %c0_177] : memref<8x8x32xf32, #tpu.memory_space<vmem>>, vector<1x8x32xf32>
    %668 = vector.shape_cast %667 : vector<1x8x32xf32> to vector<8x32xf32>
    %669 = vector.shape_cast %665 : vector<8x32xf32> to vector<1x8x32xf32>
    tpu.vector_store %arg20[%c1_175, %c0_176, %c0_177], %669 {strides = array<i32>} : memref<8x8x32xf32, #tpu.memory_space<vmem>>, vector<1x8x32xf32>,
    %c1_178 = arith.constant 1 : index
    %c0_179 = arith.constant 0 : index
    %c0_180 = arith.constant 0 : index
    %670 = vector.load %arg21[%c1_178, %c0_179, %c0_180] : memref<8x8x8xf32, #tpu.memory_space<vmem>>, vector<1x8x8xf32>
    %671 = vector.shape_cast %670 : vector<1x8x8xf32> to vector<8x8xf32>
    %672 = vector.shape_cast %620 : vector<8x8xf32> to vector<1x8x8xf32>
    tpu.vector_store %arg21[%c1_178, %c0_179, %c0_180], %672 {strides = array<i32>} : memref<8x8x8xf32, #tpu.memory_space<vmem>>, vector<1x8x8xf32>,
    %cst_181 = arith.constant dense<0xFF800000> : vector<8xf32>
    %673 = vector.multi_reduction <maximumf>, %665, %cst_181 [1] : vector<8x32xf32> to vector<8xf32>
    %674 = vector.shape_cast %673 : vector<8xf32> to vector<8x1xf32>
    %675 = vector.broadcast %674 : vector<8x1xf32> to vector<8x32xf32>
    %676 = arith.cmpf oge, %665, %675 : vector<8x32xf32>
    %cst_182 = arith.constant 3.200000e+01 : f32
    %677 = vector.broadcast %cst_182 : f32 to vector<8x32xf32>
    %678 = arith.select %676, %587, %677 : vector<8x32xi1>, vector<8x32xf32>
    %cst_183 = arith.constant dense<0x7F800000> : vector<8xf32>
    %679 = vector.multi_reduction <minimumf>, %678, %cst_183 [1] : vector<8x32xf32> to vector<8xf32>
    %680 = vector.shape_cast %679 : vector<8xf32> to vector<8x1xf32>
    %681 = vector.broadcast %680 : vector<8x1xf32> to vector<8x32xf32>
    %682 = arith.cmpf oeq, %587, %681 : vector<8x32xf32>
    %683 = arith.extui %682 : vector<8x32xi1> to vector<8x32xi32>
    %684 = arith.sitofp %683 : vector<8x32xi32> to vector<8x32xf32>
    %685 = vector.shape_cast %666 : vector<8x32xf32> to vector<1x8x32xf32>
    %686 = vector.broadcast %685 : vector<1x8x32xf32> to vector<8x8x32xf32>
    %687 = arith.addf %572, %686 : vector<8x8x32xf32>
    %688 = math.tanh %687 : vector<8x8x32xf32>
    %689 = vector.shape_cast %584 : vector<1x32xf32> to vector<1x1x32xf32>
    %690 = vector.broadcast %689 : vector<1x1x32xf32> to vector<8x8x32xf32>
    %691 = arith.mulf %688, %690 : vector<8x8x32xf32>
    %cst_184 = arith.constant dense<0.000000e+00> : vector<8x8xf32>
    %692 = vector.multi_reduction <add>, %691, %cst_184 [2] : vector<8x8x32xf32> to vector<8x8xf32>
    %cst_185 = arith.constant -1.000000e+10 : f32
    %693 = vector.broadcast %cst_185 : f32 to vector<8x8xf32>
    %694 = arith.select %14, %692, %693 : vector<8x8xi1>, vector<8x8xf32>
    %cst_186 = arith.constant dense<0xFF800000> : vector<8xf32>
    %695 = vector.multi_reduction <maximumf>, %694, %cst_186 [0] : vector<8x8xf32> to vector<8xf32>
    %696 = vector.shape_cast %695 : vector<8xf32> to vector<1x8xf32>
    %697 = vector.broadcast %696 : vector<1x8xf32> to vector<8x8xf32>
    %698 = arith.subf %694, %697 : vector<8x8xf32>
    %699 = math.exp %698 : vector<8x8xf32>
    %cst_187 = arith.constant dense<0.000000e+00> : vector<8xf32>
    %700 = vector.multi_reduction <add>, %699, %cst_187 [0] : vector<8x8xf32> to vector<8xf32>
    %701 = vector.shape_cast %700 : vector<8xf32> to vector<1x8xf32>
    %702 = tpu.reciprocal %701 {approx = true} : vector<1x8xf32> -> vector<1x8xf32>
    %703 = vector.broadcast %702 : vector<1x8xf32> to vector<8x8xf32>
    %704 = arith.mulf %699, %703 : vector<8x8xf32>
    %705 = vector.shape_cast %704 : vector<8x8xf32> to vector<8x8x1xf32>
    %706 = vector.broadcast %705 : vector<8x8x1xf32> to vector<8x8x64xf32>
    %707 = arith.mulf %706, %565 : vector<8x8x64xf32>
    %cst_188 = arith.constant dense<0.000000e+00> : vector<8x64xf32>
    %708 = vector.multi_reduction <add>, %707, %cst_188 [0] : vector<8x8x64xf32> to vector<8x64xf32>
    %c0_189 = arith.constant 0 : index
    %c0_190 = arith.constant 0 : index
    %709 = vector.load %arg23[%c0_189, %c0_190] : memref<8x128xf32, #tpu.memory_space<vmem>>, vector<8x32xf32>
    tpu.vector_store %arg23[%c0_189, %c0_190], %684 {strides = array<i32>} : memref<8x128xf32, #tpu.memory_space<vmem>>, vector<8x32xf32>,
    %c0_191 = arith.constant 0 : index
    %c32_192 = arith.constant 32 : index
    %710 = vector.load %arg23[%c0_191, %c32_192] : memref<8x128xf32, #tpu.memory_space<vmem>>, vector<8x64xf32>
    tpu.vector_store %arg23[%c0_191, %c32_192], %708 {strides = array<i32>} : memref<8x128xf32, #tpu.memory_space<vmem>>, vector<8x64xf32>,
    %c0_193 = arith.constant 0 : index
    %c96_194 = arith.constant 96 : index
    %711 = vector.load %arg23[%c0_193, %c96_194] : memref<8x128xf32, #tpu.memory_space<vmem>>, vector<8x32xf32>
    tpu.vector_store %arg23[%c0_193, %c96_194], %661 {strides = array<i32>} : memref<8x128xf32, #tpu.memory_space<vmem>>, vector<8x32xf32>,
    %c0_195 = arith.constant 0 : index
    %c0_196 = arith.constant 0 : index
    %712 = vector.load %arg23[%c0_195, %c0_196] : memref<8x128xf32, #tpu.memory_space<vmem>>, vector<8x128xf32>
    %c0_197 = arith.constant 0 : index
    %c0_198 = arith.constant 0 : index
    %713 = vector.load %arg17[%c0_197, %c0_198] : memref<128x224xf32, #tpu.memory_space<vmem>>, vector<128x224xf32>
    %cst_199 = arith.constant dense<0.000000e+00> : vector<8x224xf32>
    %714 = tpu.matmul %712, %713, %cst_199 {dimension_numbers = #tpu.dot_dimension_numbers<[1], [0], [0], [1], [0, 0, 1, 1], [], []>} : vector<8x128xf32>, vector<128x224xf32>, vector<8x224xf32> -> vector<8x224xf32>
    %715 = vector.broadcast %585 : vector<1x224xf32> to vector<8x224xf32>
    %716 = arith.addf %714, %715 : vector<8x224xf32>
    %717 = vector.extract_strided_slice %716 {offsets = [0, 0], sizes = [8, 96], strides = [1, 1]} : vector<8x224xf32> to vector<8x96xf32>
    %718 = vector.extract_strided_slice %716 {offsets = [0, 96], sizes = [8, 32], strides = [1, 1]} : vector<8x224xf32> to vector<8x32xf32>
    %719 = vector.extract_strided_slice %716 {offsets = [0, 128], sizes = [8, 96], strides = [1, 1]} : vector<8x224xf32> to vector<8x96xf32>
    %720 = vector.extract_strided_slice %717 {offsets = [0, 0], sizes = [8, 32], strides = [1, 1]} : vector<8x96xf32> to vector<8x32xf32>
    %721 = vector.extract_strided_slice %719 {offsets = [0, 0], sizes = [8, 32], strides = [1, 1]} : vector<8x96xf32> to vector<8x32xf32>
    %722 = arith.addf %720, %721 : vector<8x32xf32>
    %723 = arith.negf %722 : vector<8x32xf32>
    %724 = math.exp %723 : vector<8x32xf32>
    %cst_200 = arith.constant 1.000000e+00 : f32
    %725 = vector.broadcast %cst_200 : f32 to vector<8x32xf32>
    %726 = arith.addf %725, %724 : vector<8x32xf32>
    %727 = arith.divf %725, %726 : vector<8x32xf32>
    %728 = vector.extract_strided_slice %717 {offsets = [0, 32], sizes = [8, 32], strides = [1, 1]} : vector<8x96xf32> to vector<8x32xf32>
    %729 = vector.extract_strided_slice %719 {offsets = [0, 32], sizes = [8, 32], strides = [1, 1]} : vector<8x96xf32> to vector<8x32xf32>
    %730 = arith.addf %728, %729 : vector<8x32xf32>
    %731 = arith.negf %730 : vector<8x32xf32>
    %732 = math.exp %731 : vector<8x32xf32>
    %cst_201 = arith.constant 1.000000e+00 : f32
    %733 = vector.broadcast %cst_201 : f32 to vector<8x32xf32>
    %734 = arith.addf %733, %732 : vector<8x32xf32>
    %735 = arith.divf %733, %734 : vector<8x32xf32>
    %736 = vector.extract_strided_slice %717 {offsets = [0, 64], sizes = [8, 32], strides = [1, 1]} : vector<8x96xf32> to vector<8x32xf32>
    %737 = vector.extract_strided_slice %719 {offsets = [0, 64], sizes = [8, 32], strides = [1, 1]} : vector<8x96xf32> to vector<8x32xf32>
    %738 = arith.mulf %727, %737 : vector<8x32xf32>
    %739 = arith.addf %736, %738 : vector<8x32xf32>
    %740 = math.tanh %739 : vector<8x32xf32>
    %cst_202 = arith.constant 1.000000e+00 : f32
    %741 = vector.broadcast %cst_202 : f32 to vector<8x32xf32>
    %742 = arith.subf %741, %735 : vector<8x32xf32>
    %743 = arith.mulf %742, %740 : vector<8x32xf32>
    %744 = arith.mulf %735, %661 : vector<8x32xf32>
    %745 = arith.addf %743, %744 : vector<8x32xf32>
    %c0_203 = arith.constant 0 : index
    %c0_204 = arith.constant 0 : index
    %746 = vector.load %arg19[%c0_203, %c0_204] : memref<32x64xf32, #tpu.memory_space<vmem>>, vector<32x64xf32>
    %cst_205 = arith.constant dense<0.000000e+00> : vector<8x64xf32>
    %747 = tpu.matmul %745, %746, %cst_205 {dimension_numbers = #tpu.dot_dimension_numbers<[1], [0], [0], [1], [0, 0, 1, 1], [], []>} : vector<8x32xf32>, vector<32x64xf32>, vector<8x64xf32> -> vector<8x64xf32>
    %748 = vector.extract_strided_slice %747 {offsets = [0, 0], sizes = [8, 32], strides = [1, 1]} : vector<8x64xf32> to vector<8x32xf32>
    %749 = arith.addf %718, %748 : vector<8x32xf32>
    %750 = vector.extract_strided_slice %747 {offsets = [0, 32], sizes = [8, 32], strides = [1, 1]} : vector<8x64xf32> to vector<8x32xf32>
    %c2_206 = arith.constant 2 : index
    %c0_207 = arith.constant 0 : index
    %c0_208 = arith.constant 0 : index
    %751 = vector.load %arg20[%c2_206, %c0_207, %c0_208] : memref<8x8x32xf32, #tpu.memory_space<vmem>>, vector<1x8x32xf32>
    %752 = vector.shape_cast %751 : vector<1x8x32xf32> to vector<8x32xf32>
    %753 = vector.shape_cast %749 : vector<8x32xf32> to vector<1x8x32xf32>
    tpu.vector_store %arg20[%c2_206, %c0_207, %c0_208], %753 {strides = array<i32>} : memref<8x8x32xf32, #tpu.memory_space<vmem>>, vector<1x8x32xf32>,
    %c2_209 = arith.constant 2 : index
    %c0_210 = arith.constant 0 : index
    %c0_211 = arith.constant 0 : index
    %754 = vector.load %arg21[%c2_209, %c0_210, %c0_211] : memref<8x8x8xf32, #tpu.memory_space<vmem>>, vector<1x8x8xf32>
    %755 = vector.shape_cast %754 : vector<1x8x8xf32> to vector<8x8xf32>
    %756 = vector.shape_cast %704 : vector<8x8xf32> to vector<1x8x8xf32>
    tpu.vector_store %arg21[%c2_209, %c0_210, %c0_211], %756 {strides = array<i32>} : memref<8x8x8xf32, #tpu.memory_space<vmem>>, vector<1x8x8xf32>,
    %cst_212 = arith.constant dense<0xFF800000> : vector<8xf32>
    %757 = vector.multi_reduction <maximumf>, %749, %cst_212 [1] : vector<8x32xf32> to vector<8xf32>
    %758 = vector.shape_cast %757 : vector<8xf32> to vector<8x1xf32>
    %759 = vector.broadcast %758 : vector<8x1xf32> to vector<8x32xf32>
    %760 = arith.cmpf oge, %749, %759 : vector<8x32xf32>
    %cst_213 = arith.constant 3.200000e+01 : f32
    %761 = vector.broadcast %cst_213 : f32 to vector<8x32xf32>
    %762 = arith.select %760, %587, %761 : vector<8x32xi1>, vector<8x32xf32>
    %cst_214 = arith.constant dense<0x7F800000> : vector<8xf32>
    %763 = vector.multi_reduction <minimumf>, %762, %cst_214 [1] : vector<8x32xf32> to vector<8xf32>
    %764 = vector.shape_cast %763 : vector<8xf32> to vector<8x1xf32>
    %765 = vector.broadcast %764 : vector<8x1xf32> to vector<8x32xf32>
    %766 = arith.cmpf oeq, %587, %765 : vector<8x32xf32>
    %767 = arith.extui %766 : vector<8x32xi1> to vector<8x32xi32>
    %768 = arith.sitofp %767 : vector<8x32xi32> to vector<8x32xf32>
    %769 = vector.shape_cast %750 : vector<8x32xf32> to vector<1x8x32xf32>
    %770 = vector.broadcast %769 : vector<1x8x32xf32> to vector<8x8x32xf32>
    %771 = arith.addf %572, %770 : vector<8x8x32xf32>
    %772 = math.tanh %771 : vector<8x8x32xf32>
    %773 = vector.shape_cast %584 : vector<1x32xf32> to vector<1x1x32xf32>
    %774 = vector.broadcast %773 : vector<1x1x32xf32> to vector<8x8x32xf32>
    %775 = arith.mulf %772, %774 : vector<8x8x32xf32>
    %cst_215 = arith.constant dense<0.000000e+00> : vector<8x8xf32>
    %776 = vector.multi_reduction <add>, %775, %cst_215 [2] : vector<8x8x32xf32> to vector<8x8xf32>
    %cst_216 = arith.constant -1.000000e+10 : f32
    %777 = vector.broadcast %cst_216 : f32 to vector<8x8xf32>
    %778 = arith.select %14, %776, %777 : vector<8x8xi1>, vector<8x8xf32>
    %cst_217 = arith.constant dense<0xFF800000> : vector<8xf32>
    %779 = vector.multi_reduction <maximumf>, %778, %cst_217 [0] : vector<8x8xf32> to vector<8xf32>
    %780 = vector.shape_cast %779 : vector<8xf32> to vector<1x8xf32>
    %781 = vector.broadcast %780 : vector<1x8xf32> to vector<8x8xf32>
    %782 = arith.subf %778, %781 : vector<8x8xf32>
    %783 = math.exp %782 : vector<8x8xf32>
    %cst_218 = arith.constant dense<0.000000e+00> : vector<8xf32>
    %784 = vector.multi_reduction <add>, %783, %cst_218 [0] : vector<8x8xf32> to vector<8xf32>
    %785 = vector.shape_cast %784 : vector<8xf32> to vector<1x8xf32>
    %786 = tpu.reciprocal %785 {approx = true} : vector<1x8xf32> -> vector<1x8xf32>
    %787 = vector.broadcast %786 : vector<1x8xf32> to vector<8x8xf32>
    %788 = arith.mulf %783, %787 : vector<8x8xf32>
    %789 = vector.shape_cast %788 : vector<8x8xf32> to vector<8x8x1xf32>
    %790 = vector.broadcast %789 : vector<8x8x1xf32> to vector<8x8x64xf32>
    %791 = arith.mulf %790, %565 : vector<8x8x64xf32>
    %cst_219 = arith.constant dense<0.000000e+00> : vector<8x64xf32>
    %792 = vector.multi_reduction <add>, %791, %cst_219 [0] : vector<8x8x64xf32> to vector<8x64xf32>
    %c0_220 = arith.constant 0 : index
    %c0_221 = arith.constant 0 : index
    %793 = vector.load %arg23[%c0_220, %c0_221] : memref<8x128xf32, #tpu.memory_space<vmem>>, vector<8x32xf32>
    tpu.vector_store %arg23[%c0_220, %c0_221], %768 {strides = array<i32>} : memref<8x128xf32, #tpu.memory_space<vmem>>, vector<8x32xf32>,
    %c0_222 = arith.constant 0 : index
    %c32_223 = arith.constant 32 : index
    %794 = vector.load %arg23[%c0_222, %c32_223] : memref<8x128xf32, #tpu.memory_space<vmem>>, vector<8x64xf32>
    tpu.vector_store %arg23[%c0_222, %c32_223], %792 {strides = array<i32>} : memref<8x128xf32, #tpu.memory_space<vmem>>, vector<8x64xf32>,
    %c0_224 = arith.constant 0 : index
    %c96_225 = arith.constant 96 : index
    %795 = vector.load %arg23[%c0_224, %c96_225] : memref<8x128xf32, #tpu.memory_space<vmem>>, vector<8x32xf32>
    tpu.vector_store %arg23[%c0_224, %c96_225], %745 {strides = array<i32>} : memref<8x128xf32, #tpu.memory_space<vmem>>, vector<8x32xf32>,
    %c0_226 = arith.constant 0 : index
    %c0_227 = arith.constant 0 : index
    %796 = vector.load %arg23[%c0_226, %c0_227] : memref<8x128xf32, #tpu.memory_space<vmem>>, vector<8x128xf32>
    %c0_228 = arith.constant 0 : index
    %c0_229 = arith.constant 0 : index
    %797 = vector.load %arg17[%c0_228, %c0_229] : memref<128x224xf32, #tpu.memory_space<vmem>>, vector<128x224xf32>
    %cst_230 = arith.constant dense<0.000000e+00> : vector<8x224xf32>
    %798 = tpu.matmul %796, %797, %cst_230 {dimension_numbers = #tpu.dot_dimension_numbers<[1], [0], [0], [1], [0, 0, 1, 1], [], []>} : vector<8x128xf32>, vector<128x224xf32>, vector<8x224xf32> -> vector<8x224xf32>
    %799 = vector.broadcast %585 : vector<1x224xf32> to vector<8x224xf32>
    %800 = arith.addf %798, %799 : vector<8x224xf32>
    %801 = vector.extract_strided_slice %800 {offsets = [0, 0], sizes = [8, 96], strides = [1, 1]} : vector<8x224xf32> to vector<8x96xf32>
    %802 = vector.extract_strided_slice %800 {offsets = [0, 96], sizes = [8, 32], strides = [1, 1]} : vector<8x224xf32> to vector<8x32xf32>
    %803 = vector.extract_strided_slice %800 {offsets = [0, 128], sizes = [8, 96], strides = [1, 1]} : vector<8x224xf32> to vector<8x96xf32>
    %804 = vector.extract_strided_slice %801 {offsets = [0, 0], sizes = [8, 32], strides = [1, 1]} : vector<8x96xf32> to vector<8x32xf32>
    %805 = vector.extract_strided_slice %803 {offsets = [0, 0], sizes = [8, 32], strides = [1, 1]} : vector<8x96xf32> to vector<8x32xf32>
    %806 = arith.addf %804, %805 : vector<8x32xf32>
    %807 = arith.negf %806 : vector<8x32xf32>
    %808 = math.exp %807 : vector<8x32xf32>
    %cst_231 = arith.constant 1.000000e+00 : f32
    %809 = vector.broadcast %cst_231 : f32 to vector<8x32xf32>
    %810 = arith.addf %809, %808 : vector<8x32xf32>
    %811 = arith.divf %809, %810 : vector<8x32xf32>
    %812 = vector.extract_strided_slice %801 {offsets = [0, 32], sizes = [8, 32], strides = [1, 1]} : vector<8x96xf32> to vector<8x32xf32>
    %813 = vector.extract_strided_slice %803 {offsets = [0, 32], sizes = [8, 32], strides = [1, 1]} : vector<8x96xf32> to vector<8x32xf32>
    %814 = arith.addf %812, %813 : vector<8x32xf32>
    %815 = arith.negf %814 : vector<8x32xf32>
    %816 = math.exp %815 : vector<8x32xf32>
    %cst_232 = arith.constant 1.000000e+00 : f32
    %817 = vector.broadcast %cst_232 : f32 to vector<8x32xf32>
    %818 = arith.addf %817, %816 : vector<8x32xf32>
    %819 = arith.divf %817, %818 : vector<8x32xf32>
    %820 = vector.extract_strided_slice %801 {offsets = [0, 64], sizes = [8, 32], strides = [1, 1]} : vector<8x96xf32> to vector<8x32xf32>
    %821 = vector.extract_strided_slice %803 {offsets = [0, 64], sizes = [8, 32], strides = [1, 1]} : vector<8x96xf32> to vector<8x32xf32>
    %822 = arith.mulf %811, %821 : vector<8x32xf32>
    %823 = arith.addf %820, %822 : vector<8x32xf32>
    %824 = math.tanh %823 : vector<8x32xf32>
    %cst_233 = arith.constant 1.000000e+00 : f32
    %825 = vector.broadcast %cst_233 : f32 to vector<8x32xf32>
    %826 = arith.subf %825, %819 : vector<8x32xf32>
    %827 = arith.mulf %826, %824 : vector<8x32xf32>
    %828 = arith.mulf %819, %745 : vector<8x32xf32>
    %829 = arith.addf %827, %828 : vector<8x32xf32>
    %c0_234 = arith.constant 0 : index
    %c0_235 = arith.constant 0 : index
    %830 = vector.load %arg19[%c0_234, %c0_235] : memref<32x64xf32, #tpu.memory_space<vmem>>, vector<32x64xf32>
    %cst_236 = arith.constant dense<0.000000e+00> : vector<8x64xf32>
    %831 = tpu.matmul %829, %830, %cst_236 {dimension_numbers = #tpu.dot_dimension_numbers<[1], [0], [0], [1], [0, 0, 1, 1], [], []>} : vector<8x32xf32>, vector<32x64xf32>, vector<8x64xf32> -> vector<8x64xf32>
    %832 = vector.extract_strided_slice %831 {offsets = [0, 0], sizes = [8, 32], strides = [1, 1]} : vector<8x64xf32> to vector<8x32xf32>
    %833 = arith.addf %802, %832 : vector<8x32xf32>
    %834 = vector.extract_strided_slice %831 {offsets = [0, 32], sizes = [8, 32], strides = [1, 1]} : vector<8x64xf32> to vector<8x32xf32>
    %c3_237 = arith.constant 3 : index
    %c0_238 = arith.constant 0 : index
    %c0_239 = arith.constant 0 : index
    %835 = vector.load %arg20[%c3_237, %c0_238, %c0_239] : memref<8x8x32xf32, #tpu.memory_space<vmem>>, vector<1x8x32xf32>
    %836 = vector.shape_cast %835 : vector<1x8x32xf32> to vector<8x32xf32>
    %837 = vector.shape_cast %833 : vector<8x32xf32> to vector<1x8x32xf32>
    tpu.vector_store %arg20[%c3_237, %c0_238, %c0_239], %837 {strides = array<i32>} : memref<8x8x32xf32, #tpu.memory_space<vmem>>, vector<1x8x32xf32>,
    %c3_240 = arith.constant 3 : index
    %c0_241 = arith.constant 0 : index
    %c0_242 = arith.constant 0 : index
    %838 = vector.load %arg21[%c3_240, %c0_241, %c0_242] : memref<8x8x8xf32, #tpu.memory_space<vmem>>, vector<1x8x8xf32>
    %839 = vector.shape_cast %838 : vector<1x8x8xf32> to vector<8x8xf32>
    %840 = vector.shape_cast %788 : vector<8x8xf32> to vector<1x8x8xf32>
    tpu.vector_store %arg21[%c3_240, %c0_241, %c0_242], %840 {strides = array<i32>} : memref<8x8x8xf32, #tpu.memory_space<vmem>>, vector<1x8x8xf32>,
    %cst_243 = arith.constant dense<0xFF800000> : vector<8xf32>
    %841 = vector.multi_reduction <maximumf>, %833, %cst_243 [1] : vector<8x32xf32> to vector<8xf32>
    %842 = vector.shape_cast %841 : vector<8xf32> to vector<8x1xf32>
    %843 = vector.broadcast %842 : vector<8x1xf32> to vector<8x32xf32>
    %844 = arith.cmpf oge, %833, %843 : vector<8x32xf32>
    %cst_244 = arith.constant 3.200000e+01 : f32
    %845 = vector.broadcast %cst_244 : f32 to vector<8x32xf32>
    %846 = arith.select %844, %587, %845 : vector<8x32xi1>, vector<8x32xf32>
    %cst_245 = arith.constant dense<0x7F800000> : vector<8xf32>
    %847 = vector.multi_reduction <minimumf>, %846, %cst_245 [1] : vector<8x32xf32> to vector<8xf32>
    %848 = vector.shape_cast %847 : vector<8xf32> to vector<8x1xf32>
    %849 = vector.broadcast %848 : vector<8x1xf32> to vector<8x32xf32>
    %850 = arith.cmpf oeq, %587, %849 : vector<8x32xf32>
    %851 = arith.extui %850 : vector<8x32xi1> to vector<8x32xi32>
    %852 = arith.sitofp %851 : vector<8x32xi32> to vector<8x32xf32>
    %853 = vector.shape_cast %834 : vector<8x32xf32> to vector<1x8x32xf32>
    %854 = vector.broadcast %853 : vector<1x8x32xf32> to vector<8x8x32xf32>
    %855 = arith.addf %572, %854 : vector<8x8x32xf32>
    %856 = math.tanh %855 : vector<8x8x32xf32>
    %857 = vector.shape_cast %584 : vector<1x32xf32> to vector<1x1x32xf32>
    %858 = vector.broadcast %857 : vector<1x1x32xf32> to vector<8x8x32xf32>
    %859 = arith.mulf %856, %858 : vector<8x8x32xf32>
    %cst_246 = arith.constant dense<0.000000e+00> : vector<8x8xf32>
    %860 = vector.multi_reduction <add>, %859, %cst_246 [2] : vector<8x8x32xf32> to vector<8x8xf32>
    %cst_247 = arith.constant -1.000000e+10 : f32
    %861 = vector.broadcast %cst_247 : f32 to vector<8x8xf32>
    %862 = arith.select %14, %860, %861 : vector<8x8xi1>, vector<8x8xf32>
    %cst_248 = arith.constant dense<0xFF800000> : vector<8xf32>
    %863 = vector.multi_reduction <maximumf>, %862, %cst_248 [0] : vector<8x8xf32> to vector<8xf32>
    %864 = vector.shape_cast %863 : vector<8xf32> to vector<1x8xf32>
    %865 = vector.broadcast %864 : vector<1x8xf32> to vector<8x8xf32>
    %866 = arith.subf %862, %865 : vector<8x8xf32>
    %867 = math.exp %866 : vector<8x8xf32>
    %cst_249 = arith.constant dense<0.000000e+00> : vector<8xf32>
    %868 = vector.multi_reduction <add>, %867, %cst_249 [0] : vector<8x8xf32> to vector<8xf32>
    %869 = vector.shape_cast %868 : vector<8xf32> to vector<1x8xf32>
    %870 = tpu.reciprocal %869 {approx = true} : vector<1x8xf32> -> vector<1x8xf32>
    %871 = vector.broadcast %870 : vector<1x8xf32> to vector<8x8xf32>
    %872 = arith.mulf %867, %871 : vector<8x8xf32>
    %873 = vector.shape_cast %872 : vector<8x8xf32> to vector<8x8x1xf32>
    %874 = vector.broadcast %873 : vector<8x8x1xf32> to vector<8x8x64xf32>
    %875 = arith.mulf %874, %565 : vector<8x8x64xf32>
    %cst_250 = arith.constant dense<0.000000e+00> : vector<8x64xf32>
    %876 = vector.multi_reduction <add>, %875, %cst_250 [0] : vector<8x8x64xf32> to vector<8x64xf32>
    %c0_251 = arith.constant 0 : index
    %c0_252 = arith.constant 0 : index
    %877 = vector.load %arg23[%c0_251, %c0_252] : memref<8x128xf32, #tpu.memory_space<vmem>>, vector<8x32xf32>
    tpu.vector_store %arg23[%c0_251, %c0_252], %852 {strides = array<i32>} : memref<8x128xf32, #tpu.memory_space<vmem>>, vector<8x32xf32>,
    %c0_253 = arith.constant 0 : index
    %c32_254 = arith.constant 32 : index
    %878 = vector.load %arg23[%c0_253, %c32_254] : memref<8x128xf32, #tpu.memory_space<vmem>>, vector<8x64xf32>
    tpu.vector_store %arg23[%c0_253, %c32_254], %876 {strides = array<i32>} : memref<8x128xf32, #tpu.memory_space<vmem>>, vector<8x64xf32>,
    %c0_255 = arith.constant 0 : index
    %c96_256 = arith.constant 96 : index
    %879 = vector.load %arg23[%c0_255, %c96_256] : memref<8x128xf32, #tpu.memory_space<vmem>>, vector<8x32xf32>
    tpu.vector_store %arg23[%c0_255, %c96_256], %829 {strides = array<i32>} : memref<8x128xf32, #tpu.memory_space<vmem>>, vector<8x32xf32>,
    %c0_257 = arith.constant 0 : index
    %c0_258 = arith.constant 0 : index
    %880 = vector.load %arg23[%c0_257, %c0_258] : memref<8x128xf32, #tpu.memory_space<vmem>>, vector<8x128xf32>
    %c0_259 = arith.constant 0 : index
    %c0_260 = arith.constant 0 : index
    %881 = vector.load %arg17[%c0_259, %c0_260] : memref<128x224xf32, #tpu.memory_space<vmem>>, vector<128x224xf32>
    %cst_261 = arith.constant dense<0.000000e+00> : vector<8x224xf32>
    %882 = tpu.matmul %880, %881, %cst_261 {dimension_numbers = #tpu.dot_dimension_numbers<[1], [0], [0], [1], [0, 0, 1, 1], [], []>} : vector<8x128xf32>, vector<128x224xf32>, vector<8x224xf32> -> vector<8x224xf32>
    %883 = vector.broadcast %585 : vector<1x224xf32> to vector<8x224xf32>
    %884 = arith.addf %882, %883 : vector<8x224xf32>
    %885 = vector.extract_strided_slice %884 {offsets = [0, 0], sizes = [8, 96], strides = [1, 1]} : vector<8x224xf32> to vector<8x96xf32>
    %886 = vector.extract_strided_slice %884 {offsets = [0, 96], sizes = [8, 32], strides = [1, 1]} : vector<8x224xf32> to vector<8x32xf32>
    %887 = vector.extract_strided_slice %884 {offsets = [0, 128], sizes = [8, 96], strides = [1, 1]} : vector<8x224xf32> to vector<8x96xf32>
    %888 = vector.extract_strided_slice %885 {offsets = [0, 0], sizes = [8, 32], strides = [1, 1]} : vector<8x96xf32> to vector<8x32xf32>
    %889 = vector.extract_strided_slice %887 {offsets = [0, 0], sizes = [8, 32], strides = [1, 1]} : vector<8x96xf32> to vector<8x32xf32>
    %890 = arith.addf %888, %889 : vector<8x32xf32>
    %891 = arith.negf %890 : vector<8x32xf32>
    %892 = math.exp %891 : vector<8x32xf32>
    %cst_262 = arith.constant 1.000000e+00 : f32
    %893 = vector.broadcast %cst_262 : f32 to vector<8x32xf32>
    %894 = arith.addf %893, %892 : vector<8x32xf32>
    %895 = arith.divf %893, %894 : vector<8x32xf32>
    %896 = vector.extract_strided_slice %885 {offsets = [0, 32], sizes = [8, 32], strides = [1, 1]} : vector<8x96xf32> to vector<8x32xf32>
    %897 = vector.extract_strided_slice %887 {offsets = [0, 32], sizes = [8, 32], strides = [1, 1]} : vector<8x96xf32> to vector<8x32xf32>
    %898 = arith.addf %896, %897 : vector<8x32xf32>
    %899 = arith.negf %898 : vector<8x32xf32>
    %900 = math.exp %899 : vector<8x32xf32>
    %cst_263 = arith.constant 1.000000e+00 : f32
    %901 = vector.broadcast %cst_263 : f32 to vector<8x32xf32>
    %902 = arith.addf %901, %900 : vector<8x32xf32>
    %903 = arith.divf %901, %902 : vector<8x32xf32>
    %904 = vector.extract_strided_slice %885 {offsets = [0, 64], sizes = [8, 32], strides = [1, 1]} : vector<8x96xf32> to vector<8x32xf32>
    %905 = vector.extract_strided_slice %887 {offsets = [0, 64], sizes = [8, 32], strides = [1, 1]} : vector<8x96xf32> to vector<8x32xf32>
    %906 = arith.mulf %895, %905 : vector<8x32xf32>
    %907 = arith.addf %904, %906 : vector<8x32xf32>
    %908 = math.tanh %907 : vector<8x32xf32>
    %cst_264 = arith.constant 1.000000e+00 : f32
    %909 = vector.broadcast %cst_264 : f32 to vector<8x32xf32>
    %910 = arith.subf %909, %903 : vector<8x32xf32>
    %911 = arith.mulf %910, %908 : vector<8x32xf32>
    %912 = arith.mulf %903, %829 : vector<8x32xf32>
    %913 = arith.addf %911, %912 : vector<8x32xf32>
    %c0_265 = arith.constant 0 : index
    %c0_266 = arith.constant 0 : index
    %914 = vector.load %arg19[%c0_265, %c0_266] : memref<32x64xf32, #tpu.memory_space<vmem>>, vector<32x64xf32>
    %cst_267 = arith.constant dense<0.000000e+00> : vector<8x64xf32>
    %915 = tpu.matmul %913, %914, %cst_267 {dimension_numbers = #tpu.dot_dimension_numbers<[1], [0], [0], [1], [0, 0, 1, 1], [], []>} : vector<8x32xf32>, vector<32x64xf32>, vector<8x64xf32> -> vector<8x64xf32>
    %916 = vector.extract_strided_slice %915 {offsets = [0, 0], sizes = [8, 32], strides = [1, 1]} : vector<8x64xf32> to vector<8x32xf32>
    %917 = arith.addf %886, %916 : vector<8x32xf32>
    %918 = vector.extract_strided_slice %915 {offsets = [0, 32], sizes = [8, 32], strides = [1, 1]} : vector<8x64xf32> to vector<8x32xf32>
    %c4_268 = arith.constant 4 : index
    %c0_269 = arith.constant 0 : index
    %c0_270 = arith.constant 0 : index
    %919 = vector.load %arg20[%c4_268, %c0_269, %c0_270] : memref<8x8x32xf32, #tpu.memory_space<vmem>>, vector<1x8x32xf32>
    %920 = vector.shape_cast %919 : vector<1x8x32xf32> to vector<8x32xf32>
    %921 = vector.shape_cast %917 : vector<8x32xf32> to vector<1x8x32xf32>
    tpu.vector_store %arg20[%c4_268, %c0_269, %c0_270], %921 {strides = array<i32>} : memref<8x8x32xf32, #tpu.memory_space<vmem>>, vector<1x8x32xf32>,
    %c4_271 = arith.constant 4 : index
    %c0_272 = arith.constant 0 : index
    %c0_273 = arith.constant 0 : index
    %922 = vector.load %arg21[%c4_271, %c0_272, %c0_273] : memref<8x8x8xf32, #tpu.memory_space<vmem>>, vector<1x8x8xf32>
    %923 = vector.shape_cast %922 : vector<1x8x8xf32> to vector<8x8xf32>
    %924 = vector.shape_cast %872 : vector<8x8xf32> to vector<1x8x8xf32>
    tpu.vector_store %arg21[%c4_271, %c0_272, %c0_273], %924 {strides = array<i32>} : memref<8x8x8xf32, #tpu.memory_space<vmem>>, vector<1x8x8xf32>,
    %cst_274 = arith.constant dense<0xFF800000> : vector<8xf32>
    %925 = vector.multi_reduction <maximumf>, %917, %cst_274 [1] : vector<8x32xf32> to vector<8xf32>
    %926 = vector.shape_cast %925 : vector<8xf32> to vector<8x1xf32>
    %927 = vector.broadcast %926 : vector<8x1xf32> to vector<8x32xf32>
    %928 = arith.cmpf oge, %917, %927 : vector<8x32xf32>
    %cst_275 = arith.constant 3.200000e+01 : f32
    %929 = vector.broadcast %cst_275 : f32 to vector<8x32xf32>
    %930 = arith.select %928, %587, %929 : vector<8x32xi1>, vector<8x32xf32>
    %cst_276 = arith.constant dense<0x7F800000> : vector<8xf32>
    %931 = vector.multi_reduction <minimumf>, %930, %cst_276 [1] : vector<8x32xf32> to vector<8xf32>
    %932 = vector.shape_cast %931 : vector<8xf32> to vector<8x1xf32>
    %933 = vector.broadcast %932 : vector<8x1xf32> to vector<8x32xf32>
    %934 = arith.cmpf oeq, %587, %933 : vector<8x32xf32>
    %935 = arith.extui %934 : vector<8x32xi1> to vector<8x32xi32>
    %936 = arith.sitofp %935 : vector<8x32xi32> to vector<8x32xf32>
    %937 = vector.shape_cast %918 : vector<8x32xf32> to vector<1x8x32xf32>
    %938 = vector.broadcast %937 : vector<1x8x32xf32> to vector<8x8x32xf32>
    %939 = arith.addf %572, %938 : vector<8x8x32xf32>
    %940 = math.tanh %939 : vector<8x8x32xf32>
    %941 = vector.shape_cast %584 : vector<1x32xf32> to vector<1x1x32xf32>
    %942 = vector.broadcast %941 : vector<1x1x32xf32> to vector<8x8x32xf32>
    %943 = arith.mulf %940, %942 : vector<8x8x32xf32>
    %cst_277 = arith.constant dense<0.000000e+00> : vector<8x8xf32>
    %944 = vector.multi_reduction <add>, %943, %cst_277 [2] : vector<8x8x32xf32> to vector<8x8xf32>
    %cst_278 = arith.constant -1.000000e+10 : f32
    %945 = vector.broadcast %cst_278 : f32 to vector<8x8xf32>
    %946 = arith.select %14, %944, %945 : vector<8x8xi1>, vector<8x8xf32>
    %cst_279 = arith.constant dense<0xFF800000> : vector<8xf32>
    %947 = vector.multi_reduction <maximumf>, %946, %cst_279 [0] : vector<8x8xf32> to vector<8xf32>
    %948 = vector.shape_cast %947 : vector<8xf32> to vector<1x8xf32>
    %949 = vector.broadcast %948 : vector<1x8xf32> to vector<8x8xf32>
    %950 = arith.subf %946, %949 : vector<8x8xf32>
    %951 = math.exp %950 : vector<8x8xf32>
    %cst_280 = arith.constant dense<0.000000e+00> : vector<8xf32>
    %952 = vector.multi_reduction <add>, %951, %cst_280 [0] : vector<8x8xf32> to vector<8xf32>
    %953 = vector.shape_cast %952 : vector<8xf32> to vector<1x8xf32>
    %954 = tpu.reciprocal %953 {approx = true} : vector<1x8xf32> -> vector<1x8xf32>
    %955 = vector.broadcast %954 : vector<1x8xf32> to vector<8x8xf32>
    %956 = arith.mulf %951, %955 : vector<8x8xf32>
    %957 = vector.shape_cast %956 : vector<8x8xf32> to vector<8x8x1xf32>
    %958 = vector.broadcast %957 : vector<8x8x1xf32> to vector<8x8x64xf32>
    %959 = arith.mulf %958, %565 : vector<8x8x64xf32>
    %cst_281 = arith.constant dense<0.000000e+00> : vector<8x64xf32>
    %960 = vector.multi_reduction <add>, %959, %cst_281 [0] : vector<8x8x64xf32> to vector<8x64xf32>
    %c0_282 = arith.constant 0 : index
    %c0_283 = arith.constant 0 : index
    %961 = vector.load %arg23[%c0_282, %c0_283] : memref<8x128xf32, #tpu.memory_space<vmem>>, vector<8x32xf32>
    tpu.vector_store %arg23[%c0_282, %c0_283], %936 {strides = array<i32>} : memref<8x128xf32, #tpu.memory_space<vmem>>, vector<8x32xf32>,
    %c0_284 = arith.constant 0 : index
    %c32_285 = arith.constant 32 : index
    %962 = vector.load %arg23[%c0_284, %c32_285] : memref<8x128xf32, #tpu.memory_space<vmem>>, vector<8x64xf32>
    tpu.vector_store %arg23[%c0_284, %c32_285], %960 {strides = array<i32>} : memref<8x128xf32, #tpu.memory_space<vmem>>, vector<8x64xf32>,
    %c0_286 = arith.constant 0 : index
    %c96_287 = arith.constant 96 : index
    %963 = vector.load %arg23[%c0_286, %c96_287] : memref<8x128xf32, #tpu.memory_space<vmem>>, vector<8x32xf32>
    tpu.vector_store %arg23[%c0_286, %c96_287], %913 {strides = array<i32>} : memref<8x128xf32, #tpu.memory_space<vmem>>, vector<8x32xf32>,
    %c0_288 = arith.constant 0 : index
    %c0_289 = arith.constant 0 : index
    %964 = vector.load %arg23[%c0_288, %c0_289] : memref<8x128xf32, #tpu.memory_space<vmem>>, vector<8x128xf32>
    %c0_290 = arith.constant 0 : index
    %c0_291 = arith.constant 0 : index
    %965 = vector.load %arg17[%c0_290, %c0_291] : memref<128x224xf32, #tpu.memory_space<vmem>>, vector<128x224xf32>
    %cst_292 = arith.constant dense<0.000000e+00> : vector<8x224xf32>
    %966 = tpu.matmul %964, %965, %cst_292 {dimension_numbers = #tpu.dot_dimension_numbers<[1], [0], [0], [1], [0, 0, 1, 1], [], []>} : vector<8x128xf32>, vector<128x224xf32>, vector<8x224xf32> -> vector<8x224xf32>
    %967 = vector.broadcast %585 : vector<1x224xf32> to vector<8x224xf32>
    %968 = arith.addf %966, %967 : vector<8x224xf32>
    %969 = vector.extract_strided_slice %968 {offsets = [0, 0], sizes = [8, 96], strides = [1, 1]} : vector<8x224xf32> to vector<8x96xf32>
    %970 = vector.extract_strided_slice %968 {offsets = [0, 96], sizes = [8, 32], strides = [1, 1]} : vector<8x224xf32> to vector<8x32xf32>
    %971 = vector.extract_strided_slice %968 {offsets = [0, 128], sizes = [8, 96], strides = [1, 1]} : vector<8x224xf32> to vector<8x96xf32>
    %972 = vector.extract_strided_slice %969 {offsets = [0, 0], sizes = [8, 32], strides = [1, 1]} : vector<8x96xf32> to vector<8x32xf32>
    %973 = vector.extract_strided_slice %971 {offsets = [0, 0], sizes = [8, 32], strides = [1, 1]} : vector<8x96xf32> to vector<8x32xf32>
    %974 = arith.addf %972, %973 : vector<8x32xf32>
    %975 = arith.negf %974 : vector<8x32xf32>
    %976 = math.exp %975 : vector<8x32xf32>
    %cst_293 = arith.constant 1.000000e+00 : f32
    %977 = vector.broadcast %cst_293 : f32 to vector<8x32xf32>
    %978 = arith.addf %977, %976 : vector<8x32xf32>
    %979 = arith.divf %977, %978 : vector<8x32xf32>
    %980 = vector.extract_strided_slice %969 {offsets = [0, 32], sizes = [8, 32], strides = [1, 1]} : vector<8x96xf32> to vector<8x32xf32>
    %981 = vector.extract_strided_slice %971 {offsets = [0, 32], sizes = [8, 32], strides = [1, 1]} : vector<8x96xf32> to vector<8x32xf32>
    %982 = arith.addf %980, %981 : vector<8x32xf32>
    %983 = arith.negf %982 : vector<8x32xf32>
    %984 = math.exp %983 : vector<8x32xf32>
    %cst_294 = arith.constant 1.000000e+00 : f32
    %985 = vector.broadcast %cst_294 : f32 to vector<8x32xf32>
    %986 = arith.addf %985, %984 : vector<8x32xf32>
    %987 = arith.divf %985, %986 : vector<8x32xf32>
    %988 = vector.extract_strided_slice %969 {offsets = [0, 64], sizes = [8, 32], strides = [1, 1]} : vector<8x96xf32> to vector<8x32xf32>
    %989 = vector.extract_strided_slice %971 {offsets = [0, 64], sizes = [8, 32], strides = [1, 1]} : vector<8x96xf32> to vector<8x32xf32>
    %990 = arith.mulf %979, %989 : vector<8x32xf32>
    %991 = arith.addf %988, %990 : vector<8x32xf32>
    %992 = math.tanh %991 : vector<8x32xf32>
    %cst_295 = arith.constant 1.000000e+00 : f32
    %993 = vector.broadcast %cst_295 : f32 to vector<8x32xf32>
    %994 = arith.subf %993, %987 : vector<8x32xf32>
    %995 = arith.mulf %994, %992 : vector<8x32xf32>
    %996 = arith.mulf %987, %913 : vector<8x32xf32>
    %997 = arith.addf %995, %996 : vector<8x32xf32>
    %c0_296 = arith.constant 0 : index
    %c0_297 = arith.constant 0 : index
    %998 = vector.load %arg19[%c0_296, %c0_297] : memref<32x64xf32, #tpu.memory_space<vmem>>, vector<32x64xf32>
    %cst_298 = arith.constant dense<0.000000e+00> : vector<8x64xf32>
    %999 = tpu.matmul %997, %998, %cst_298 {dimension_numbers = #tpu.dot_dimension_numbers<[1], [0], [0], [1], [0, 0, 1, 1], [], []>} : vector<8x32xf32>, vector<32x64xf32>, vector<8x64xf32> -> vector<8x64xf32>
    %1000 = vector.extract_strided_slice %999 {offsets = [0, 0], sizes = [8, 32], strides = [1, 1]} : vector<8x64xf32> to vector<8x32xf32>
    %1001 = arith.addf %970, %1000 : vector<8x32xf32>
    %1002 = vector.extract_strided_slice %999 {offsets = [0, 32], sizes = [8, 32], strides = [1, 1]} : vector<8x64xf32> to vector<8x32xf32>
    %c5_299 = arith.constant 5 : index
    %c0_300 = arith.constant 0 : index
    %c0_301 = arith.constant 0 : index
    %1003 = vector.load %arg20[%c5_299, %c0_300, %c0_301] : memref<8x8x32xf32, #tpu.memory_space<vmem>>, vector<1x8x32xf32>
    %1004 = vector.shape_cast %1003 : vector<1x8x32xf32> to vector<8x32xf32>
    %1005 = vector.shape_cast %1001 : vector<8x32xf32> to vector<1x8x32xf32>
    tpu.vector_store %arg20[%c5_299, %c0_300, %c0_301], %1005 {strides = array<i32>} : memref<8x8x32xf32, #tpu.memory_space<vmem>>, vector<1x8x32xf32>,
    %c5_302 = arith.constant 5 : index
    %c0_303 = arith.constant 0 : index
    %c0_304 = arith.constant 0 : index
    %1006 = vector.load %arg21[%c5_302, %c0_303, %c0_304] : memref<8x8x8xf32, #tpu.memory_space<vmem>>, vector<1x8x8xf32>
    %1007 = vector.shape_cast %1006 : vector<1x8x8xf32> to vector<8x8xf32>
    %1008 = vector.shape_cast %956 : vector<8x8xf32> to vector<1x8x8xf32>
    tpu.vector_store %arg21[%c5_302, %c0_303, %c0_304], %1008 {strides = array<i32>} : memref<8x8x8xf32, #tpu.memory_space<vmem>>, vector<1x8x8xf32>,
    %cst_305 = arith.constant dense<0xFF800000> : vector<8xf32>
    %1009 = vector.multi_reduction <maximumf>, %1001, %cst_305 [1] : vector<8x32xf32> to vector<8xf32>
    %1010 = vector.shape_cast %1009 : vector<8xf32> to vector<8x1xf32>
    %1011 = vector.broadcast %1010 : vector<8x1xf32> to vector<8x32xf32>
    %1012 = arith.cmpf oge, %1001, %1011 : vector<8x32xf32>
    %cst_306 = arith.constant 3.200000e+01 : f32
    %1013 = vector.broadcast %cst_306 : f32 to vector<8x32xf32>
    %1014 = arith.select %1012, %587, %1013 : vector<8x32xi1>, vector<8x32xf32>
    %cst_307 = arith.constant dense<0x7F800000> : vector<8xf32>
    %1015 = vector.multi_reduction <minimumf>, %1014, %cst_307 [1] : vector<8x32xf32> to vector<8xf32>
    %1016 = vector.shape_cast %1015 : vector<8xf32> to vector<8x1xf32>
    %1017 = vector.broadcast %1016 : vector<8x1xf32> to vector<8x32xf32>
    %1018 = arith.cmpf oeq, %587, %1017 : vector<8x32xf32>
    %1019 = arith.extui %1018 : vector<8x32xi1> to vector<8x32xi32>
    %1020 = arith.sitofp %1019 : vector<8x32xi32> to vector<8x32xf32>
    %1021 = vector.shape_cast %1002 : vector<8x32xf32> to vector<1x8x32xf32>
    %1022 = vector.broadcast %1021 : vector<1x8x32xf32> to vector<8x8x32xf32>
    %1023 = arith.addf %572, %1022 : vector<8x8x32xf32>
    %1024 = math.tanh %1023 : vector<8x8x32xf32>
    %1025 = vector.shape_cast %584 : vector<1x32xf32> to vector<1x1x32xf32>
    %1026 = vector.broadcast %1025 : vector<1x1x32xf32> to vector<8x8x32xf32>
    %1027 = arith.mulf %1024, %1026 : vector<8x8x32xf32>
    %cst_308 = arith.constant dense<0.000000e+00> : vector<8x8xf32>
    %1028 = vector.multi_reduction <add>, %1027, %cst_308 [2] : vector<8x8x32xf32> to vector<8x8xf32>
    %cst_309 = arith.constant -1.000000e+10 : f32
    %1029 = vector.broadcast %cst_309 : f32 to vector<8x8xf32>
    %1030 = arith.select %14, %1028, %1029 : vector<8x8xi1>, vector<8x8xf32>
    %cst_310 = arith.constant dense<0xFF800000> : vector<8xf32>
    %1031 = vector.multi_reduction <maximumf>, %1030, %cst_310 [0] : vector<8x8xf32> to vector<8xf32>
    %1032 = vector.shape_cast %1031 : vector<8xf32> to vector<1x8xf32>
    %1033 = vector.broadcast %1032 : vector<1x8xf32> to vector<8x8xf32>
    %1034 = arith.subf %1030, %1033 : vector<8x8xf32>
    %1035 = math.exp %1034 : vector<8x8xf32>
    %cst_311 = arith.constant dense<0.000000e+00> : vector<8xf32>
    %1036 = vector.multi_reduction <add>, %1035, %cst_311 [0] : vector<8x8xf32> to vector<8xf32>
    %1037 = vector.shape_cast %1036 : vector<8xf32> to vector<1x8xf32>
    %1038 = tpu.reciprocal %1037 {approx = true} : vector<1x8xf32> -> vector<1x8xf32>
    %1039 = vector.broadcast %1038 : vector<1x8xf32> to vector<8x8xf32>
    %1040 = arith.mulf %1035, %1039 : vector<8x8xf32>
    %1041 = vector.shape_cast %1040 : vector<8x8xf32> to vector<8x8x1xf32>
    %1042 = vector.broadcast %1041 : vector<8x8x1xf32> to vector<8x8x64xf32>
    %1043 = arith.mulf %1042, %565 : vector<8x8x64xf32>
    %cst_312 = arith.constant dense<0.000000e+00> : vector<8x64xf32>
    %1044 = vector.multi_reduction <add>, %1043, %cst_312 [0] : vector<8x8x64xf32> to vector<8x64xf32>
    %c0_313 = arith.constant 0 : index
    %c0_314 = arith.constant 0 : index
    %1045 = vector.load %arg23[%c0_313, %c0_314] : memref<8x128xf32, #tpu.memory_space<vmem>>, vector<8x32xf32>
    tpu.vector_store %arg23[%c0_313, %c0_314], %1020 {strides = array<i32>} : memref<8x128xf32, #tpu.memory_space<vmem>>, vector<8x32xf32>,
    %c0_315 = arith.constant 0 : index
    %c32_316 = arith.constant 32 : index
    %1046 = vector.load %arg23[%c0_315, %c32_316] : memref<8x128xf32, #tpu.memory_space<vmem>>, vector<8x64xf32>
    tpu.vector_store %arg23[%c0_315, %c32_316], %1044 {strides = array<i32>} : memref<8x128xf32, #tpu.memory_space<vmem>>, vector<8x64xf32>,
    %c0_317 = arith.constant 0 : index
    %c96_318 = arith.constant 96 : index
    %1047 = vector.load %arg23[%c0_317, %c96_318] : memref<8x128xf32, #tpu.memory_space<vmem>>, vector<8x32xf32>
    tpu.vector_store %arg23[%c0_317, %c96_318], %997 {strides = array<i32>} : memref<8x128xf32, #tpu.memory_space<vmem>>, vector<8x32xf32>,
    %c0_319 = arith.constant 0 : index
    %c0_320 = arith.constant 0 : index
    %1048 = vector.load %arg23[%c0_319, %c0_320] : memref<8x128xf32, #tpu.memory_space<vmem>>, vector<8x128xf32>
    %c0_321 = arith.constant 0 : index
    %c0_322 = arith.constant 0 : index
    %1049 = vector.load %arg17[%c0_321, %c0_322] : memref<128x224xf32, #tpu.memory_space<vmem>>, vector<128x224xf32>
    %cst_323 = arith.constant dense<0.000000e+00> : vector<8x224xf32>
    %1050 = tpu.matmul %1048, %1049, %cst_323 {dimension_numbers = #tpu.dot_dimension_numbers<[1], [0], [0], [1], [0, 0, 1, 1], [], []>} : vector<8x128xf32>, vector<128x224xf32>, vector<8x224xf32> -> vector<8x224xf32>
    %1051 = vector.broadcast %585 : vector<1x224xf32> to vector<8x224xf32>
    %1052 = arith.addf %1050, %1051 : vector<8x224xf32>
    %1053 = vector.extract_strided_slice %1052 {offsets = [0, 0], sizes = [8, 96], strides = [1, 1]} : vector<8x224xf32> to vector<8x96xf32>
    %1054 = vector.extract_strided_slice %1052 {offsets = [0, 96], sizes = [8, 32], strides = [1, 1]} : vector<8x224xf32> to vector<8x32xf32>
    %1055 = vector.extract_strided_slice %1052 {offsets = [0, 128], sizes = [8, 96], strides = [1, 1]} : vector<8x224xf32> to vector<8x96xf32>
    %1056 = vector.extract_strided_slice %1053 {offsets = [0, 0], sizes = [8, 32], strides = [1, 1]} : vector<8x96xf32> to vector<8x32xf32>
    %1057 = vector.extract_strided_slice %1055 {offsets = [0, 0], sizes = [8, 32], strides = [1, 1]} : vector<8x96xf32> to vector<8x32xf32>
    %1058 = arith.addf %1056, %1057 : vector<8x32xf32>
    %1059 = arith.negf %1058 : vector<8x32xf32>
    %1060 = math.exp %1059 : vector<8x32xf32>
    %cst_324 = arith.constant 1.000000e+00 : f32
    %1061 = vector.broadcast %cst_324 : f32 to vector<8x32xf32>
    %1062 = arith.addf %1061, %1060 : vector<8x32xf32>
    %1063 = arith.divf %1061, %1062 : vector<8x32xf32>
    %1064 = vector.extract_strided_slice %1053 {offsets = [0, 32], sizes = [8, 32], strides = [1, 1]} : vector<8x96xf32> to vector<8x32xf32>
    %1065 = vector.extract_strided_slice %1055 {offsets = [0, 32], sizes = [8, 32], strides = [1, 1]} : vector<8x96xf32> to vector<8x32xf32>
    %1066 = arith.addf %1064, %1065 : vector<8x32xf32>
    %1067 = arith.negf %1066 : vector<8x32xf32>
    %1068 = math.exp %1067 : vector<8x32xf32>
    %cst_325 = arith.constant 1.000000e+00 : f32
    %1069 = vector.broadcast %cst_325 : f32 to vector<8x32xf32>
    %1070 = arith.addf %1069, %1068 : vector<8x32xf32>
    %1071 = arith.divf %1069, %1070 : vector<8x32xf32>
    %1072 = vector.extract_strided_slice %1053 {offsets = [0, 64], sizes = [8, 32], strides = [1, 1]} : vector<8x96xf32> to vector<8x32xf32>
    %1073 = vector.extract_strided_slice %1055 {offsets = [0, 64], sizes = [8, 32], strides = [1, 1]} : vector<8x96xf32> to vector<8x32xf32>
    %1074 = arith.mulf %1063, %1073 : vector<8x32xf32>
    %1075 = arith.addf %1072, %1074 : vector<8x32xf32>
    %1076 = math.tanh %1075 : vector<8x32xf32>
    %cst_326 = arith.constant 1.000000e+00 : f32
    %1077 = vector.broadcast %cst_326 : f32 to vector<8x32xf32>
    %1078 = arith.subf %1077, %1071 : vector<8x32xf32>
    %1079 = arith.mulf %1078, %1076 : vector<8x32xf32>
    %1080 = arith.mulf %1071, %997 : vector<8x32xf32>
    %1081 = arith.addf %1079, %1080 : vector<8x32xf32>
    %c0_327 = arith.constant 0 : index
    %c0_328 = arith.constant 0 : index
    %1082 = vector.load %arg19[%c0_327, %c0_328] : memref<32x64xf32, #tpu.memory_space<vmem>>, vector<32x64xf32>
    %cst_329 = arith.constant dense<0.000000e+00> : vector<8x64xf32>
    %1083 = tpu.matmul %1081, %1082, %cst_329 {dimension_numbers = #tpu.dot_dimension_numbers<[1], [0], [0], [1], [0, 0, 1, 1], [], []>} : vector<8x32xf32>, vector<32x64xf32>, vector<8x64xf32> -> vector<8x64xf32>
    %1084 = vector.extract_strided_slice %1083 {offsets = [0, 0], sizes = [8, 32], strides = [1, 1]} : vector<8x64xf32> to vector<8x32xf32>
    %1085 = arith.addf %1054, %1084 : vector<8x32xf32>
    %1086 = vector.extract_strided_slice %1083 {offsets = [0, 32], sizes = [8, 32], strides = [1, 1]} : vector<8x64xf32> to vector<8x32xf32>
    %c6_330 = arith.constant 6 : index
    %c0_331 = arith.constant 0 : index
    %c0_332 = arith.constant 0 : index
    %1087 = vector.load %arg20[%c6_330, %c0_331, %c0_332] : memref<8x8x32xf32, #tpu.memory_space<vmem>>, vector<1x8x32xf32>
    %1088 = vector.shape_cast %1087 : vector<1x8x32xf32> to vector<8x32xf32>
    %1089 = vector.shape_cast %1085 : vector<8x32xf32> to vector<1x8x32xf32>
    tpu.vector_store %arg20[%c6_330, %c0_331, %c0_332], %1089 {strides = array<i32>} : memref<8x8x32xf32, #tpu.memory_space<vmem>>, vector<1x8x32xf32>,
    %c6_333 = arith.constant 6 : index
    %c0_334 = arith.constant 0 : index
    %c0_335 = arith.constant 0 : index
    %1090 = vector.load %arg21[%c6_333, %c0_334, %c0_335] : memref<8x8x8xf32, #tpu.memory_space<vmem>>, vector<1x8x8xf32>
    %1091 = vector.shape_cast %1090 : vector<1x8x8xf32> to vector<8x8xf32>
    %1092 = vector.shape_cast %1040 : vector<8x8xf32> to vector<1x8x8xf32>
    tpu.vector_store %arg21[%c6_333, %c0_334, %c0_335], %1092 {strides = array<i32>} : memref<8x8x8xf32, #tpu.memory_space<vmem>>, vector<1x8x8xf32>,
    %cst_336 = arith.constant dense<0xFF800000> : vector<8xf32>
    %1093 = vector.multi_reduction <maximumf>, %1085, %cst_336 [1] : vector<8x32xf32> to vector<8xf32>
    %1094 = vector.shape_cast %1093 : vector<8xf32> to vector<8x1xf32>
    %1095 = vector.broadcast %1094 : vector<8x1xf32> to vector<8x32xf32>
    %1096 = arith.cmpf oge, %1085, %1095 : vector<8x32xf32>
    %cst_337 = arith.constant 3.200000e+01 : f32
    %1097 = vector.broadcast %cst_337 : f32 to vector<8x32xf32>
    %1098 = arith.select %1096, %587, %1097 : vector<8x32xi1>, vector<8x32xf32>
    %cst_338 = arith.constant dense<0x7F800000> : vector<8xf32>
    %1099 = vector.multi_reduction <minimumf>, %1098, %cst_338 [1] : vector<8x32xf32> to vector<8xf32>
    %1100 = vector.shape_cast %1099 : vector<8xf32> to vector<8x1xf32>
    %1101 = vector.broadcast %1100 : vector<8x1xf32> to vector<8x32xf32>
    %1102 = arith.cmpf oeq, %587, %1101 : vector<8x32xf32>
    %1103 = arith.extui %1102 : vector<8x32xi1> to vector<8x32xi32>
    %1104 = arith.sitofp %1103 : vector<8x32xi32> to vector<8x32xf32>
    %1105 = vector.shape_cast %1086 : vector<8x32xf32> to vector<1x8x32xf32>
    %1106 = vector.broadcast %1105 : vector<1x8x32xf32> to vector<8x8x32xf32>
    %1107 = arith.addf %572, %1106 : vector<8x8x32xf32>
    %1108 = math.tanh %1107 : vector<8x8x32xf32>
    %1109 = vector.shape_cast %584 : vector<1x32xf32> to vector<1x1x32xf32>
    %1110 = vector.broadcast %1109 : vector<1x1x32xf32> to vector<8x8x32xf32>
    %1111 = arith.mulf %1108, %1110 : vector<8x8x32xf32>
    %cst_339 = arith.constant dense<0.000000e+00> : vector<8x8xf32>
    %1112 = vector.multi_reduction <add>, %1111, %cst_339 [2] : vector<8x8x32xf32> to vector<8x8xf32>
    %cst_340 = arith.constant -1.000000e+10 : f32
    %1113 = vector.broadcast %cst_340 : f32 to vector<8x8xf32>
    %1114 = arith.select %14, %1112, %1113 : vector<8x8xi1>, vector<8x8xf32>
    %cst_341 = arith.constant dense<0xFF800000> : vector<8xf32>
    %1115 = vector.multi_reduction <maximumf>, %1114, %cst_341 [0] : vector<8x8xf32> to vector<8xf32>
    %1116 = vector.shape_cast %1115 : vector<8xf32> to vector<1x8xf32>
    %1117 = vector.broadcast %1116 : vector<1x8xf32> to vector<8x8xf32>
    %1118 = arith.subf %1114, %1117 : vector<8x8xf32>
    %1119 = math.exp %1118 : vector<8x8xf32>
    %cst_342 = arith.constant dense<0.000000e+00> : vector<8xf32>
    %1120 = vector.multi_reduction <add>, %1119, %cst_342 [0] : vector<8x8xf32> to vector<8xf32>
    %1121 = vector.shape_cast %1120 : vector<8xf32> to vector<1x8xf32>
    %1122 = tpu.reciprocal %1121 {approx = true} : vector<1x8xf32> -> vector<1x8xf32>
    %1123 = vector.broadcast %1122 : vector<1x8xf32> to vector<8x8xf32>
    %1124 = arith.mulf %1119, %1123 : vector<8x8xf32>
    %1125 = vector.shape_cast %1124 : vector<8x8xf32> to vector<8x8x1xf32>
    %1126 = vector.broadcast %1125 : vector<8x8x1xf32> to vector<8x8x64xf32>
    %1127 = arith.mulf %1126, %565 : vector<8x8x64xf32>
    %cst_343 = arith.constant dense<0.000000e+00> : vector<8x64xf32>
    %1128 = vector.multi_reduction <add>, %1127, %cst_343 [0] : vector<8x8x64xf32> to vector<8x64xf32>
    %c0_344 = arith.constant 0 : index
    %c0_345 = arith.constant 0 : index
    %1129 = vector.load %arg23[%c0_344, %c0_345] : memref<8x128xf32, #tpu.memory_space<vmem>>, vector<8x32xf32>
    tpu.vector_store %arg23[%c0_344, %c0_345], %1104 {strides = array<i32>} : memref<8x128xf32, #tpu.memory_space<vmem>>, vector<8x32xf32>,
    %c0_346 = arith.constant 0 : index
    %c32_347 = arith.constant 32 : index
    %1130 = vector.load %arg23[%c0_346, %c32_347] : memref<8x128xf32, #tpu.memory_space<vmem>>, vector<8x64xf32>
    tpu.vector_store %arg23[%c0_346, %c32_347], %1128 {strides = array<i32>} : memref<8x128xf32, #tpu.memory_space<vmem>>, vector<8x64xf32>,
    %c0_348 = arith.constant 0 : index
    %c96_349 = arith.constant 96 : index
    %1131 = vector.load %arg23[%c0_348, %c96_349] : memref<8x128xf32, #tpu.memory_space<vmem>>, vector<8x32xf32>
    tpu.vector_store %arg23[%c0_348, %c96_349], %1081 {strides = array<i32>} : memref<8x128xf32, #tpu.memory_space<vmem>>, vector<8x32xf32>,
    %c0_350 = arith.constant 0 : index
    %c0_351 = arith.constant 0 : index
    %1132 = vector.load %arg23[%c0_350, %c0_351] : memref<8x128xf32, #tpu.memory_space<vmem>>, vector<8x128xf32>
    %c0_352 = arith.constant 0 : index
    %c0_353 = arith.constant 0 : index
    %1133 = vector.load %arg17[%c0_352, %c0_353] : memref<128x224xf32, #tpu.memory_space<vmem>>, vector<128x224xf32>
    %cst_354 = arith.constant dense<0.000000e+00> : vector<8x224xf32>
    %1134 = tpu.matmul %1132, %1133, %cst_354 {dimension_numbers = #tpu.dot_dimension_numbers<[1], [0], [0], [1], [0, 0, 1, 1], [], []>} : vector<8x128xf32>, vector<128x224xf32>, vector<8x224xf32> -> vector<8x224xf32>
    %1135 = vector.broadcast %585 : vector<1x224xf32> to vector<8x224xf32>
    %1136 = arith.addf %1134, %1135 : vector<8x224xf32>
    %1137 = vector.extract_strided_slice %1136 {offsets = [0, 0], sizes = [8, 96], strides = [1, 1]} : vector<8x224xf32> to vector<8x96xf32>
    %1138 = vector.extract_strided_slice %1136 {offsets = [0, 96], sizes = [8, 32], strides = [1, 1]} : vector<8x224xf32> to vector<8x32xf32>
    %1139 = vector.extract_strided_slice %1136 {offsets = [0, 128], sizes = [8, 96], strides = [1, 1]} : vector<8x224xf32> to vector<8x96xf32>
    %1140 = vector.extract_strided_slice %1137 {offsets = [0, 0], sizes = [8, 32], strides = [1, 1]} : vector<8x96xf32> to vector<8x32xf32>
    %1141 = vector.extract_strided_slice %1139 {offsets = [0, 0], sizes = [8, 32], strides = [1, 1]} : vector<8x96xf32> to vector<8x32xf32>
    %1142 = arith.addf %1140, %1141 : vector<8x32xf32>
    %1143 = arith.negf %1142 : vector<8x32xf32>
    %1144 = math.exp %1143 : vector<8x32xf32>
    %cst_355 = arith.constant 1.000000e+00 : f32
    %1145 = vector.broadcast %cst_355 : f32 to vector<8x32xf32>
    %1146 = arith.addf %1145, %1144 : vector<8x32xf32>
    %1147 = arith.divf %1145, %1146 : vector<8x32xf32>
    %1148 = vector.extract_strided_slice %1137 {offsets = [0, 32], sizes = [8, 32], strides = [1, 1]} : vector<8x96xf32> to vector<8x32xf32>
    %1149 = vector.extract_strided_slice %1139 {offsets = [0, 32], sizes = [8, 32], strides = [1, 1]} : vector<8x96xf32> to vector<8x32xf32>
    %1150 = arith.addf %1148, %1149 : vector<8x32xf32>
    %1151 = arith.negf %1150 : vector<8x32xf32>
    %1152 = math.exp %1151 : vector<8x32xf32>
    %cst_356 = arith.constant 1.000000e+00 : f32
    %1153 = vector.broadcast %cst_356 : f32 to vector<8x32xf32>
    %1154 = arith.addf %1153, %1152 : vector<8x32xf32>
    %1155 = arith.divf %1153, %1154 : vector<8x32xf32>
    %1156 = vector.extract_strided_slice %1137 {offsets = [0, 64], sizes = [8, 32], strides = [1, 1]} : vector<8x96xf32> to vector<8x32xf32>
    %1157 = vector.extract_strided_slice %1139 {offsets = [0, 64], sizes = [8, 32], strides = [1, 1]} : vector<8x96xf32> to vector<8x32xf32>
    %1158 = arith.mulf %1147, %1157 : vector<8x32xf32>
    %1159 = arith.addf %1156, %1158 : vector<8x32xf32>
    %1160 = math.tanh %1159 : vector<8x32xf32>
    %cst_357 = arith.constant 1.000000e+00 : f32
    %1161 = vector.broadcast %cst_357 : f32 to vector<8x32xf32>
    %1162 = arith.subf %1161, %1155 : vector<8x32xf32>
    %1163 = arith.mulf %1162, %1160 : vector<8x32xf32>
    %1164 = arith.mulf %1155, %1081 : vector<8x32xf32>
    %1165 = arith.addf %1163, %1164 : vector<8x32xf32>
    %c0_358 = arith.constant 0 : index
    %c0_359 = arith.constant 0 : index
    %1166 = vector.load %arg19[%c0_358, %c0_359] : memref<32x64xf32, #tpu.memory_space<vmem>>, vector<32x64xf32>
    %cst_360 = arith.constant dense<0.000000e+00> : vector<8x64xf32>
    %1167 = tpu.matmul %1165, %1166, %cst_360 {dimension_numbers = #tpu.dot_dimension_numbers<[1], [0], [0], [1], [0, 0, 1, 1], [], []>} : vector<8x32xf32>, vector<32x64xf32>, vector<8x64xf32> -> vector<8x64xf32>
    %1168 = vector.extract_strided_slice %1167 {offsets = [0, 0], sizes = [8, 32], strides = [1, 1]} : vector<8x64xf32> to vector<8x32xf32>
    %1169 = arith.addf %1138, %1168 : vector<8x32xf32>
    %c7_361 = arith.constant 7 : index
    %c0_362 = arith.constant 0 : index
    %c0_363 = arith.constant 0 : index
    %1170 = vector.load %arg20[%c7_361, %c0_362, %c0_363] : memref<8x8x32xf32, #tpu.memory_space<vmem>>, vector<1x8x32xf32>
    %1171 = vector.shape_cast %1170 : vector<1x8x32xf32> to vector<8x32xf32>
    %1172 = vector.shape_cast %1169 : vector<8x32xf32> to vector<1x8x32xf32>
    tpu.vector_store %arg20[%c7_361, %c0_362, %c0_363], %1172 {strides = array<i32>} : memref<8x8x32xf32, #tpu.memory_space<vmem>>, vector<1x8x32xf32>,
    %c7_364 = arith.constant 7 : index
    %c0_365 = arith.constant 0 : index
    %c0_366 = arith.constant 0 : index
    %1173 = vector.load %arg21[%c7_364, %c0_365, %c0_366] : memref<8x8x8xf32, #tpu.memory_space<vmem>>, vector<1x8x8xf32>
    %1174 = vector.shape_cast %1173 : vector<1x8x8xf32> to vector<8x8xf32>
    %1175 = vector.shape_cast %1124 : vector<8x8xf32> to vector<1x8x8xf32>
    tpu.vector_store %arg21[%c7_364, %c0_365, %c0_366], %1175 {strides = array<i32>} : memref<8x8x8xf32, #tpu.memory_space<vmem>>, vector<1x8x8xf32>,
    return
  }
  func.func @transform_0(%arg0: i32) -> (i32, i32) {
    %c0_i32 = arith.constant 0 : i32
    %c0_i32_0 = arith.constant 0 : i32
    %c0_i32_1 = arith.constant 0 : i32
    return %c0_i32, %c0_i32_0 : i32, i32
  }
  func.func @transform_1(%arg0: i32) -> (i32, i32) {
    %c0_i32 = arith.constant 0 : i32
    %c0_i32_0 = arith.constant 0 : i32
    %c0_i32_1 = arith.constant 0 : i32
    return %c0_i32, %c0_i32_0 : i32, i32
  }
  func.func @transform_2(%arg0: i32) -> (i32, i32) {
    %c0_i32 = arith.constant 0 : i32
    %c0_i32_0 = arith.constant 0 : i32
    %c0_i32_1 = arith.constant 0 : i32
    return %c0_i32, %c0_i32_0 : i32, i32
  }
  func.func @transform_3(%arg0: i32) -> (i32, i32) {
    %c0_i32 = arith.constant 0 : i32
    %c0_i32_0 = arith.constant 0 : i32
    %c0_i32_1 = arith.constant 0 : i32
    return %c0_i32, %c0_i32_0 : i32, i32
  }
  func.func @transform_4(%arg0: i32) -> (i32, i32) {
    %c0_i32 = arith.constant 0 : i32
    %c0_i32_0 = arith.constant 0 : i32
    %c0_i32_1 = arith.constant 0 : i32
    return %c0_i32, %c0_i32_0 : i32, i32
  }
  func.func @transform_5(%arg0: i32) -> (i32, i32) {
    %c0_i32 = arith.constant 0 : i32
    %c0_i32_0 = arith.constant 0 : i32
    %c0_i32_1 = arith.constant 0 : i32
    return %c0_i32, %c0_i32_0 : i32, i32
  }
  func.func @transform_6(%arg0: i32) -> (i32, i32) {
    %c0_i32 = arith.constant 0 : i32
    %c0_i32_0 = arith.constant 0 : i32
    %c0_i32_1 = arith.constant 0 : i32
    return %c0_i32, %c0_i32_0 : i32, i32
  }
  func.func @transform_7(%arg0: i32) -> (i32, i32) {
    %c0_i32 = arith.constant 0 : i32
    %c0_i32_0 = arith.constant 0 : i32
    %c0_i32_1 = arith.constant 0 : i32
    return %c0_i32, %c0_i32_0 : i32, i32
  }
  func.func @transform_8(%arg0: i32) -> (i32, i32) {
    %c0_i32 = arith.constant 0 : i32
    %c0_i32_0 = arith.constant 0 : i32
    %c0_i32_1 = arith.constant 0 : i32
    return %c0_i32, %c0_i32_0 : i32, i32
  }
  func.func @transform_9(%arg0: i32) -> (i32, i32) {
    %c0_i32 = arith.constant 0 : i32
    %c0_i32_0 = arith.constant 0 : i32
    %c0_i32_1 = arith.constant 0 : i32
    return %c0_i32, %c0_i32_0 : i32, i32
  }
  func.func @transform_10(%arg0: i32) -> (i32, i32) {
    %c0_i32 = arith.constant 0 : i32
    %c0_i32_0 = arith.constant 0 : i32
    %c0_i32_1 = arith.constant 0 : i32
    return %c0_i32, %c0_i32_0 : i32, i32
  }
  func.func @transform_11(%arg0: i32) -> (i32, i32) {
    %c0_i32 = arith.constant 0 : i32
    %c0_i32_0 = arith.constant 0 : i32
    %c0_i32_1 = arith.constant 0 : i32
    return %c0_i32, %c0_i32_0 : i32, i32
  }
  func.func @transform_12(%arg0: i32) -> (i32, i32) {
    %c0_i32 = arith.constant 0 : i32
    %c0_i32_0 = arith.constant 0 : i32
    %c0_i32_1 = arith.constant 0 : i32
    return %c0_i32, %c0_i32_0 : i32, i32
  }
  func.func @transform_13(%arg0: i32) -> (i32, i32) {
    %c0_i32 = arith.constant 0 : i32
    %c0_i32_0 = arith.constant 0 : i32
    %c0_i32_1 = arith.constant 0 : i32
    return %c0_i32, %c0_i32_0 : i32, i32
  }
  func.func @transform_14(%arg0: i32) -> (i32, i32) {
    %c0_i32 = arith.constant 0 : i32
    %c0_i32_0 = arith.constant 0 : i32
    %c0_i32_1 = arith.constant 0 : i32
    return %c0_i32, %c0_i32_0 : i32, i32
  }
  func.func @transform_15(%arg0: i32) -> (i32, i32) {
    %c0_i32 = arith.constant 0 : i32
    %c0_i32_0 = arith.constant 0 : i32
    %c0_i32_1 = arith.constant 0 : i32
    return %c0_i32, %c0_i32_0 : i32, i32
  }
  func.func @transform_16(%arg0: i32) -> (i32, i32) {
    %c0_i32 = arith.constant 0 : i32
    %c0_i32_0 = arith.constant 0 : i32
    %c0_i32_1 = arith.constant 0 : i32
    return %c0_i32, %c0_i32_0 : i32, i32
  }
  func.func @transform_17(%arg0: i32) -> (i32, i32) {
    %c0_i32 = arith.constant 0 : i32
    %c0_i32_0 = arith.constant 0 : i32
    %c0_i32_1 = arith.constant 0 : i32
    return %c0_i32, %c0_i32_0 : i32, i32
  }
  func.func @transform_18(%arg0: i32) -> (i32, i32) {
    %c0_i32 = arith.constant 0 : i32
    %c0_i32_0 = arith.constant 0 : i32
    %c0_i32_1 = arith.constant 0 : i32
    return %c0_i32, %c0_i32_0 : i32, i32
  }
  func.func @transform_19(%arg0: i32) -> (i32, i32, i32) {
    %c0_i32 = arith.constant 0 : i32
    %c0_i32_0 = arith.constant 0 : i32
    %c0_i32_1 = arith.constant 0 : i32
    %c0_i32_2 = arith.constant 0 : i32
    return %c0_i32, %c0_i32_0, %c0_i32_1 : i32, i32, i32
  }
  func.func @transform_20(%arg0: i32) -> (i32, i32, i32) {
    %c0_i32 = arith.constant 0 : i32
    %c0_i32_0 = arith.constant 0 : i32
    %c0_i32_1 = arith.constant 0 : i32
    %c0_i32_2 = arith.constant 0 : i32
    return %c0_i32, %c0_i32_0, %c0_i32_1 : i32, i32, i32
  }
}

</mosaic_0001>

<bundles_post_ra>
// kernel: seq2seq_forward.1
= control target key start
LH: loop header
LB: loop body
LE: loop exit
PB: predicated region body
PF: predicated region fallthrough
CT: control target
= control target key end

     0   :  { %v6452_v0 = vmov 0   ;;  %v8994_v8 = vmov 0.0   ;;  %v72_v13 = vlaneseq  ;;  %vm142_vm0 = vcmask 261120   ;;  %s6455_s28 = smov 64   ;;  %s8969_s1 = inlined_call_operand.vmem [shape: s32[64,1], index: 1, kind: input, shape index: {}]   ;;  %s8970_s3 = inlined_call_operand.vmem [shape: f32[32,192], index: 3, kind: input, shape index: {}]   ;;  %s8971_s5 = inlined_call_operand.vmem [shape: f32[32,96], index: 5, kind: input, shape index: {}]   ;;  %s8972_s6 = inlined_call_operand.vmem [shape: f32[1,96], index: 6, kind: input, shape index: {}]   ;;  %s8973_s4 = inlined_call_operand.vmem [shape: f32[1,192], index: 4, kind: input, shape index: {}]   ;;  %s8974_s7 = inlined_call_operand.vmem [shape: f32[32,96], index: 7, kind: input, shape index: {}]   ;;  %s8975_s8 = inlined_call_operand.vmem [shape: f32[1,96], index: 8, kind: input, shape index: {}]   ;;  %s8976_s10 = inlined_call_operand.vmem [shape: f32[32,32], index: 10, kind: input, shape index: {}]   ;;  %s8977_s12 = inlined_call_operand.vmem [shape: f32[64,32], index: 12, kind: input, shape index: {}]   ;;  %s8978_s9 = inlined_call_operand.vmem [shape: f32[32,32], index: 9, kind: input, shape index: {}]   ;;  %s8979_s14 = inlined_call_operand.vmem [shape: f32[32,32], index: 14, kind: input, shape index: {}]   ;;  %s8980_s11 = inlined_call_operand.vmem [shape: f32[1,32], index: 11, kind: input, shape index: {}]   ;;  %s8981_s13 = inlined_call_operand.vmem [shape: f32[1,32], index: 13, kind: input, shape index: {}]   ;;  %s8982_s15 = inlined_call_operand.vmem [shape: f32[1,32], index: 15, kind: input, shape index: {}]   ;;  %s8983_s20 = inlined_call_operand.vmem [shape: f32[8,8,8], index: 20, kind: output, shape index: {1}]   ;;  %s8984_s0 = inlined_call_operand.vmem [shape: s32[8,8], index: 0, kind: input, shape index: {}]   ;;  %s8985_s2 = inlined_call_operand.vmem [shape: s32[8,1], index: 2, kind: input, shape index: {}]   ;;  %s8986_s16 = inlined_call_operand.vmem [shape: f32[128,224], index: 16, kind: input, shape index: {}]   ;;  %s8987_s17 = inlined_call_operand.vmem [shape: f32[1,224], index: 17, kind: input, shape index: {}]   ;;  %s8988_s18 = inlined_call_operand.vmem [shape: f32[32,64], index: 18, kind: input, shape index: {}]   ;;  %s8989_s19 = inlined_call_operand.vmem [shape: f32[8,8,32], index: 19, kind: output, shape index: {0}]  }
   0x1   :  { %9044 = sst [smem:[#allocation20_spill]] %s8969_s1  ;;  %6118 = vset.pattern.permute.xlu0 %v6452_v0  ;;  %6119 = vset.pattern.permute.xlu1 %v6452_v0  ;;  %vm6454_vm4 = vmmov 0   ;;  %vm1246_vm10 = vcmask 523520   ;;  %vm2062_vm11 = vcmask 523264   ;;  %vm2441_vm12 = vcmask 64512  }
   0x2   :  { %9045 = sst [smem:[#allocation21_spill]] %s8970_s3  ;;  %267 = vmatprep.mubr.f32.mxu1 %v8994_v8  ;;  %231 = vmatprep.mubr.f32.mxu0 %v8994_v8  ;;  %v6600_v14 = vand.u32 127, %v72_v13  ;;  %v6677_v33 = vshrl.u32 %v72_v13, 7  ;;  %2442 = vst.msk [vmem:[%s8983_s20] sm:$0xff] %vm2441_vm12, %v8994_v8  ;;  %vm2537_vm13 = vcmask 1041409   ;;  %vm2539_vm14 = vcmask 1042434  }
   0x3   :  { %9046 = sst [smem:[#allocation22_spill]] %s8971_s5  ;;  %vm2541_vm15 = vcmask 1043459  }
   0x4   :  { %9047 = sst [smem:[#allocation23_spill]] %s8972_s6  ;;  %v6680_v34 = vsub.s32 0, %v6677_v33  ;;  %s6457_s6 = smov 32  }
   0x5   :  { %9048 = sst [smem:[#allocation24_spill]] %s8973_s4 }
   0x6   :  { %s9049_s23 = sld [smem:[#allocation20_spill]] }
   0x7   :  { %s9050_s26 = sld [smem:[#allocation21_spill]] }
   0x8   :  { %s9051_s30 = sld [smem:[#allocation22_spill]] }
   0x9   :  { %s9052_s27 = sld [smem:[#allocation23_spill]] }
   0xa   :  { %s9053_s29 = sld [smem:[#allocation24_spill]] }
   0xc   :  { %v70_v1 = vld [vmem:[%s9049_s23 + $0x30] sm:$0xff]  ;;  %v64_v2 = vld [vmem:[%s9049_s23] sm:$0xff]  ;;  %v71_v6 = vld [vmem:[%s9049_s23 + $0x38] sm:$0xff] }
   0xd   :  { %93 = vperm.xlu0 %6118, %v70_v1   ;;  %75 = vperm.xlu1 %6119, %v64_v2   ;;  %v129_v3 = vld [vmem:[%s9050_s26 + $0x38] sm:$0xff]  ;;  %v128_v4 = vld [vmem:[%s9050_s26 + $0x30] sm:$0xff]  ;;  %v127_v5 = vld [vmem:[%s9050_s26 + $0x28] sm:$0xff] }
   0xe   :  { %6104 = vmatprep.subr.mxu1 %v129_v3  ;;  %v126_v7 = vld [vmem:[%s9050_s26 + $0x20] sm:$0xff]  ;;  %v125_v9 = vld [vmem:[%s9050_s26 + $0x18] sm:$0xff]  ;;  %191 = vmatprep.subr.mxu0 %v129_v3  ;;  %v124_v10 = vld [vmem:[%s9050_s26 + $0x10] sm:$0xff] }
   0xf   :  { %6108 = vmatpush1.msra.mxu1 %v128_v4  ;;  %192 = vmatpush1.msra.mxu0 %v128_v4  ;;  %v123_v11 = vld [vmem:[%s9050_s26 + $0x8] sm:$0xff]  ;;  %v122_v12 = vld [vmem:[%s9050_s26] sm:$0xff]  ;;  %v6606_v17 = vld [vmem:[%s9051_s30 + $0x18] sm:$0xff] }
  0x10   :  { %6105 = vmatprep.subr.mxu1 %v127_v5  ;;  %193 = vmatprep.subr.mxu0 %v127_v5  ;;  %v6615_v20 = vld [vmem:[%s9051_s30 + $0x10] sm:$0xff]  ;;  %v6625_v22 = vld [vmem:[%s9051_s30 + $0x8] sm:$0xff]  ;;  %v6636_v24 = vld [vmem:[%s9051_s30] sm:$0xff]  ;;  %s6456_s30 = smov 96  }
  0x11   :  { %96 = vperm.xlu0 %6118, %v71_v6   ;;  %6109 = vmatpush1.msra.mxu1 %v126_v7  ;;  %v6673_v29 = vld [vmem:[%s9052_s27] ss:$0 sm:$0xff]  ;;  %v65_v49 = vld [vmem:[%s9049_s23 + $0x8] sm:$0xff] }
  0x12   :  { %6106 = vmatprep.subr.mxu1 %v125_v9  ;;  %194 = vmatpush1.msra.mxu0 %v126_v7  ;;  %v6685_v35 = vld [vmem:[%s9053_s29] sm:$0x3] }
  0x13   :  { %6110 = vmatpush1.msra.mxu1 %v124_v10  ;;  %195 = vmatprep.subr.mxu0 %v125_v9  ;;  %v6689_v37 = vrot.slane %v6685_v35, %v6680_v34 }
  0x14   :  { %6107 = vmatprep.subr.mxu1 %v123_v11  ;;  %196 = vmatpush1.msra.mxu0 %v124_v10 }
  0x15   :  { %6111 = vmatpush1.msra.mxu1 %v122_v12  ;;  %197 = vmatprep.subr.mxu0 %v123_v11  ;;  %v66_v11 = vld [vmem:[%s9049_s23 + $0x10] sm:$0xff] }
  0x16   :  { %5790 = vmatprep.subr.mxu1 %v8994_v8  ;;  %198 = vmatpush1.msra.mxu0 %v122_v12 }
  0x17   :  { %5834 = vmatprep.subr.mxu0 %v8994_v8 }
  0x88   :  { %v94_v15 = vpop.permute.xlu0 %93  ;;  %v76_v16 = vpop.permute.xlu1 %75 }
  0x89   :  { %vm104_vm1 = vcmp.eq.s32.totalorder %v6600_v14, %v94_v15  ;;  %vm98_vm2 = vcmp.eq.s32.totalorder %v6600_v14, %v76_v16 }
  0x8a   :  { %v5545_v18 = vsel %vm104_vm1, 1.0, %v8994_v8  ;;  %v5539_v19 = vsel %vm98_vm2, 1.0, %v8994_v8  ;;  %vm2543_vm1 = vcmask 1044484   ;;  %vm2545_vm2 = vcmask 1045509  }
  0x8b   :  { %5553 = vmatmul.mubr.msk.f32.vlgmr.msra.gmra.mxu1 %vm142_vm0, %v5545_v18  ;;  %5547 = vmatmul.mubr.msk.f32.vlgmr.msra.gmra.mxu0 %vm142_vm0, %v5539_v19 }
  0x8c   :  { %5791 = vmatpush3.msra.mxu1 %v6606_v17  ;;  %v97_v21 = vpop.permute.xlu0 %96  ;;  %273 = vmatprep.mubr.f32.mxu1 %v8994_v8 }
  0x8d   :  { %5792 = vmatprep.subr.mxu1 %v8994_v8  ;;  %vm105_vm3 = vcmp.eq.s32.totalorder %v6600_v14, %v97_v21  ;;  %237 = vmatprep.mubr.f32.mxu0 %v8994_v8 }
  0x8e   :  { %v5546_v23 = vsel %vm105_vm3, 1.0, %v8994_v8  ;;  %5793 = vmatpush3.msra.mxu1 %v6615_v20  ;;  %5835 = vmatpush3.msra.mxu0 %v6606_v17  ;;  %vm2547_vm3 = vcmask 1046534  }
  0x8f   :  { %5794 = vmatprep.subr.mxu1 %v8994_v8  ;;  %5554 = vmatmul.mubr.msk.f32.gmra.mxu1 %vm142_vm0, %v5546_v23 }
  0x90   :  { %5795 = vmatpush3.msra.mxu1 %v6625_v22  ;;  %5798 = vmatprep.mubr.msk.f32.mxu1 %vm6454_vm4, %v8994_v8 }
  0x91   :  { %5796 = vmatprep.subr.mxu1 %v8994_v8  ;;  %5836 = vmatprep.subr.mxu0 %v8994_v8 }
  0x92   :  { %5797 = vmatpush3.msra.mxu1 %v6636_v24  ;;  %5837 = vmatpush3.msra.mxu0 %v6615_v20 }
  0x93   :  { %5799 = vmatmul.mubr.f32.vlgmr.msra.gmra.mxu1 %v8994_v8  ;;  %5801 = vmatprep.subr.mxu1 %v8994_v8 }
  0x94   :  { %5802 = vmatpush3.msra.mxu1 %v6606_v17  ;;  %5809 = vmatprep.mubr.msk.f32.mxu1 %vm6454_vm4, %v8994_v8 }
  0x95   :  { %5803 = vmatprep.subr.mxu1 %v8994_v8  ;;  %5838 = vmatprep.subr.mxu0 %v8994_v8 }
  0x96   :  { %5804 = vmatpush3.msra.mxu1 %v6615_v20  ;;  %5839 = vmatpush3.msra.mxu0 %v6625_v22 }
  0x97   :  { %5805 = vmatprep.subr.mxu1 %v8994_v8  ;;  %5840 = vmatprep.subr.mxu0 %v8994_v8 }
  0x98   :  { %5806 = vmatpush3.msra.mxu1 %v6625_v22  ;;  %5841 = vmatpush3.msra.mxu0 %v6636_v24 }
  0x99   :  { %5807 = vmatprep.subr.mxu1 %v8994_v8  ;;  %5856 = vmatprep.subr.mxu0 %v8994_v8 }
  0x9a   :  { %5808 = vmatpush3.msra.mxu1 %v6636_v24 }
  0x9b   :  { %5812 = vmatprep.subr.mxu1 %v8994_v8 }
 0x14b   :  { %v6662_v25 = vpop.f32.mrf.mxu1  ;;  %v233_v36 = vpop.f32.mrf.mxu0 }
 0x14c   :  { %v6692_v38 = vadd.f32 %v233_v36, %v6689_v37 }
 0x14d   :  { %v6664_v26 = vpop.f32.mrf.mxu1  ;;  %v6720_v61 = vpop.f32.mrf.mxu0 }
 0x14f   :  { %v6666_v27 = vpop.f32.mrf.mxu1 }
 0x151   :  { %v6668_v28 = vpop.f32.mrf.mxu1 }
 0x153   :  { %v367_v30 = vpop.f32.mrf.mxu1 }
 0x154   :  { %v368_v31 = vadd.f32 %v6673_v29, %v367_v30 }
 0x155   :  { %v5800_v32 = vpop.f32.mrf.mxu1 }
 0x156   :  { %379 = vrot.lane.b32.xlu1 %v368_v31, %s6455_s28  ;;  %v371_v39 = vadd.f32 %v368_v31, %v6692_v38 }
 0x158   :  { %v5556_v40 = vmul.f32 -1.442695, %v371_v39 }
 0x15a   :  { %6120 = vpow2.f32 %v5556_v40 }
 0x167   :  { %v6121_v41 = vpop.eup %6120 }
 0x168   :  { %v375_v42 = vadd.f32 1.0, %v6121_v41 }
 0x16a   :  { %6122 = vrcp.f32 %v375_v42 }
 0x177   :  { %v6123_v43 = vpop.eup %6122 }
 0x178   :  { %v389_v50 = vsub.f32 1.0, %v6123_v43  ;;  %v395_v52 = vmul.f32 0.0, %v6123_v43 }
 0x1c8   :  { %v380_v44 = vpop.permute.xlu1 %379 }
 0x1c9   :  { %v382_v45 = vmul.f32 %v6123_v43, %v380_v44 }
 0x1cb   :  { %384 = vrot.lane.b32.xlu0 %v382_v45, %s6455_s28 }
 0x23d   :  { %v385_v46 = vpop.permute.xlu0 %384 }
 0x23e   :  { %v387_v47 = vadd.f32 %v385_v46, %v6692_v38 }
 0x240   :  { %6124 = vtanh.f32 %v387_v47 }
 0x24d   :  { %v6125_v48 = vpop.eup %6124 }
 0x24e   :  { %391 = vrot.lane.b32.xlu1 %v6125_v48, %s6456_s30 }
 0x252   :  { %78 = vperm.xlu1 %6119, %v65_v49  }
 0x2c0   :  { %v392_v51 = vpop.permute.xlu1 %391 }
 0x2c1   :  { %v394_v53 = vmul.f32 %v392_v51, %v389_v50  ;;  %v67_v51 = vld [vmem:[%s9049_s23 + $0x18] sm:$0xff] }
 0x2c3   :  { %v396_v54 = vadd.f32 %v395_v52, %v394_v53 }
 0x2c5   :  { %398 = vrot.lane.b32.xlu0 %v396_v54, %s6456_s30 }
 0x2cd   :  { %v79_v55 = vpop.permute.xlu1 %78 }
 0x2ce   :  { %vm99_vm5 = vcmp.eq.s32.totalorder %v6600_v14, %v79_v55 }
 0x2cf   :  { %v5540_v56 = vsel %vm99_vm5, 1.0, %v8994_v8  ;;  %vm2549_vm5 = vcmask 1047559  }
 0x2d0   :  { %5548 = vmatmul.mubr.msk.f32.gmra.mxu0 %vm142_vm0, %v5540_v56 }
 0x2d1   :  { %243 = vmatprep.mubr.f32.mxu0 %v8994_v8 }
 0x337   :  { %v399_v57 = vpop.permute.xlu0 %398 }
 0x338   :  { %401 = vst.msk [vmem:[#allocation2] sm:$0xff] %vm142_vm0, %v399_v57  ;;  %5810 = vmatmul.mubr.msk.f32.vlgmr.msra.gmra.mxu1 %vm142_vm0, %v399_v57 }
 0x339   :  { %5813 = vmatpush3.msra.mxu1 %v6606_v17  ;;  %5820 = vmatprep.mubr.msk.f32.mxu1 %vm6454_vm4, %v8994_v8 }
 0x33a   :  { %5814 = vmatprep.subr.mxu1 %v8994_v8 }
 0x33b   :  { %5815 = vmatpush3.msra.mxu1 %v6615_v20 }
 0x33c   :  { %5816 = vmatprep.subr.mxu1 %v8994_v8 }
 0x33d   :  { %5817 = vmatpush3.msra.mxu1 %v6625_v22 }
 0x33e   :  { %5818 = vmatprep.subr.mxu1 %v8994_v8 }
 0x33f   :  { %5819 = vmatpush3.msra.mxu1 %v6636_v24 }
 0x340   :  { %5823 = vmatprep.subr.mxu1 %v8994_v8 }
 0x390   :  { %v239_v62 = vpop.f32.mrf.mxu0 }
 0x391   :  { %v6723_v63 = vadd.f32 %v239_v62, %v6689_v37 }
 0x392   :  { %v6751_v36 = vpop.f32.mrf.mxu0 }
 0x3f8   :  { %v470_v58 = vpop.f32.mrf.mxu1 }
 0x3f9   :  { %v471_v59 = vadd.f32 %v6673_v29, %v470_v58 }
 0x3fa   :  { %v5811_v60 = vpop.f32.mrf.mxu1 }
 0x3fb   :  { %482 = vrot.lane.b32.xlu0 %v471_v59, %s6455_s28  ;;  %v474_v0 = vadd.f32 %v471_v59, %v6723_v63 }
 0x3fd   :  { %v5558_v1 = vmul.f32 -1.442695, %v474_v0 }
 0x3ff   :  { %6126 = vpow2.f32 %v5558_v1 }
 0x40c   :  { %v6127_v2 = vpop.eup %6126 }
 0x40d   :  { %v478_v3 = vadd.f32 1.0, %v6127_v2 }
 0x40f   :  { %6128 = vrcp.f32 %v478_v3 }
 0x41c   :  { %v6129_v4 = vpop.eup %6128 }
 0x41d   :  { %v492_v12 = vsub.f32 1.0, %v6129_v4  ;;  %v498_v15 = vmul.f32 %v6129_v4, %v396_v54 }
 0x46d   :  { %v483_v5 = vpop.permute.xlu0 %482 }
 0x46e   :  { %v485_v6 = vmul.f32 %v6129_v4, %v483_v5 }
 0x470   :  { %487 = vrot.lane.b32.xlu1 %v485_v6, %s6455_s28 }
 0x4e2   :  { %v488_v7 = vpop.permute.xlu1 %487 }
 0x4e3   :  { %v490_v9 = vadd.f32 %v488_v7, %v6723_v63 }
 0x4e5   :  { %6130 = vtanh.f32 %v490_v9 }
 0x4f2   :  { %v6131_v10 = vpop.eup %6130 }
 0x4f3   :  { %494 = vrot.lane.b32.xlu0 %v6131_v10, %s6456_s30 }
 0x4f7   :  { %81 = vperm.xlu0 %6118, %v66_v11  }
 0x565   :  { %v495_v13 = vpop.permute.xlu0 %494 }
 0x566   :  { %v497_v16 = vmul.f32 %v495_v13, %v492_v12  ;;  %v68_v12 = vld [vmem:[%s9049_s23 + $0x20] sm:$0xff] }
 0x568   :  { %v499_v18 = vadd.f32 %v498_v15, %v497_v16 }
 0x56a   :  { %501 = vrot.lane.b32.xlu1 %v499_v18, %s6456_s30 }
 0x572   :  { %v82_v19 = vpop.permute.xlu0 %81 }
 0x573   :  { %vm100_vm6 = vcmp.eq.s32.totalorder %v6600_v14, %v82_v19 }
 0x574   :  { %v5541_v21 = vsel %vm100_vm6, 1.0, %v8994_v8 }
 0x575   :  { %5549 = vmatmul.mubr.msk.f32.gmra.mxu0 %vm142_vm0, %v5541_v21  ;;  %v69_v21 = vld [vmem:[%s9049_s23 + $0x28] sm:$0xff] }
 0x576   :  { %249 = vmatprep.mubr.f32.mxu0 %v8994_v8 }
 0x5dc   :  { %v502_v23 = vpop.permute.xlu1 %501 }
 0x5dd   :  { %505 = vst.msk [vmem:[#allocation2 + $0x8] sm:$0xff] %vm142_vm0, %v502_v23  ;;  %5821 = vmatmul.mubr.msk.f32.vlgmr.msra.gmra.mxu1 %vm142_vm0, %v502_v23 }
 0x5de   :  { %5824 = vmatpush3.msra.mxu1 %v6606_v17  ;;  %5831 = vmatprep.mubr.msk.f32.mxu1 %vm6454_vm4, %v8994_v8 }
 0x5df   :  { %5825 = vmatprep.subr.mxu1 %v8994_v8 }
 0x5e0   :  { %5826 = vmatpush3.msra.mxu1 %v6615_v20 }
 0x5e1   :  { %5827 = vmatprep.subr.mxu1 %v8994_v8 }
 0x5e2   :  { %5828 = vmatpush3.msra.mxu1 %v6625_v22 }
 0x5e3   :  { %5829 = vmatprep.subr.mxu1 %v8994_v8 }
 0x5e4   :  { %5830 = vmatpush3.msra.mxu1 %v6636_v24 }
 0x5e5   :  { %5845 = vmatprep.subr.mxu1 %v8994_v8 }
 0x635   :  { %v245_v39 = vpop.f32.mrf.mxu0 }
 0x636   :  { %v6754_v40 = vadd.f32 %v245_v39, %v6689_v37 }
 0x637   :  { %v6782_v1 = vpop.f32.mrf.mxu0 }
 0x69d   :  { %v574_v30 = vpop.f32.mrf.mxu1 }
 0x69e   :  { %v575_v31 = vadd.f32 %v6673_v29, %v574_v30 }
 0x69f   :  { %v5822_v32 = vpop.f32.mrf.mxu1 }
 0x6a0   :  { %586 = vrot.lane.b32.xlu1 %v575_v31, %s6455_s28  ;;  %v578_v41 = vadd.f32 %v575_v31, %v6754_v40 }
 0x6a2   :  { %v5560_v42 = vmul.f32 -1.442695, %v578_v41 }
 0x6a4   :  { %6132 = vpow2.f32 %v5560_v42 }
 0x6b1   :  { %v6133_v43 = vpop.eup %6132 }
 0x6b2   :  { %v582_v44 = vadd.f32 1.0, %v6133_v43 }
 0x6b4   :  { %6134 = vrcp.f32 %v582_v44 }
 0x6c1   :  { %v6135_v45 = vpop.eup %6134 }
 0x6c2   :  { %v596_v52 = vsub.f32 1.0, %v6135_v45  ;;  %v602_v54 = vmul.f32 %v6135_v45, %v499_v18 }
 0x712   :  { %v587_v46 = vpop.permute.xlu1 %586 }
 0x713   :  { %v589_v47 = vmul.f32 %v6135_v45, %v587_v46 }
 0x715   :  { %591 = vrot.lane.b32.xlu0 %v589_v47, %s6455_s28 }
 0x787   :  { %v592_v48 = vpop.permute.xlu0 %591 }
 0x788   :  { %v594_v49 = vadd.f32 %v592_v48, %v6754_v40 }
 0x78a   :  { %6136 = vtanh.f32 %v594_v49 }
 0x797   :  { %v6137_v50 = vpop.eup %6136 }
 0x798   :  { %598 = vrot.lane.b32.xlu1 %v6137_v50, %s6456_s30 }
 0x79c   :  { %84 = vperm.xlu1 %6119, %v67_v51  }
 0x80a   :  { %v599_v53 = vpop.permute.xlu1 %598 }
 0x80b   :  { %v601_v55 = vmul.f32 %v599_v53, %v596_v52 }
 0x80d   :  { %v603_v56 = vadd.f32 %v602_v54, %v601_v55 }
 0x80f   :  { %605 = vrot.lane.b32.xlu0 %v603_v56, %s6456_s30 }
 0x817   :  { %v85_v57 = vpop.permute.xlu1 %84 }
 0x818   :  { %vm101_vm7 = vcmp.eq.s32.totalorder %v6600_v14, %v85_v57 }
 0x819   :  { %v5542_v58 = vsel %vm101_vm7, 1.0, %v8994_v8 }
 0x81a   :  { %5550 = vmatmul.mubr.msk.f32.gmra.mxu0 %vm142_vm0, %v5542_v58 }
 0x81b   :  { %255 = vmatprep.mubr.f32.mxu0 %v8994_v8 }
 0x881   :  { %v606_v59 = vpop.permute.xlu0 %605 }
 0x882   :  { %609 = vst.msk [vmem:[#allocation2 + $0x10] sm:$0xff] %vm142_vm0, %v606_v59  ;;  %5832 = vmatmul.mubr.msk.f32.vlgmr.msra.gmra.mxu1 %vm142_vm0, %v606_v59 }
 0x883   :  { %5846 = vmatpush3.msra.mxu1 %v6606_v17  ;;  %5853 = vmatprep.mubr.msk.f32.mxu1 %vm6454_vm4, %v8994_v8 }
 0x884   :  { %5847 = vmatprep.subr.mxu1 %v8994_v8 }
 0x885   :  { %5848 = vmatpush3.msra.mxu1 %v6615_v20 }
 0x886   :  { %5849 = vmatprep.subr.mxu1 %v8994_v8 }
 0x887   :  { %5850 = vmatpush3.msra.mxu1 %v6625_v22 }
 0x888   :  { %5851 = vmatprep.subr.mxu1 %v8994_v8 }
 0x889   :  { %5852 = vmatpush3.msra.mxu1 %v6636_v24 }
 0x88a   :  { %5867 = vmatprep.subr.mxu1 %v8994_v8 }
 0x8da   :  { %v251_v2 = vpop.f32.mrf.mxu0 }
 0x8db   :  { %v6785_v3 = vadd.f32 %v251_v2, %v6689_v37 }
 0x8dc   :  { %v6819_v44 = vpop.f32.mrf.mxu0 }
 0x942   :  { %v678_v60 = vpop.f32.mrf.mxu1 }
 0x943   :  { %v679_v62 = vadd.f32 %v6673_v29, %v678_v60 }
 0x944   :  { %v5833_v0 = vpop.f32.mrf.mxu1 }
 0x945   :  { %690 = vrot.lane.b32.xlu0 %v679_v62, %s6455_s28  ;;  %v682_v4 = vadd.f32 %v679_v62, %v6785_v3 }
 0x947   :  { %v5562_v5 = vmul.f32 -1.442695, %v682_v4 }
 0x949   :  { %6138 = vpow2.f32 %v5562_v5 }
 0x956   :  { %v6139_v6 = vpop.eup %6138 }
 0x957   :  { %v686_v7 = vadd.f32 1.0, %v6139_v6 }
 0x959   :  { %6140 = vrcp.f32 %v686_v7 }
 0x966   :  { %v6141_v9 = vpop.eup %6140 }
 0x967   :  { %v700_v23 = vsub.f32 1.0, %v6141_v9  ;;  %v706_v31 = vmul.f32 %v6141_v9, %v603_v56 }
 0x9b7   :  { %v691_v10 = vpop.permute.xlu0 %690 }
 0x9b8   :  { %v693_v11 = vmul.f32 %v6141_v9, %v691_v10 }
 0x9ba   :  { %695 = vrot.lane.b32.xlu1 %v693_v11, %s6455_s28 }
 0x9be   :  { %87 = vperm.xlu1 %6119, %v68_v12  }
 0xa2c   :  { %v696_v13 = vpop.permute.xlu1 %695 }
 0xa2d   :  { %v698_v15 = vadd.f32 %v696_v13, %v6785_v3 }
 0xa2f   :  { %6142 = vtanh.f32 %v698_v15 }
 0xa39   :  { %v88_v16 = vpop.permute.xlu1 %87 }
 0xa3a   :  { %vm102_vm8 = vcmp.eq.s32.totalorder %v6600_v14, %v88_v16 }
 0xa3b   :  { %v5543_v18 = vsel %vm102_vm8, 1.0, %v8994_v8  ;;  %vm2656_vm8 = vcmask 785664  }
 0xa3c   :  { %v6143_v19 = vpop.eup %6142  ;;  %5551 = vmatmul.mubr.msk.f32.gmra.mxu0 %vm142_vm0, %v5543_v18 }
 0xa3d   :  { %702 = vrot.lane.b32.xlu0 %v6143_v19, %s6456_s30  ;;  %261 = vmatprep.mubr.f32.mxu0 %v8994_v8 }
 0xa41   :  { %90 = vperm.xlu0 %6118, %v69_v21  }
 0xaaf   :  { %v703_v30 = vpop.permute.xlu0 %702 }
 0xab0   :  { %v705_v32 = vmul.f32 %v703_v30, %v700_v23 }
 0xab2   :  { %v707_v39 = vadd.f32 %v706_v31, %v705_v32 }
 0xab4   :  { %709 = vrot.lane.b32.xlu1 %v707_v39, %s6456_s30 }
 0xabc   :  { %v91_v41 = vpop.permute.xlu0 %90 }
 0xabd   :  { %vm103_vm9 = vcmp.eq.s32.totalorder %v6600_v14, %v91_v41 }
 0xabe   :  { %v5544_v42 = vsel %vm103_vm9, 1.0, %v8994_v8  ;;  %vm2661_vm9 = vcmask 1048320  }
 0xabf   :  { %5552 = vmatmul.mubr.msk.f32.gmra.mxu0 %vm142_vm0, %v5544_v42  ;;  %v6863_v42 = vld [vmem:[%s8974_s7 + $0x18] sm:$0xff] }
 0xac0   :  { %5842 = vmatprep.mubr.msk.f32.mxu0 %vm6454_vm4, %v8994_v8 }
 0xafc   :  { %v257_v45 = vpop.f32.mrf.mxu0 }
 0xafd   :  { %v6828_v52 = vadd.f32 %v257_v45, %v6689_v37  ;;  %v6870_v45 = vld [vmem:[%s8974_s7 + $0x10] sm:$0xff] }
 0xafe   :  { %v6821_v46 = vpop.f32.mrf.mxu0 }
 0xb26   :  { %v710_v43 = vpop.permute.xlu1 %709 }
 0xb27   :  { %713 = vst.msk [vmem:[#allocation2 + $0x18] sm:$0xff] %vm142_vm0, %v710_v43  ;;  %5843 = vmatmul.mubr.msk.f32.vlgmr.msra.gmra.mxu0 %vm142_vm0, %v710_v43 }
 0xb28   :  { %5857 = vmatpush3.msra.mxu0 %v6606_v17  ;;  %5864 = vmatprep.mubr.msk.f32.mxu0 %vm6454_vm4, %v8994_v8 }
 0xb29   :  { %5858 = vmatprep.subr.mxu0 %v8994_v8 }
 0xb2a   :  { %5859 = vmatpush3.msra.mxu0 %v6615_v20 }
 0xb2b   :  { %5860 = vmatprep.subr.mxu0 %v8994_v8 }
 0xb2c   :  { %5861 = vmatpush3.msra.mxu0 %v6625_v22 }
 0xb2d   :  { %5862 = vmatprep.subr.mxu0 %v8994_v8 }
 0xb2e   :  { %5863 = vmatpush3.msra.mxu0 %v6636_v24 }
 0xb2f   :  { %5878 = vmatprep.subr.mxu0 %v8994_v8 }
 0xb7f   :  { %v263_v47 = vpop.f32.mrf.mxu0 }
 0xb80   :  { %v6850_v12 = vadd.f32 %v263_v47, %v6689_v37  ;;  %v6879_v47 = vld [vmem:[%s8974_s7 + $0x8] sm:$0xff] }
 0xb81   :  { %v6823_v48 = vpop.f32.mrf.mxu0 }
 0xbe7   :  { %v782_v49 = vpop.f32.mrf.mxu0 }
 0xbe8   :  { %v783_v50 = vadd.f32 %v6673_v29, %v782_v49  ;;  %v6886_v49 = vld [vmem:[%s8974_s7] sm:$0xff] }
 0xbe9   :  { %v5844_v51 = vpop.f32.mrf.mxu0 }
 0xbea   :  { %794 = vrot.lane.b32.xlu0 %v783_v50, %s6455_s28  ;;  %v786_v53 = vadd.f32 %v783_v50, %v6828_v52 }
 0xbec   :  { %v5564_v54 = vmul.f32 -1.442695, %v786_v53 }
 0xbee   :  { %6144 = vpow2.f32 %v5564_v54  ;;  %v6908_v54 = vld [vmem:[%s8975_s8] ss:$0 sm:$0xff] }
 0xbfb   :  { %v6145_v55 = vpop.eup %6144 }
 0xbfc   :  { %v790_v56 = vadd.f32 1.0, %v6145_v55 }
 0xbfe   :  { %6146 = vrcp.f32 %v790_v56 }
 0xc0b   :  { %v6147_v57 = vpop.eup %6146 }
 0xc0c   :  { %v804_v2 = vsub.f32 1.0, %v6147_v57  ;;  %v810_v5 = vmul.f32 %v6147_v57, %v707_v39 }
 0xc5c   :  { %v795_v58 = vpop.permute.xlu0 %794 }
 0xc5d   :  { %v797_v59 = vmul.f32 %v6147_v57, %v795_v58 }
 0xc5f   :  { %799 = vrot.lane.b32.xlu1 %v797_v59, %s6455_s28 }
 0xcd1   :  { %v800_v60 = vpop.permute.xlu1 %799 }
 0xcd2   :  { %v802_v62 = vadd.f32 %v800_v60, %v6828_v52 }
 0xcd4   :  { %6148 = vtanh.f32 %v802_v62 }
 0xce1   :  { %v6149_v0 = vpop.eup %6148 }
 0xce2   :  { %806 = vrot.lane.b32.xlu0 %v6149_v0, %s6456_s30 }
 0xd54   :  { %v807_v4 = vpop.permute.xlu0 %806 }
 0xd55   :  { %v809_v6 = vmul.f32 %v807_v4, %v804_v2 }
 0xd57   :  { %v811_v7 = vadd.f32 %v810_v5, %v809_v6  ;;  %v6921_v5 = vadd.f32 %v6666_v27, %v6689_v37  ;;  %v6928_v27 = vsub.s32 1, %v6677_v33 }
 0xd59   :  { %813 = vrot.lane.b32.xlu1 %v811_v7, %s6456_s30 }
 0xdcb   :  { %v814_v9 = vpop.permute.xlu1 %813 }
 0xdcc   :  { %817 = vst.msk [vmem:[#allocation2 + $0x20] sm:$0xff] %vm142_vm0, %v814_v9  ;;  %5854 = vmatmul.mubr.msk.f32.vlgmr.msra.gmra.mxu1 %vm142_vm0, %v814_v9 }
 0xdcd   :  { %5868 = vmatpush3.msra.mxu1 %v6606_v17  ;;  %5875 = vmatprep.mubr.msk.f32.mxu1 %vm6454_vm4, %v8994_v8 }
 0xdce   :  { %5869 = vmatprep.subr.mxu1 %v8994_v8 }
 0xdcf   :  { %5870 = vmatpush3.msra.mxu1 %v6615_v20 }
 0xdd0   :  { %5871 = vmatprep.subr.mxu1 %v8994_v8 }
 0xdd1   :  { %5872 = vmatpush3.msra.mxu1 %v6625_v22 }
 0xdd2   :  { %5873 = vmatprep.subr.mxu1 %v8994_v8 }
 0xdd3   :  { %5874 = vmatpush3.msra.mxu1 %v6636_v24 }
 0xdd4   :  { %5889 = vmatprep.subr.mxu1 %v8994_v8 }
 0xe8c   :  { %v886_v10 = vpop.f32.mrf.mxu1 }
 0xe8d   :  { %v887_v17 = vadd.f32 %v6673_v29, %v886_v10 }
 0xe8e   :  { %v5855_v11 = vpop.f32.mrf.mxu1 }
 0xe8f   :  { %898 = vrot.lane.b32.xlu0 %v887_v17, %s6455_s28  ;;  %v890_v20 = vadd.f32 %v887_v17, %v6850_v12 }
 0xe91   :  { %v5566_v13 = vmul.f32 -1.442695, %v890_v20 }
 0xe93   :  { %6150 = vpow2.f32 %v5566_v13 }
 0xea0   :  { %v6151_v22 = vpop.eup %6150 }
 0xea1   :  { %v894_v15 = vadd.f32 1.0, %v6151_v22 }
 0xea3   :  { %6152 = vrcp.f32 %v894_v15 }
 0xeb0   :  { %v6153_v16 = vpop.eup %6152 }
 0xeb1   :  { %v908_v30 = vsub.f32 1.0, %v6153_v16  ;;  %v914_v32 = vmul.f32 %v6153_v16, %v811_v7 }
 0xf01   :  { %v899_v24 = vpop.permute.xlu0 %898 }
 0xf02   :  { %v901_v18 = vmul.f32 %v6153_v16, %v899_v24 }
 0xf04   :  { %903 = vrot.lane.b32.xlu1 %v901_v18, %s6455_s28 }
 0xf76   :  { %v904_v19 = vpop.permute.xlu1 %903 }
 0xf77   :  { %v906_v21 = vadd.f32 %v904_v19, %v6850_v12 }
 0xf79   :  { %6154 = vtanh.f32 %v906_v21 }
 0xf86   :  { %v6155_v23 = vpop.eup %6154 }
 0xf87   :  { %910 = vrot.lane.b32.xlu0 %v6155_v23, %s6456_s30 }
 0xff9   :  { %v911_v31 = vpop.permute.xlu0 %910 }
 0xffa   :  { %v913_v39 = vmul.f32 %v911_v31, %v908_v30 }
 0xffc   :  { %v6856_v41 = vadd.f32 %v914_v32, %v913_v39 }
 0xffe   :  { %917 = vrot.lane.b32.xlu1 %v6856_v41, %s6456_s30 }
0x1070   :  { %v918_v43 = vpop.permute.xlu1 %917 }
0x1071   :  { %921 = vst.msk [vmem:[#allocation2 + $0x28] sm:$0xff] %vm142_vm0, %v918_v43  ;;  %5865 = vmatmul.mubr.msk.f32.vlgmr.msra.gmra.mxu0 %vm142_vm0, %v918_v43 }
0x1072   :  { %5879 = vmatpush3.msra.mxu0 %v6863_v42  ;;  %5886 = vmatprep.mubr.msk.f32.mxu0 %vm6454_vm4, %v8994_v8 }
0x1073   :  { %5880 = vmatprep.subr.mxu0 %v8994_v8 }
0x1074   :  { %5881 = vmatpush3.msra.mxu0 %v6870_v45 }
0x1075   :  { %5882 = vmatprep.subr.mxu0 %v8994_v8 }
0x1076   :  { %5883 = vmatpush3.msra.mxu0 %v6879_v47 }
0x1077   :  { %5884 = vmatprep.subr.mxu0 %v8994_v8 }
0x1078   :  { %5885 = vmatpush3.msra.mxu0 %v6886_v49 }
0x1079   :  { %5887 = vmatmul.mubr.f32.vlgmr.msra.gmra.mxu0 %v8994_v8  ;;  %5900 = vmatprep.subr.mxu0 %v8994_v8 }
0x107a   :  { %5901 = vmatpush3.msra.mxu0 %v6863_v42  ;;  %5908 = vmatprep.mubr.msk.f32.mxu0 %vm6454_vm4, %v8994_v8 }
0x107b   :  { %5902 = vmatprep.subr.mxu0 %v8994_v8 }
0x107c   :  { %5903 = vmatpush3.msra.mxu0 %v6870_v45 }
0x107d   :  { %5904 = vmatprep.subr.mxu0 %v8994_v8 }
0x107e   :  { %5905 = vmatpush3.msra.mxu0 %v6879_v47 }
0x107f   :  { %5906 = vmatprep.subr.mxu0 %v8994_v8 }
0x1080   :  { %5907 = vmatpush3.msra.mxu0 %v6886_v49 }
0x1081   :  { %5922 = vmatprep.subr.mxu0 %v8994_v8 }
0x1131   :  { %v990_v50 = vpop.f32.mrf.mxu0 }
0x1132   :  { %v991_v51 = vadd.f32 %v6673_v29, %v990_v50  ;;  %v6915_v29 = vadd.f32 %v6662_v25, %v6689_v37  ;;  %v6932_v37 = vrot.slane %v6685_v35, %v6928_v27 }
0x1133   :  { %v5866_v53 = vpop.f32.mrf.mxu0 }
0x1134   :  { %1002 = vrot.lane.b32.xlu0 %v991_v51, %s6455_s28  ;;  %v994_v58 = vadd.f32 %v991_v51, %v6915_v29  ;;  %v278_v16 = vadd.f32 %v6668_v28, %v6932_v37 }
0x1136   :  { %v5568_v59 = vmul.f32 -1.442695, %v994_v58 }
0x1138   :  { %6156 = vpow2.f32 %v5568_v59 }
0x1139   :  { %v1202_v55 = vpop.f32.mrf.mxu0 }
0x113a   :  { %v1203_v56 = vadd.f32 %v6908_v54, %v1202_v55 }
0x113b   :  { %v5888_v57 = vpop.f32.mrf.mxu0 }
0x113c   :  { %1207 = vrot.lane.b32.xlu1 %v1203_v56, %s6456_s30 }
0x1140   :  { %1224 = vrot.lane.b32.xlu1 %v1203_v56, %s6457_s6 }
0x1145   :  { %v6157_v60 = vpop.eup %6156 }
0x1146   :  { %v998_v62 = vadd.f32 1.0, %v6157_v60 }
0x1148   :  { %6158 = vrcp.f32 %v998_v62 }
0x1155   :  { %v6159_v0 = vpop.eup %6158 }
0x1156   :  { %v1012_v21 = vsub.f32 1.0, %v6159_v0  ;;  %v1018_v30 = vmul.f32 %v6159_v0, %v6856_v41 }
0x11a6   :  { %v1003_v2 = vpop.permute.xlu0 %1002 }
0x11a7   :  { %v1005_v4 = vmul.f32 %v6159_v0, %v1003_v2 }
0x11a9   :  { %1007 = vrot.lane.b32.xlu0 %v1005_v4, %s6455_s28 }
0x11ae   :  { %v1208_v6 = vpop.permute.xlu1 %1207 }
0x11af   :  { %v1210_v25 = vadd.f32 %v1208_v6, %v6921_v5  ;;  %v1217_v35 = vadd.f32 %v1208_v6, %v278_v16 }
0x11b1   :  { %v5572_v7 = vmul.f32 -1.442695, %v1210_v25  ;;  %v5573_v39 = vmul.f32 -1.442695, %v1217_v35 }
0x11b2   :  { %v1225_v17 = vpop.permute.xlu1 %1224 }
0x11b3   :  { %6160 = vpow2.f32 %v5572_v7 }
0x11c0   :  { %v6161_v9 = vpop.eup %6160 }
0x11c1   :  { %v1214_v10 = vadd.f32 1.0, %v6161_v9 }
0x11c3   :  { %6162 = vrcp.f32 %v1214_v10 }
0x11d0   :  { %v6163_v11 = vpop.eup %6162 }
0x11d1   :  { %v1227_v20 = vmul.f32 %v6163_v11, %v1225_v17  ;;  %v272_v11 = vadd.f32 %v6664_v26, %v6932_v37 }
0x11d3   :  { %1229 = vrot.lane.b32.xlu0 %v1227_v20, %s6455_s28 }
0x121b   :  { %v1008_v13 = vpop.permute.xlu0 %1007 }
0x121c   :  { %v1010_v22 = vadd.f32 %v1008_v13, %v6915_v29 }
0x121e   :  { %6164 = vtanh.f32 %v1010_v22 }
0x122b   :  { %v6165_v15 = vpop.eup %6164 }
0x122c   :  { %1014 = vrot.lane.b32.xlu1 %v6165_v15, %s6456_s30 }
0x1245   :  { %v1230_v24 = vpop.permute.xlu0 %1229 }
0x1246   :  { %v1232_v18 = vadd.f32 %v1230_v24, %v278_v16 }
0x1248   :  { %6166 = vtanh.f32 %v1232_v18 }
0x1249   :  { %6168 = vpow2.f32 %v5573_v39 }
0x1255   :  { %v6167_v19 = vpop.eup %6166 }
0x1256   :  { %1236 = vrot.lane.b32.xlu1 %v6167_v19, %s6456_s30  ;;  %v6169_v28 = vpop.eup %6168 }
0x1257   :  { %v1221_v43 = vadd.f32 1.0, %v6169_v28 }
0x1259   :  { %6170 = vrcp.f32 %v1221_v43 }
0x1266   :  { %v6171_v50 = vpop.eup %6170 }
0x1267   :  { %v1234_v55 = vsub.f32 1.0, %v6171_v50  ;;  %v1240_v56 = vmul.f32 0.0, %v6171_v50 }
0x129e   :  { %v1015_v23 = vpop.permute.xlu1 %1014 }
0x129f   :  { %v1017_v31 = vmul.f32 %v1015_v23, %v1012_v21 }
0x12a1   :  { %v6938_v32 = vadd.f32 %v1018_v30, %v1017_v31 }
0x12a3   :  { %1021 = vrot.lane.b32.xlu0 %v6938_v32, %s6456_s30 }
0x12c8   :  { %v1237_v51 = vpop.permute.xlu1 %1236 }
0x12c9   :  { %v1239_v41 = vmul.f32 %v1237_v51, %v1234_v55 }
0x12cb   :  { %v6951_v57 = vadd.f32 %v1240_v56, %v1239_v41 }
0x1315   :  { %v1022_v53 = vpop.permute.xlu0 %1021 }
0x1316   :  { %1025 = vst.msk [vmem:[#allocation2 + $0x30] sm:$0xff] %vm142_vm0, %v1022_v53  ;;  %5876 = vmatmul.mubr.msk.f32.vlgmr.msra.gmra.mxu1 %vm142_vm0, %v1022_v53 }
0x1317   :  { %5890 = vmatpush3.msra.mxu1 %v6863_v42  ;;  %5897 = vmatprep.mubr.msk.f32.mxu1 %vm6454_vm4, %v8994_v8 }
0x1318   :  { %5891 = vmatprep.subr.mxu1 %v8994_v8 }
0x1319   :  { %5892 = vmatpush3.msra.mxu1 %v6870_v45 }
0x131a   :  { %5893 = vmatprep.subr.mxu1 %v8994_v8 }
0x131b   :  { %5894 = vmatpush3.msra.mxu1 %v6879_v47 }
0x131c   :  { %5895 = vmatprep.subr.mxu1 %v8994_v8 }
0x131d   :  { %5896 = vmatpush3.msra.mxu1 %v6886_v49 }
0x131e   :  { %5898 = vmatmul.mubr.msk.f32.vlgmr.msra.gmra.mxu1 %vm142_vm0, %v6951_v57  ;;  %5911 = vmatprep.subr.mxu1 %v8994_v8 }
0x131f   :  { %5912 = vmatpush3.msra.mxu1 %v6863_v42  ;;  %5919 = vmatprep.mubr.msk.f32.mxu1 %vm6454_vm4, %v8994_v8 }
0x1320   :  { %5913 = vmatprep.subr.mxu1 %v8994_v8 }
0x1321   :  { %5914 = vmatpush3.msra.mxu1 %v6870_v45 }
0x1322   :  { %5915 = vmatprep.subr.mxu1 %v8994_v8 }
0x1323   :  { %5916 = vmatpush3.msra.mxu1 %v6879_v47 }
0x1324   :  { %5917 = vmatprep.subr.mxu1 %v8994_v8 }
0x1325   :  { %5918 = vmatpush3.msra.mxu1 %v6886_v49 }
0x1326   :  { %5933 = vmatprep.subr.mxu1 %v8994_v8 }
0x13d6   :  { %v6968_v58 = vpop.f32.mrf.mxu1 }
0x13d8   :  { %v5877_v59 = vpop.f32.mrf.mxu1 }
0x13d9   :  { %v266_v59 = vadd.f32 %v6823_v48, %v6932_v37 }
0x13de   :  { %v1316_v60 = vpop.f32.mrf.mxu1 }
0x13df   :  { %v1317_v62 = vadd.f32 %v6908_v54, %v1316_v60 }
0x13e0   :  { %v5899_v0 = vpop.f32.mrf.mxu1 }
0x13e1   :  { %1338 = vrot.lane.b32.xlu1 %v1317_v62, %s6457_s6  ;;  %1321 = vrot.lane.b32.xlu0 %v1317_v62, %s6456_s30 }
0x1453   :  { %v1322_v2 = vpop.permute.xlu0 %1321  ;;  %v1339_v10 = vpop.permute.xlu1 %1338 }
0x1454   :  { %v1324_v4 = vadd.f32 %v1322_v2, %v6915_v29  ;;  %v1331_v29 = vadd.f32 %v1322_v2, %v272_v11 }
0x1456   :  { %v5575_v6 = vmul.f32 -1.442695, %v1324_v4  ;;  %v5576_v15 = vmul.f32 -1.442695, %v1331_v29 }
0x1458   :  { %6172 = vpow2.f32 %v5575_v6 }
0x1465   :  { %v6173_v25 = vpop.eup %6172 }
0x1466   :  { %v1328_v7 = vadd.f32 1.0, %v6173_v25 }
0x1468   :  { %6174 = vrcp.f32 %v1328_v7 }
0x1475   :  { %v6175_v9 = vpop.eup %6174 }
0x1476   :  { %v1341_v17 = vmul.f32 %v6175_v9, %v1339_v10 }
0x1478   :  { %1343 = vrot.lane.b32.xlu0 %v1341_v17, %s6455_s28 }
0x14ea   :  { %v1344_v20 = vpop.permute.xlu0 %1343 }
0x14eb   :  { %v1346_v13 = vadd.f32 %v1344_v20, %v272_v11 }
0x14ed   :  { %6176 = vtanh.f32 %v1346_v13 }
0x14ee   :  { %6178 = vpow2.f32 %v5576_v15 }
0x14fa   :  { %v6177_v22 = vpop.eup %6176 }
0x14fb   :  { %1350 = vrot.lane.b32.xlu1 %v6177_v22, %s6456_s30  ;;  %v6179_v16 = vpop.eup %6178 }
0x14fc   :  { %v1335_v24 = vadd.f32 1.0, %v6179_v16 }
0x14fe   :  { %6180 = vrcp.f32 %v1335_v24 }
0x150b   :  { %v6181_v18 = vpop.eup %6180 }
0x150c   :  { %v1348_v19 = vsub.f32 1.0, %v6181_v18  ;;  %v1354_v23 = vmul.f32 %v6181_v18, %v6951_v57 }
0x156d   :  { %v1351_v21 = vpop.permute.xlu1 %1350 }
0x156e   :  { %v1353_v30 = vmul.f32 %v1351_v21, %v1348_v19 }
0x1570   :  { %v6979_v31 = vadd.f32 %v1354_v23, %v1353_v30  ;;  %v260_v23 = vadd.f32 %v6821_v46, %v6932_v37 }
0x1572   :  { %5909 = vmatmul.mubr.msk.f32.vlgmr.msra.gmra.mxu0 %vm142_vm0, %v6979_v31 }
0x1573   :  { %5923 = vmatpush3.msra.mxu0 %v6863_v42  ;;  %5930 = vmatprep.mubr.msk.f32.mxu0 %vm6454_vm4, %v8994_v8 }
0x1574   :  { %5924 = vmatprep.subr.mxu0 %v8994_v8 }
0x1575   :  { %5925 = vmatpush3.msra.mxu0 %v6870_v45 }
0x1576   :  { %5926 = vmatprep.subr.mxu0 %v8994_v8 }
0x1577   :  { %5927 = vmatpush3.msra.mxu0 %v6879_v47 }
0x1578   :  { %5928 = vmatprep.subr.mxu0 %v8994_v8 }
0x1579   :  { %5929 = vmatpush3.msra.mxu0 %v6886_v49 }
0x157a   :  { %5944 = vmatprep.subr.mxu0 %v8994_v8 }
0x1632   :  { %v1429_v26 = vpop.f32.mrf.mxu0 }
0x1633   :  { %v1430_v35 = vadd.f32 %v6908_v54, %v1429_v26 }
0x1634   :  { %v5910_v39 = vpop.f32.mrf.mxu0 }
0x1635   :  { %1451 = vrot.lane.b32.xlu1 %v1430_v35, %s6457_s6  ;;  %1434 = vrot.lane.b32.xlu0 %v1430_v35, %s6456_s30 }
0x16a7   :  { %v1435_v28 = vpop.permute.xlu0 %1434  ;;  %v1452_v41 = vpop.permute.xlu1 %1451 }
0x16a8   :  { %v1437_v43 = vadd.f32 %v1435_v28, %v6850_v12  ;;  %v1444_v12 = vadd.f32 %v1435_v28, %v266_v59 }
0x16aa   :  { %v5578_v50 = vmul.f32 -1.442695, %v1437_v43  ;;  %v5579_v2 = vmul.f32 -1.442695, %v1444_v12 }
0x16ac   :  { %6182 = vpow2.f32 %v5578_v50 }
0x16b9   :  { %v6183_v51 = vpop.eup %6182 }
0x16ba   :  { %v1441_v53 = vadd.f32 1.0, %v6183_v51 }
0x16bc   :  { %6184 = vrcp.f32 %v1441_v53 }
0x16c9   :  { %v6185_v55 = vpop.eup %6184 }
0x16ca   :  { %v1454_v56 = vmul.f32 %v6185_v55, %v1452_v41 }
0x16cc   :  { %1456 = vrot.lane.b32.xlu0 %v1454_v56, %s6455_s28 }
0x173e   :  { %v1457_v60 = vpop.permute.xlu0 %1456 }
0x173f   :  { %v1459_v62 = vadd.f32 %v1457_v60, %v266_v59 }
0x1741   :  { %6186 = vtanh.f32 %v1459_v62 }
0x1742   :  { %6188 = vpow2.f32 %v5579_v2 }
0x174e   :  { %v6187_v0 = vpop.eup %6186 }
0x174f   :  { %1463 = vrot.lane.b32.xlu1 %v6187_v0, %s6456_s30  ;;  %v6189_v4 = vpop.eup %6188 }
0x1750   :  { %v1448_v6 = vadd.f32 1.0, %v6189_v4 }
0x1752   :  { %6190 = vrcp.f32 %v1448_v6 }
0x175f   :  { %v6191_v25 = vpop.eup %6190 }
0x1760   :  { %v1461_v7 = vsub.f32 1.0, %v6191_v25  ;;  %v1467_v10 = vmul.f32 %v6191_v25, %v6979_v31 }
0x17c1   :  { %v1464_v9 = vpop.permute.xlu1 %1463 }
0x17c2   :  { %v1466_v17 = vmul.f32 %v1464_v9, %v1461_v7  ;;  %v254_v9 = vadd.f32 %v6819_v44, %v6932_v37 }
0x17c4   :  { %v7002_v11 = vadd.f32 %v1467_v10, %v1466_v17 }
0x17c6   :  { %5920 = vmatmul.mubr.msk.f32.vlgmr.msra.gmra.mxu1 %vm142_vm0, %v7002_v11 }
0x17c7   :  { %5934 = vmatpush3.msra.mxu1 %v6863_v42  ;;  %5941 = vmatprep.mubr.msk.f32.mxu1 %vm6454_vm4, %v8994_v8 }
0x17c8   :  { %5935 = vmatprep.subr.mxu1 %v8994_v8 }
0x17c9   :  { %5936 = vmatpush3.msra.mxu1 %v6870_v45 }
0x17ca   :  { %5937 = vmatprep.subr.mxu1 %v8994_v8 }
0x17cb   :  { %5938 = vmatpush3.msra.mxu1 %v6879_v47 }
0x17cc   :  { %5939 = vmatprep.subr.mxu1 %v8994_v8 }
0x17cd   :  { %5940 = vmatpush3.msra.mxu1 %v6886_v49 }
0x17ce   :  { %5955 = vmatprep.subr.mxu1 %v8994_v8 }
0x1886   :  { %v1542_v48 = vpop.f32.mrf.mxu1 }
0x1887   :  { %v1543_v20 = vadd.f32 %v6908_v54, %v1542_v48 }
0x1888   :  { %v5921_v13 = vpop.f32.mrf.mxu1 }
0x1889   :  { %1564 = vrot.lane.b32.xlu1 %v1543_v20, %s6457_s6  ;;  %1547 = vrot.lane.b32.xlu0 %v1543_v20, %s6456_s30 }
0x18fb   :  { %v1548_v22 = vpop.permute.xlu0 %1547  ;;  %v1565_v19 = vpop.permute.xlu1 %1564 }
0x18fc   :  { %v1550_v29 = vadd.f32 %v1548_v22, %v6828_v52  ;;  %v1557_v52 = vadd.f32 %v1548_v22, %v260_v23 }
0x18fe   :  { %v5581_v15 = vmul.f32 -1.442695, %v1550_v29  ;;  %v5582_v39 = vmul.f32 -1.442695, %v1557_v52 }
0x1900   :  { %6192 = vpow2.f32 %v5581_v15 }
0x190d   :  { %v6193_v16 = vpop.eup %6192 }
0x190e   :  { %v1554_v24 = vadd.f32 1.0, %v6193_v16 }
0x1910   :  { %6194 = vrcp.f32 %v1554_v24 }
0x191d   :  { %v6195_v18 = vpop.eup %6194 }
0x191e   :  { %v1567_v21 = vmul.f32 %v6195_v18, %v1565_v19 }
0x1920   :  { %1569 = vrot.lane.b32.xlu0 %v1567_v21, %s6455_s28 }
0x1992   :  { %v1570_v30 = vpop.permute.xlu0 %1569 }
0x1993   :  { %v1572_v26 = vadd.f32 %v1570_v30, %v260_v23 }
0x1995   :  { %6196 = vtanh.f32 %v1572_v26 }
0x1996   :  { %6198 = vpow2.f32 %v5582_v39  ;;  %v248_v39 = vadd.f32 %v6782_v1, %v6932_v37 }
0x19a2   :  { %v6197_v35 = vpop.eup %6196 }
0x19a3   :  { %1576 = vrot.lane.b32.xlu1 %v6197_v35, %s6456_s30  ;;  %v6199_v28 = vpop.eup %6198 }
0x19a4   :  { %v1561_v43 = vadd.f32 1.0, %v6199_v28 }
0x19a6   :  { %6200 = vrcp.f32 %v1561_v43 }
0x19b3   :  { %v6201_v50 = vpop.eup %6200 }
0x19b4   :  { %v1574_v51 = vsub.f32 1.0, %v6201_v50  ;;  %v1580_v55 = vmul.f32 %v6201_v50, %v7002_v11 }
0x1a15   :  { %v1577_v53 = vpop.permute.xlu1 %1576 }
0x1a16   :  { %v1579_v41 = vmul.f32 %v1577_v53, %v1574_v51 }
0x1a18   :  { %v7025_v56 = vadd.f32 %v1580_v55, %v1579_v41 }
0x1a1a   :  { %5931 = vmatmul.mubr.msk.f32.vlgmr.msra.gmra.mxu0 %vm142_vm0, %v7025_v56 }
0x1a1b   :  { %5945 = vmatpush3.msra.mxu0 %v6863_v42  ;;  %5952 = vmatprep.mubr.msk.f32.mxu0 %vm6454_vm4, %v8994_v8 }
0x1a1c   :  { %5946 = vmatprep.subr.mxu0 %v8994_v8 }
0x1a1d   :  { %5947 = vmatpush3.msra.mxu0 %v6870_v45 }
0x1a1e   :  { %5948 = vmatprep.subr.mxu0 %v8994_v8 }
0x1a1f   :  { %5949 = vmatpush3.msra.mxu0 %v6879_v47 }
0x1a20   :  { %5950 = vmatprep.subr.mxu0 %v8994_v8 }
0x1a21   :  { %5951 = vmatpush3.msra.mxu0 %v6886_v49 }
0x1ada   :  { %v1655_v46 = vpop.f32.mrf.mxu0 }
0x1adb   :  { %v1656_v59 = vadd.f32 %v6908_v54, %v1655_v46 }
0x1adc   :  { %v5932_v60 = vpop.f32.mrf.mxu0 }
0x1add   :  { %1677 = vrot.lane.b32.xlu1 %v1656_v59, %s6457_s6  ;;  %1660 = vrot.lane.b32.xlu0 %v1656_v59, %s6456_s30 }
0x1b4f   :  { %v1661_v62 = vpop.permute.xlu0 %1660  ;;  %v1678_v25 = vpop.permute.xlu1 %1677 }
0x1b50   :  { %v1663_v0 = vadd.f32 %v1661_v62, %v6785_v3  ;;  %v1670_v3 = vadd.f32 %v1661_v62, %v254_v9 }
0x1b52   :  { %v5584_v12 = vmul.f32 -1.442695, %v1663_v0  ;;  %v5585_v20 = vmul.f32 -1.442695, %v1670_v3  ;;  %v6432_v3 = vld [vmem:[%s9052_s27] ss:$0 sm:$0xff] }
0x1b54   :  { %6202 = vpow2.f32 %v5584_v12 }
0x1b61   :  { %v6203_v2 = vpop.eup %6202 }
0x1b62   :  { %v1667_v4 = vadd.f32 1.0, %v6203_v2 }
0x1b64   :  { %6204 = vrcp.f32 %v1667_v4 }
0x1b71   :  { %v6205_v6 = vpop.eup %6204 }
0x1b72   :  { %v1680_v7 = vmul.f32 %v6205_v6, %v1678_v25 }
0x1b74   :  { %1682 = vrot.lane.b32.xlu0 %v1680_v7, %s6455_s28 }
0x1be6   :  { %v1683_v10 = vpop.permute.xlu0 %1682 }
0x1be7   :  { %v1685_v17 = vadd.f32 %v1683_v10, %v254_v9 }
0x1be9   :  { %6206 = vtanh.f32 %v1685_v17 }
0x1bea   :  { %6208 = vpow2.f32 %v5585_v20  ;;  %v1095_v20 = vadd.f32 %v6432_v3, %v6968_v58 }
0x1bf6   :  { %v6207_v48 = vpop.eup %6206 }
0x1bf7   :  { %1689 = vrot.lane.b32.xlu1 %v6207_v48, %s6456_s30  ;;  %v6209_v13 = vpop.eup %6208 }
0x1bf8   :  { %v1674_v22 = vadd.f32 1.0, %v6209_v13 }
0x1bfa   :  { %6210 = vrcp.f32 %v1674_v22 }
0x1c07   :  { %v6211_v29 = vpop.eup %6210 }
0x1c08   :  { %v1687_v15 = vsub.f32 1.0, %v6211_v29  ;;  %v1693_v24 = vmul.f32 %v6211_v29, %v7025_v56 }
0x1c69   :  { %v1690_v16 = vpop.permute.xlu1 %1689 }
0x1c6a   :  { %v1692_v18 = vmul.f32 %v1690_v16, %v1687_v15 }
0x1c6c   :  { %v7047_v19 = vadd.f32 %v1693_v24, %v1692_v18 }
0x1c6e   :  { %5942 = vmatmul.mubr.msk.f32.vlgmr.msra.gmra.mxu1 %vm142_vm0, %v7047_v19 }
0x1c6f   :  { %5956 = vmatpush3.msra.mxu1 %v6863_v42  ;;  %5963 = vmatprep.mubr.msk.f32.mxu1 %vm6454_vm4, %v8994_v8 }
0x1c70   :  { %5957 = vmatprep.subr.mxu1 %v8994_v8 }
0x1c71   :  { %5958 = vmatpush3.msra.mxu1 %v6870_v45 }
0x1c72   :  { %5959 = vmatprep.subr.mxu1 %v8994_v8 }
0x1c73   :  { %5960 = vmatpush3.msra.mxu1 %v6879_v47 }
0x1c74   :  { %5961 = vmatprep.subr.mxu1 %v8994_v8 }
0x1c75   :  { %5962 = vmatpush3.msra.mxu1 %v6886_v49 }
0x1c76   :  { %5994 = vmatprep.subr.mxu1 %v8994_v8 }
0x1d2e   :  { %v1768_v44 = vpop.f32.mrf.mxu1 }
0x1d2f   :  { %v1769_v42 = vadd.f32 %v6908_v54, %v1768_v44 }
0x1d30   :  { %v5943_v21 = vpop.f32.mrf.mxu1 }
0x1d31   :  { %1790 = vrot.lane.b32.xlu1 %v1769_v42, %s6457_s6  ;;  %1773 = vrot.lane.b32.xlu0 %v1769_v42, %s6456_s30 }
0x1da3   :  { %v1774_v23 = vpop.permute.xlu0 %1773  ;;  %v1791_v49 = vpop.permute.xlu1 %1790 }
0x1da4   :  { %v1776_v45 = vadd.f32 %v1774_v23, %v6754_v40  ;;  %v1783_v40 = vadd.f32 %v1774_v23, %v248_v39 }
0x1da6   :  { %v5587_v30 = vmul.f32 -1.442695, %v1776_v45  ;;  %v5588_v51 = vmul.f32 -1.442695, %v1783_v40 }
0x1da8   :  { %6212 = vpow2.f32 %v5587_v30 }
0x1db5   :  { %v6213_v47 = vpop.eup %6212 }
0x1db6   :  { %v1780_v26 = vadd.f32 1.0, %v6213_v47 }
0x1db8   :  { %6214 = vrcp.f32 %v1780_v26 }
0x1dc5   :  { %v6215_v35 = vpop.eup %6214 }
0x1dc6   :  { %v1793_v52 = vmul.f32 %v6215_v35, %v1791_v49 }
0x1dc8   :  { %1795 = vrot.lane.b32.xlu0 %v1793_v52, %s6455_s28 }
0x1e3a   :  { %v1796_v28 = vpop.permute.xlu0 %1795 }
0x1e3b   :  { %v1798_v43 = vadd.f32 %v1796_v28, %v248_v39 }
0x1e3d   :  { %6216 = vtanh.f32 %v1798_v43 }
0x1e3e   :  { %6218 = vpow2.f32 %v5588_v51 }
0x1e4a   :  { %v6217_v50 = vpop.eup %6216 }
0x1e4b   :  { %1802 = vrot.lane.b32.xlu1 %v6217_v50, %s6456_s30  ;;  %v6219_v53 = vpop.eup %6218 }
0x1e4c   :  { %v1787_v55 = vadd.f32 1.0, %v6219_v53 }
0x1e4e   :  { %6220 = vrcp.f32 %v1787_v55 }
0x1e5b   :  { %v6221_v41 = vpop.eup %6220 }
0x1e5c   :  { %v1800_v46 = vsub.f32 1.0, %v6221_v41  ;;  %v1806_v60 = vmul.f32 %v6221_v41, %v7047_v19 }
0x1ebd   :  { %v1803_v59 = vpop.permute.xlu1 %1802 }
0x1ebe   :  { %v1805_v62 = vmul.f32 %v1803_v59, %v1800_v46 }
0x1ec0   :  { %v7070_v0 = vadd.f32 %v1806_v60, %v1805_v62 }
0x1ec2   :  { %5953 = vmatmul.mubr.msk.f32.vlgmr.msra.gmra.mxu0 %vm142_vm0, %v7070_v0 }
0x1f82   :  { %v1881_v1 = vpop.f32.mrf.mxu0 }
0x1f83   :  { %v1882_v12 = vadd.f32 %v6908_v54, %v1881_v1 }
0x1f84   :  { %v5954_v2 = vpop.f32.mrf.mxu0 }
0x1f85   :  { %1903 = vrot.lane.b32.xlu1 %v1882_v12, %s6457_s6  ;;  %1886 = vrot.lane.b32.xlu0 %v1882_v12, %s6456_s30 }
0x1ff7   :  { %v1887_v4 = vpop.permute.xlu0 %1886  ;;  %v1904_v17 = vpop.permute.xlu1 %1903 }
0x1ff8   :  { %v1889_v6 = vadd.f32 %v1887_v4, %v6723_v63  ;;  %v242_v63 = vadd.f32 %v6751_v36, %v6932_v37  ;;  %v1098_v36 = vadd.f32 %v1095_v20, %v6921_v5 }
0x1ffa   :  { %v5590_v25 = vmul.f32 -1.442695, %v1889_v6  ;;  %v1896_v15 = vadd.f32 %v1887_v4, %v242_v63  ;;  %v5570_v30 = vmul.f32 -1.442695, %v1098_v36  ;;  %v2198_v6 = vld [vmem:[%s8976_s10 + $0x10] sm:$0xff] }
0x1ffc   :  { %6222 = vpow2.f32 %v5590_v25  ;;  %v5591_v16 = vmul.f32 -1.442695, %v1896_v15 }
0x2009   :  { %v6223_v7 = vpop.eup %6222 }
0x200a   :  { %v1893_v9 = vadd.f32 1.0, %v6223_v7 }
0x200c   :  { %6224 = vrcp.f32 %v1893_v9  ;;  %v2197_v9 = vld [vmem:[%s8976_s10 + $0x8] sm:$0xff] }
0x2019   :  { %v6225_v10 = vpop.eup %6224 }
0x201a   :  { %v1906_v48 = vmul.f32 %v6225_v10, %v1904_v17  ;;  %v2051_v10 = vld [vmem:[%s8977_s12 + $0x20] sm:$0xff] }
0x201c   :  { %1908 = vrot.lane.b32.xlu0 %v1906_v48, %s6455_s28 }
0x2020   :  { %1106 = vrot.lane.b32.xlu0 %v1095_v20, %s6455_s28 }
0x208e   :  { %v1909_v13 = vpop.permute.xlu0 %1908 }
0x208f   :  { %v1911_v22 = vadd.f32 %v1909_v13, %v242_v63 }
0x2091   :  { %6226 = vtanh.f32 %v1911_v22 }
0x2092   :  { %6228 = vpow2.f32 %v5591_v16  ;;  %v1107_v52 = vpop.permute.xlu0 %1106  ;;  %v2050_v16 = vld [vmem:[%s8977_s12 + $0x18] sm:$0xff] }
0x209e   :  { %v6227_v29 = vpop.eup %6226 }
0x209f   :  { %1915 = vrot.lane.b32.xlu1 %v6227_v29, %s6456_s30  ;;  %v6229_v24 = vpop.eup %6228 }
0x20a0   :  { %v1900_v18 = vadd.f32 1.0, %v6229_v24  ;;  %v2049_v24 = vld [vmem:[%s8977_s12 + $0x10] sm:$0xff] }
0x20a2   :  { %6230 = vrcp.f32 %v1900_v18 }
0x20a3   :  { %6232 = vpow2.f32 %v5570_v30 }
0x20af   :  { %v6231_v44 = vpop.eup %6230 }
0x20b0   :  { %v1913_v42 = vsub.f32 1.0, %v6231_v44  ;;  %v1919_v21 = vmul.f32 %v6231_v44, %v7070_v0  ;;  %v6233_v47 = vpop.eup %6232  ;;  %v2048_v44 = vld [vmem:[%s8977_s12 + $0x8] sm:$0xff] }
0x20b1   :  { %v1102_v26 = vadd.f32 1.0, %v6233_v47  ;;  %v2195_v47 = vld [vmem:[%s8978_s9 + $0x18] sm:$0xff] }
0x20b3   :  { %6234 = vrcp.f32 %v1102_v26  ;;  %v2194_v26 = vld [vmem:[%s8978_s9 + $0x10] sm:$0xff] }
0x20c0   :  { %v6235_v28 = vpop.eup %6234 }
0x20c1   :  { %v1109_v43 = vmul.f32 %v6235_v28, %v1107_v52  ;;  %v1116_v1 = vsub.f32 1.0, %v6235_v28 }
0x2111   :  { %v1916_v58 = vpop.permute.xlu1 %1915 }
0x2112   :  { %v1918_v23 = vmul.f32 %v1916_v58, %v1913_v42  ;;  %v2047_v42 = vld [vmem:[%s8977_s12] sm:$0xff] }
0x2114   :  { %v7088_v45 = vadd.f32 %v1919_v21, %v1918_v23 }
0x2116   :  { %5964 = vmatmul.mubr.msk.f32.vlgmr.msra.gmra.mxu1 %vm142_vm0, %v7088_v45 }
0x2117   :  { %6002 = vmatprep.mubr.msk.f32.mxu1 %vm6454_vm4, %v8994_v8 }
0x21d6   :  { %v1994_v35 = vpop.f32.mrf.mxu1 }
0x21d7   :  { %v1995_v49 = vadd.f32 %v6908_v54, %v1994_v35  ;;  %v2192_v35 = vld [vmem:[%s8978_s9] sm:$0xff] }
0x21d8   :  { %v5965_v39 = vpop.f32.mrf.mxu1 }
0x21d9   :  { %2016 = vrot.lane.b32.xlu0 %v1995_v49, %s6457_s6  ;;  %1999 = vrot.lane.b32.xlu1 %v1995_v49, %s6456_s30  ;;  %v2355_v49 = vld [vmem:[%s8979_s14 + $0x10] sm:$0xff] }
0x21dd   :  { %1111 = vrot.lane.b32.xlu1 %v1109_v43, %s6455_s28 }
0x224b   :  { %v2000_v50 = vpop.permute.xlu1 %1999  ;;  %v2017_v60 = vpop.permute.xlu0 %2016 }
0x224c   :  { %v2002_v40 = vadd.f32 %v2000_v50, %v6692_v38  ;;  %v1122_v38 = vmul.f32 %v6235_v28, %v6938_v32  ;;  %v236_v32 = vadd.f32 %v6720_v61, %v6932_v37  ;;  %v2196_v61 = vld [vmem:[%s8976_s10] sm:$0xff] }
0x224e   :  { %v5593_v51 = vmul.f32 -1.442695, %v2002_v40  ;;  %v2009_v17 = vadd.f32 %v2000_v50, %v236_v32 }
0x224f   :  { %v1112_v53 = vpop.permute.xlu1 %1111 }
0x2250   :  { %6236 = vpow2.f32 %v5593_v51  ;;  %v1114_v55 = vadd.f32 %v1112_v53, %v6921_v5  ;;  %v2199_v5 = vld [vmem:[%s8976_s10 + $0x18] sm:$0xff]  ;;  %v5594_v48 = vmul.f32 -1.442695, %v2009_v17 }
0x2251   :  { %5995 = vmatpush3.msra.mxu1 %v2199_v5 }
0x2252   :  { %6238 = vtanh.f32 %v1114_v55  ;;  %5996 = vmatprep.subr.mxu1 %v8994_v8 }
0x2253   :  { %5997 = vmatpush3.msra.mxu1 %v2198_v6 }
0x2254   :  { %5998 = vmatprep.subr.mxu1 %v8994_v8 }
0x2255   :  { %5999 = vmatpush3.msra.mxu1 %v2197_v9 }
0x2256   :  { %6000 = vmatprep.subr.mxu1 %v8994_v8 }
0x2257   :  { %6001 = vmatpush3.msra.mxu1 %v2196_v61 }
0x2258   :  { %6005 = vmatprep.subr.mxu1 %v8994_v8 }
0x225d   :  { %v6237_v54 = vpop.eup %6236 }
0x225e   :  { %v2006_v41 = vadd.f32 1.0, %v6237_v54 }
0x225f   :  { %v6239_v46 = vpop.eup %6238 }
0x2260   :  { %6240 = vrcp.f32 %v2006_v41  ;;  %1118 = vrot.lane.b32.xlu1 %v6239_v46, %s6456_s30 }
0x226d   :  { %v6241_v59 = vpop.eup %6240 }
0x226e   :  { %v2019_v62 = vmul.f32 %v6241_v59, %v2017_v60 }
0x2270   :  { %2021 = vrot.lane.b32.xlu0 %v2019_v62, %s6455_s28 }
0x22d2   :  { %v1119_v12 = vpop.permute.xlu1 %1118 }
0x22d3   :  { %v1121_v2 = vmul.f32 %v1119_v12, %v1116_v1  ;;  %v5606_v1 = vld [vmem:[%s8980_s11] ss:$0 sm:$0xff] }
0x22d5   :  { %v1123_v4 = vadd.f32 %v1122_v38, %v1121_v2 }
0x22d7   :  { %1125 = vrot.lane.b32.xlu1 %v1123_v4, %s6456_s30 }
0x22db   :  { %1922 = vrot.lane.b32.xlu1 %v7088_v45, %s6457_s6 }
0x22df   :  { %1696 = vrot.lane.b32.xlu1 %v7047_v19, %s6457_s6  ;;  %v2052_v19 = vld [vmem:[%s8977_s12 + $0x28] sm:$0xff] }
0x22e2   :  { %v2022_v25 = vpop.permute.xlu0 %2021 }
0x22e3   :  { %v2024_v7 = vadd.f32 %v2022_v25, %v236_v32  ;;  %1470 = vrot.lane.b32.xlu1 %v7002_v11, %s6457_s6  ;;  %v2054_v11 = vld [vmem:[%s8977_s12 + $0x38] sm:$0xff] }
0x22e4   :  { %5966 = vmatprep.subr.mxu0 %v2054_v11 }
0x22e5   :  { %6242 = vtanh.f32 %v2024_v7  ;;  %5967 = vmatpush3.msra.mxu0 %v2054_v11 }
0x22e6   :  { %6244 = vpow2.f32 %v5594_v48 }
0x22e7   :  { %1243 = vrot.lane.b32.xlu1 %v6951_v57, %s6457_s6  ;;  %v2053_v57 = vld [vmem:[%s8977_s12 + $0x30] sm:$0xff] }
0x22e8   :  { %5968 = vmatprep.subr.mxu0 %v2053_v57 }
0x22e9   :  { %5969 = vmatpush3.msra.mxu0 %v2053_v57 }
0x22ea   :  { %5970 = vmatprep.subr.mxu0 %v2052_v19 }
0x22eb   :  { %5971 = vmatpush3.msra.mxu0 %v2052_v19 }
0x22ec   :  { %5972 = vmatprep.subr.mxu0 %v2051_v10 }
0x22ed   :  { %5973 = vmatpush3.msra.mxu0 %v2051_v10 }
0x22ee   :  { %5974 = vmatprep.subr.mxu0 %v2050_v16 }
0x22ef   :  { %5975 = vmatpush3.msra.mxu0 %v2050_v16 }
0x22f0   :  { %5976 = vmatprep.subr.mxu0 %v2049_v24 }
0x22f1   :  { %5977 = vmatpush3.msra.mxu0 %v2049_v24 }
0x22f2   :  { %v6243_v37 = vpop.eup %6242  ;;  %5978 = vmatprep.subr.mxu0 %v2048_v44 }
0x22f3   :  { %2028 = vrot.lane.b32.xlu0 %v6243_v37, %s6456_s30  ;;  %v6245_v20 = vpop.eup %6244  ;;  %5979 = vmatpush3.msra.mxu0 %v2048_v44  ;;  %v5595_v37 = vld [vmem:[%s8981_s13] ss:$0 sm:$0xff] }
0x22f4   :  { %v2013_v13 = vadd.f32 1.0, %v6245_v20  ;;  %5980 = vmatprep.subr.mxu0 %v2047_v42 }
0x22f5   :  { %5981 = vmatpush3.msra.mxu0 %v2047_v42 }
0x22f6   :  { %6246 = vrcp.f32 %v2013_v13 }
0x2303   :  { %v6247_v18 = vpop.eup %6246 }
0x2304   :  { %v2026_v58 = vsub.f32 1.0, %v6247_v18  ;;  %v2032_v23 = vmul.f32 %v6247_v18, %v7088_v45  ;;  %v2193_v45 = vld [vmem:[%s8978_s9 + $0x8] sm:$0xff] }
0x2349   :  { %v1126_v3 = vpop.permute.xlu1 %1125 }
0x234a   :  { %1129 = vst.msk [vmem:[#allocation2 + $0x38] sm:$0xff] %vm142_vm0, %v1126_v3 }
0x234d   :  { %v1923_v63 = vpop.permute.xlu1 %1922 }
0x234e   :  { %1925 = vst.msk [vmem:[#allocation2 + $0x8] sm:$0xff] %vm1246_vm10, %v1923_v63 }
0x2351   :  { %v1697_v22 = vpop.permute.xlu1 %1696 }
0x2352   :  { %1699 = vst.msk [vmem:[#allocation2 + $0x18] sm:$0xff] %vm1246_vm10, %v1697_v22 }
0x2355   :  { %v1471_v29 = vpop.permute.xlu1 %1470  ;;  %v7214_v50 = vld [vmem:[#allocation2 + $0x8] sm:$0xff] }
0x2356   :  { %1473 = vst.msk [vmem:[#allocation2 + $0x28] sm:$0xff] %vm1246_vm10, %v1471_v29  ;;  %9054 = vst [vmem:[#allocation4_spill] sm:$0xff] %v7214_v50 }
0x2359   :  { %v1244_v15 = vpop.permute.xlu1 %1243  ;;  %v7223_v53 = vld [vmem:[#allocation2 + $0x18] sm:$0xff] }
0x235a   :  { %1247 = vst.msk [vmem:[#allocation2 + $0x38] sm:$0xff] %vm1246_vm10, %v1244_v15  ;;  %9055 = vst [vmem:[#allocation5_spill] sm:$0xff] %v7223_v53 }
0x235d   :  { %v7231_v54 = vld [vmem:[#allocation2 + $0x28] sm:$0xff] }
0x2361   :  { %v7239_v46 = vld [vmem:[#allocation2 + $0x38] sm:$0xff] }
0x2365   :  { %v2029_v21 = vpop.permute.xlu0 %2028 }
0x2366   :  { %v2031_v36 = vmul.f32 %v2029_v21, %v2026_v58  ;;  %v7283_v21 = vld [vmem:[%s8982_s15] ss:$0 sm:$0xff] }
0x2368   :  { %v2033_v30 = vadd.f32 %v2032_v23, %v2031_v36 }
0x236a   :  { %2035 = vrot.lane.b32.xlu0 %v2033_v30, %s6457_s6  ;;  %6003 = vmatmul.mubr.msk.f32.vlgmr.msra.gmra.mxu1 %vm142_vm0, %v2033_v30 }
0x236b   :  { %6006 = vmatpush3.msra.mxu1 %v2195_v47  ;;  %6013 = vmatprep.mubr.msk.f32.mxu1 %vm6454_vm4, %v8994_v8 }
0x236c   :  { %6007 = vmatprep.subr.mxu1 %v8994_v8 }
0x236d   :  { %6008 = vmatpush3.msra.mxu1 %v2194_v26 }
0x236e   :  { %6009 = vmatprep.subr.mxu1 %v8994_v8  ;;  %1809 = vrot.lane.b32.xlu0 %v7070_v0, %s6457_s6  ;;  %v2356_v0 = vld [vmem:[%s8979_s14 + $0x18] sm:$0xff] }
0x236f   :  { %6010 = vmatpush3.msra.mxu1 %v2193_v45 }
0x2370   :  { %6011 = vmatprep.subr.mxu1 %v8994_v8 }
0x2371   :  { %6012 = vmatpush3.msra.mxu1 %v2192_v35 }
0x2372   :  { %6014 = vmatmul.mubr.msk.f32.vlgmr.msra.gmra.mxu1 %vm142_vm0, %v1126_v3  ;;  %1583 = vrot.lane.b32.xlu0 %v7025_v56, %s6457_s6  ;;  %v2354_v56 = vld [vmem:[%s8979_s14 + $0x8] sm:$0xff] }
0x2373   :  { %6016 = vmatprep.subr.mxu1 %v8994_v8  ;;  %6024 = vmatprep.mubr.msk.f32.mxu1 %vm6454_vm4, %v8994_v8 }
0x2374   :  { %6017 = vmatpush3.msra.mxu1 %v2356_v0 }
0x2375   :  { %6018 = vmatprep.subr.mxu1 %v8994_v8 }
0x2376   :  { %1357 = vrot.lane.b32.xlu0 %v6979_v31, %s6457_s6  ;;  %6019 = vmatpush3.msra.mxu1 %v2355_v49  ;;  %v2353_v31 = vld [vmem:[%s8979_s14] sm:$0xff] }
0x2377   :  { %6020 = vmatprep.subr.mxu1 %v8994_v8 }
0x2378   :  { %6021 = vmatpush3.msra.mxu1 %v2354_v56 }
0x2379   :  { %6022 = vmatprep.subr.mxu1 %v8994_v8 }
0x237a   :  { %6023 = vmatpush3.msra.mxu1 %v2353_v31 }
0x237b   :  { %6027 = vmatprep.subr.mxu1 %v8994_v8 }
0x23dc   :  { %v2036_v52 = vpop.permute.xlu0 %2035 }
0x23dd   :  { %2038 = vst.msk [vmem:[#allocation2] sm:$0xff] %vm1246_vm10, %v2036_v52 }
0x23e0   :  { %v1810_v39 = vpop.permute.xlu0 %1809 }
0x23e1   :  { %1812 = vst.msk [vmem:[#allocation2 + $0x10] sm:$0xff] %vm1246_vm10, %v1810_v39 }
0x23e4   :  { %v1584_v28 = vpop.permute.xlu0 %1583  ;;  %v7209_v43 = vld [vmem:[#allocation2] sm:$0xff] }
0x23e5   :  { %1586 = vst.msk [vmem:[#allocation2 + $0x20] sm:$0xff] %vm1246_vm10, %v1584_v28  ;;  %5982 = vmatprep.mubr.msk.f32.mxu0 %vm2062_vm11, %v7209_v43 }
0x23e6   :  { %5983 = vmatmul.mubr.msk.f32.vlgmr.msra.gmra.mxu0 %vm2062_vm11, %v7214_v50 }
0x23e8   :  { %v1358_v40 = vpop.permute.xlu0 %1357  ;;  %v7218_v51 = vld [vmem:[#allocation2 + $0x10] sm:$0xff] }
0x23e9   :  { %1360 = vst.msk [vmem:[#allocation2 + $0x30] sm:$0xff] %vm1246_vm10, %v1358_v40  ;;  %5985 = vmatprep.mubr.msk.f32.mxu0 %vm2062_vm11, %v7218_v51 }
0x23ea   :  { %5986 = vmatmul.mubr.msk.f32.gmra.mxu0 %vm2062_vm11, %v7223_v53 }
0x23ec   :  { %v7227_v55 = vld [vmem:[#allocation2 + $0x20] sm:$0xff] }
0x23ed   :  { %5988 = vmatprep.mubr.msk.f32.mxu0 %vm2062_vm11, %v7227_v55 }
0x23ee   :  { %5989 = vmatmul.mubr.msk.f32.gmra.mxu0 %vm2062_vm11, %v7231_v54 }
0x23f0   :  { %v7235_v41 = vld [vmem:[#allocation2 + $0x30] sm:$0xff] }
0x23f1   :  { %5991 = vmatprep.mubr.msk.f32.mxu0 %vm2062_vm11, %v7235_v41 }
0x23f2   :  { %5992 = vmatmul.mubr.msk.f32.gmra.mxu0 %vm2062_vm11, %v7239_v46 }
0x23f3   :  { %2771 = vmatprep.mubr.f32.mxu0 %v8994_v8 }
0x242a   :  { %v2268_v59 = vpop.f32.mrf.mxu1 }
0x242c   :  { %v6004_v60 = vpop.f32.mrf.mxu1 }
0x2432   :  { %v2340_v62 = vpop.f32.mrf.mxu1 }
0x2433   :  { %v2341_v12 = vadd.f32 %v2340_v62, %v2268_v59 }
0x2434   :  { %v6015_v38 = vpop.f32.mrf.mxu1 }
0x2435   :  { %v2351_v2 = vadd.f32 %v5606_v1, %v2341_v12 }
0x2437   :  { %6248 = vtanh.f32 %v2351_v2 }
0x2444   :  { %v7247_v4 = vpop.eup %6248 }
0x2445   :  { %6025 = vmatmul.mubr.msk.f32.vlgmr.msra.gmra.mxu1 %vm142_vm0, %v7247_v4 }
0x2446   :  { %6035 = vmatprep.mubr.msk.f32.mxu1 %vm6454_vm4, %v8994_v8 }
0x24a6   :  { %v5984_v5 = vpop.f32.mrf.mxu0 }
0x24a7   :  { %v7256_v57 = vadd.f32 %v5984_v5, %v5595_v37 }
0x24a8   :  { %v2153_v6 = vpop.f32.mrf.mxu0 }
0x24a9   :  { %v7258_v19 = vadd.f32 %v5595_v37, %v2153_v6 }
0x24aa   :  { %v5987_v32 = vpop.f32.mrf.mxu0 }
0x24ab   :  { %v7269_v22 = vadd.f32 %v5987_v32, %v5595_v37 }
0x24ac   :  { %v2163_v25 = vpop.f32.mrf.mxu0 }
0x24ad   :  { %v7262_v17 = vadd.f32 %v5595_v37, %v2163_v25  ;;  %v7308_v25 = vsub.s32 %v6600_v14, %v6677_v33 }
0x24ae   :  { %v5990_v7 = vpop.f32.mrf.mxu0 }
0x24af   :  { %v7274_v18 = vadd.f32 %v5990_v7, %v5595_v37 }
0x24b0   :  { %v2173_v9 = vpop.f32.mrf.mxu0 }
0x24b1   :  { %v7260_v10 = vadd.f32 %v5595_v37, %v2173_v9 }
0x24b2   :  { %v5993_v61 = vpop.f32.mrf.mxu0 }
0x24b3   :  { %v7277_v42 = vadd.f32 %v5993_v61, %v5595_v37 }
0x24b4   :  { %v2183_v11 = vpop.f32.mrf.mxu0 }
0x24b5   :  { %v7264_v3 = vadd.f32 %v5595_v37, %v2183_v11 }
0x2505   :  { %v2426_v48 = vpop.f32.mrf.mxu1 }
0x2506   :  { %v2444_v20 = vadd.f32 %v2426_v48, %v7256_v57  ;;  %v2443_v63 = vadd.f32 %v2426_v48, %v7258_v19  ;;  %v2447_v13 = vadd.f32 %v2426_v48, %v7260_v10  ;;  %v2445_v15 = vadd.f32 %v2426_v48, %v7262_v17 }
0x2507   :  { %v6026_v29 = vpop.f32.mrf.mxu1  ;;  %v2449_v16 = vadd.f32 %v2426_v48, %v7264_v3  ;;  %v2446_v24 = vadd.f32 %v2426_v48, %v7269_v22  ;;  %v2448_v44 = vadd.f32 %v2426_v48, %v7274_v18  ;;  %v2450_v58 = vadd.f32 %v2426_v48, %v7277_v42 }
0x2508   :  { %6250 = vtanh.f32 %v2444_v20 }
0x2509   :  { %6252 = vtanh.f32 %v2443_v63 }
0x250a   :  { %6254 = vtanh.f32 %v2447_v13 }
0x250b   :  { %6256 = vtanh.f32 %v2445_v15 }
0x250c   :  { %6258 = vtanh.f32 %v2449_v16 }
0x250d   :  { %6260 = vtanh.f32 %v2446_v24 }
0x250e   :  { %6262 = vtanh.f32 %v2448_v44 }
0x250f   :  { %6264 = vtanh.f32 %v2450_v58 }
0x2515   :  { %v6251_v23 = vpop.eup %6250 }
0x2516   :  { %v6253_v36 = vpop.eup %6252  ;;  %v2466_v30 = vmul.f32 %v6251_v23, %v7283_v21 }
0x2517   :  { %v6255_v47 = vpop.eup %6254  ;;  %v2465_v26 = vmul.f32 %v6253_v36, %v7283_v21  ;;  %v7323_v36 = vld [vmem:[%s8984_s0] sm:$0xff] }
0x2518   :  { %v6257_v45 = vpop.eup %6256  ;;  %v2476_v35 = vsel %vm142_vm0, %v2466_v30, 0.0  ;;  %v2469_v0 = vmul.f32 %v6255_v47, %v7283_v21  ;;  %vm281_vm6 = vcmp.ne.s32.totalorder %v7323_v36, 1 }
0x2519   :  { %v6259_v49 = vpop.eup %6258  ;;  %2477 = vadd.xlane.f32.xlu1 %v2476_v35  ;;  %v2473_v56 = vsel %vm142_vm0, %v2465_v26, 0.0  ;;  %v2467_v31 = vmul.f32 %v6257_v45, %v7283_v21 }
0x251a   :  { %v6261_v52 = vpop.eup %6260  ;;  %2474 = vadd.xlane.f32.xlu0 %v2473_v56  ;;  %v2485_v39 = vsel %vm142_vm0, %v2469_v0, 0.0  ;;  %v2471_v28 = vmul.f32 %v6259_v49, %v7283_v21 }
0x251b   :  { %v2479_v40 = vsel %vm142_vm0, %v2467_v31, 0.0  ;;  %v2468_v59 = vmul.f32 %v6261_v52, %v7283_v21  ;;  %v6263_v60 = vpop.eup %6262 }
0x251c   :  { %v2491_v62 = vsel %vm142_vm0, %v2471_v28, 0.0  ;;  %v2470_v12 = vmul.f32 %v6263_v60, %v7283_v21  ;;  %v6265_v38 = vpop.eup %6264 }
0x251d   :  { %2486 = vadd.xlane.f32.xlu1 %v2485_v39  ;;  %v2482_v1 = vsel %vm142_vm0, %v2468_v59, 0.0  ;;  %v2472_v5 = vmul.f32 %v6265_v38, %v7283_v21 }
0x251e   :  { %2480 = vadd.xlane.f32.xlu0 %v2479_v40  ;;  %v2488_v2 = vsel %vm142_vm0, %v2470_v12, 0.0 }
0x251f   :  { %v2494_v6 = vsel %vm142_vm0, %v2472_v5, 0.0 }
0x2521   :  { %2492 = vadd.xlane.f32.xlu1 %v2491_v62 }
0x2522   :  { %2483 = vadd.xlane.f32.xlu0 %v2482_v1 }
0x2526   :  { %2489 = vadd.xlane.f32.xlu0 %v2488_v2 }
0x252a   :  { %2495 = vadd.xlane.f32.xlu0 %v2494_v6 }
0x25a2   :  { %v2478_v7 = vpop.xlane.xlu1 %2477 }
0x25a3   :  { %v2475_v32 = vpop.xlane.xlu0 %2474  ;;  %v2512_v61 = vrot.slane %v2478_v7, %v7308_v25 }
0x25a4   :  { %v2508_v37 = vrot.slane %v2475_v32, %v7308_v25 }
0x25a6   :  { %v2487_v48 = vpop.xlane.xlu1 %2486  ;;  %v2538_v63 = vsel %vm2537_vm13, %v2512_v61, %v2508_v37 }
0x25a7   :  { %v2481_v9 = vpop.xlane.xlu0 %2480  ;;  %v2524_v16 = vrot.slane %v2487_v48, %v7308_v25  ;;  %v7342_v48 = vsub.s32 4, %v6677_v33 }
0x25a8   :  { %v2516_v11 = vrot.slane %v2481_v9, %v7308_v25 }
0x25a9   :  { %9056 = vst [vmem:[#allocation6_spill] sm:$0xff] %v7342_v48 }
0x25aa   :  { %v2540_v29 = vsel %vm2539_vm14, %v2516_v11, %v2538_v63  ;;  %v2493_v44 = vpop.xlane.xlu1 %2492 }
0x25ab   :  { %v2484_v20 = vpop.xlane.xlu0 %2483  ;;  %v2532_v47 = vrot.slane %v2493_v44, %v7308_v25  ;;  %v7358_v44 = vsub.s32 5, %v6677_v33 }
0x25ac   :  { %v2520_v13 = vrot.slane %v2484_v20, %v7308_v25  ;;  %v7345_v20 = vsub.s32 2, %v6677_v33 }
0x25ad   :  { %9058 = vst [vmem:[#allocation8_spill] sm:$0xff] %v7358_v44 }
0x25ae   :  { %v2542_v15 = vsel %vm2541_vm15, %v2520_v13, %v2540_v29  ;;  %v7350_v29 = vsub.s32 6, %v6677_v33 }
0x25af   :  { %v2490_v24 = vpop.xlane.xlu0 %2489  ;;  %v2544_v23 = vsel %vm2543_vm1, %v2524_v16, %v2542_v15  ;;  %v7353_v15 = vsub.s32 3, %v6677_v33 }
0x25b0   :  { %v2528_v58 = vrot.slane %v2490_v24, %v7308_v25  ;;  %9057 = vst [vmem:[#allocation7_spill] sm:$0xff] %v7350_v29 }
0x25b2   :  { %v2546_v30 = vsel %vm2545_vm2, %v2528_v58, %v2544_v23  ;;  %v2433_v58 = vld [vmem:[%s8985_s2] sm:$0xff] }
0x25b3   :  { %v2496_v26 = vpop.xlane.xlu0 %2495  ;;  %v2548_v35 = vsel %vm2547_vm3, %v2532_v47, %v2546_v30  ;;  %v7365_v30 = vsub.s32 7, %v6677_v33  ;;  %v7370_v47 = vld [vmem:[%s8986_s16 + $0xf8] sm:$0xff] }
0x25b4   :  { %v2536_v45 = vrot.slane %v2496_v26, %v7308_v25  ;;  %v7375_v26 = vld [vmem:[%s8986_s16 + $0xf0] sm:$0xff]  ;;  %2707 = vmatprep.subr.mxu0 %v7370_v47 }
0x25b5   :  { %9059 = vst [vmem:[#allocation9_spill] sm:$0xff] %v7365_v30  ;;  %2708 = vmatpush1.msra.mxu0 %v7375_v26 }
0x25b6   :  { %v2550_v0 = vsel %vm2549_vm5, %v2536_v45, %v2548_v35  ;;  %v7380_v45 = vld [vmem:[%s8986_s16 + $0xe8] sm:$0xff]  ;;  %v7388_v35 = vld [vmem:[%s8986_s16 + $0xe0] sm:$0xff] }
0x25b7   :  { %v2552_v49 = vsel %vm281_vm6, %v2550_v0, -1e+10  ;;  %2709 = vmatprep.subr.mxu0 %v7380_v45  ;;  %v7394_v0 = vld [vmem:[%s8986_s16 + $0xd8] sm:$0xff] }
0x25b8   :  { %v2553_v56 = vsel %vm2441_vm12, %v2552_v49, -inf  ;;  %2710 = vmatpush1.msra.mxu0 %v7388_v35 }
0x25b9   :  { %v2554_v31 = vrot.slane %v2553_v56, 4  ;;  %2711 = vmatprep.subr.mxu0 %v7394_v0 }
0x25bb   :  { %v2555_v52 = vmax.f32 %v2553_v56, %v2554_v31  ;;  %v7407_v56 = vld [vmem:[%s8986_s16 + $0xc8] sm:$0xff]  ;;  %v7413_v31 = vld [vmem:[%s8986_s16 + $0xc0] sm:$0xff] }
0x25bd   :  { %v2556_v39 = vrot.slane %v2555_v52, 2 }
0x25bf   :  { %v2557_v28 = vmax.f32 %v2555_v52, %v2556_v39  ;;  %v7419_v52 = vld [vmem:[%s8986_s16 + $0xb8] sm:$0xff]  ;;  %v7425_v39 = vld [vmem:[%s8986_s16 + $0xb0] sm:$0xff] }
0x25c1   :  { %v2558_v40 = vrot.slane %v2557_v28, 1 }
0x25c3   :  { %v2559_v59 = vmax.f32 %v2557_v28, %v2558_v40  ;;  %v7431_v28 = vld [vmem:[%s8986_s16 + $0xa8] sm:$0xff]  ;;  %v7437_v40 = vld [vmem:[%s8986_s16 + $0xa0] sm:$0xff] }
0x25c5   :  { %v2560_v60 = vsub.f32 %v2552_v49, %v2559_v59  ;;  %v7401_v49 = vld [vmem:[%s8986_s16 + $0xd0] sm:$0xff]  ;;  %v7443_v59 = vld [vmem:[%s8986_s16 + $0x98] sm:$0xff] }
0x25c6   :  { %2712 = vmatpush1.msra.mxu0 %v7401_v49 }
0x25c7   :  { %v2561_v62 = vmul.f32 1.442695, %v2560_v60  ;;  %2713 = vmatprep.subr.mxu0 %v7407_v56  ;;  %v7449_v60 = vld [vmem:[%s8986_s16 + $0x90] sm:$0xff] }
0x25c8   :  { %2714 = vmatpush1.msra.mxu0 %v7413_v31 }
0x25c9   :  { %6266 = vpow2.f32 %v2561_v62  ;;  %2715 = vmatprep.subr.mxu0 %v7419_v52  ;;  %v7455_v62 = vld [vmem:[%s8986_s16 + $0x88] sm:$0xff] }
0x25ca   :  { %2716 = vmatpush1.msra.mxu0 %v7425_v39 }
0x25cb   :  { %2717 = vmatprep.subr.mxu0 %v7431_v28 }
0x25cc   :  { %2718 = vmatpush1.msra.mxu0 %v7437_v40 }
0x25cd   :  { %2719 = vmatprep.subr.mxu0 %v7443_v59 }
0x25ce   :  { %2720 = vmatpush1.msra.mxu0 %v7449_v60 }
0x25cf   :  { %2721 = vmatprep.subr.mxu0 %v7455_v62 }
0x25d6   :  { %v6267_v1 = vpop.eup %6266 }
0x25d7   :  { %v2563_v12 = vsel %vm2441_vm12, %v6267_v1, 0.0 }
0x25d8   :  { %v2564_v38 = vrot.slane %v2563_v12, 4 }
0x25da   :  { %v2565_v2 = vadd.f32 %v2564_v38, %v2563_v12  ;;  %v7467_v12 = vld [vmem:[%s8986_s16 + $0x78] sm:$0xff]  ;;  %v7473_v38 = vld [vmem:[%s8986_s16 + $0x70] sm:$0xff] }
0x25dc   :  { %v2566_v5 = vrot.slane %v2565_v2, 2 }
0x25de   :  { %v2567_v6 = vadd.f32 %v2566_v5, %v2565_v2  ;;  %v7479_v2 = vld [vmem:[%s8986_s16 + $0x68] sm:$0xff]  ;;  %v7485_v5 = vld [vmem:[%s8986_s16 + $0x60] sm:$0xff] }
0x25e0   :  { %v2568_v32 = vrot.slane %v2567_v6, 1 }
0x25e2   :  { %v2569_v7 = vadd.f32 %v2568_v32, %v2567_v6  ;;  %v7491_v6 = vld [vmem:[%s8986_s16 + $0x58] sm:$0xff]  ;;  %v7497_v32 = vld [vmem:[%s8986_s16 + $0x50] sm:$0xff] }
0x25e4   :  { %6268 = vrcp.f32 %v2569_v7  ;;  %v7503_v7 = vld [vmem:[%s8986_s16 + $0x48] sm:$0xff] }
0x25f1   :  { %v6269_v9 = vpop.eup %6268 }
0x25f2   :  { %v2571_v61 = vmul.f32 %v6269_v9, %v6267_v1  ;;  %v7461_v1 = vld [vmem:[%s8986_s16 + $0x80] sm:$0xff] }
0x25f3   :  { %2722 = vmatpush1.msra.mxu0 %v7461_v1 }
0x25f4   :  { %5613 = vst.msk [vmem:[%s8983_s20 + $0x8] sm:$0xff] %vm2441_vm12, %v2571_v61  ;;  %v2582_v37 = vrot.slane %v2571_v61, %v6928_v27  ;;  %v2575_v11 = vrot.slane %v2571_v61, %v6680_v34  ;;  %v2603_v63 = vrot.slane %v2571_v61, %v7342_v48  ;;  %v2589_v13 = vrot.slane %v2571_v61, %v7345_v20 }
0x25f5   :  { %v2617_v16 = vrot.slane %v2571_v61, %v7350_v29  ;;  %v2596_v24 = vrot.slane %v2571_v61, %v7353_v15  ;;  %v2610_v23 = vrot.slane %v2571_v61, %v7358_v44  ;;  %v2624_v33 = vrot.slane %v2571_v61, %v7365_v30  ;;  %2723 = vmatprep.subr.mxu0 %v7467_v12 }
0x25f6   :  { %2584 = vbcast.lane.b32.xlu0 %v2582_v37, 256  ;;  %2577 = vbcast.lane.b32.xlu1 %v2575_v11, 256 }
0x25f7   :  { %2724 = vmatpush1.msra.mxu0 %v7473_v38 }
0x25f8   :  { %2725 = vmatprep.subr.mxu0 %v7479_v2 }
0x25f9   :  { %2726 = vmatpush1.msra.mxu0 %v7485_v5 }
0x25fa   :  { %2605 = vbcast.lane.b32.xlu0 %v2603_v63, 256  ;;  %2591 = vbcast.lane.b32.xlu1 %v2589_v13, 256 }
0x25fb   :  { %2727 = vmatprep.subr.mxu0 %v7491_v6 }
0x25fc   :  { %2728 = vmatpush1.msra.mxu0 %v7497_v32 }
0x25fd   :  { %2729 = vmatprep.subr.mxu0 %v7503_v7 }
0x25fe   :  { %2619 = vbcast.lane.b32.xlu0 %v2617_v16, 256  ;;  %2598 = vbcast.lane.b32.xlu1 %v2596_v24, 256 }
0x2602   :  { %2435 = vperm.xlu0 %6118, %v2433_v58   ;;  %2612 = vbcast.lane.b32.xlu1 %v2610_v23, 256 }
0x2606   :  { %2658 = vrot.lane.b32.xlu0 %v7247_v4, %s6456_s30  ;;  %2626 = vbcast.lane.b32.xlu1 %v2624_v33, 256 }
0x2668   :  { %v2585_v9 = vpop.permute.xlu0 %2584  ;;  %v2578_v61 = vpop.permute.xlu1 %2577 }
0x2669   :  { %v2629_v37 = vmul.f32 %v2585_v9, %v7214_v50  ;;  %v2628_v11 = vmul.f32 %v2578_v61, %v7209_v43  ;;  %v7519_v43 = vld [vmem:[%s8986_s16 + $0x40] sm:$0xff]  ;;  %v7524_v61 = vld [vmem:[%s8986_s16 + $0x38] sm:$0xff] }
0x266a   :  { %2730 = vmatpush1.msra.mxu0 %v7519_v43 }
0x266b   :  { %v2637_v16 = vsel %vm2062_vm11, %v2629_v37, 0.0  ;;  %v2636_v24 = vsel %vm2062_vm11, %v2628_v11, 0.0  ;;  %2731 = vmatprep.subr.mxu0 %v7524_v61 }
0x266c   :  { %v2606_v63 = vpop.permute.xlu0 %2605  ;;  %v2592_v13 = vpop.permute.xlu1 %2591  ;;  %v2638_v33 = vadd.f32 %v2637_v16, %v2636_v24 }
0x266d   :  { %v2630_v58 = vmul.f32 %v2592_v13, %v7218_v51  ;;  %v2632_v30 = vmul.f32 %v2606_v63, %v7227_v55  ;;  %v7529_v51 = vld [vmem:[%s8986_s16 + $0x30] sm:$0xff]  ;;  %v7542_v63 = vld [vmem:[%s8986_s16 + $0x20] sm:$0xff] }
0x266e   :  { %2732 = vmatpush1.msra.mxu0 %v7529_v51 }
0x266f   :  { %v2639_v23 = vsel %vm2062_vm11, %v2630_v58, 0.0  ;;  %v2643_v13 = vsel %vm2062_vm11, %v2632_v30, 0.0  ;;  %v7557_v58 = vld [vmem:[%s8986_s16 + $0x10] sm:$0xff] }
0x2670   :  { %v2599_v8 = vpop.permute.xlu1 %2598  ;;  %v2640_v44 = vadd.f32 %v2639_v23, %v2638_v33  ;;  %v2620_v9 = vpop.permute.xlu0 %2619  ;;  %v7570_v33 = vld [vmem:[%s8986_s16] sm:$0xff] }
0x2671   :  { %v2631_v29 = vmul.f32 %v2599_v8, %v7223_v53  ;;  %v7536_v8 = vld [vmem:[%s8986_s16 + $0x28] sm:$0xff] }
0x2672   :  { %2733 = vmatprep.subr.mxu0 %v7536_v8 }
0x2673   :  { %v2641_v55 = vsel %vm2062_vm11, %v2631_v29, 0.0  ;;  %v2634_v29 = vmul.f32 %v2620_v9, %v7235_v41  ;;  %2734 = vmatpush1.msra.mxu0 %v7542_v63 }
0x2674   :  { %v2642_v37 = vadd.f32 %v2641_v55, %v2640_v44  ;;  %v2613_v11 = vpop.permute.xlu1 %2612  ;;  %v7551_v44 = vld [vmem:[%s8986_s16 + $0x18] sm:$0xff] }
0x2675   :  { %v2633_v16 = vmul.f32 %v2613_v11, %v7231_v54  ;;  %v7564_v54 = vld [vmem:[%s8986_s16 + $0x8] sm:$0xff]  ;;  %2735 = vmatprep.subr.mxu0 %v7551_v44  ;;  %v2647_v9 = vsel %vm2062_vm11, %v2634_v29, 0.0 }
0x2676   :  { %v2644_v24 = vadd.f32 %v2643_v13, %v2642_v37  ;;  %2736 = vmatpush1.msra.mxu0 %v7557_v58 }
0x2677   :  { %v2645_v30 = vsel %vm2062_vm11, %v2633_v16, 0.0  ;;  %2737 = vmatprep.subr.mxu0 %v7564_v54  ;;  %v9060_v16 = vmov 0.0  }
0x2678   :  { %v2646_v41 = vadd.f32 %v2645_v30, %v2644_v24  ;;  %v2627_v23 = vpop.permute.xlu1 %2626  ;;  %2738 = vmatpush1.msra.mxu0 %v7570_v33  ;;  %2440 = vst.msk [vmem:[%s8989_s19] sm:$0xff] %vm142_vm0, %v9060_v16 }
0x2679   :  { %v2635_v55 = vmul.f32 %v2627_v23, %v7239_v46  ;;  %6038 = vmatprep.subr.mxu0 %v9060_v16  ;;  %v2431_v23 = vld [vmem:[%s8987_s17] sm:$0x3] }
0x267a   :  { %v2648_v37 = vadd.f32 %v2647_v9, %v2646_v41  ;;  %v7591_v9 = vrot.slane %v2431_v23, %v6928_v27 }
0x267b   :  { %v2649_v11 = vsel %vm2062_vm11, %v2635_v55, 0.0 }
0x267c   :  { %v2650_v13 = vadd.f32 %v2649_v11, %v2648_v37 }
0x267d   :  { %v2436_v24 = vpop.permute.xlu0 %2435 }
0x267e   :  { %vm2437_vm7 = vcmp.eq.s32.totalorder %v6600_v14, %v2436_v24  ;;  %2653 = vrot.lane.b32.xlu1 %v2650_v13, %s6457_s6  ;;  %v7596_v13 = vrot.slane %v2431_v23, %v6680_v34 }
0x267f   :  { %v5608_v29 = vsel %vm2437_vm7, 1.0, %v9060_v16 }
0x2680   :  { %2651 = vst.msk [vmem:[#allocation3] sm:$0xff] %vm142_vm0, %v5608_v29 }
0x2681   :  { %v2659_v30 = vpop.permute.xlu0 %2658 }
0x26f0   :  { %v2654_v46 = vpop.permute.xlu1 %2653 }
0x26f1   :  { %2657 = vst.msk [vmem:[#allocation3] sm:$0xff] %vm2656_vm8, %v2654_v46 }
0x26f2   :  { %2662 = vst.msk [vmem:[#allocation3] sm:$0xff] %vm2661_vm9, %v2659_v30 }
0x26f9   :  { %v2663_v41 = vld [vmem:[#allocation3] sm:$0xff] }
0x26fa   :  { %2772 = vmatmul.mubr.f32.vlgmr.msra.gmra.mxu0 %v2663_v41 }
0x26fb   :  { %6046 = vmatprep.mubr.msk.f32.mxu0 %vm6454_vm4, %v9060_v16 }
0x27ba   :  { %v2773_v55 = vpop.f32.mrf.mxu0 }
0x27bb   :  { %v7599_v24 = vadd.f32 %v2773_v55, %v7596_v13  ;;  %v2810_v55 = vld [vmem:[%s8988_s18 + $0x18] sm:$0xff] }
0x27bc   :  { %v2775_v37 = vpop.f32.mrf.mxu0  ;;  %6028 = vmatpush3.msra.mxu1 %v2810_v55  ;;  %6039 = vmatpush3.msra.mxu0 %v2810_v55 }
0x27bd   :  { %v2776_v11 = vadd.f32 %v2775_v37, %v7591_v9  ;;  %6029 = vmatprep.subr.mxu1 %v9060_v16  ;;  %6040 = vmatprep.subr.mxu0 %v9060_v16 }
0x27bf   :  { %2786 = vrot.lane.b32.xlu1 %v2776_v11, %s6455_s28  ;;  %v2778_v29 = vadd.f32 %v2776_v11, %v7599_v24  ;;  %v2809_v11 = vld [vmem:[%s8988_s18 + $0x10] sm:$0xff] }
0x27c0   :  { %6030 = vmatpush3.msra.mxu1 %v2809_v11  ;;  %6041 = vmatpush3.msra.mxu0 %v2809_v11 }
0x27c1   :  { %v5610_v46 = vmul.f32 -1.442695, %v2778_v29  ;;  %6031 = vmatprep.subr.mxu1 %v9060_v16  ;;  %6042 = vmatprep.subr.mxu0 %v9060_v16 }
0x27c3   :  { %6270 = vpow2.f32 %v5610_v46 }
0x27d0   :  { %v6271_v30 = vpop.eup %6270 }
0x27d1   :  { %v2782_v41 = vadd.f32 1.0, %v6271_v30 }
0x27d3   :  { %6272 = vrcp.f32 %v2782_v41 }
0x27e0   :  { %v6273_v53 = vpop.eup %6272 }
0x27e1   :  { %v2796_v46 = vsub.f32 1.0, %v6273_v53 }
0x2831   :  { %v2787_v50 = vpop.permute.xlu1 %2786 }
0x2832   :  { %v2789_v48 = vmul.f32 %v6273_v53, %v2787_v50  ;;  %v2808_v50 = vld [vmem:[%s8988_s18 + $0x8] sm:$0xff] }
0x2833   :  { %6032 = vmatpush3.msra.mxu1 %v2808_v50  ;;  %6043 = vmatpush3.msra.mxu0 %v2808_v50 }
0x2834   :  { %2791 = vrot.lane.b32.xlu0 %v2789_v48, %s6455_s28  ;;  %6033 = vmatprep.subr.mxu1 %v9060_v16 }
0x2835   :  { %6044 = vmatprep.subr.mxu0 %v9060_v16 }
0x2838   :  { %2802 = vrot.lane.b32.xlu0 %v7247_v4, %s6457_s6  ;;  %v2807_v4 = vld [vmem:[%s8988_s18] sm:$0xff] }
0x2839   :  { %6034 = vmatpush3.msra.mxu1 %v2807_v4  ;;  %6045 = vmatpush3.msra.mxu0 %v2807_v4 }
0x283a   :  { %3152 = vmatprep.subr.mxu1 %v7370_v47 }
0x28a6   :  { %v2792_v23 = vpop.permute.xlu0 %2791 }
0x28a7   :  { %v2794_v37 = vadd.f32 %v2792_v23, %v7599_v24 }
0x28a9   :  { %6274 = vtanh.f32 %v2794_v37 }
0x28aa   :  { %v2803_v29 = vpop.permute.xlu0 %2802 }
0x28ab   :  { %v2805_v41 = vmul.f32 %v6273_v53, %v2803_v29  ;;  %v7695_v29 = vcvt.s32.f32 %v6600_v14 }
0x28ad   :  { %9062 = vst [vmem:[#allocation11_spill] sm:$0xff] %v7695_v29 }
0x28b6   :  { %v6275_v48 = vpop.eup %6274 }
0x28b7   :  { %2798 = vrot.lane.b32.xlu1 %v6275_v48, %s6456_s30 }
0x2929   :  { %v2799_v30 = vpop.permute.xlu1 %2798 }
0x292a   :  { %v2801_v23 = vmul.f32 %v2799_v30, %v2796_v46 }
0x292c   :  { %v7626_v37 = vadd.f32 %v2805_v41, %v2801_v23 }
0x292e   :  { %2812 = vrot.lane.b32.xlu1 %v7626_v37, %s6456_s30 }
0x29a0   :  { %v2813_v55 = vpop.permute.xlu1 %2812 }
0x29a1   :  { %6036 = vmatmul.mubr.msk.f32.vlgmr.msra.gmra.mxu1 %vm142_vm0, %v2813_v55 }
0x29a2   :  { %3153 = vmatpush1.msra.mxu1 %v7375_v26  ;;  %3216 = vmatprep.mubr.f32.mxu1 %v9060_v16 }
0x29a3   :  { %3154 = vmatprep.subr.mxu1 %v7380_v45 }
0x29a4   :  { %3155 = vmatpush1.msra.mxu1 %v7388_v35 }
0x29a5   :  { %3156 = vmatprep.subr.mxu1 %v7394_v0 }
0x29a6   :  { %3157 = vmatpush1.msra.mxu1 %v7401_v49 }
0x29a7   :  { %3158 = vmatprep.subr.mxu1 %v7407_v56 }
0x29a8   :  { %3159 = vmatpush1.msra.mxu1 %v7413_v31 }
0x29a9   :  { %3160 = vmatprep.subr.mxu1 %v7419_v52 }
0x29aa   :  { %3161 = vmatpush1.msra.mxu1 %v7425_v39 }
0x29ab   :  { %3162 = vmatprep.subr.mxu1 %v7431_v28 }
0x29ac   :  { %3163 = vmatpush1.msra.mxu1 %v7437_v40 }
0x29ad   :  { %3164 = vmatprep.subr.mxu1 %v7443_v59 }
0x29ae   :  { %3165 = vmatpush1.msra.mxu1 %v7449_v60 }
0x29af   :  { %3166 = vmatprep.subr.mxu1 %v7455_v62 }
0x29b0   :  { %3167 = vmatpush1.msra.mxu1 %v7461_v1 }
0x29b1   :  { %3168 = vmatprep.subr.mxu1 %v7467_v12 }
0x29b2   :  { %3169 = vmatpush1.msra.mxu1 %v7473_v38 }
0x29b3   :  { %3170 = vmatprep.subr.mxu1 %v7479_v2 }
0x29b4   :  { %3171 = vmatpush1.msra.mxu1 %v7485_v5 }
0x29b5   :  { %3172 = vmatprep.subr.mxu1 %v7491_v6 }
0x29b6   :  { %3173 = vmatpush1.msra.mxu1 %v7497_v32 }
0x29b7   :  { %3174 = vmatprep.subr.mxu1 %v7503_v7 }
0x29b8   :  { %3175 = vmatpush1.msra.mxu1 %v7519_v43 }
0x29b9   :  { %3176 = vmatprep.subr.mxu1 %v7524_v61 }
0x29ba   :  { %3177 = vmatpush1.msra.mxu1 %v7529_v51 }
0x29bb   :  { %3178 = vmatprep.subr.mxu1 %v7536_v8 }
0x29bc   :  { %3179 = vmatpush1.msra.mxu1 %v7542_v63 }
0x29bd   :  { %3180 = vmatprep.subr.mxu1 %v7551_v44 }
0x29be   :  { %3181 = vmatpush1.msra.mxu1 %v7557_v58 }
0x29bf   :  { %3182 = vmatprep.subr.mxu1 %v7564_v54 }
0x29c0   :  { %3183 = vmatpush1.msra.mxu1 %v7570_v33 }
0x29c1   :  { %6049 = vmatprep.subr.mxu1 %v9060_v16 }
0x2a61   :  { %v2882_v53 = vpop.f32.mrf.mxu1 }
0x2a62   :  { %2887 = vrot.lane.b32.xlu0 %v2882_v53, %s6456_s30 }
0x2a63   :  { %v6037_v47 = vpop.f32.mrf.mxu1 }
0x2ad4   :  { %v2888_v26 = vpop.permute.xlu0 %2887 }
0x2ad5   :  { %v2915_v45 = vadd.f32 %v2888_v26, %v7256_v57  ;;  %v2914_v35 = vadd.f32 %v2888_v26, %v7258_v19  ;;  %v2916_v0 = vadd.f32 %v2888_v26, %v7262_v17  ;;  %v2917_v49 = vadd.f32 %v2888_v26, %v7269_v22 }
0x2ad6   :  { %v2918_v56 = vadd.f32 %v2888_v26, %v7260_v10  ;;  %v2919_v31 = vadd.f32 %v2888_v26, %v7274_v18  ;;  %v2920_v52 = vadd.f32 %v2888_v26, %v7264_v3  ;;  %v2921_v39 = vadd.f32 %v2888_v26, %v7277_v42 }
0x2ad7   :  { %6276 = vtanh.f32 %v2915_v45  ;;  %v7689_v50 = vadd.f32 %v2888_v26, %v7599_v24 }
0x2ad8   :  { %6278 = vtanh.f32 %v2914_v35 }
0x2ad9   :  { %6280 = vtanh.f32 %v2916_v0  ;;  %9061 = vst [vmem:[#allocation10_spill] sm:$0xff] %v7689_v50  ;;  %v2899_v48 = vsel %vm2661_vm9, %v7689_v50, -inf }
0x2ada   :  { %6282 = vtanh.f32 %v2917_v49 }
0x2adb   :  { %6284 = vtanh.f32 %v2918_v56 }
0x2adc   :  { %6286 = vtanh.f32 %v2919_v31 }
0x2add   :  { %6288 = vtanh.f32 %v2920_v52 }
0x2ade   :  { %6290 = vtanh.f32 %v2921_v39 }
0x2ae4   :  { %v6277_v28 = vpop.eup %6276 }
0x2ae5   :  { %v6279_v40 = vpop.eup %6278  ;;  %v2931_v59 = vmul.f32 %v6277_v28, %v7283_v21 }
0x2ae6   :  { %v6281_v60 = vpop.eup %6280  ;;  %v2930_v62 = vmul.f32 %v6279_v40, %v7283_v21 }
0x2ae7   :  { %v6283_v1 = vpop.eup %6282  ;;  %v2941_v12 = vsel %vm142_vm0, %v2931_v59, 0.0  ;;  %v2932_v38 = vmul.f32 %v6281_v60, %v7283_v21 }
0x2ae8   :  { %v6285_v2 = vpop.eup %6284  ;;  %2942 = vadd.xlane.f32.xlu0 %v2941_v12  ;;  %v2938_v5 = vsel %vm142_vm0, %v2930_v62, 0.0  ;;  %v2933_v6 = vmul.f32 %v6283_v1, %v7283_v21 }
0x2ae9   :  { %v6287_v32 = vpop.eup %6286  ;;  %2939 = vadd.xlane.f32.xlu1 %v2938_v5  ;;  %v2944_v7 = vsel %vm142_vm0, %v2932_v38, 0.0  ;;  %v2934_v43 = vmul.f32 %v6285_v2, %v7283_v21 }
0x2aea   :  { %v6289_v61 = vpop.eup %6288  ;;  %v2947_v51 = vsel %vm142_vm0, %v2933_v6, 0.0  ;;  %v2935_v8 = vmul.f32 %v6287_v32, %v7283_v21 }
0x2aeb   :  { %v6291_v63 = vpop.eup %6290  ;;  %v2950_v44 = vsel %vm142_vm0, %v2934_v43, 0.0  ;;  %v2936_v58 = vmul.f32 %v6289_v61, %v7283_v21 }
0x2aec   :  { %2945 = vadd.xlane.f32.xlu0 %v2944_v7  ;;  %v2953_v54 = vsel %vm142_vm0, %v2935_v8, 0.0  ;;  %v2937_v33 = vmul.f32 %v6291_v63, %v7283_v21 }
0x2aed   :  { %2948 = vadd.xlane.f32.xlu1 %v2947_v51  ;;  %v2956_v11 = vsel %vm142_vm0, %v2936_v58, 0.0 }
0x2aee   :  { %v2959_v4 = vsel %vm142_vm0, %v2937_v33, 0.0 }
0x2af0   :  { %2951 = vadd.xlane.f32.xlu0 %v2950_v44 }
0x2af1   :  { %2954 = vadd.xlane.f32.xlu1 %v2953_v54 }
0x2af4   :  { %2957 = vadd.xlane.f32.xlu0 %v2956_v11 }
0x2af5   :  { %2960 = vadd.xlane.f32.xlu1 %v2959_v4 }
0x2af8   :  { %2900 = vmax.xlane.f32.xlu0 %v2899_v48 }
0x2b06   :  { %2904 = vrot.lane.b32.xlu1 %v7695_v29, %s6456_s30 }
0x2b71   :  { %v2943_v21 = vpop.xlane.xlu0 %2942 }
0x2b72   :  { %v2940_v46 = vpop.xlane.xlu1 %2939  ;;  %v2977_v30 = vrot.slane %v2943_v21, %v7308_v25 }
0x2b73   :  { %v2973_v24 = vrot.slane %v2940_v46, %v7308_v25 }
0x2b75   :  { %v2946_v41 = vpop.xlane.xlu0 %2945  ;;  %v3002_v53 = vsel %vm2537_vm13, %v2977_v30, %v2973_v24  ;;  %v9063_v24 = vld [vmem:[#allocation6_spill] sm:$0xff] }
0x2b76   :  { %v2981_v23 = vrot.slane %v2946_v41, %v7308_v25  ;;  %v2949_v55 = vpop.xlane.xlu1 %2948 }
0x2b77   :  { %v2985_v47 = vrot.slane %v2949_v55, %v7308_v25 }
0x2b78   :  { %v3003_v14 = vsel %vm2539_vm14, %v2981_v23, %v3002_v53  ;;  %v9064_v23 = vld [vmem:[#allocation8_spill] sm:$0xff]  ;;  %v9065_v53 = vld [vmem:[#allocation7_spill] sm:$0xff] }
0x2b79   :  { %v2952_v26 = vpop.xlane.xlu0 %2951  ;;  %v3004_v0 = vsel %vm2541_vm15, %v2985_v47, %v3003_v14  ;;  %v9066_v14 = vld [vmem:[#allocation9_spill] sm:$0xff] }
0x2b7a   :  { %v2989_v45 = vrot.slane %v2952_v26, %v7308_v25  ;;  %v2955_v35 = vpop.xlane.xlu1 %2954 }
0x2b7b   :  { %v2993_v49 = vrot.slane %v2955_v35, %v7308_v25 }
0x2b7c   :  { %v3005_v56 = vsel %vm2543_vm1, %v2989_v45, %v3004_v0 }
0x2b7d   :  { %v2958_v31 = vpop.xlane.xlu0 %2957  ;;  %v3006_v28 = vsel %vm2545_vm2, %v2993_v49, %v3005_v56 }
0x2b7e   :  { %v2997_v52 = vrot.slane %v2958_v31, %v7308_v25  ;;  %v2961_v39 = vpop.xlane.xlu1 %2960 }
0x2b7f   :  { %v3001_v40 = vrot.slane %v2961_v39, %v7308_v25 }
0x2b80   :  { %v3007_v59 = vsel %vm2547_vm3, %v2997_v52, %v3006_v28  ;;  %v9068_v52 = vld [vmem:[#allocation4_spill] sm:$0xff]  ;;  %v7736_v28 = vld [vmem:[#allocation2] sm:$0xff] }
0x2b81   :  { %v3008_v60 = vsel %vm2549_vm5, %v3001_v40, %v3007_v59  ;;  %v2901_v45 = vpop.xlane.xlu0 %2900  ;;  %9069 = vst [vmem:[#allocation4_spill] sm:$0xff] %v7736_v28 }
0x2b82   :  { %v3010_v62 = vsel %vm281_vm6, %v3008_v60, -1e+10  ;;  %vm2902_vm10 = vcmp.ge.f32.partialorder %v7689_v50, %v2901_v45  ;;  %v7731_v35 = vpop.permute.xlu1 %2904 }
0x2b83   :  { %v3011_v1 = vsel %vm2441_vm12, %v3010_v62, -inf  ;;  %9067 = vst [vmem:[#allocation6_spill] sm:$0xff] %v7731_v35  ;;  %v2907_v0 = vsel %vm2902_vm10, %v7731_v35, 32.0 }
0x2b84   :  { %v3012_v12 = vrot.slane %v3011_v1, 4  ;;  %v2908_v49 = vsel %vm2661_vm9, %v2907_v0, inf }
0x2b86   :  { %v3013_v38 = vmax.f32 %v3011_v1, %v3012_v12  ;;  %v7741_v12 = vld [vmem:[#allocation2 + $0x10] sm:$0xff] }
0x2b87   :  { %9070 = vst [vmem:[#allocation12_spill] sm:$0xff] %v7741_v12 }
0x2b88   :  { %v3014_v2 = vrot.slane %v3013_v38, 2 }
0x2b8a   :  { %v3015_v5 = vmax.f32 %v3013_v38, %v3014_v2  ;;  %v9071_v2 = vld [vmem:[#allocation5_spill] sm:$0xff] }
0x2b8c   :  { %v3016_v6 = vrot.slane %v3015_v5, 1 }
0x2b8e   :  { %v3017_v32 = vmax.f32 %v3015_v5, %v3016_v6 }
0x2b90   :  { %v3018_v7 = vsub.f32 %v3010_v62, %v3017_v32 }
0x2b92   :  { %v3019_v43 = vmul.f32 1.442695, %v3018_v7 }
0x2b94   :  { %6292 = vpow2.f32 %v3019_v43 }
0x2ba1   :  { %v6293_v61 = vpop.eup %6292 }
0x2ba2   :  { %v3021_v51 = vsel %vm2441_vm12, %v6293_v61, 0.0 }
0x2ba3   :  { %v3022_v8 = vrot.slane %v3021_v51, 4 }
0x2ba5   :  { %v3023_v63 = vadd.f32 %v3022_v8, %v3021_v51  ;;  %v7747_v8 = vld [vmem:[#allocation2 + $0x20] sm:$0xff] }
0x2ba6   :  { %9072 = vst [vmem:[#allocation5_spill] sm:$0xff] %v7747_v8 }
0x2ba7   :  { %v3024_v44 = vrot.slane %v3023_v63, 2 }
0x2ba9   :  { %v3025_v58 = vadd.f32 %v3024_v44, %v3023_v63  ;;  %v7750_v44 = vld [vmem:[#allocation2 + $0x28] sm:$0xff] }
0x2baa   :  { %9073 = vst [vmem:[#allocation13_spill] sm:$0xff] %v7750_v44 }
0x2bab   :  { %v3026_v54 = vrot.slane %v3025_v58, 1 }
0x2bad   :  { %v3027_v33 = vadd.f32 %v3026_v54, %v3025_v58 }
0x2baf   :  { %6294 = vrcp.f32 %v3027_v33 }
0x2bbc   :  { %v6295_v11 = vpop.eup %6294 }
0x2bbd   :  { %v3029_v4 = vmul.f32 %v6295_v11, %v6293_v61 }
0x2bbf   :  { %5618 = vst.msk [vmem:[%s8983_s20 + $0x10] sm:$0xff] %vm2441_vm12, %v3029_v4  ;;  %v3040_v48 = vrot.slane %v3029_v4, %v6928_v27  ;;  %v3033_v21 = vrot.slane %v3029_v4, %v6680_v34  ;;  %v3047_v46 = vrot.slane %v3029_v4, %v7345_v20  ;;  %v3054_v30 = vrot.slane %v3029_v4, %v7353_v15 }
0x2bc0   :  { %v3061_v41 = vrot.slane %v3029_v4, %v9063_v24  ;;  %v3068_v55 = vrot.slane %v3029_v4, %v9064_v23  ;;  %v3075_v47 = vrot.slane %v3029_v4, %v9065_v53  ;;  %v3082_v26 = vrot.slane %v3029_v4, %v9066_v14 }
0x2bc1   :  { %3042 = vbcast.lane.b32.xlu1 %v3040_v48, 256  ;;  %3035 = vbcast.lane.b32.xlu0 %v3033_v21, 256 }
0x2bc5   :  { %3049 = vbcast.lane.b32.xlu1 %v3047_v46, 256  ;;  %3056 = vbcast.lane.b32.xlu0 %v3054_v30, 256  ;;  %v7755_v46 = vld [vmem:[#allocation2 + $0x30] sm:$0xff] }
0x2bc6   :  { %9074 = vst [vmem:[#allocation14_spill] sm:$0xff] %v7755_v46 }
0x2bc9   :  { %3063 = vbcast.lane.b32.xlu1 %v3061_v41, 256  ;;  %3070 = vbcast.lane.b32.xlu0 %v3068_v55, 256  ;;  %v7758_v41 = vld [vmem:[#allocation2 + $0x38] sm:$0xff] }
0x2bca   :  { %9075 = vst [vmem:[#allocation15_spill] sm:$0xff] %v7758_v41 }
0x2bcd   :  { %3077 = vbcast.lane.b32.xlu1 %v3075_v47, 256  ;;  %3084 = vbcast.lane.b32.xlu0 %v3082_v26, 256 }
0x2bf1   :  { %2909 = vmin.xlane.f32.xlu1 %v2908_v49 }
0x2c33   :  { %v3043_v56 = vpop.permute.xlu1 %3042  ;;  %v3036_v31 = vpop.permute.xlu0 %3035 }
0x2c34   :  { %v3087_v39 = vmul.f32 %v3043_v56, %v9068_v52  ;;  %v3086_v40 = vmul.f32 %v7736_v28, %v3036_v31 }
0x2c36   :  { %v3095_v59 = vsel %vm2062_vm11, %v3087_v39, 0.0  ;;  %v3094_v60 = vsel %vm2062_vm11, %v3086_v40, 0.0 }
0x2c37   :  { %v3050_v62 = vpop.permute.xlu1 %3049  ;;  %v3057_v1 = vpop.permute.xlu0 %3056  ;;  %v3096_v6 = vadd.f32 %v3095_v59, %v3094_v60 }
0x2c38   :  { %v3088_v38 = vmul.f32 %v7741_v12, %v3050_v62  ;;  %v3089_v5 = vmul.f32 %v3057_v1, %v9071_v2 }
0x2c3a   :  { %v3097_v32 = vsel %vm2062_vm11, %v3088_v38, 0.0  ;;  %v3099_v51 = vsel %vm2062_vm11, %v3089_v5, 0.0 }
0x2c3b   :  { %v3098_v7 = vadd.f32 %v3097_v32, %v3096_v6  ;;  %v3064_v43 = vpop.permute.xlu1 %3063  ;;  %v3071_v61 = vpop.permute.xlu0 %3070 }
0x2c3c   :  { %v3090_v63 = vmul.f32 %v7747_v8, %v3064_v43  ;;  %v3091_v58 = vmul.f32 %v7750_v44, %v3071_v61 }
0x2c3d   :  { %v3100_v54 = vadd.f32 %v3099_v51, %v3098_v7 }
0x2c3e   :  { %v3101_v33 = vsel %vm2062_vm11, %v3090_v63, 0.0  ;;  %v3103_v21 = vsel %vm2062_vm11, %v3091_v58, 0.0 }
0x2c3f   :  { %v3102_v11 = vadd.f32 %v3101_v33, %v3100_v54  ;;  %v3078_v4 = vpop.permute.xlu1 %3077  ;;  %v3085_v48 = vpop.permute.xlu0 %3084 }
0x2c40   :  { %v3092_v30 = vmul.f32 %v7755_v46, %v3078_v4  ;;  %v3093_v55 = vmul.f32 %v7758_v41, %v3085_v48 }
0x2c41   :  { %v3104_v47 = vadd.f32 %v3103_v21, %v3102_v11 }
0x2c42   :  { %v3105_v26 = vsel %vm2062_vm11, %v3092_v30, 0.0  ;;  %v3107_v0 = vsel %vm2062_vm11, %v3093_v55, 0.0 }
0x2c43   :  { %v3106_v45 = vadd.f32 %v3105_v26, %v3104_v47 }
0x2c45   :  { %v3108_v49 = vadd.f32 %v3107_v0, %v3106_v45 }
0x2c47   :  { %3111 = vrot.lane.b32.xlu0 %v3108_v49, %s6457_s6 }
0x2c4b   :  { %3115 = vrot.lane.b32.xlu0 %v7626_v37, %s6455_s28 }
0x2c7a   :  { %v2910_v56 = vpop.xlane.xlu1 %2909 }
0x2c7b   :  { %vm2911_vm7 = vcmp.eq.f32.partialorder %v7695_v29, %v2910_v56 }
0x2c7c   :  { %v5614_v31 = vsel %vm2911_vm7, 1.0, %v9060_v16 }
0x2c7d   :  { %3109 = vst.msk [vmem:[#allocation3] sm:$0xff] %vm142_vm0, %v5614_v31 }
0x2cb9   :  { %v3112_v52 = vpop.permute.xlu0 %3111 }
0x2cba   :  { %3114 = vst.msk [vmem:[#allocation3] sm:$0xff] %vm2656_vm8, %v3112_v52 }
0x2cbd   :  { %v3116_v39 = vpop.permute.xlu0 %3115 }
0x2cbe   :  { %3118 = vst.msk [vmem:[#allocation3] sm:$0xff] %vm2661_vm9, %v3116_v39  ;;  %v7796_v39 = vld [vmem:[%s8982_s15] ss:$0 sm:$0xff] }
0x2cc5   :  { %v3119_v40 = vld [vmem:[#allocation3] sm:$0xff] }
0x2cc6   :  { %3217 = vmatmul.mubr.f32.vlgmr.msra.gmra.mxu1 %v3119_v40 }
0x2cc7   :  { %6057 = vmatprep.mubr.msk.f32.mxu1 %vm6454_vm4, %v9060_v16 }
0x2d86   :  { %v3218_v59 = vpop.f32.mrf.mxu1 }
0x2d87   :  { %v3219_v1 = vadd.f32 %v3218_v59, %v7596_v13 }
0x2d88   :  { %v3220_v60 = vpop.f32.mrf.mxu1 }
0x2d89   :  { %v3221_v62 = vadd.f32 %v3220_v60, %v7591_v9 }
0x2d8b   :  { %3231 = vrot.lane.b32.xlu0 %v3221_v62, %s6455_s28  ;;  %v3223_v38 = vadd.f32 %v3221_v62, %v3219_v1 }
0x2d8d   :  { %v5615_v2 = vmul.f32 -1.442695, %v3223_v38 }
0x2d8f   :  { %6296 = vpow2.f32 %v5615_v2 }
0x2d9c   :  { %v6297_v5 = vpop.eup %6296 }
0x2d9d   :  { %v3227_v6 = vadd.f32 1.0, %v6297_v5 }
0x2d9f   :  { %6298 = vrcp.f32 %v3227_v6 }
0x2dac   :  { %v6299_v32 = vpop.eup %6298 }
0x2dad   :  { %v3241_v58 = vsub.f32 1.0, %v6299_v32  ;;  %v3247_v33 = vmul.f32 %v6299_v32, %v7626_v37 }
0x2dfd   :  { %v3232_v7 = vpop.permute.xlu0 %3231 }
0x2dfe   :  { %v3234_v43 = vmul.f32 %v6299_v32, %v3232_v7 }
0x2e00   :  { %3236 = vrot.lane.b32.xlu0 %v3234_v43, %s6455_s28 }
0x2e72   :  { %v3237_v61 = vpop.permute.xlu0 %3236 }
0x2e73   :  { %v3239_v51 = vadd.f32 %v3237_v61, %v3219_v1 }
0x2e75   :  { %6300 = vtanh.f32 %v3239_v51 }
0x2e82   :  { %v6301_v63 = vpop.eup %6300 }
0x2e83   :  { %3243 = vrot.lane.b32.xlu0 %v6301_v63, %s6456_s30 }
0x2ef5   :  { %v3244_v54 = vpop.permute.xlu0 %3243 }
0x2ef6   :  { %v3246_v11 = vmul.f32 %v3244_v54, %v3241_v58 }
0x2ef8   :  { %v7779_v4 = vadd.f32 %v3247_v33, %v3246_v11 }
0x2efa   :  { %3254 = vrot.lane.b32.xlu0 %v7779_v4, %s6456_s30 }
0x2f6c   :  { %v3255_v48 = vpop.permute.xlu0 %3254 }
0x2f6d   :  { %6047 = vmatmul.mubr.msk.f32.vlgmr.msra.gmra.mxu0 %vm142_vm0, %v3255_v48 }
0x2f6e   :  { %3654 = vmatprep.mubr.f32.mxu0 %v9060_v16 }
0x302d   :  { %v3324_v21 = vpop.f32.mrf.mxu0 }
0x302e   :  { %3329 = vrot.lane.b32.xlu0 %v3324_v21, %s6456_s30 }
0x302f   :  { %v6048_v30 = vpop.f32.mrf.mxu0 }
0x30a0   :  { %v3330_v55 = vpop.permute.xlu0 %3329 }
0x30a1   :  { %v3353_v47 = vadd.f32 %v3330_v55, %v7256_v57  ;;  %v3352_v37 = vadd.f32 %v3330_v55, %v7258_v19  ;;  %v3354_v26 = vadd.f32 %v3330_v55, %v7262_v17  ;;  %v3355_v45 = vadd.f32 %v3330_v55, %v7269_v22 }
0x30a2   :  { %v3356_v0 = vadd.f32 %v3330_v55, %v7260_v10  ;;  %v3357_v49 = vadd.f32 %v3330_v55, %v7274_v18  ;;  %v3358_v56 = vadd.f32 %v3330_v55, %v7264_v3  ;;  %v3359_v2 = vadd.f32 %v3330_v55, %v7277_v42 }
0x30a3   :  { %6302 = vtanh.f32 %v3353_v47  ;;  %v7804_v32 = vadd.f32 %v3330_v55, %v3219_v1 }
0x30a4   :  { %6304 = vtanh.f32 %v3352_v37 }
0x30a5   :  { %6306 = vtanh.f32 %v3354_v26  ;;  %9076 = vst [vmem:[#allocation16_spill] sm:$0xff] %v7804_v32  ;;  %v3341_v51 = vsel %vm2661_vm9, %v7804_v32, -inf }
0x30a6   :  { %6308 = vtanh.f32 %v3355_v45 }
0x30a7   :  { %6310 = vtanh.f32 %v3356_v0 }
0x30a8   :  { %6312 = vtanh.f32 %v3357_v49 }
0x30a9   :  { %6314 = vtanh.f32 %v3358_v56 }
0x30aa   :  { %6316 = vtanh.f32 %v3359_v2 }
0x30b0   :  { %v6303_v31 = vpop.eup %6302 }
0x30b1   :  { %v6305_v52 = vpop.eup %6304  ;;  %v3369_v40 = vmul.f32 %v7796_v39, %v6303_v31 }
0x30b2   :  { %v6307_v59 = vpop.eup %6306  ;;  %v3368_v60 = vmul.f32 %v7796_v39, %v6305_v52 }
0x30b3   :  { %v3379_v62 = vsel %vm142_vm0, %v3369_v40, 0.0  ;;  %v3370_v38 = vmul.f32 %v7796_v39, %v6307_v59  ;;  %v6309_v5 = vpop.eup %6308 }
0x30b4   :  { %3380 = vadd.xlane.f32.xlu1 %v3379_v62  ;;  %v3376_v6 = vsel %vm142_vm0, %v3368_v60, 0.0  ;;  %v3371_v43 = vmul.f32 %v7796_v39, %v6309_v5  ;;  %v6311_v61 = vpop.eup %6310 }
0x30b5   :  { %3377 = vadd.xlane.f32.xlu0 %v3376_v6  ;;  %v3382_v7 = vsel %vm142_vm0, %v3370_v38, 0.0  ;;  %v3372_v58 = vmul.f32 %v7796_v39, %v6311_v61  ;;  %v6313_v54 = vpop.eup %6312 }
0x30b6   :  { %v3385_v63 = vsel %vm142_vm0, %v3371_v43, 0.0  ;;  %v3373_v33 = vmul.f32 %v7796_v39, %v6313_v54  ;;  %v6315_v11 = vpop.eup %6314 }
0x30b7   :  { %v3388_v1 = vsel %vm142_vm0, %v3372_v58, 0.0  ;;  %v3374_v21 = vmul.f32 %v7796_v39, %v6315_v11  ;;  %v6317_v30 = vpop.eup %6316 }
0x30b8   :  { %3383 = vadd.xlane.f32.xlu1 %v3382_v7  ;;  %v3391_v48 = vsel %vm142_vm0, %v3373_v33, 0.0  ;;  %v3375_v47 = vmul.f32 %v7796_v39, %v6317_v30 }
0x30b9   :  { %3342 = vmax.xlane.f32.xlu0 %v3341_v51  ;;  %v3394_v55 = vsel %vm142_vm0, %v3374_v21, 0.0 }
0x30ba   :  { %v3397_v37 = vsel %vm142_vm0, %v3375_v47, 0.0 }
0x30bc   :  { %3386 = vadd.xlane.f32.xlu1 %v3385_v63 }
0x30c0   :  { %3389 = vadd.xlane.f32.xlu1 %v3388_v1 }
0x30c4   :  { %3392 = vadd.xlane.f32.xlu1 %v3391_v48 }
0x30c8   :  { %3395 = vadd.xlane.f32.xlu1 %v3394_v55 }
0x30cc   :  { %3398 = vadd.xlane.f32.xlu1 %v3397_v37 }
0x313d   :  { %v3381_v26 = vpop.xlane.xlu1 %3380 }
0x313e   :  { %v3378_v56 = vpop.xlane.xlu0 %3377  ;;  %v3415_v52 = vrot.slane %v3381_v26, %v7308_v25 }
0x313f   :  { %v3411_v40 = vrot.slane %v3378_v56, %v7308_v25 }
0x3141   :  { %v3384_v45 = vpop.xlane.xlu1 %3383  ;;  %v3440_v2 = vsel %vm2537_vm13, %v3415_v52, %v3411_v40 }
0x3142   :  { %v3419_v59 = vrot.slane %v3384_v45, %v7308_v25 }
0x3144   :  { %v3441_v6 = vsel %vm2539_vm14, %v3419_v59, %v3440_v2 }
0x3145   :  { %v3387_v0 = vpop.xlane.xlu1 %3386 }
0x3146   :  { %v3423_v60 = vrot.slane %v3387_v0, %v7308_v25 }
0x3148   :  { %v3442_v43 = vsel %vm2541_vm15, %v3423_v60, %v3441_v6 }
0x3149   :  { %v3390_v49 = vpop.xlane.xlu1 %3389 }
0x314a   :  { %v3427_v62 = vrot.slane %v3390_v49, %v7308_v25 }
0x314c   :  { %v3443_v61 = vsel %vm2543_vm1, %v3427_v62, %v3442_v43 }
0x314d   :  { %v3393_v31 = vpop.xlane.xlu1 %3392 }
0x314e   :  { %v3431_v5 = vrot.slane %v3393_v31, %v7308_v25 }
0x3150   :  { %v3444_v63 = vsel %vm2545_vm2, %v3431_v5, %v3443_v61 }
0x3151   :  { %v3396_v38 = vpop.xlane.xlu1 %3395 }
0x3152   :  { %v3435_v7 = vrot.slane %v3396_v38, %v7308_v25 }
0x3154   :  { %v3445_v54 = vsel %vm2547_vm3, %v3435_v7, %v3444_v63 }
0x3155   :  { %v3399_v51 = vpop.xlane.xlu1 %3398 }
0x3156   :  { %v3439_v58 = vrot.slane %v3399_v51, %v7308_v25 }
0x3158   :  { %v3446_v1 = vsel %vm2549_vm5, %v3439_v58, %v3445_v54  ;;  %v3343_v58 = vpop.xlane.xlu0 %3342 }
0x3159   :  { %v3448_v33 = vsel %vm281_vm6, %v3446_v1, -1e+10  ;;  %vm3344_vm10 = vcmp.ge.f32.partialorder %v7804_v32, %v3343_v58 }
0x315a   :  { %v3449_v11 = vsel %vm2441_vm12, %v3448_v33, -inf  ;;  %v3345_v54 = vsel %vm3344_vm10, %v7731_v35, 32.0 }
0x315b   :  { %v3450_v48 = vrot.slane %v3449_v11, 4  ;;  %v3346_v1 = vsel %vm2661_vm9, %v3345_v54, inf }
0x315d   :  { %v3451_v21 = vmax.f32 %v3449_v11, %v3450_v48  ;;  %v7861_v11 = vld [vmem:[%s8986_s16 + $0xf0] sm:$0xff]  ;;  %v7866_v48 = vld [vmem:[%s8986_s16 + $0xe8] sm:$0xff] }
0x315f   :  { %v3452_v30 = vrot.slane %v3451_v21, 2 }
0x3161   :  { %v3453_v55 = vmax.f32 %v3451_v21, %v3452_v30  ;;  %v7872_v21 = vld [vmem:[%s8986_s16 + $0xe0] sm:$0xff]  ;;  %v7878_v30 = vld [vmem:[%s8986_s16 + $0xd8] sm:$0xff] }
0x3163   :  { %v3454_v47 = vrot.slane %v3453_v55, 1 }
0x3165   :  { %v3455_v37 = vmax.f32 %v3453_v55, %v3454_v47  ;;  %v7884_v55 = vld [vmem:[%s8986_s16 + $0xd0] sm:$0xff]  ;;  %v7890_v47 = vld [vmem:[%s8986_s16 + $0xc8] sm:$0xff] }
0x3167   :  { %v3456_v26 = vsub.f32 %v3448_v33, %v3455_v37  ;;  %v7856_v33 = vld [vmem:[%s8986_s16 + $0xf8] sm:$0xff]  ;;  %v7896_v37 = vld [vmem:[%s8986_s16 + $0xc0] sm:$0xff] }
0x3168   :  { %3590 = vmatprep.subr.mxu0 %v7856_v33 }
0x3169   :  { %v3457_v45 = vmul.f32 1.442695, %v3456_v26  ;;  %3591 = vmatpush1.msra.mxu0 %v7861_v11  ;;  %v7902_v26 = vld [vmem:[%s8986_s16 + $0xb8] sm:$0xff] }
0x316a   :  { %3592 = vmatprep.subr.mxu0 %v7866_v48 }
0x316b   :  { %6318 = vpow2.f32 %v3457_v45  ;;  %3593 = vmatpush1.msra.mxu0 %v7872_v21  ;;  %v7908_v45 = vld [vmem:[%s8986_s16 + $0xb0] sm:$0xff] }
0x316c   :  { %3594 = vmatprep.subr.mxu0 %v7878_v30 }
0x316d   :  { %3595 = vmatpush1.msra.mxu0 %v7884_v55 }
0x316e   :  { %3596 = vmatprep.subr.mxu0 %v7890_v47 }
0x316f   :  { %3597 = vmatpush1.msra.mxu0 %v7896_v37 }
0x3170   :  { %3598 = vmatprep.subr.mxu0 %v7902_v26 }
0x3171   :  { %3599 = vmatpush1.msra.mxu0 %v7908_v45 }
0x3178   :  { %v6319_v0 = vpop.eup %6318 }
0x3179   :  { %v3459_v49 = vsel %vm2441_vm12, %v6319_v0, 0.0 }
0x317a   :  { %v3460_v56 = vrot.slane %v3459_v49, 4 }
0x317c   :  { %v3461_v31 = vadd.f32 %v3460_v56, %v3459_v49  ;;  %v7920_v49 = vld [vmem:[%s8986_s16 + $0xa0] sm:$0xff]  ;;  %v7926_v56 = vld [vmem:[%s8986_s16 + $0x98] sm:$0xff] }
0x317e   :  { %v3462_v52 = vrot.slane %v3461_v31, 2 }
0x3180   :  { %v3463_v40 = vadd.f32 %v3462_v52, %v3461_v31  ;;  %v7932_v31 = vld [vmem:[%s8986_s16 + $0x90] sm:$0xff]  ;;  %v7938_v52 = vld [vmem:[%s8986_s16 + $0x88] sm:$0xff] }
0x3182   :  { %v3464_v59 = vrot.slane %v3463_v40, 1 }
0x3184   :  { %v3465_v60 = vadd.f32 %v3464_v59, %v3463_v40  ;;  %v7944_v40 = vld [vmem:[%s8986_s16 + $0x80] sm:$0xff]  ;;  %v7950_v59 = vld [vmem:[%s8986_s16 + $0x78] sm:$0xff] }
0x3186   :  { %6320 = vrcp.f32 %v3465_v60  ;;  %v7956_v60 = vld [vmem:[%s8986_s16 + $0x70] sm:$0xff] }
0x3193   :  { %v6321_v62 = vpop.eup %6320 }
0x3194   :  { %v3467_v38 = vmul.f32 %v6321_v62, %v6319_v0  ;;  %v7914_v0 = vld [vmem:[%s8986_s16 + $0xa8] sm:$0xff] }
0x3195   :  { %3600 = vmatprep.subr.mxu0 %v7914_v0  ;;  %v7962_v62 = vld [vmem:[%s8986_s16 + $0x68] sm:$0xff] }
0x3196   :  { %5623 = vst.msk [vmem:[%s8983_s20 + $0x18] sm:$0xff] %vm2441_vm12, %v3467_v38  ;;  %v3471_v2 = vrot.slane %v3467_v38, %v6680_v34  ;;  %v3478_v5 = vrot.slane %v3467_v38, %v6928_v27  ;;  %v3485_v6 = vrot.slane %v3467_v38, %v7345_v20  ;;  %v3499_v7 = vrot.slane %v3467_v38, %v9063_v24 }
0x3197   :  { %v3492_v43 = vrot.slane %v3467_v38, %v7353_v15  ;;  %v3513_v61 = vrot.slane %v3467_v38, %v9065_v53  ;;  %v3506_v51 = vrot.slane %v3467_v38, %v9064_v23  ;;  %v3520_v63 = vrot.slane %v3467_v38, %v9066_v14  ;;  %3601 = vmatpush1.msra.mxu0 %v7920_v49  ;;  %v7968_v38 = vld [vmem:[%s8986_s16 + $0x60] sm:$0xff]  ;;  %v7982_v14 = vld [vmem:[#allocation2 + $0x18] sm:$0xff] }
0x3198   :  { %3473 = vbcast.lane.b32.xlu1 %v3471_v2, 256  ;;  %3480 = vbcast.lane.b32.xlu0 %v3478_v5, 256  ;;  %9078 = vst [vmem:[#allocation18_spill] sm:$0xff] %v7982_v14 }
0x3199   :  { %3602 = vmatprep.subr.mxu0 %v7926_v56 }
0x319a   :  { %3603 = vmatpush1.msra.mxu0 %v7932_v31 }
0x319b   :  { %3604 = vmatprep.subr.mxu0 %v7938_v52 }
0x319c   :  { %3487 = vbcast.lane.b32.xlu1 %v3485_v6, 256  ;;  %3501 = vbcast.lane.b32.xlu0 %v3499_v7, 256  ;;  %v7974_v7 = vld [vmem:[#allocation2 + $0x8] sm:$0xff] }
0x319d   :  { %3605 = vmatpush1.msra.mxu0 %v7944_v40  ;;  %9077 = vst [vmem:[#allocation17_spill] sm:$0xff] %v7974_v7 }
0x319e   :  { %3606 = vmatprep.subr.mxu0 %v7950_v59 }
0x319f   :  { %3607 = vmatpush1.msra.mxu0 %v7956_v60 }
0x31a0   :  { %3494 = vbcast.lane.b32.xlu1 %v3492_v43, 256  ;;  %3515 = vbcast.lane.b32.xlu0 %v3513_v61, 256 }
0x31a1   :  { %3608 = vmatprep.subr.mxu0 %v7962_v62 }
0x31a2   :  { %3609 = vmatpush1.msra.mxu0 %v7968_v38 }
0x31a4   :  { %3508 = vbcast.lane.b32.xlu1 %v3506_v51, 256 }
0x31a8   :  { %3522 = vbcast.lane.b32.xlu1 %v3520_v63, 256 }
0x31bf   :  { %3347 = vmin.xlane.f32.xlu0 %v3346_v1 }
0x320a   :  { %v3474_v2 = vpop.permute.xlu1 %3473  ;;  %v3481_v5 = vpop.permute.xlu0 %3480 }
0x320b   :  { %v3524_v6 = vmul.f32 %v7736_v28, %v3474_v2  ;;  %v3525_v43 = vmul.f32 %v7974_v7, %v3481_v5  ;;  %v7988_v5 = vld [vmem:[%s8986_s16 + $0x58] sm:$0xff] }
0x320c   :  { %3610 = vmatprep.subr.mxu0 %v7988_v5 }
0x320d   :  { %v3532_v63 = vsel %vm2062_vm11, %v3524_v6, 0.0  ;;  %v3533_v58 = vsel %vm2062_vm11, %v3525_v43, 0.0  ;;  %v7993_v6 = vld [vmem:[%s8986_s16 + $0x50] sm:$0xff]  ;;  %v7998_v43 = vld [vmem:[%s8986_s16 + $0x48] sm:$0xff] }
0x320e   :  { %v3488_v61 = vpop.permute.xlu1 %3487  ;;  %v3502_v51 = vpop.permute.xlu0 %3501  ;;  %v3534_v50 = vadd.f32 %v3533_v58, %v3532_v63  ;;  %3611 = vmatpush1.msra.mxu0 %v7993_v6 }
0x320f   :  { %v3526_v54 = vmul.f32 %v7741_v12, %v3488_v61  ;;  %v3528_v35 = vmul.f32 %v7747_v8, %v3502_v51  ;;  %3612 = vmatprep.subr.mxu0 %v7998_v43  ;;  %v8053_v12 = vld [vmem:[%s8986_s16 + $0x8] sm:$0xff] }
0x3211   :  { %v3535_v1 = vsel %vm2062_vm11, %v3526_v54, 0.0  ;;  %v3539_v8 = vsel %vm2062_vm11, %v3528_v35, 0.0  ;;  %v8026_v35 = vld [vmem:[%s8986_s16 + $0x28] sm:$0xff] }
0x3212   :  { %v3495_v32 = vpop.permute.xlu1 %3494  ;;  %v3536_v61 = vadd.f32 %v3535_v1, %v3534_v50  ;;  %v3516_v51 = vpop.permute.xlu0 %3515 }
0x3213   :  { %v3527_v2 = vmul.f32 %v7982_v14, %v3495_v32  ;;  %v8004_v32 = vld [vmem:[%s8986_s16 + $0x40] sm:$0xff]  ;;  %v3530_v50 = vmul.f32 %v7755_v46, %v3516_v51  ;;  %v8016_v14 = vld [vmem:[%s8986_s16 + $0x38] sm:$0xff] }
0x3214   :  { %3613 = vmatpush1.msra.mxu0 %v8004_v32  ;;  %v8032_v51 = vld [vmem:[%s8986_s16 + $0x20] sm:$0xff] }
0x3215   :  { %v3537_v63 = vsel %vm2062_vm11, %v3527_v2, 0.0  ;;  %v8021_v2 = vld [vmem:[%s8986_s16 + $0x30] sm:$0xff]  ;;  %3614 = vmatprep.subr.mxu0 %v8016_v14 }
0x3216   :  { %v3538_v58 = vadd.f32 %v3537_v63, %v3536_v61  ;;  %v3509_v54 = vpop.permute.xlu1 %3508  ;;  %3615 = vmatpush1.msra.mxu0 %v8021_v2 }
0x3217   :  { %v3529_v1 = vmul.f32 %v7750_v44, %v3509_v54  ;;  %v8039_v54 = vld [vmem:[%s8986_s16 + $0x18] sm:$0xff]  ;;  %3616 = vmatprep.subr.mxu0 %v8026_v35 }
0x3218   :  { %v3540_v61 = vadd.f32 %v3539_v8, %v3538_v58  ;;  %v8045_v8 = vld [vmem:[%s8986_s16 + $0x10] sm:$0xff]  ;;  %v3543_v58 = vsel %vm2062_vm11, %v3530_v50, 0.0  ;;  %3617 = vmatpush1.msra.mxu0 %v8032_v51 }
0x3219   :  { %v3541_v63 = vsel %vm2062_vm11, %v3529_v1, 0.0  ;;  %3618 = vmatprep.subr.mxu0 %v8039_v54 }
0x321a   :  { %v3542_v46 = vadd.f32 %v3541_v63, %v3540_v61  ;;  %v3523_v44 = vpop.permute.xlu1 %3522  ;;  %v8059_v63 = vld [vmem:[%s8986_s16] sm:$0xff]  ;;  %3619 = vmatpush1.msra.mxu0 %v8045_v8 }
0x321b   :  { %v3531_v1 = vmul.f32 %v7758_v41, %v3523_v44  ;;  %3620 = vmatprep.subr.mxu0 %v8053_v12 }
0x321c   :  { %v3544_v61 = vadd.f32 %v3543_v58, %v3542_v46  ;;  %3621 = vmatpush1.msra.mxu0 %v8059_v63 }
0x321d   :  { %v3545_v28 = vsel %vm2062_vm11, %v3531_v1, 0.0  ;;  %6060 = vmatprep.subr.mxu0 %v9060_v16 }
0x321e   :  { %v3546_v44 = vadd.f32 %v3545_v28, %v3544_v61 }
0x3220   :  { %3549 = vrot.lane.b32.xlu1 %v3546_v44, %s6457_s6 }
0x3224   :  { %3553 = vrot.lane.b32.xlu1 %v7779_v4, %s6455_s28 }
0x3248   :  { %v3348_v46 = vpop.xlane.xlu0 %3347 }
0x3249   :  { %vm3349_vm7 = vcmp.eq.f32.partialorder %v7695_v29, %v3348_v46 }
0x324a   :  { %v5619_v50 = vsel %vm3349_vm7, 1.0, %v9060_v16 }
0x324b   :  { %3547 = vst.msk [vmem:[#allocation3] sm:$0xff] %vm142_vm0, %v5619_v50 }
0x3292   :  { %v3550_v58 = vpop.permute.xlu1 %3549 }
0x3293   :  { %3552 = vst.msk [vmem:[#allocation3] sm:$0xff] %vm2656_vm8, %v3550_v58 }
0x3296   :  { %v3554_v28 = vpop.permute.xlu1 %3553 }
0x3297   :  { %3556 = vst.msk [vmem:[#allocation3] sm:$0xff] %vm2661_vm9, %v3554_v28 }
0x329e   :  { %v3557_v1 = vld [vmem:[#allocation3] sm:$0xff] }
0x329f   :  { %3655 = vmatmul.mubr.f32.vlgmr.msra.gmra.mxu0 %v3557_v1 }
0x32a0   :  { %6068 = vmatprep.mubr.msk.f32.mxu0 %vm6454_vm4, %v9060_v16 }
0x335f   :  { %v3656_v61 = vpop.f32.mrf.mxu0 }
0x3360   :  { %v8079_v46 = vadd.f32 %v3656_v61, %v7596_v13  ;;  %v3690_v61 = vld [vmem:[%s8988_s18 + $0x18] sm:$0xff] }
0x3361   :  { %v3658_v44 = vpop.f32.mrf.mxu0  ;;  %6050 = vmatpush3.msra.mxu1 %v3690_v61  ;;  %6061 = vmatpush3.msra.mxu0 %v3690_v61 }
0x3362   :  { %v3659_v41 = vadd.f32 %v3658_v44, %v7591_v9  ;;  %6051 = vmatprep.subr.mxu1 %v9060_v16  ;;  %6062 = vmatprep.subr.mxu0 %v9060_v16 }
0x3364   :  { %3669 = vrot.lane.b32.xlu1 %v3659_v41, %s6455_s28  ;;  %v3661_v50 = vadd.f32 %v3659_v41, %v8079_v46  ;;  %v3689_v41 = vld [vmem:[%s8988_s18 + $0x10] sm:$0xff] }
0x3365   :  { %6052 = vmatpush3.msra.mxu1 %v3689_v41  ;;  %6063 = vmatpush3.msra.mxu0 %v3689_v41 }
0x3366   :  { %v5620_v58 = vmul.f32 -1.442695, %v3661_v50  ;;  %6053 = vmatprep.subr.mxu1 %v9060_v16  ;;  %6064 = vmatprep.subr.mxu0 %v9060_v16 }
0x3368   :  { %6322 = vpow2.f32 %v5620_v58 }
0x3375   :  { %v6323_v29 = vpop.eup %6322 }
0x3376   :  { %v3665_v28 = vadd.f32 1.0, %v6323_v29  ;;  %v3688_v29 = vld [vmem:[%s8988_s18 + $0x8] sm:$0xff] }
0x3377   :  { %6054 = vmatpush3.msra.mxu1 %v3688_v29  ;;  %6065 = vmatpush3.msra.mxu0 %v3688_v29 }
0x3378   :  { %6324 = vrcp.f32 %v3665_v28  ;;  %6055 = vmatprep.subr.mxu1 %v9060_v16  ;;  %6066 = vmatprep.subr.mxu0 %v9060_v16 }
0x3385   :  { %v6325_v1 = vpop.eup %6324 }
0x3386   :  { %v3685_v58 = vmul.f32 %v6325_v1, %v7779_v4 }
0x33d6   :  { %v3670_v7 = vpop.permute.xlu1 %3669 }
0x33d7   :  { %v3672_v53 = vmul.f32 %v6325_v1, %v3670_v7  ;;  %v3679_v7 = vsub.f32 1.0, %v6325_v1 }
0x33d9   :  { %3674 = vrot.lane.b32.xlu1 %v3672_v53, %s6455_s28 }
0x344b   :  { %v3675_v23 = vpop.permute.xlu1 %3674 }
0x344c   :  { %v3677_v44 = vadd.f32 %v3675_v23, %v8079_v46  ;;  %v3687_v23 = vld [vmem:[%s8988_s18] sm:$0xff] }
0x344d   :  { %6056 = vmatpush3.msra.mxu1 %v3687_v23  ;;  %6067 = vmatpush3.msra.mxu0 %v3687_v23 }
0x344e   :  { %6326 = vtanh.f32 %v3677_v44  ;;  %4028 = vmatprep.subr.mxu1 %v7856_v33 }
0x345b   :  { %v6327_v53 = vpop.eup %6326 }
0x345c   :  { %3681 = vrot.lane.b32.xlu1 %v6327_v53, %s6456_s30 }
0x34ce   :  { %v3682_v50 = vpop.permute.xlu1 %3681 }
0x34cf   :  { %v3684_v28 = vmul.f32 %v3682_v50, %v3679_v7 }
0x34d1   :  { %v8105_v44 = vadd.f32 %v3685_v58, %v3684_v28 }
0x34d3   :  { %3692 = vrot.lane.b32.xlu1 %v8105_v44, %s6456_s30 }
0x3545   :  { %v3693_v61 = vpop.permute.xlu1 %3692 }
0x3546   :  { %6058 = vmatmul.mubr.msk.f32.vlgmr.msra.gmra.mxu1 %vm142_vm0, %v3693_v61 }
0x3547   :  { %4029 = vmatpush1.msra.mxu1 %v7861_v11  ;;  %4092 = vmatprep.mubr.f32.mxu1 %v9060_v16 }
0x3548   :  { %4030 = vmatprep.subr.mxu1 %v7866_v48 }
0x3549   :  { %4031 = vmatpush1.msra.mxu1 %v7872_v21 }
0x354a   :  { %4032 = vmatprep.subr.mxu1 %v7878_v30 }
0x354b   :  { %4033 = vmatpush1.msra.mxu1 %v7884_v55 }
0x354c   :  { %4034 = vmatprep.subr.mxu1 %v7890_v47 }
0x354d   :  { %4035 = vmatpush1.msra.mxu1 %v7896_v37 }
0x354e   :  { %4036 = vmatprep.subr.mxu1 %v7902_v26 }
0x354f   :  { %4037 = vmatpush1.msra.mxu1 %v7908_v45 }
0x3550   :  { %4038 = vmatprep.subr.mxu1 %v7914_v0 }
0x3551   :  { %4039 = vmatpush1.msra.mxu1 %v7920_v49 }
0x3552   :  { %4040 = vmatprep.subr.mxu1 %v7926_v56 }
0x3553   :  { %4041 = vmatpush1.msra.mxu1 %v7932_v31 }
0x3554   :  { %4042 = vmatprep.subr.mxu1 %v7938_v52 }
0x3555   :  { %4043 = vmatpush1.msra.mxu1 %v7944_v40 }
0x3556   :  { %4044 = vmatprep.subr.mxu1 %v7950_v59 }
0x3557   :  { %4045 = vmatpush1.msra.mxu1 %v7956_v60 }
0x3558   :  { %4046 = vmatprep.subr.mxu1 %v7962_v62 }
0x3559   :  { %4047 = vmatpush1.msra.mxu1 %v7968_v38 }
0x355a   :  { %4048 = vmatprep.subr.mxu1 %v7988_v5 }
0x355b   :  { %4049 = vmatpush1.msra.mxu1 %v7993_v6 }
0x355c   :  { %4050 = vmatprep.subr.mxu1 %v7998_v43 }
0x355d   :  { %4051 = vmatpush1.msra.mxu1 %v8004_v32 }
0x355e   :  { %4052 = vmatprep.subr.mxu1 %v8016_v14 }
0x355f   :  { %4053 = vmatpush1.msra.mxu1 %v8021_v2 }
0x3560   :  { %4054 = vmatprep.subr.mxu1 %v8026_v35 }
0x3561   :  { %4055 = vmatpush1.msra.mxu1 %v8032_v51 }
0x3562   :  { %4056 = vmatprep.subr.mxu1 %v8039_v54 }
0x3563   :  { %4057 = vmatpush1.msra.mxu1 %v8045_v8 }
0x3564   :  { %4058 = vmatprep.subr.mxu1 %v8053_v12 }
0x3565   :  { %4059 = vmatpush1.msra.mxu1 %v8059_v63 }
0x3566   :  { %6071 = vmatprep.subr.mxu1 %v9060_v16 }
0x3606   :  { %v3762_v4 = vpop.f32.mrf.mxu1 }
0x3607   :  { %3767 = vrot.lane.b32.xlu1 %v3762_v4, %s6456_s30 }
0x3608   :  { %v6059_v14 = vpop.f32.mrf.mxu1 }
0x3679   :  { %v3768_v33 = vpop.permute.xlu1 %3767 }
0x367a   :  { %v3791_v11 = vadd.f32 %v3768_v33, %v7256_v57  ;;  %v3790_v48 = vadd.f32 %v3768_v33, %v7258_v19  ;;  %v3792_v21 = vadd.f32 %v3768_v33, %v7262_v17  ;;  %v3793_v30 = vadd.f32 %v3768_v33, %v7269_v22 }
0x367b   :  { %v3794_v12 = vadd.f32 %v3768_v33, %v7260_v10  ;;  %v3795_v55 = vadd.f32 %v3768_v33, %v7274_v18  ;;  %v3796_v47 = vadd.f32 %v3768_v33, %v7264_v3  ;;  %v3797_v52 = vadd.f32 %v3768_v33, %v7277_v42 }
0x367c   :  { %6328 = vtanh.f32 %v3791_v11  ;;  %v8169_v29 = vadd.f32 %v3768_v33, %v8079_v46 }
0x367d   :  { %6330 = vtanh.f32 %v3790_v48 }
0x367e   :  { %6332 = vtanh.f32 %v3792_v21  ;;  %9079 = vst [vmem:[#allocation19_spill] sm:$0xff] %v8169_v29  ;;  %v3779_v23 = vsel %vm2661_vm9, %v8169_v29, -inf }
0x367f   :  { %6334 = vtanh.f32 %v3793_v30 }
0x3680   :  { %6336 = vtanh.f32 %v3794_v12 }
0x3681   :  { %6338 = vtanh.f32 %v3795_v55 }
0x3682   :  { %6340 = vtanh.f32 %v3796_v47 }
0x3683   :  { %6342 = vtanh.f32 %v3797_v52 }
0x3689   :  { %v6329_v37 = vpop.eup %6328 }
0x368a   :  { %v6331_v26 = vpop.eup %6330  ;;  %v3807_v45 = vmul.f32 %v7796_v39, %v6329_v37 }
0x368b   :  { %v6333_v0 = vpop.eup %6332  ;;  %v3806_v49 = vmul.f32 %v7796_v39, %v6331_v26 }
0x368c   :  { %v3817_v56 = vsel %vm142_vm0, %v3807_v45, 0.0  ;;  %v3808_v31 = vmul.f32 %v7796_v39, %v6333_v0  ;;  %v6335_v40 = vpop.eup %6334 }
0x368d   :  { %3818 = vadd.xlane.f32.xlu0 %v3817_v56  ;;  %v3814_v59 = vsel %vm142_vm0, %v3806_v49, 0.0  ;;  %v3809_v62 = vmul.f32 %v7796_v39, %v6335_v40  ;;  %v6337_v38 = vpop.eup %6336 }
0x368e   :  { %3815 = vadd.xlane.f32.xlu1 %v3814_v59  ;;  %v3820_v60 = vsel %vm142_vm0, %v3808_v31, 0.0  ;;  %v3810_v6 = vmul.f32 %v7796_v39, %v6337_v38  ;;  %v6339_v43 = vpop.eup %6338 }
0x368f   :  { %v3823_v5 = vsel %vm142_vm0, %v3809_v62, 0.0  ;;  %v3811_v2 = vmul.f32 %v7796_v39, %v6339_v43  ;;  %v6341_v35 = vpop.eup %6340 }
0x3690   :  { %v3826_v32 = vsel %vm142_vm0, %v3810_v6, 0.0  ;;  %v3812_v54 = vmul.f32 %v7796_v39, %v6341_v35  ;;  %v6343_v8 = vpop.eup %6342 }
0x3691   :  { %3821 = vadd.xlane.f32.xlu0 %v3820_v60  ;;  %v3829_v51 = vsel %vm142_vm0, %v3811_v2, 0.0  ;;  %v3813_v1 = vmul.f32 %v7796_v39, %v6343_v8 }
0x3692   :  { %v3832_v63 = vsel %vm142_vm0, %v3812_v54, 0.0 }
0x3693   :  { %v3835_v41 = vsel %vm142_vm0, %v3813_v1, 0.0 }
0x3695   :  { %3824 = vadd.xlane.f32.xlu0 %v3823_v5 }
0x3699   :  { %3827 = vadd.xlane.f32.xlu0 %v3826_v32 }
0x369d   :  { %3830 = vadd.xlane.f32.xlu0 %v3829_v51 }
0x36a1   :  { %3833 = vadd.xlane.f32.xlu0 %v3832_v63 }
0x36a5   :  { %3836 = vadd.xlane.f32.xlu0 %v3835_v41 }
0x36a9   :  { %3780 = vmax.xlane.f32.xlu0 %v3779_v23 }
0x3716   :  { %v3819_v53 = vpop.xlane.xlu0 %3818 }
0x3717   :  { %v3816_v28 = vpop.xlane.xlu1 %3815  ;;  %v3853_v4 = vrot.slane %v3819_v53, %v7308_v25 }
0x3718   :  { %v3849_v14 = vrot.slane %v3816_v28, %v7308_v25 }
0x371a   :  { %v3822_v7 = vpop.xlane.xlu0 %3821  ;;  %v3878_v21 = vsel %vm2537_vm13, %v3853_v4, %v3849_v14  ;;  %v9081_v14 = vld [vmem:[#allocation7_spill] sm:$0xff] }
0x371b   :  { %v3857_v11 = vrot.slane %v3822_v7, %v7308_v25 }
0x371d   :  { %v3879_v12 = vsel %vm2539_vm14, %v3857_v11, %v3878_v21  ;;  %v9083_v21 = vld [vmem:[#allocation6_spill] sm:$0xff] }
0x371e   :  { %v3825_v50 = vpop.xlane.xlu0 %3824 }
0x371f   :  { %v3861_v46 = vrot.slane %v3825_v50, %v7308_v25 }
0x3721   :  { %v3880_v47 = vsel %vm2541_vm15, %v3861_v46, %v3879_v12  ;;  %v9082_v46 = vld [vmem:[#allocation9_spill] sm:$0xff] }
0x3722   :  { %v3828_v58 = vpop.xlane.xlu0 %3827 }
0x3723   :  { %v3865_v33 = vrot.slane %v3828_v58, %v7308_v25 }
0x3725   :  { %v3881_v37 = vsel %vm2543_vm1, %v3865_v33, %v3880_v47 }
0x3726   :  { %v3831_v61 = vpop.xlane.xlu0 %3830 }
0x3727   :  { %v3869_v30 = vrot.slane %v3831_v61, %v7308_v25  ;;  %v9080_v61 = vld [vmem:[#allocation8_spill] sm:$0xff] }
0x3729   :  { %v3882_v45 = vsel %vm2545_vm2, %v3869_v30, %v3881_v37  ;;  %v9084_v37 = vld [vmem:[#allocation17_spill] sm:$0xff] }
0x372a   :  { %v3834_v48 = vpop.xlane.xlu0 %3833 }
0x372b   :  { %v3873_v55 = vrot.slane %v3834_v48, %v7308_v25 }
0x372d   :  { %v3883_v49 = vsel %vm2547_vm3, %v3873_v55, %v3882_v45  ;;  %v9085_v45 = vld [vmem:[#allocation4_spill] sm:$0xff] }
0x372e   :  { %v3837_v26 = vpop.xlane.xlu0 %3836 }
0x372f   :  { %v3877_v0 = vrot.slane %v3837_v26, %v7308_v25 }
0x3731   :  { %v3884_v56 = vsel %vm2549_vm5, %v3877_v0, %v3883_v49 }
0x3732   :  { %v3886_v31 = vsel %vm281_vm6, %v3884_v56, -1e+10  ;;  %v3781_v48 = vpop.xlane.xlu0 %3780 }
0x3733   :  { %v3887_v52 = vsel %vm2441_vm12, %v3886_v31, -inf  ;;  %vm3782_vm10 = vcmp.ge.f32.partialorder %v8169_v29, %v3781_v48 }
0x3734   :  { %v3888_v40 = vrot.slane %v3887_v52, 4  ;;  %v3783_v30 = vsel %vm3782_vm10, %v9083_v21, 32.0 }
0x3735   :  { %v3784_v12 = vsel %vm2661_vm9, %v3783_v30, inf }
0x3736   :  { %v3889_v59 = vmax.f32 %v3887_v52, %v3888_v40  ;;  %v9086_v40 = vld [vmem:[#allocation12_spill] sm:$0xff] }
0x3738   :  { %v3890_v60 = vrot.slane %v3889_v59, 2 }
0x373a   :  { %v3891_v62 = vmax.f32 %v3889_v59, %v3890_v60  ;;  %v9087_v60 = vld [vmem:[#allocation18_spill] sm:$0xff] }
0x373c   :  { %v3892_v38 = vrot.slane %v3891_v62, 1 }
0x373e   :  { %v3893_v5 = vmax.f32 %v3891_v62, %v3892_v38 }
0x3740   :  { %v3894_v6 = vsub.f32 %v3886_v31, %v3893_v5 }
0x3742   :  { %v3895_v43 = vmul.f32 1.442695, %v3894_v6 }
0x3744   :  { %6344 = vpow2.f32 %v3895_v43 }
0x3751   :  { %v6345_v32 = vpop.eup %6344 }
0x3752   :  { %v3897_v2 = vsel %vm2441_vm12, %v6345_v32, 0.0 }
0x3753   :  { %v3898_v35 = vrot.slane %v3897_v2, 4 }
0x3755   :  { %v3899_v51 = vadd.f32 %v3898_v35, %v3897_v2  ;;  %v9088_v35 = vld [vmem:[#allocation5_spill] sm:$0xff] }
0x3757   :  { %v3900_v54 = vrot.slane %v3899_v51, 2 }
0x3759   :  { %v3901_v8 = vadd.f32 %v3900_v54, %v3899_v51  ;;  %v9089_v54 = vld [vmem:[#allocation13_spill] sm:$0xff] }
0x375b   :  { %v3902_v63 = vrot.slane %v3901_v8, 1 }
0x375d   :  { %v3903_v1 = vadd.f32 %v3902_v63, %v3901_v8 }
0x375f   :  { %6346 = vrcp.f32 %v3903_v1 }
0x376c   :  { %v6347_v41 = vpop.eup %6346 }
0x376d   :  { %v3905_v23 = vmul.f32 %v6347_v41, %v6345_v32 }
0x376f   :  { %5628 = vst.msk [vmem:[%s8983_s20 + $0x20] sm:$0xff] %vm2441_vm12, %v3905_v23  ;;  %v3916_v53 = vrot.slane %v3905_v23, %v6928_v27  ;;  %v3909_v7 = vrot.slane %v3905_v23, %v6680_v34  ;;  %v3923_v50 = vrot.slane %v3905_v23, %v7345_v20  ;;  %v3930_v58 = vrot.slane %v3905_v23, %v7353_v15 }
0x3770   :  { %v3937_v28 = vrot.slane %v3905_v23, %v9063_v24  ;;  %v3944_v4 = vrot.slane %v3905_v23, %v9080_v61  ;;  %v3951_v11 = vrot.slane %v3905_v23, %v9081_v14  ;;  %v3958_v33 = vrot.slane %v3905_v23, %v9082_v46 }
0x3771   :  { %3918 = vbcast.lane.b32.xlu1 %v3916_v53, 256  ;;  %3911 = vbcast.lane.b32.xlu0 %v3909_v7, 256 }
0x3775   :  { %3925 = vbcast.lane.b32.xlu1 %v3923_v50, 256  ;;  %3932 = vbcast.lane.b32.xlu0 %v3930_v58, 256  ;;  %v9090_v50 = vld [vmem:[#allocation14_spill] sm:$0xff] }
0x3779   :  { %3939 = vbcast.lane.b32.xlu1 %v3937_v28, 256  ;;  %3946 = vbcast.lane.b32.xlu0 %v3944_v4, 256  ;;  %v9091_v28 = vld [vmem:[#allocation15_spill] sm:$0xff] }
0x377d   :  { %3953 = vbcast.lane.b32.xlu1 %v3951_v11, 256  ;;  %3960 = vbcast.lane.b32.xlu0 %v3958_v33, 256 }
0x37a1   :  { %3785 = vmin.xlane.f32.xlu1 %v3784_v12 }
0x37e3   :  { %v3919_v55 = vpop.permute.xlu1 %3918  ;;  %v3912_v47 = vpop.permute.xlu0 %3911 }
0x37e4   :  { %v3963_v26 = vmul.f32 %v9084_v37, %v3919_v55  ;;  %v3962_v0 = vmul.f32 %v9085_v45, %v3912_v47  ;;  %v9092_v47 = vld [vmem:[#allocation11_spill] sm:$0xff] }
0x37e6   :  { %v3971_v49 = vsel %vm2062_vm11, %v3963_v26, 0.0  ;;  %v3970_v56 = vsel %vm2062_vm11, %v3962_v0, 0.0 }
0x37e7   :  { %v3926_v31 = vpop.permute.xlu1 %3925  ;;  %v3933_v52 = vpop.permute.xlu0 %3932  ;;  %v3972_v38 = vadd.f32 %v3971_v49, %v3970_v56 }
0x37e8   :  { %v3964_v59 = vmul.f32 %v9086_v40, %v3926_v31  ;;  %v3965_v62 = vmul.f32 %v9087_v60, %v3933_v52 }
0x37ea   :  { %v3973_v5 = vsel %vm2062_vm11, %v3964_v59, 0.0  ;;  %v3975_v2 = vsel %vm2062_vm11, %v3965_v62, 0.0 }
0x37eb   :  { %v3974_v6 = vadd.f32 %v3973_v5, %v3972_v38  ;;  %v3940_v43 = vpop.permute.xlu1 %3939  ;;  %v3947_v32 = vpop.permute.xlu0 %3946 }
0x37ec   :  { %v3966_v51 = vmul.f32 %v9088_v35, %v3940_v43  ;;  %v3967_v8 = vmul.f32 %v9089_v54, %v3947_v32 }
0x37ed   :  { %v3976_v63 = vadd.f32 %v3975_v2, %v3974_v6 }
0x37ee   :  { %v3977_v1 = vsel %vm2062_vm11, %v3966_v51, 0.0  ;;  %v3979_v7 = vsel %vm2062_vm11, %v3967_v8, 0.0 }
0x37ef   :  { %v3978_v41 = vadd.f32 %v3977_v1, %v3976_v63  ;;  %v3954_v23 = vpop.permute.xlu1 %3953  ;;  %v3961_v53 = vpop.permute.xlu0 %3960 }
0x37f0   :  { %v3968_v58 = vmul.f32 %v9090_v50, %v3954_v23  ;;  %v3969_v4 = vmul.f32 %v9091_v28, %v3961_v53 }
0x37f1   :  { %v3980_v11 = vadd.f32 %v3979_v7, %v3978_v41 }
0x37f2   :  { %v3981_v33 = vsel %vm2062_vm11, %v3968_v58, 0.0  ;;  %v3983_v30 = vsel %vm2062_vm11, %v3969_v4, 0.0 }
0x37f3   :  { %v3982_v48 = vadd.f32 %v3981_v33, %v3980_v11 }
0x37f5   :  { %v3984_v12 = vadd.f32 %v3983_v30, %v3982_v48 }
0x37f7   :  { %3987 = vrot.lane.b32.xlu0 %v3984_v12, %s6457_s6 }
0x37fb   :  { %3991 = vrot.lane.b32.xlu0 %v8105_v44, %s6455_s28 }
0x382a   :  { %v3786_v55 = vpop.xlane.xlu1 %3785 }
0x382b   :  { %vm3787_vm7 = vcmp.eq.f32.partialorder %v9092_v47, %v3786_v55 }
0x382c   :  { %v5624_v26 = vsel %vm3787_vm7, 1.0, %v9060_v16 }
0x382d   :  { %3985 = vst.msk [vmem:[#allocation3] sm:$0xff] %vm142_vm0, %v5624_v26 }
0x3869   :  { %v3988_v45 = vpop.permute.xlu0 %3987 }
0x386a   :  { %3990 = vst.msk [vmem:[#allocation3] sm:$0xff] %vm2656_vm8, %v3988_v45 }
0x386d   :  { %v3992_v0 = vpop.permute.xlu0 %3991 }
0x386e   :  { %3994 = vst.msk [vmem:[#allocation3] sm:$0xff] %vm2661_vm9, %v3992_v0 }
0x3875   :  { %v3995_v49 = vld [vmem:[#allocation3] sm:$0xff] }
0x3876   :  { %4093 = vmatmul.mubr.f32.vlgmr.msra.gmra.mxu1 %v3995_v49 }
0x3877   :  { %6079 = vmatprep.mubr.msk.f32.mxu1 %vm6454_vm4, %v9060_v16 }
0x3936   :  { %v4094_v56 = vpop.f32.mrf.mxu1 }
0x3937   :  { %v4095_v40 = vadd.f32 %v4094_v56, %v7596_v13 }
0x3938   :  { %v4096_v31 = vpop.f32.mrf.mxu1 }
0x3939   :  { %v4097_v52 = vadd.f32 %v4096_v31, %v7591_v9 }
0x393b   :  { %4107 = vrot.lane.b32.xlu0 %v4097_v52, %s6455_s28  ;;  %v4099_v59 = vadd.f32 %v4097_v52, %v4095_v40 }
0x393d   :  { %v5625_v62 = vmul.f32 -1.442695, %v4099_v59 }
0x393f   :  { %6348 = vpow2.f32 %v5625_v62 }
0x394c   :  { %v6349_v38 = vpop.eup %6348 }
0x394d   :  { %v4103_v5 = vadd.f32 1.0, %v6349_v38  ;;  %v8265_v38 = vld [vmem:[%s8982_s15] ss:$0 sm:$0xff] }
0x394f   :  { %6350 = vrcp.f32 %v4103_v5 }
0x395c   :  { %v6351_v6 = vpop.eup %6350 }
0x395d   :  { %v4117_v54 = vsub.f32 1.0, %v6351_v6  ;;  %v4123_v63 = vmul.f32 %v6351_v6, %v8105_v44 }
0x39ad   :  { %v4108_v43 = vpop.permute.xlu0 %4107 }
0x39ae   :  { %v4110_v32 = vmul.f32 %v6351_v6, %v4108_v43 }
0x39b0   :  { %4112 = vrot.lane.b32.xlu0 %v4110_v32, %s6455_s28 }
0x3a22   :  { %v4113_v2 = vpop.permute.xlu0 %4112 }
0x3a23   :  { %v4115_v35 = vadd.f32 %v4113_v2, %v4095_v40 }
0x3a25   :  { %6352 = vtanh.f32 %v4115_v35 }
0x3a32   :  { %v6353_v51 = vpop.eup %6352 }
0x3a33   :  { %4119 = vrot.lane.b32.xlu0 %v6353_v51, %s6456_s30 }
0x3aa5   :  { %v4120_v8 = vpop.permute.xlu0 %4119 }
0x3aa6   :  { %v4122_v1 = vmul.f32 %v4120_v8, %v4117_v54 }
0x3aa8   :  { %v8239_v41 = vadd.f32 %v4123_v63, %v4122_v1 }
0x3aaa   :  { %4130 = vrot.lane.b32.xlu0 %v8239_v41, %s6456_s30 }
0x3b1c   :  { %v4131_v23 = vpop.permute.xlu0 %4130 }
0x3b1d   :  { %6069 = vmatmul.mubr.msk.f32.vlgmr.msra.gmra.mxu0 %vm142_vm0, %v4131_v23 }
0x3b1e   :  { %4530 = vmatprep.mubr.f32.mxu0 %v9060_v16 }
0x3bdd   :  { %v4200_v53 = vpop.f32.mrf.mxu0 }
0x3bde   :  { %4205 = vrot.lane.b32.xlu0 %v4200_v53, %s6456_s30 }
0x3bdf   :  { %v6070_v7 = vpop.f32.mrf.mxu0 }
0x3c50   :  { %v4206_v50 = vpop.permute.xlu0 %4205 }
0x3c51   :  { %v4229_v58 = vadd.f32 %v4206_v50, %v7256_v57  ;;  %v4228_v44 = vadd.f32 %v4206_v50, %v7258_v19  ;;  %v4230_v28 = vadd.f32 %v4206_v50, %v7262_v17  ;;  %v4231_v4 = vadd.f32 %v4206_v50, %v7269_v22 }
0x3c52   :  { %v4232_v11 = vadd.f32 %v4206_v50, %v7260_v10  ;;  %v4233_v33 = vadd.f32 %v4206_v50, %v7274_v18  ;;  %v4234_v48 = vadd.f32 %v4206_v50, %v7264_v3  ;;  %v4235_v56 = vadd.f32 %v4206_v50, %v7277_v42 }
0x3c53   :  { %6354 = vtanh.f32 %v4229_v58  ;;  %v8259_v59 = vadd.f32 %v4206_v50, %v4095_v40 }
0x3c54   :  { %6356 = vtanh.f32 %v4228_v44 }
0x3c55   :  { %6358 = vtanh.f32 %v4230_v28  ;;  %9093 = vst [vmem:[#allocation17_spill] sm:$0xff] %v8259_v59  ;;  %v4217_v6 = vsel %vm2661_vm9, %v8259_v59, -inf }
0x3c56   :  { %6360 = vtanh.f32 %v4231_v4 }
0x3c57   :  { %6362 = vtanh.f32 %v4232_v11 }
0x3c58   :  { %6364 = vtanh.f32 %v4233_v33 }
0x3c59   :  { %6366 = vtanh.f32 %v4234_v48 }
0x3c5a   :  { %6368 = vtanh.f32 %v4235_v56 }
0x3c60   :  { %v6355_v30 = vpop.eup %6354 }
0x3c61   :  { %v6357_v12 = vpop.eup %6356  ;;  %v4245_v55 = vmul.f32 %v7796_v39, %v6355_v30 }
0x3c62   :  { %v6359_v26 = vpop.eup %6358  ;;  %v4244_v45 = vmul.f32 %v7796_v39, %v6357_v12 }
0x3c63   :  { %v4255_v0 = vsel %vm142_vm0, %v4245_v55, 0.0  ;;  %v4246_v49 = vmul.f32 %v7796_v39, %v6359_v26  ;;  %v6361_v31 = vpop.eup %6360 }
0x3c64   :  { %4256 = vadd.xlane.f32.xlu1 %v4255_v0  ;;  %v4252_v52 = vsel %vm142_vm0, %v4244_v45, 0.0  ;;  %v4247_v5 = vmul.f32 %v8265_v38, %v6361_v31  ;;  %v6363_v39 = vpop.eup %6362 }
0x3c65   :  { %4253 = vadd.xlane.f32.xlu0 %v4252_v52  ;;  %v4258_v62 = vsel %vm142_vm0, %v4246_v49, 0.0  ;;  %v4248_v43 = vmul.f32 %v8265_v38, %v6363_v39  ;;  %v6365_v32 = vpop.eup %6364 }
0x3c66   :  { %v4261_v40 = vsel %vm142_vm0, %v4247_v5, 0.0  ;;  %v4249_v35 = vmul.f32 %v8265_v38, %v6365_v32  ;;  %v6367_v51 = vpop.eup %6366 }
0x3c67   :  { %v4264_v2 = vsel %vm142_vm0, %v4248_v43, 0.0  ;;  %v4250_v8 = vmul.f32 %v8265_v38, %v6367_v51  ;;  %v6369_v63 = vpop.eup %6368 }
0x3c68   :  { %4259 = vadd.xlane.f32.xlu1 %v4258_v62  ;;  %v4267_v54 = vsel %vm142_vm0, %v4249_v35, 0.0  ;;  %v4251_v23 = vmul.f32 %v8265_v38, %v6369_v63 }
0x3c69   :  { %4218 = vmax.xlane.f32.xlu0 %v4217_v6  ;;  %v4270_v1 = vsel %vm142_vm0, %v4250_v8, 0.0 }
0x3c6a   :  { %v4273_v53 = vsel %vm142_vm0, %v4251_v23, 0.0 }
0x3c6c   :  { %4262 = vadd.xlane.f32.xlu1 %v4261_v40 }
0x3c70   :  { %4265 = vadd.xlane.f32.xlu1 %v4264_v2 }
0x3c74   :  { %4268 = vadd.xlane.f32.xlu1 %v4267_v54 }
0x3c78   :  { %4271 = vadd.xlane.f32.xlu1 %v4270_v1 }
0x3c7c   :  { %4274 = vadd.xlane.f32.xlu1 %v4273_v53 }
0x3ced   :  { %v4257_v7 = vpop.xlane.xlu1 %4256 }
0x3cee   :  { %v4254_v28 = vpop.xlane.xlu0 %4253  ;;  %v4291_v11 = vrot.slane %v4257_v7, %v7308_v25 }
0x3cef   :  { %v4287_v33 = vrot.slane %v4254_v28, %v7308_v25 }
0x3cf1   :  { %v4260_v50 = vpop.xlane.xlu1 %4259  ;;  %v4316_v26 = vsel %vm2537_vm13, %v4291_v11, %v4287_v33 }
0x3cf2   :  { %v4295_v48 = vrot.slane %v4260_v50, %v7308_v25 }
0x3cf4   :  { %v4317_v0 = vsel %vm2539_vm14, %v4295_v48, %v4316_v26 }
0x3cf5   :  { %v4263_v58 = vpop.xlane.xlu1 %4262 }
0x3cf6   :  { %v4299_v30 = vrot.slane %v4263_v58, %v7308_v25 }
0x3cf8   :  { %v4318_v56 = vsel %vm2541_vm15, %v4299_v30, %v4317_v0 }
0x3cf9   :  { %v4266_v44 = vpop.xlane.xlu1 %4265 }
0x3cfa   :  { %v4303_v12 = vrot.slane %v4266_v44, %v7308_v25 }
0x3cfc   :  { %v4319_v31 = vsel %vm2543_vm1, %v4303_v12, %v4318_v56  ;;  %v4219_v56 = vpop.xlane.xlu0 %4218 }
0x3cfd   :  { %v4269_v4 = vpop.xlane.xlu1 %4268  ;;  %vm4220_vm10 = vcmp.ge.f32.partialorder %v8259_v59, %v4219_v56  ;;  %v8472_v59 = vld [vmem:[#allocation2 + $0x30] sm:$0xff] }
0x3cfe   :  { %v4307_v45 = vrot.slane %v4269_v4, %v7308_v25  ;;  %9097 = vst [vmem:[#allocation5_spill] sm:$0xff] %v8472_v59 }
0x3d00   :  { %v4320_v62 = vsel %vm2545_vm2, %v4307_v45, %v4319_v31  ;;  %v4221_v31 = vsel %vm4220_vm10, %v9083_v21, 32.0 }
0x3d01   :  { %v4272_v55 = vpop.xlane.xlu1 %4271 }
0x3d02   :  { %v4311_v49 = vrot.slane %v4272_v55, %v7308_v25 }
0x3d04   :  { %v4321_v39 = vsel %vm2547_vm3, %v4311_v49, %v4320_v62  ;;  %v8316_v62 = vld [vmem:[%s8986_s16 + $0xf8] sm:$0xff] }
0x3d05   :  { %v4275_v52 = vpop.xlane.xlu1 %4274  ;;  %4466 = vmatprep.subr.mxu0 %v8316_v62 }
0x3d06   :  { %v4315_v5 = vrot.slane %v4275_v52, %v7308_v25  ;;  %v4222_v52 = vsel %vm2661_vm9, %v4221_v31, inf }
0x3d08   :  { %v4322_v6 = vsel %vm2549_vm5, %v4315_v5, %v4321_v39  ;;  %v8321_v5 = vld [vmem:[%s8986_s16 + $0xf0] sm:$0xff]  ;;  %v8326_v39 = vld [vmem:[%s8986_s16 + $0xe8] sm:$0xff] }
0x3d09   :  { %v4324_v40 = vsel %vm281_vm6, %v4322_v6, -1e+10  ;;  %v8332_v6 = vld [vmem:[%s8986_s16 + $0xe0] sm:$0xff]  ;;  %4467 = vmatpush1.msra.mxu0 %v8321_v5 }
0x3d0a   :  { %v4325_v43 = vsel %vm2441_vm12, %v4324_v40, -inf  ;;  %4468 = vmatprep.subr.mxu0 %v8326_v39 }
0x3d0b   :  { %v4326_v32 = vrot.slane %v4325_v43, 4  ;;  %4469 = vmatpush1.msra.mxu0 %v8332_v6 }
0x3d0d   :  { %v4327_v2 = vmax.f32 %v4325_v43, %v4326_v32  ;;  %v8344_v43 = vld [vmem:[%s8986_s16 + $0xd0] sm:$0xff]  ;;  %v8350_v32 = vld [vmem:[%s8986_s16 + $0xc8] sm:$0xff] }
0x3d0f   :  { %v4328_v35 = vrot.slane %v4327_v2, 2 }
0x3d11   :  { %v4329_v51 = vmax.f32 %v4327_v2, %v4328_v35  ;;  %v8356_v2 = vld [vmem:[%s8986_s16 + $0xc0] sm:$0xff]  ;;  %v8362_v35 = vld [vmem:[%s8986_s16 + $0xb8] sm:$0xff] }
0x3d13   :  { %v4330_v54 = vrot.slane %v4329_v51, 1 }
0x3d15   :  { %v4331_v8 = vmax.f32 %v4329_v51, %v4330_v54  ;;  %v8368_v51 = vld [vmem:[%s8986_s16 + $0xb0] sm:$0xff]  ;;  %v8374_v54 = vld [vmem:[%s8986_s16 + $0xa8] sm:$0xff] }
0x3d17   :  { %v4332_v63 = vsub.f32 %v4324_v40, %v4331_v8  ;;  %v8338_v40 = vld [vmem:[%s8986_s16 + $0xd8] sm:$0xff]  ;;  %v8380_v8 = vld [vmem:[%s8986_s16 + $0xa0] sm:$0xff] }
0x3d18   :  { %4470 = vmatprep.subr.mxu0 %v8338_v40 }
0x3d19   :  { %v4333_v1 = vmul.f32 1.442695, %v4332_v63  ;;  %4471 = vmatpush1.msra.mxu0 %v8344_v43  ;;  %v8386_v63 = vld [vmem:[%s8986_s16 + $0x98] sm:$0xff] }
0x3d1a   :  { %4472 = vmatprep.subr.mxu0 %v8350_v32 }
0x3d1b   :  { %6370 = vpow2.f32 %v4333_v1  ;;  %4473 = vmatpush1.msra.mxu0 %v8356_v2  ;;  %v8392_v1 = vld [vmem:[%s8986_s16 + $0x90] sm:$0xff] }
0x3d1c   :  { %4474 = vmatprep.subr.mxu0 %v8362_v35 }
0x3d1d   :  { %4475 = vmatpush1.msra.mxu0 %v8368_v51 }
0x3d1e   :  { %4476 = vmatprep.subr.mxu0 %v8374_v54 }
0x3d1f   :  { %4477 = vmatpush1.msra.mxu0 %v8380_v8 }
0x3d20   :  { %4478 = vmatprep.subr.mxu0 %v8386_v63 }
0x3d21   :  { %4479 = vmatpush1.msra.mxu0 %v8392_v1 }
0x3d28   :  { %v6371_v23 = vpop.eup %6370 }
0x3d29   :  { %v4335_v53 = vsel %vm2441_vm12, %v6371_v23, 0.0 }
0x3d2a   :  { %v4336_v7 = vrot.slane %v4335_v53, 4 }
0x3d2c   :  { %v4337_v50 = vadd.f32 %v4336_v7, %v4335_v53  ;;  %v8404_v53 = vld [vmem:[%s8986_s16 + $0x80] sm:$0xff]  ;;  %v8410_v7 = vld [vmem:[%s8986_s16 + $0x78] sm:$0xff] }
0x3d2e   :  { %v4338_v58 = vrot.slane %v4337_v50, 2 }
0x3d30   :  { %v4339_v44 = vadd.f32 %v4338_v58, %v4337_v50  ;;  %v8416_v50 = vld [vmem:[%s8986_s16 + $0x70] sm:$0xff]  ;;  %v8422_v58 = vld [vmem:[%s8986_s16 + $0x68] sm:$0xff] }
0x3d32   :  { %v4340_v28 = vrot.slane %v4339_v44, 1 }
0x3d34   :  { %v4341_v4 = vadd.f32 %v4340_v28, %v4339_v44  ;;  %v8428_v44 = vld [vmem:[%s8986_s16 + $0x60] sm:$0xff] }
0x3d36   :  { %6372 = vrcp.f32 %v4341_v4 }
0x3d43   :  { %v6373_v11 = vpop.eup %6372 }
0x3d44   :  { %v4343_v33 = vmul.f32 %v6373_v11, %v6371_v23  ;;  %v8398_v23 = vld [vmem:[%s8986_s16 + $0x88] sm:$0xff]  ;;  %v8433_v11 = vld [vmem:[#allocation2] sm:$0xff] }
0x3d45   :  { %4480 = vmatprep.subr.mxu0 %v8398_v23  ;;  %9094 = vst [vmem:[#allocation4_spill] sm:$0xff] %v8433_v11 }
0x3d46   :  { %5633 = vst.msk [vmem:[%s8983_s20 + $0x28] sm:$0xff] %vm2441_vm12, %v4343_v33  ;;  %v4347_v48 = vrot.slane %v4343_v33, %v6680_v34  ;;  %v4354_v30 = vrot.slane %v4343_v33, %v6928_v27  ;;  %v4361_v12 = vrot.slane %v4343_v33, %v7345_v20  ;;  %v4375_v55 = vrot.slane %v4343_v33, %v9063_v24 }
0x3d47   :  { %v4368_v26 = vrot.slane %v4343_v33, %v7353_v15  ;;  %v4389_v45 = vrot.slane %v4343_v33, %v9081_v14  ;;  %v4382_v0 = vrot.slane %v4343_v33, %v9080_v61  ;;  %v4396_v49 = vrot.slane %v4343_v33, %v9082_v46  ;;  %4481 = vmatpush1.msra.mxu0 %v8404_v53 }
0x3d48   :  { %4349 = vbcast.lane.b32.xlu1 %v4347_v48, 256  ;;  %4356 = vbcast.lane.b32.xlu0 %v4354_v30, 256 }
0x3d49   :  { %4482 = vmatprep.subr.mxu0 %v8410_v7 }
0x3d4a   :  { %4483 = vmatpush1.msra.mxu0 %v8416_v50 }
0x3d4b   :  { %4484 = vmatprep.subr.mxu0 %v8422_v58 }
0x3d4c   :  { %4363 = vbcast.lane.b32.xlu1 %v4361_v12, 256  ;;  %4377 = vbcast.lane.b32.xlu0 %v4375_v55, 256 }
0x3d4d   :  { %4485 = vmatpush1.msra.mxu0 %v8428_v44 }
0x3d50   :  { %4370 = vbcast.lane.b32.xlu1 %v4368_v26, 256  ;;  %4391 = vbcast.lane.b32.xlu0 %v4389_v45, 256  ;;  %v8439_v45 = vld [vmem:[#allocation2 + $0x10] sm:$0xff] }
0x3d51   :  { %9095 = vst [vmem:[#allocation12_spill] sm:$0xff] %v8439_v45 }
0x3d54   :  { %4384 = vbcast.lane.b32.xlu1 %v4382_v0, 256 }
0x3d58   :  { %4398 = vbcast.lane.b32.xlu1 %v4396_v49, 256 }
0x3d6f   :  { %4223 = vmin.xlane.f32.xlu0 %v4222_v52  ;;  %v8443_v52 = vld [vmem:[#allocation2 + $0x20] sm:$0xff] }
0x3d70   :  { %9096 = vst [vmem:[#allocation18_spill] sm:$0xff] %v8443_v52 }
0x3dba   :  { %v4350_v28 = vpop.permute.xlu1 %4349  ;;  %v4357_v4 = vpop.permute.xlu0 %4356 }
0x3dbb   :  { %v4400_v33 = vmul.f32 %v8433_v11, %v4350_v28  ;;  %v4401_v48 = vmul.f32 %v9084_v37, %v4357_v4  ;;  %v8450_v4 = vld [vmem:[%s8986_s16 + $0x58] sm:$0xff]  ;;  %v8527_v11 = vld [vmem:[%s8986_s16] sm:$0xff] }
0x3dbc   :  { %4486 = vmatprep.subr.mxu0 %v8450_v4 }
0x3dbd   :  { %v4408_v55 = vsel %vm2062_vm11, %v4400_v33, 0.0  ;;  %v4409_v26 = vsel %vm2062_vm11, %v4401_v48, 0.0  ;;  %v8455_v33 = vld [vmem:[%s8986_s16 + $0x50] sm:$0xff]  ;;  %v8460_v48 = vld [vmem:[%s8986_s16 + $0x48] sm:$0xff] }
0x3dbe   :  { %v4364_v30 = vpop.permute.xlu1 %4363  ;;  %v4378_v12 = vpop.permute.xlu0 %4377  ;;  %v4410_v56 = vadd.f32 %v4409_v26, %v4408_v55  ;;  %4487 = vmatpush1.msra.mxu0 %v8455_v33 }
0x3dbf   :  { %v4402_v0 = vmul.f32 %v8439_v45, %v4364_v30  ;;  %v4404_v28 = vmul.f32 %v8443_v52, %v4378_v12  ;;  %4488 = vmatprep.subr.mxu0 %v8460_v48  ;;  %v8514_v45 = vld [vmem:[#allocation2 + $0x38] sm:$0xff] }
0x3dc0   :  { %9099 = vst [vmem:[#allocation14_spill] sm:$0xff] %v8514_v45 }
0x3dc1   :  { %v4411_v49 = vsel %vm2062_vm11, %v4402_v0, 0.0 }
0x3dc2   :  { %v4371_v31 = vpop.permute.xlu1 %4370  ;;  %v4412_v30 = vadd.f32 %v4411_v49, %v4410_v56  ;;  %v4392_v55 = vpop.permute.xlu0 %4391  ;;  %v8475_v56 = vld [vmem:[#allocation2 + $0x28] sm:$0xff] }
0x3dc3   :  { %v4403_v37 = vmul.f32 %v9087_v60, %v4371_v31  ;;  %v8466_v60 = vld [vmem:[%s8986_s16 + $0x40] sm:$0xff]  ;;  %v4415_v31 = vsel %vm2062_vm11, %v4404_v28, 0.0  ;;  %v4406_v49 = vmul.f32 %v8472_v59, %v4392_v55  ;;  %9098 = vst [vmem:[#allocation13_spill] sm:$0xff] %v8475_v56  ;;  %v8492_v28 = vld [vmem:[%s8986_s16 + $0x28] sm:$0xff]  ;;  %v8505_v59 = vld [vmem:[%s8986_s16 + $0x18] sm:$0xff] }
0x3dc4   :  { %4489 = vmatpush1.msra.mxu0 %v8466_v60 }
0x3dc5   :  { %v4413_v12 = vsel %vm2062_vm11, %v4403_v37, 0.0  ;;  %v8482_v37 = vld [vmem:[%s8986_s16 + $0x38] sm:$0xff] }
0x3dc6   :  { %v4414_v26 = vadd.f32 %v4413_v12, %v4412_v30  ;;  %v4385_v0 = vpop.permute.xlu1 %4384  ;;  %v8487_v30 = vld [vmem:[%s8986_s16 + $0x30] sm:$0xff]  ;;  %4490 = vmatprep.subr.mxu0 %v8482_v37  ;;  %v8498_v12 = vld [vmem:[%s8986_s16 + $0x20] sm:$0xff] }
0x3dc7   :  { %v4405_v29 = vmul.f32 %v8475_v56, %v4385_v0  ;;  %4491 = vmatpush1.msra.mxu0 %v8487_v30 }
0x3dc8   :  { %v4416_v55 = vadd.f32 %v4415_v31, %v4414_v26  ;;  %4492 = vmatprep.subr.mxu0 %v8492_v28  ;;  %v8511_v26 = vld [vmem:[%s8986_s16 + $0x10] sm:$0xff]  ;;  %v4419_v31 = vsel %vm2062_vm11, %v4406_v49, 0.0 }
0x3dc9   :  { %v4417_v0 = vsel %vm2062_vm11, %v4405_v29, 0.0  ;;  %4493 = vmatpush1.msra.mxu0 %v8498_v12 }
0x3dca   :  { %v4418_v56 = vadd.f32 %v4417_v0, %v4416_v55  ;;  %v4399_v52 = vpop.permute.xlu1 %4398  ;;  %v8521_v55 = vld [vmem:[%s8986_s16 + $0x8] sm:$0xff]  ;;  %4494 = vmatprep.subr.mxu0 %v8505_v59 }
0x3dcb   :  { %v4407_v29 = vmul.f32 %v8514_v45, %v4399_v52  ;;  %4495 = vmatpush1.msra.mxu0 %v8511_v26 }
0x3dcc   :  { %v4420_v0 = vadd.f32 %v4419_v31, %v4418_v56  ;;  %4496 = vmatprep.subr.mxu0 %v8521_v55 }
0x3dcd   :  { %v4421_v49 = vsel %vm2062_vm11, %v4407_v29, 0.0  ;;  %4497 = vmatpush1.msra.mxu0 %v8527_v11 }
0x3dce   :  { %v4422_v52 = vadd.f32 %v4421_v49, %v4420_v0  ;;  %6082 = vmatprep.subr.mxu0 %v9060_v16 }
0x3dd0   :  { %4425 = vrot.lane.b32.xlu1 %v4422_v52, %s6457_s6 }
0x3dd4   :  { %4429 = vrot.lane.b32.xlu1 %v8239_v41, %s6455_s28 }
0x3df8   :  { %v4224_v56 = vpop.xlane.xlu0 %4223 }
0x3df9   :  { %vm4225_vm7 = vcmp.eq.f32.partialorder %v9092_v47, %v4224_v56 }
0x3dfa   :  { %v5629_v31 = vsel %vm4225_vm7, 1.0, %v9060_v16 }
0x3dfb   :  { %4423 = vst.msk [vmem:[#allocation3] sm:$0xff] %vm142_vm0, %v5629_v31 }
0x3e42   :  { %v4426_v29 = vpop.permute.xlu1 %4425 }
0x3e43   :  { %4428 = vst.msk [vmem:[#allocation3] sm:$0xff] %vm2656_vm8, %v4426_v29 }
0x3e46   :  { %v4430_v0 = vpop.permute.xlu1 %4429 }
0x3e47   :  { %4432 = vst.msk [vmem:[#allocation3] sm:$0xff] %vm2661_vm9, %v4430_v0 }
0x3e4e   :  { %v4433_v49 = vld [vmem:[#allocation3] sm:$0xff] }
0x3e4f   :  { %4531 = vmatmul.mubr.f32.vlgmr.msra.gmra.mxu0 %v4433_v49 }
0x3e50   :  { %6090 = vmatprep.mubr.msk.f32.mxu0 %vm6454_vm4, %v9060_v16 }
0x3f0f   :  { %v4532_v52 = vpop.f32.mrf.mxu0 }
0x3f10   :  { %v8547_v56 = vadd.f32 %v4532_v52, %v7596_v13  ;;  %v4566_v52 = vld [vmem:[%s8988_s18 + $0x18] sm:$0xff] }
0x3f11   :  { %v4534_v45 = vpop.f32.mrf.mxu0  ;;  %6072 = vmatpush3.msra.mxu1 %v4566_v52  ;;  %6083 = vmatpush3.msra.mxu0 %v4566_v52 }
0x3f12   :  { %v4535_v21 = vadd.f32 %v4534_v45, %v7591_v9  ;;  %6073 = vmatprep.subr.mxu1 %v9060_v16  ;;  %6084 = vmatprep.subr.mxu0 %v9060_v16 }
0x3f14   :  { %4545 = vrot.lane.b32.xlu1 %v4535_v21, %s6455_s28  ;;  %v4537_v31 = vadd.f32 %v4535_v21, %v8547_v56  ;;  %v4565_v21 = vld [vmem:[%s8988_s18 + $0x10] sm:$0xff] }
0x3f15   :  { %6074 = vmatpush3.msra.mxu1 %v4565_v21  ;;  %6085 = vmatpush3.msra.mxu0 %v4565_v21 }
0x3f16   :  { %v5630_v29 = vmul.f32 -1.442695, %v4537_v31  ;;  %6075 = vmatprep.subr.mxu1 %v9060_v16  ;;  %6086 = vmatprep.subr.mxu0 %v9060_v16 }
0x3f18   :  { %6374 = vpow2.f32 %v5630_v29 }
0x3f25   :  { %v6375_v47 = vpop.eup %6374 }
0x3f26   :  { %v4541_v0 = vadd.f32 1.0, %v6375_v47 }
0x3f28   :  { %6376 = vrcp.f32 %v4541_v0 }
0x3f35   :  { %v6377_v49 = vpop.eup %6376 }
0x3f36   :  { %v4555_v47 = vsub.f32 1.0, %v6377_v49  ;;  %v4561_v29 = vmul.f32 %v6377_v49, %v8239_v41 }
0x3f86   :  { %v4546_v46 = vpop.permute.xlu1 %4545 }
0x3f87   :  { %v4548_v14 = vmul.f32 %v6377_v49, %v4546_v46 }
0x3f89   :  { %4550 = vrot.lane.b32.xlu1 %v4548_v14, %s6455_s28  ;;  %v4564_v14 = vld [vmem:[%s8988_s18 + $0x8] sm:$0xff] }
0x3f8a   :  { %6076 = vmatpush3.msra.mxu1 %v4564_v14  ;;  %6087 = vmatpush3.msra.mxu0 %v4564_v14 }
0x3f8b   :  { %6077 = vmatprep.subr.mxu1 %v9060_v16  ;;  %6088 = vmatprep.subr.mxu0 %v9060_v16 }
0x3ffb   :  { %v4551_v61 = vpop.permute.xlu1 %4550 }
0x3ffc   :  { %v4553_v45 = vadd.f32 %v4551_v61, %v8547_v56  ;;  %v4563_v61 = vld [vmem:[%s8988_s18] sm:$0xff] }
0x3ffd   :  { %6078 = vmatpush3.msra.mxu1 %v4563_v61  ;;  %6089 = vmatpush3.msra.mxu0 %v4563_v61 }
0x3ffe   :  { %6378 = vtanh.f32 %v4553_v45  ;;  %4904 = vmatprep.subr.mxu1 %v8316_v62 }
0x400b   :  { %v6379_v46 = vpop.eup %6378 }
0x400c   :  { %4557 = vrot.lane.b32.xlu1 %v6379_v46, %s6456_s30 }
0x407e   :  { %v4558_v31 = vpop.permute.xlu1 %4557 }
0x407f   :  { %v4560_v0 = vmul.f32 %v4558_v31, %v4555_v47 }
0x4081   :  { %v8573_v45 = vadd.f32 %v4561_v29, %v4560_v0 }
0x4083   :  { %4568 = vrot.lane.b32.xlu1 %v8573_v45, %s6456_s30 }
0x40f5   :  { %v4569_v52 = vpop.permute.xlu1 %4568 }
0x40f6   :  { %6080 = vmatmul.mubr.msk.f32.vlgmr.msra.gmra.mxu1 %vm142_vm0, %v4569_v52 }
0x40f7   :  { %4905 = vmatpush1.msra.mxu1 %v8321_v5  ;;  %4968 = vmatprep.mubr.f32.mxu1 %v9060_v16 }
0x40f8   :  { %4906 = vmatprep.subr.mxu1 %v8326_v39 }
0x40f9   :  { %4907 = vmatpush1.msra.mxu1 %v8332_v6 }
0x40fa   :  { %4908 = vmatprep.subr.mxu1 %v8338_v40 }
0x40fb   :  { %4909 = vmatpush1.msra.mxu1 %v8344_v43 }
0x40fc   :  { %4910 = vmatprep.subr.mxu1 %v8350_v32 }
0x40fd   :  { %4911 = vmatpush1.msra.mxu1 %v8356_v2 }
0x40fe   :  { %4912 = vmatprep.subr.mxu1 %v8362_v35 }
0x40ff   :  { %4913 = vmatpush1.msra.mxu1 %v8368_v51 }
0x4100   :  { %4914 = vmatprep.subr.mxu1 %v8374_v54 }
0x4101   :  { %4915 = vmatpush1.msra.mxu1 %v8380_v8 }
0x4102   :  { %4916 = vmatprep.subr.mxu1 %v8386_v63 }
0x4103   :  { %4917 = vmatpush1.msra.mxu1 %v8392_v1 }
0x4104   :  { %4918 = vmatprep.subr.mxu1 %v8398_v23 }
0x4105   :  { %4919 = vmatpush1.msra.mxu1 %v8404_v53 }
0x4106   :  { %4920 = vmatprep.subr.mxu1 %v8410_v7 }
0x4107   :  { %4921 = vmatpush1.msra.mxu1 %v8416_v50 }
0x4108   :  { %4922 = vmatprep.subr.mxu1 %v8422_v58 }
0x4109   :  { %4923 = vmatpush1.msra.mxu1 %v8428_v44 }
0x410a   :  { %4924 = vmatprep.subr.mxu1 %v8450_v4 }
0x410b   :  { %4925 = vmatpush1.msra.mxu1 %v8455_v33 }
0x410c   :  { %4926 = vmatprep.subr.mxu1 %v8460_v48 }
0x410d   :  { %4927 = vmatpush1.msra.mxu1 %v8466_v60 }
0x410e   :  { %4928 = vmatprep.subr.mxu1 %v8482_v37 }
0x410f   :  { %4929 = vmatpush1.msra.mxu1 %v8487_v30 }
0x4110   :  { %4930 = vmatprep.subr.mxu1 %v8492_v28 }
0x4111   :  { %4931 = vmatpush1.msra.mxu1 %v8498_v12 }
0x4112   :  { %4932 = vmatprep.subr.mxu1 %v8505_v59 }
0x4113   :  { %4933 = vmatpush1.msra.mxu1 %v8511_v26 }
0x4114   :  { %4934 = vmatprep.subr.mxu1 %v8521_v55 }
0x4115   :  { %4935 = vmatpush1.msra.mxu1 %v8527_v11 }
0x4116   :  { %6093 = vmatprep.subr.mxu1 %v9060_v16 }
0x41b6   :  { %v4638_v41 = vpop.f32.mrf.mxu1 }
0x41b7   :  { %4643 = vrot.lane.b32.xlu1 %v4638_v41, %s6456_s30 }
0x41b8   :  { %v6081_v62 = vpop.f32.mrf.mxu1 }
0x4229   :  { %v4644_v5 = vpop.permute.xlu1 %4643 }
0x422a   :  { %v4667_v39 = vadd.f32 %v4644_v5, %v7256_v57  ;;  %v4666_v6 = vadd.f32 %v4644_v5, %v7258_v19  ;;  %v4668_v40 = vadd.f32 %v4644_v5, %v7262_v17  ;;  %v4669_v59 = vadd.f32 %v4644_v5, %v7269_v22 }
0x422b   :  { %v4670_v43 = vadd.f32 %v4644_v5, %v7260_v10  ;;  %v4671_v32 = vadd.f32 %v4644_v5, %v7274_v18  ;;  %v4672_v2 = vadd.f32 %v4644_v5, %v7264_v3  ;;  %v4673_v53 = vadd.f32 %v4644_v5, %v7277_v42 }
0x422c   :  { %6380 = vtanh.f32 %v4667_v39  ;;  %v8637_v14 = vadd.f32 %v4644_v5, %v8547_v56 }
0x422d   :  { %6382 = vtanh.f32 %v4666_v6 }
0x422e   :  { %6384 = vtanh.f32 %v4668_v40  ;;  %v4655_v61 = vsel %vm2661_vm9, %v8637_v14, -inf }
0x422f   :  { %6386 = vtanh.f32 %v4669_v59 }
0x4230   :  { %6388 = vtanh.f32 %v4670_v43 }
0x4231   :  { %6390 = vtanh.f32 %v4671_v32 }
0x4232   :  { %6392 = vtanh.f32 %v4672_v2 }
0x4233   :  { %6394 = vtanh.f32 %v4673_v53 }
0x4239   :  { %v6381_v35 = vpop.eup %6380 }
0x423a   :  { %v6383_v51 = vpop.eup %6382  ;;  %v4683_v54 = vmul.f32 %v8265_v38, %v6381_v35 }
0x423b   :  { %v6385_v8 = vpop.eup %6384  ;;  %v4682_v63 = vmul.f32 %v8265_v38, %v6383_v51 }
0x423c   :  { %v4693_v1 = vsel %vm142_vm0, %v4683_v54, 0.0  ;;  %v4684_v23 = vmul.f32 %v8265_v38, %v6385_v8  ;;  %v6387_v7 = vpop.eup %6386 }
0x423d   :  { %4694 = vadd.xlane.f32.xlu0 %v4693_v1  ;;  %v4690_v50 = vsel %vm142_vm0, %v4682_v63, 0.0  ;;  %v4685_v44 = vmul.f32 %v8265_v38, %v6387_v7  ;;  %v6389_v11 = vpop.eup %6388 }
0x423e   :  { %4691 = vadd.xlane.f32.xlu1 %v4690_v50  ;;  %v4696_v58 = vsel %vm142_vm0, %v4684_v23, 0.0  ;;  %v4686_v33 = vmul.f32 %v8265_v38, %v6389_v11  ;;  %v6391_v48 = vpop.eup %6390 }
0x423f   :  { %v4699_v4 = vsel %vm142_vm0, %v4685_v44, 0.0  ;;  %v4687_v37 = vmul.f32 %v8265_v38, %v6391_v48  ;;  %v6393_v30 = vpop.eup %6392 }
0x4240   :  { %v4702_v60 = vsel %vm142_vm0, %v4686_v33, 0.0  ;;  %v4688_v12 = vmul.f32 %v8265_v38, %v6393_v30  ;;  %v6395_v26 = vpop.eup %6394 }
0x4241   :  { %4697 = vadd.xlane.f32.xlu0 %v4696_v58  ;;  %v4705_v28 = vsel %vm142_vm0, %v4687_v37, 0.0  ;;  %v4689_v49 = vmul.f32 %v8265_v38, %v6395_v26 }
0x4242   :  { %v4708_v55 = vsel %vm142_vm0, %v4688_v12, 0.0 }
0x4243   :  { %v4711_v21 = vsel %vm142_vm0, %v4689_v49, 0.0 }
0x4245   :  { %4700 = vadd.xlane.f32.xlu0 %v4699_v4 }
0x4249   :  { %4703 = vadd.xlane.f32.xlu0 %v4702_v60 }
0x424d   :  { %4706 = vadd.xlane.f32.xlu0 %v4705_v28 }
0x4251   :  { %4709 = vadd.xlane.f32.xlu0 %v4708_v55 }
0x4255   :  { %4712 = vadd.xlane.f32.xlu0 %v4711_v21 }
0x4259   :  { %4656 = vmax.xlane.f32.xlu0 %v4655_v61 }
0x42c6   :  { %v4695_v46 = vpop.xlane.xlu0 %4694 }
0x42c7   :  { %v4692_v0 = vpop.xlane.xlu1 %4691  ;;  %v4729_v41 = vrot.slane %v4695_v46, %v7308_v25 }
0x42c8   :  { %v4725_v62 = vrot.slane %v4692_v0, %v7308_v25 }
0x42ca   :  { %v4698_v47 = vpop.xlane.xlu0 %4697  ;;  %v4754_v40 = vsel %vm2537_vm13, %v4729_v41, %v4725_v62  ;;  %v9101_v62 = vld [vmem:[#allocation7_spill] sm:$0xff] }
0x42cb   :  { %v4733_v39 = vrot.slane %v4698_v47, %v7308_v25 }
0x42cd   :  { %v4755_v43 = vsel %vm2539_vm14, %v4733_v39, %v4754_v40  ;;  %v9103_v40 = vld [vmem:[#allocation6_spill] sm:$0xff] }
0x42ce   :  { %v4701_v31 = vpop.xlane.xlu0 %4700 }
0x42cf   :  { %v4737_v56 = vrot.slane %v4701_v31, %v7308_v25 }
0x42d1   :  { %v4756_v2 = vsel %vm2541_vm15, %v4737_v56, %v4755_v43  ;;  %v9102_v56 = vld [vmem:[#allocation9_spill] sm:$0xff] }
0x42d2   :  { %v4704_v29 = vpop.xlane.xlu0 %4703 }
0x42d3   :  { %v4741_v5 = vrot.slane %v4704_v29, %v7308_v25 }
0x42d5   :  { %v4757_v35 = vsel %vm2543_vm1, %v4741_v5, %v4756_v2 }
0x42d6   :  { %v4707_v52 = vpop.xlane.xlu0 %4706 }
0x42d7   :  { %v4745_v59 = vrot.slane %v4707_v52, %v7308_v25  ;;  %v9100_v52 = vld [vmem:[#allocation8_spill] sm:$0xff] }
0x42d9   :  { %v4758_v54 = vsel %vm2545_vm2, %v4745_v59, %v4757_v35  ;;  %v8675_v35 = vld [vmem:[#allocation2 + $0x8] sm:$0xff] }
0x42da   :  { %v4710_v6 = vpop.xlane.xlu0 %4709 }
0x42db   :  { %v4749_v32 = vrot.slane %v4710_v6, %v7308_v25 }
0x42dd   :  { %v4759_v63 = vsel %vm2547_vm3, %v4749_v32, %v4758_v54  ;;  %v9104_v54 = vld [vmem:[#allocation4_spill] sm:$0xff] }
0x42de   :  { %v4713_v51 = vpop.xlane.xlu0 %4712 }
0x42df   :  { %v4753_v8 = vrot.slane %v4713_v51, %v7308_v25 }
0x42e1   :  { %v4760_v1 = vsel %vm2549_vm5, %v4753_v8, %v4759_v63 }
0x42e2   :  { %v4762_v23 = vsel %vm281_vm6, %v4760_v1, -1e+10  ;;  %v4657_v6 = vpop.xlane.xlu0 %4656 }
0x42e3   :  { %v4763_v53 = vsel %vm2441_vm12, %v4762_v23, -inf  ;;  %vm4658_vm10 = vcmp.ge.f32.partialorder %v8637_v14, %v4657_v6 }
0x42e4   :  { %v4764_v7 = vrot.slane %v4763_v53, 4  ;;  %v4659_v59 = vsel %vm4658_vm10, %v9103_v40, 32.0 }
0x42e5   :  { %v4660_v43 = vsel %vm2661_vm9, %v4659_v59, inf }
0x42e6   :  { %v4765_v50 = vmax.f32 %v4763_v53, %v4764_v7  ;;  %v9105_v7 = vld [vmem:[#allocation12_spill] sm:$0xff] }
0x42e8   :  { %v4766_v58 = vrot.slane %v4765_v50, 2 }
0x42ea   :  { %v4767_v44 = vmax.f32 %v4765_v50, %v4766_v58  ;;  %v8682_v58 = vld [vmem:[#allocation2 + $0x18] sm:$0xff] }
0x42ec   :  { %v4768_v11 = vrot.slane %v4767_v44, 1 }
0x42ee   :  { %v4769_v4 = vmax.f32 %v4767_v44, %v4768_v11 }
0x42f0   :  { %v4770_v33 = vsub.f32 %v4762_v23, %v4769_v4 }
0x42f2   :  { %v4771_v48 = vmul.f32 1.442695, %v4770_v33 }
0x42f4   :  { %6396 = vpow2.f32 %v4771_v48 }
0x4301   :  { %v6397_v60 = vpop.eup %6396 }
0x4302   :  { %v4773_v37 = vsel %vm2441_vm12, %v6397_v60, 0.0 }
0x4303   :  { %v4774_v30 = vrot.slane %v4773_v37, 4 }
0x4305   :  { %v4775_v28 = vadd.f32 %v4774_v30, %v4773_v37  ;;  %v9106_v30 = vld [vmem:[#allocation18_spill] sm:$0xff] }
0x4307   :  { %v4776_v12 = vrot.slane %v4775_v28, 2 }
0x4309   :  { %v4777_v26 = vadd.f32 %v4776_v12, %v4775_v28  ;;  %v9107_v12 = vld [vmem:[#allocation13_spill] sm:$0xff] }
0x430b   :  { %v4778_v55 = vrot.slane %v4777_v26, 1 }
0x430d   :  { %v4779_v49 = vadd.f32 %v4778_v55, %v4777_v26 }
0x430f   :  { %6398 = vrcp.f32 %v4779_v49 }
0x431c   :  { %v6399_v21 = vpop.eup %6398 }
0x431d   :  { %v4781_v61 = vmul.f32 %v6399_v21, %v6397_v60 }
0x431f   :  { %5638 = vst.msk [vmem:[%s8983_s20 + $0x30] sm:$0xff] %vm2441_vm12, %v4781_v61  ;;  %v4792_v46 = vrot.slane %v4781_v61, %v6928_v27  ;;  %v4785_v47 = vrot.slane %v4781_v61, %v6680_v34  ;;  %v4799_v31 = vrot.slane %v4781_v61, %v7345_v20  ;;  %v4806_v29 = vrot.slane %v4781_v61, %v7353_v15 }
0x4320   :  { %v4813_v0 = vrot.slane %v4781_v61, %v9063_v24  ;;  %v4820_v41 = vrot.slane %v4781_v61, %v9100_v52  ;;  %v4827_v39 = vrot.slane %v4781_v61, %v9101_v62  ;;  %v4834_v5 = vrot.slane %v4781_v61, %v9102_v56 }
0x4321   :  { %4794 = vbcast.lane.b32.xlu1 %v4792_v46, 256  ;;  %4787 = vbcast.lane.b32.xlu0 %v4785_v47, 256 }
0x4325   :  { %4801 = vbcast.lane.b32.xlu1 %v4799_v31, 256  ;;  %4808 = vbcast.lane.b32.xlu0 %v4806_v29, 256  ;;  %v9108_v31 = vld [vmem:[#allocation5_spill] sm:$0xff] }
0x4329   :  { %4815 = vbcast.lane.b32.xlu1 %v4813_v0, 256  ;;  %4822 = vbcast.lane.b32.xlu0 %v4820_v41, 256  ;;  %v9109_v0 = vld [vmem:[#allocation14_spill] sm:$0xff] }
0x432d   :  { %4829 = vbcast.lane.b32.xlu1 %v4827_v39, 256  ;;  %4836 = vbcast.lane.b32.xlu0 %v4834_v5, 256 }
0x4351   :  { %4661 = vmin.xlane.f32.xlu1 %v4660_v43 }
0x4393   :  { %v4795_v32 = vpop.permute.xlu1 %4794  ;;  %v4788_v2 = vpop.permute.xlu0 %4787 }
0x4394   :  { %v4839_v51 = vmul.f32 %v8675_v35, %v4795_v32  ;;  %v4838_v8 = vmul.f32 %v9104_v54, %v4788_v2  ;;  %v9110_v2 = vld [vmem:[#allocation11_spill] sm:$0xff] }
0x4396   :  { %v4847_v63 = vsel %vm2062_vm11, %v4839_v51, 0.0  ;;  %v4846_v1 = vsel %vm2062_vm11, %v4838_v8, 0.0 }
0x4397   :  { %v4802_v23 = vpop.permute.xlu1 %4801  ;;  %v4809_v53 = vpop.permute.xlu0 %4808  ;;  %v4848_v11 = vadd.f32 %v4847_v63, %v4846_v1 }
0x4398   :  { %v4840_v50 = vmul.f32 %v9105_v7, %v4802_v23  ;;  %v4841_v44 = vmul.f32 %v8682_v58, %v4809_v53 }
0x439a   :  { %v4849_v4 = vsel %vm2062_vm11, %v4840_v50, 0.0  ;;  %v4851_v37 = vsel %vm2062_vm11, %v4841_v44, 0.0 }
0x439b   :  { %v4850_v33 = vadd.f32 %v4849_v4, %v4848_v11  ;;  %v4816_v48 = vpop.permute.xlu1 %4815  ;;  %v4823_v60 = vpop.permute.xlu0 %4822 }
0x439c   :  { %v4842_v28 = vmul.f32 %v9106_v30, %v4816_v48  ;;  %v4843_v26 = vmul.f32 %v9107_v12, %v4823_v60 }
0x439d   :  { %v4852_v55 = vadd.f32 %v4851_v37, %v4850_v33 }
0x439e   :  { %v4853_v49 = vsel %vm2062_vm11, %v4842_v28, 0.0  ;;  %v4855_v47 = vsel %vm2062_vm11, %v4843_v26, 0.0 }
0x439f   :  { %v4854_v21 = vadd.f32 %v4853_v49, %v4852_v55  ;;  %v4830_v61 = vpop.permute.xlu1 %4829  ;;  %v4837_v46 = vpop.permute.xlu0 %4836 }
0x43a0   :  { %v4844_v29 = vmul.f32 %v9108_v31, %v4830_v61  ;;  %v4845_v41 = vmul.f32 %v9109_v0, %v4837_v46 }
0x43a1   :  { %v4856_v39 = vadd.f32 %v4855_v47, %v4854_v21 }
0x43a2   :  { %v4857_v5 = vsel %vm2062_vm11, %v4844_v29, 0.0  ;;  %v4859_v59 = vsel %vm2062_vm11, %v4845_v41, 0.0 }
0x43a3   :  { %v4858_v6 = vadd.f32 %v4857_v5, %v4856_v39 }
0x43a5   :  { %v4860_v43 = vadd.f32 %v4859_v59, %v4858_v6 }
0x43a7   :  { %4863 = vrot.lane.b32.xlu0 %v4860_v43, %s6457_s6 }
0x43ab   :  { %4867 = vrot.lane.b32.xlu0 %v8573_v45, %s6455_s28 }
0x43da   :  { %v4662_v32 = vpop.xlane.xlu1 %4661 }
0x43db   :  { %vm4663_vm7 = vcmp.eq.f32.partialorder %v9110_v2, %v4662_v32 }
0x43dc   :  { %v5634_v51 = vsel %vm4663_vm7, 1.0, %v9060_v16 }
0x43dd   :  { %4861 = vst.msk [vmem:[#allocation3] sm:$0xff] %vm142_vm0, %v5634_v51 }
0x4419   :  { %v4864_v8 = vpop.permute.xlu0 %4863 }
0x441a   :  { %4866 = vst.msk [vmem:[#allocation3] sm:$0xff] %vm2656_vm8, %v4864_v8 }
0x441d   :  { %v4868_v63 = vpop.permute.xlu0 %4867 }
0x441e   :  { %4870 = vst.msk [vmem:[#allocation3] sm:$0xff] %vm2661_vm9, %v4868_v63 }
0x4425   :  { %v4871_v1 = vld [vmem:[#allocation3] sm:$0xff] }
0x4426   :  { %4969 = vmatmul.mubr.f32.vlgmr.msra.gmra.mxu1 %v4871_v1 }
0x4427   :  { %6101 = vmatprep.mubr.msk.f32.mxu1 %vm6454_vm4, %v9060_v16 }
0x44e6   :  { %v4970_v23 = vpop.f32.mrf.mxu1 }
0x44e7   :  { %v4971_v44 = vadd.f32 %v4970_v23, %v7596_v13 }
0x44e8   :  { %v4972_v53 = vpop.f32.mrf.mxu1 }
0x44e9   :  { %v4973_v50 = vadd.f32 %v4972_v53, %v7591_v9 }
0x44eb   :  { %4983 = vrot.lane.b32.xlu0 %v4973_v50, %s6455_s28  ;;  %v4975_v11 = vadd.f32 %v4973_v50, %v4971_v44 }
0x44ed   :  { %v5635_v4 = vmul.f32 -1.442695, %v4975_v11 }
0x44ef   :  { %6400 = vpow2.f32 %v5635_v4 }
0x44fc   :  { %v6401_v33 = vpop.eup %6400 }
0x44fd   :  { %v4979_v48 = vadd.f32 1.0, %v6401_v33 }
0x44ff   :  { %6402 = vrcp.f32 %v4979_v48 }
0x450c   :  { %v6403_v60 = vpop.eup %6402 }
0x450d   :  { %v4993_v21 = vsub.f32 1.0, %v6403_v60  ;;  %v4999_v46 = vmul.f32 %v6403_v60, %v8573_v45 }
0x455d   :  { %v4984_v37 = vpop.permute.xlu0 %4983 }
0x455e   :  { %v4986_v28 = vmul.f32 %v6403_v60, %v4984_v37  ;;  %v6451_v60 = vld [vmem:[%s8982_s15] ss:$0 sm:$0xff] }
0x4560   :  { %4988 = vrot.lane.b32.xlu0 %v4986_v28, %s6455_s28 }
0x45d2   :  { %v4989_v26 = vpop.permute.xlu0 %4988 }
0x45d3   :  { %v4991_v55 = vadd.f32 %v4989_v26, %v4971_v44 }
0x45d5   :  { %6404 = vtanh.f32 %v4991_v55 }
0x45e2   :  { %v6405_v49 = vpop.eup %6404 }
0x45e3   :  { %4995 = vrot.lane.b32.xlu0 %v6405_v49, %s6456_s30 }
0x4655   :  { %v4996_v61 = vpop.permute.xlu0 %4995 }
0x4656   :  { %v4998_v47 = vmul.f32 %v4996_v61, %v4993_v21 }
0x4658   :  { %v8711_v29 = vadd.f32 %v4999_v46, %v4998_v47 }
0x465a   :  { %5006 = vrot.lane.b32.xlu0 %v8711_v29, %s6456_s30 }
0x46cc   :  { %v5007_v41 = vpop.permute.xlu0 %5006 }
0x46cd   :  { %6091 = vmatmul.mubr.msk.f32.vlgmr.msra.gmra.mxu0 %vm142_vm0, %v5007_v41 }
0x46ce   :  { %5406 = vmatprep.mubr.f32.mxu0 %v9060_v16 }
0x478d   :  { %v5076_v39 = vpop.f32.mrf.mxu0 }
0x478e   :  { %5081 = vrot.lane.b32.xlu0 %v5076_v39, %s6456_s30 }
0x478f   :  { %v6092_v5 = vpop.f32.mrf.mxu0 }
0x4800   :  { %v5082_v6 = vpop.permute.xlu0 %5081 }
0x4801   :  { %v5105_v59 = vadd.f32 %v5082_v6, %v7256_v57  ;;  %v5104_v45 = vadd.f32 %v5082_v6, %v7258_v19  ;;  %v5106_v43 = vadd.f32 %v5082_v6, %v7262_v17  ;;  %v5107_v32 = vadd.f32 %v5082_v6, %v7269_v22 }
0x4802   :  { %v5108_v51 = vadd.f32 %v5082_v6, %v7260_v10  ;;  %v5109_v8 = vadd.f32 %v5082_v6, %v7274_v18  ;;  %v5110_v63 = vadd.f32 %v5082_v6, %v7264_v3  ;;  %v5111_v10 = vadd.f32 %v5082_v6, %v7277_v42 }
0x4803   :  { %6406 = vtanh.f32 %v5105_v59  ;;  %v8731_v11 = vadd.f32 %v5082_v6, %v4971_v44 }
0x4804   :  { %6408 = vtanh.f32 %v5104_v45 }
0x4805   :  { %6410 = vtanh.f32 %v5106_v43  ;;  %v5093_v48 = vsel %vm2661_vm9, %v8731_v11, -inf }
0x4806   :  { %6412 = vtanh.f32 %v5107_v32 }
0x4807   :  { %6414 = vtanh.f32 %v5108_v51 }
0x4808   :  { %6416 = vtanh.f32 %v5109_v8 }
0x4809   :  { %6418 = vtanh.f32 %v5110_v63 }
0x480a   :  { %6420 = vtanh.f32 %v5111_v10 }
0x4810   :  { %v6407_v1 = vpop.eup %6406 }
0x4811   :  { %v6409_v57 = vpop.eup %6408  ;;  %v5121_v19 = vmul.f32 %v8265_v38, %v6407_v1 }
0x4812   :  { %v6411_v23 = vpop.eup %6410  ;;  %v5120_v17 = vmul.f32 %v8265_v38, %v6409_v57 }
0x4813   :  { %v5131_v22 = vsel %vm142_vm0, %v5121_v19, 0.0  ;;  %v5122_v53 = vmul.f32 %v8265_v38, %v6411_v23  ;;  %v6413_v50 = vpop.eup %6412 }
0x4814   :  { %5132 = vadd.xlane.f32.xlu1 %v5131_v22  ;;  %v5128_v18 = vsel %vm142_vm0, %v5120_v17, 0.0  ;;  %v5123_v4 = vmul.f32 %v8265_v38, %v6413_v50  ;;  %v6415_v33 = vpop.eup %6414 }
0x4815   :  { %5129 = vadd.xlane.f32.xlu0 %v5128_v18  ;;  %v5134_v3 = vsel %vm142_vm0, %v5122_v53, 0.0  ;;  %v5124_v44 = vmul.f32 %v6451_v60, %v6415_v33  ;;  %v6417_v37 = vpop.eup %6416 }
0x4816   :  { %v5137_v42 = vsel %vm142_vm0, %v5123_v4, 0.0  ;;  %v5125_v26 = vmul.f32 %v6451_v60, %v6417_v37  ;;  %v6419_v38 = vpop.eup %6418 }
0x4817   :  { %v5140_v28 = vsel %vm142_vm0, %v5124_v44, 0.0  ;;  %v5126_v49 = vmul.f32 %v6451_v60, %v6419_v38  ;;  %v6421_v21 = vpop.eup %6420 }
0x4818   :  { %5135 = vadd.xlane.f32.xlu1 %v5134_v3  ;;  %v5143_v55 = vsel %vm142_vm0, %v5125_v26, 0.0  ;;  %v5127_v46 = vmul.f32 %v6451_v60, %v6421_v21 }
0x4819   :  { %5094 = vmax.xlane.f32.xlu0 %v5093_v48  ;;  %v5146_v61 = vsel %vm142_vm0, %v5126_v49, 0.0 }
0x481a   :  { %v5149_v47 = vsel %vm142_vm0, %v5127_v46, 0.0 }
0x481c   :  { %5138 = vadd.xlane.f32.xlu1 %v5137_v42 }
0x4820   :  { %5141 = vadd.xlane.f32.xlu1 %v5140_v28 }
0x4824   :  { %5144 = vadd.xlane.f32.xlu1 %v5143_v55 }
0x4828   :  { %5147 = vadd.xlane.f32.xlu1 %v5146_v61 }
0x482c   :  { %5150 = vadd.xlane.f32.xlu1 %v5149_v47 }
0x489d   :  { %v5133_v41 = vpop.xlane.xlu1 %5132 }
0x489e   :  { %v5130_v59 = vpop.xlane.xlu0 %5129  ;;  %v5167_v43 = vrot.slane %v5133_v41, %v7308_v25 }
0x489f   :  { %v5163_v32 = vrot.slane %v5130_v59, %v7308_v25 }
0x48a1   :  { %v5136_v39 = vpop.xlane.xlu1 %5135  ;;  %v5192_v57 = vsel %vm2537_vm13, %v5167_v43, %v5163_v32 }
0x48a2   :  { %v5171_v51 = vrot.slane %v5136_v39, %v7308_v25 }
0x48a4   :  { %v5193_v23 = vsel %vm2539_vm14, %v5171_v51, %v5192_v57  ;;  %v5334_v57 = vld [vmem:[%s8986_s16 + $0xc0] sm:$0xff] }
0x48a5   :  { %v5139_v5 = vpop.xlane.xlu1 %5138 }
0x48a6   :  { %v5175_v8 = vrot.slane %v5139_v5, %v7308_v25 }
0x48a8   :  { %v5194_v22 = vsel %vm2541_vm15, %v5175_v8, %v5193_v23  ;;  %v5332_v23 = vld [vmem:[%s8986_s16 + $0xb0] sm:$0xff] }
0x48a9   :  { %v5142_v6 = vpop.xlane.xlu1 %5141 }
0x48aa   :  { %v5179_v63 = vrot.slane %v5142_v6, %v7308_v25 }
0x48ac   :  { %v5195_v53 = vsel %vm2543_vm1, %v5179_v63, %v5194_v22  ;;  %v5336_v63 = vld [vmem:[%s8986_s16 + $0xd0] sm:$0xff]  ;;  %v5331_v22 = vld [vmem:[%s8986_s16 + $0xa8] sm:$0xff] }
0x48ad   :  { %v5145_v45 = vpop.xlane.xlu1 %5144 }
0x48ae   :  { %v5183_v19 = vrot.slane %v5145_v45, %v7308_v25 }
0x48b0   :  { %v5196_v50 = vsel %vm2545_vm2, %v5183_v19, %v5195_v53  ;;  %v5333_v19 = vld [vmem:[%s8986_s16 + $0xb8] sm:$0xff]  ;;  %v5330_v53 = vld [vmem:[%s8986_s16 + $0xa0] sm:$0xff] }
0x48b1   :  { %v5148_v1 = vpop.xlane.xlu1 %5147 }
0x48b2   :  { %v5187_v17 = vrot.slane %v5148_v1, %v7308_v25  ;;  %v5335_v1 = vld [vmem:[%s8986_s16 + $0xc8] sm:$0xff] }
0x48b4   :  { %v5197_v3 = vsel %vm2547_vm3, %v5187_v17, %v5196_v50  ;;  %v9111_v17 = vld [vmem:[#allocation16_spill] sm:$0xff]  ;;  %v5328_v50 = vld [vmem:[%s8986_s16 + $0x90] sm:$0xff] }
0x48b5   :  { %v5151_v10 = vpop.xlane.xlu1 %5150 }
0x48b6   :  { %v5191_v18 = vrot.slane %v5151_v10, %v7308_v25  ;;  %v5329_v10 = vld [vmem:[%s8986_s16 + $0x98] sm:$0xff] }
0x48b8   :  { %v5198_v4 = vsel %vm2549_vm5, %v5191_v18, %v5197_v3  ;;  %v5327_v18 = vld [vmem:[%s8986_s16 + $0x88] sm:$0xff]  ;;  %v5326_v3 = vld [vmem:[%s8986_s16 + $0x80] sm:$0xff] }
0x48b9   :  { %v5200_v33 = vsel %vm281_vm6, %v5198_v4, -1e+10  ;;  %v5325_v4 = vld [vmem:[%s8986_s16 + $0x78] sm:$0xff] }
0x48ba   :  { %v5201_v48 = vsel %vm2441_vm12, %v5200_v33, -inf }
0x48bb   :  { %v5202_v42 = vrot.slane %v5201_v48, 4 }
0x48bd   :  { %v5203_v60 = vmax.f32 %v5201_v48, %v5202_v42  ;;  %v5323_v48 = vld [vmem:[%s8986_s16 + $0x68] sm:$0xff]  ;;  %v5322_v42 = vld [vmem:[%s8986_s16 + $0x60] sm:$0xff] }
0x48bf   :  { %v5204_v44 = vrot.slane %v5203_v60, 2 }
0x48c1   :  { %v5205_v37 = vmax.f32 %v5203_v60, %v5204_v44 }
0x48c3   :  { %v5206_v28 = vrot.slane %v5205_v37, 1 }
0x48c5   :  { %v5207_v26 = vmax.f32 %v5205_v37, %v5206_v28 }
0x48c7   :  { %v5208_v38 = vsub.f32 %v5200_v33, %v5207_v26  ;;  %v5324_v33 = vld [vmem:[%s8986_s16 + $0x70] sm:$0xff] }
0x48c9   :  { %v5209_v55 = vmul.f32 1.442695, %v5208_v38 }
0x48cb   :  { %6422 = vpow2.f32 %v5209_v55 }
0x48d8   :  { %v6423_v49 = vpop.eup %6422 }
0x48d9   :  { %v5211_v25 = vsel %vm2441_vm12, %v6423_v49, 0.0 }
0x48da   :  { %v5212_v21 = vrot.slane %v5211_v25, 4 }
0x48dc   :  { %v5213_v61 = vadd.f32 %v5212_v21, %v5211_v25 }
0x48de   :  { %v5214_v46 = vrot.slane %v5213_v61, 2 }
0x48e0   :  { %v5215_v47 = vadd.f32 %v5214_v46, %v5213_v61 }
0x48e2   :  { %v5216_v36 = vrot.slane %v5215_v47, 1 }
0x48e4   :  { %v5217_v41 = vadd.f32 %v5216_v36, %v5215_v47 }
0x48e6   :  { %6424 = vrcp.f32 %v5217_v41 }
0x48f3   :  { %v6425_v39 = vpop.eup %6424 }
0x48f4   :  { %v5219_v5 = vmul.f32 %v6425_v39, %v6423_v49 }
0x48f6   :  { %5643 = vst.msk [vmem:[%s8983_s20 + $0x38] sm:$0xff] %vm2441_vm12, %v5219_v5  ;;  %v5223_v6 = vrot.slane %v5219_v5, %v6680_v34  ;;  %v5230_v59 = vrot.slane %v5219_v5, %v6928_v27  ;;  %v5237_v45 = vrot.slane %v5219_v5, %v7345_v20  ;;  %v5251_v43 = vrot.slane %v5219_v5, %v9063_v24  ;;  %v5095_v27 = vpop.xlane.xlu0 %5094 }
0x48f7   :  { %v5244_v32 = vrot.slane %v5219_v5, %v7353_v15  ;;  %v5265_v51 = vrot.slane %v5219_v5, %v9101_v62  ;;  %v5258_v8 = vrot.slane %v5219_v5, %v9100_v52  ;;  %v5272_v34 = vrot.slane %v5219_v5, %v9102_v56  ;;  %v5341_v15 = vld [vmem:[%s8986_s16 + $0xf8] sm:$0xff]  ;;  %v5340_v52 = vld [vmem:[%s8986_s16 + $0xf0] sm:$0xff]  ;;  %v5339_v62 = vld [vmem:[%s8986_s16 + $0xe8] sm:$0xff] }
0x48f8   :  { %5225 = vbcast.lane.b32.xlu1 %v5223_v6, 256  ;;  %5232 = vbcast.lane.b32.xlu0 %v5230_v59, 256  ;;  %vm5096_vm4 = vcmp.ge.f32.partialorder %v8731_v11, %v5095_v27  ;;  %v5338_v56 = vld [vmem:[%s8986_s16 + $0xe0] sm:$0xff]  ;;  %v5313_v27 = vld [vmem:[%s8986_s16 + $0x18] sm:$0xff] }
0x48f9   :  { %v5097_v20 = vsel %vm5096_vm4, %v9103_v40, 32.0  ;;  %5342 = vmatprep.subr.mxu0 %v5341_v15  ;;  %v5337_v40 = vld [vmem:[%s8986_s16 + $0xd8] sm:$0xff]  ;;  %v5312_v15 = vld [vmem:[%s8986_s16 + $0x10] sm:$0xff] }
0x48fa   :  { %v5098_v24 = vsel %vm2661_vm9, %v5097_v20, inf  ;;  %5343 = vmatpush1.msra.mxu0 %v5340_v52 }
0x48fb   :  { %5344 = vmatprep.subr.mxu0 %v5339_v62 }
0x48fc   :  { %5239 = vbcast.lane.b32.xlu1 %v5237_v45, 256  ;;  %5253 = vbcast.lane.b32.xlu0 %v5251_v43, 256 }
0x48fd   :  { %5345 = vmatpush1.msra.mxu0 %v5338_v56  ;;  %v5311_v56 = vld [vmem:[%s8986_s16 + $0x8] sm:$0xff] }
0x48fe   :  { %5346 = vmatprep.subr.mxu0 %v5337_v40 }
0x48ff   :  { %5347 = vmatpush1.msra.mxu0 %v5336_v63  ;;  %v5310_v63 = vld [vmem:[%s8986_s16] sm:$0xff] }
0x4900   :  { %5246 = vbcast.lane.b32.xlu1 %v5244_v32, 256  ;;  %5267 = vbcast.lane.b32.xlu0 %v5265_v51, 256  ;;  %v5317_v32 = vld [vmem:[%s8986_s16 + $0x38] sm:$0xff]  ;;  %v5316_v51 = vld [vmem:[%s8986_s16 + $0x30] sm:$0xff] }
0x4901   :  { %5348 = vmatprep.subr.mxu0 %v5335_v1 }
0x4902   :  { %5349 = vmatpush1.msra.mxu0 %v5334_v57 }
0x4903   :  { %5350 = vmatprep.subr.mxu0 %v5333_v19 }
0x4904   :  { %5260 = vbcast.lane.b32.xlu1 %v5258_v8, 256  ;;  %5351 = vmatpush1.msra.mxu0 %v5332_v23  ;;  %v5315_v8 = vld [vmem:[%s8986_s16 + $0x28] sm:$0xff] }
0x4905   :  { %5352 = vmatprep.subr.mxu0 %v5331_v22 }
0x4906   :  { %5353 = vmatpush1.msra.mxu0 %v5330_v53 }
0x4907   :  { %5354 = vmatprep.subr.mxu0 %v5329_v10 }
0x4908   :  { %5274 = vbcast.lane.b32.xlu1 %v5272_v34, 256  ;;  %5355 = vmatpush1.msra.mxu0 %v5328_v50 }
0x4909   :  { %5356 = vmatprep.subr.mxu0 %v5327_v18 }
0x490a   :  { %5357 = vmatpush1.msra.mxu0 %v5326_v3 }
0x490b   :  { %5358 = vmatprep.subr.mxu0 %v5325_v4 }
0x490c   :  { %5359 = vmatpush1.msra.mxu0 %v5324_v33 }
0x490d   :  { %5360 = vmatprep.subr.mxu0 %v5323_v48 }
0x490e   :  { %5361 = vmatpush1.msra.mxu0 %v5322_v42 }
0x491f   :  { %5099 = vmin.xlane.f32.xlu0 %v5098_v24 }
0x4935   :  { %3334 = vrot.lane.b32.xlu0 %v9111_v17, %s6457_s6 }
0x496a   :  { %v5226_v60 = vpop.permute.xlu1 %5225  ;;  %v5233_v44 = vpop.permute.xlu0 %5232 }
0x496b   :  { %v5276_v37 = vmul.f32 %v9104_v54, %v5226_v60  ;;  %v5277_v28 = vmul.f32 %v8675_v35, %v5233_v44  ;;  %v5321_v35 = vld [vmem:[%s8986_s16 + $0x58] sm:$0xff]  ;;  %v5320_v54 = vld [vmem:[%s8986_s16 + $0x50] sm:$0xff] }
0x496c   :  { %5362 = vmatprep.subr.mxu0 %v5321_v35 }
0x496d   :  { %v5284_v55 = vsel %vm2062_vm11, %v5276_v37, 0.0  ;;  %v5285_v49 = vsel %vm2062_vm11, %v5277_v28, 0.0  ;;  %5363 = vmatpush1.msra.mxu0 %v5320_v54  ;;  %v9113_v54 = vld [vmem:[#allocation19_spill] sm:$0xff] }
0x496e   :  { %v5240_v26 = vpop.permute.xlu1 %5239  ;;  %v5254_v38 = vpop.permute.xlu0 %5253  ;;  %v5286_v61 = vadd.f32 %v5285_v49, %v5284_v55 }
0x496f   :  { %v5278_v25 = vmul.f32 %v9105_v7, %v5240_v26  ;;  %v5280_v47 = vmul.f32 %v9106_v30, %v5254_v38  ;;  %v5319_v7 = vld [vmem:[%s8986_s16 + $0x48] sm:$0xff]  ;;  %v5318_v30 = vld [vmem:[%s8986_s16 + $0x40] sm:$0xff] }
0x4970   :  { %5364 = vmatprep.subr.mxu0 %v5319_v7  ;;  %v5440_v26 = vld [vmem:[%s8988_s18 + $0x8] sm:$0xff]  ;;  %v5439_v38 = vld [vmem:[%s8988_s18] sm:$0xff]  ;;  %v9114_v7 = vld [vmem:[#allocation17_spill] sm:$0xff] }
0x4971   :  { %v5287_v21 = vsel %vm2062_vm11, %v5278_v25, 0.0  ;;  %v5291_v59 = vsel %vm2062_vm11, %v5280_v47, 0.0  ;;  %5365 = vmatpush1.msra.mxu0 %v5318_v30 }
0x4972   :  { %v5247_v46 = vpop.permute.xlu1 %5246  ;;  %v5288_v41 = vadd.f32 %v5287_v21, %v5286_v61  ;;  %v5268_v39 = vpop.permute.xlu0 %5267  ;;  %5366 = vmatprep.subr.mxu0 %v5317_v32 }
0x4973   :  { %v5279_v36 = vmul.f32 %v8682_v58, %v5247_v46  ;;  %v5282_v45 = vmul.f32 %v9108_v31, %v5268_v39  ;;  %v5314_v31 = vld [vmem:[%s8986_s16 + $0x20] sm:$0xff]  ;;  %5367 = vmatpush1.msra.mxu0 %v5316_v51 }
0x4974   :  { %5368 = vmatprep.subr.mxu0 %v5315_v8 }
0x4975   :  { %v5289_v58 = vsel %vm2062_vm11, %v5279_v36, 0.0  ;;  %v5295_v52 = vsel %vm2062_vm11, %v5282_v45, 0.0  ;;  %5369 = vmatpush1.msra.mxu0 %v5314_v31 }
0x4976   :  { %v5290_v5 = vadd.f32 %v5289_v58, %v5288_v41  ;;  %v5261_v6 = vpop.permute.xlu1 %5260  ;;  %5370 = vmatprep.subr.mxu0 %v5313_v27 }
0x4977   :  { %v5281_v43 = vmul.f32 %v9107_v12, %v5261_v6  ;;  %5371 = vmatpush1.msra.mxu0 %v5312_v15 }
0x4978   :  { %v5292_v34 = vadd.f32 %v5291_v59, %v5290_v5  ;;  %5372 = vmatprep.subr.mxu0 %v5311_v56 }
0x4979   :  { %v5293_v12 = vsel %vm2062_vm11, %v5281_v43, 0.0  ;;  %5373 = vmatpush1.msra.mxu0 %v5310_v63 }
0x497a   :  { %v5294_v20 = vadd.f32 %v5293_v12, %v5292_v34  ;;  %v5275_v24 = vpop.permute.xlu1 %5274 }
0x497b   :  { %v5283_v62 = vmul.f32 %v9109_v0, %v5275_v24 }
0x497c   :  { %v5296_v40 = vadd.f32 %v5295_v52, %v5294_v20 }
0x497d   :  { %v5297_v1 = vsel %vm2062_vm11, %v5283_v62, 0.0 }
0x497e   :  { %v5298_v57 = vadd.f32 %v5297_v1, %v5296_v40 }
0x4980   :  { %5301 = vrot.lane.b32.xlu1 %v5298_v57, %s6457_s6 }
0x4984   :  { %5305 = vrot.lane.b32.xlu1 %v8711_v29, %s6455_s28 }
0x49a8   :  { %v5100_v0 = vpop.xlane.xlu0 %5099 }
0x49a9   :  { %vm5101_vm12 = vcmp.eq.f32.partialorder %v9110_v2, %v5100_v0 }
0x49aa   :  { %v5639_v19 = vsel %vm5101_vm12, 1.0, %v9060_v16 }
0x49ab   :  { %5299 = vst.msk [vmem:[#allocation3] sm:$0xff] %vm142_vm0, %v5639_v19 }
0x49ac   :  { %v3335_v23 = vpop.permute.xlu0 %3334 }
0x49ad   :  { %5617 = vst.msk [vmem:[%s8989_s19 + $0x10] sm:$0xff] %vm142_vm0, %v3335_v23 }
0x49f2   :  { %v5302_v17 = vpop.permute.xlu1 %5301 }
0x49f3   :  { %5304 = vst.msk [vmem:[#allocation3] sm:$0xff] %vm2656_vm8, %v5302_v17 }
0x49f6   :  { %v5306_v22 = vpop.permute.xlu1 %5305 }
0x49f7   :  { %5308 = vst.msk [vmem:[#allocation3] sm:$0xff] %vm2661_vm9, %v5306_v22 }
0x49fe   :  { %v5309_v53 = vld [vmem:[#allocation3] sm:$0xff] }
0x49ff   :  { %5407 = vmatmul.mubr.f32.vlgmr.msra.gmra.mxu0 %v5309_v53 }
0x4abf   :  { %v5408_v10 = vpop.f32.mrf.mxu0 }
0x4ac0   :  { %v5409_v18 = vadd.f32 %v5408_v10, %v7596_v13  ;;  %v5441_v13 = vld [vmem:[%s8988_s18 + $0x10] sm:$0xff] }
0x4ac1   :  { %v5410_v2 = vpop.f32.mrf.mxu0 }
0x4ac2   :  { %v5411_v50 = vadd.f32 %v5410_v2, %v7591_v9  ;;  %v5442_v9 = vld [vmem:[%s8988_s18 + $0x18] sm:$0xff] }
0x4ac3   :  { %6094 = vmatpush3.msra.mxu1 %v5442_v9 }
0x4ac4   :  { %5421 = vrot.lane.b32.xlu1 %v5411_v50, %s6455_s28  ;;  %v5413_v3 = vadd.f32 %v5411_v50, %v5409_v18  ;;  %6095 = vmatprep.subr.mxu1 %v9060_v16 }
0x4ac5   :  { %6096 = vmatpush3.msra.mxu1 %v5441_v13 }
0x4ac6   :  { %v5640_v4 = vmul.f32 -1.442695, %v5413_v3  ;;  %6097 = vmatprep.subr.mxu1 %v9060_v16 }
0x4ac7   :  { %6098 = vmatpush3.msra.mxu1 %v5440_v26 }
0x4ac8   :  { %6426 = vpow2.f32 %v5640_v4  ;;  %6099 = vmatprep.subr.mxu1 %v9060_v16  ;;  %v9112_v16 = vld [vmem:[#allocation10_spill] sm:$0xff] }
0x4ac9   :  { %6100 = vmatpush3.msra.mxu1 %v5439_v38 }
0x4ad5   :  { %v6427_v33 = vpop.eup %6426 }
0x4ad6   :  { %v5417_v48 = vadd.f32 1.0, %v6427_v33 }
0x4ad8   :  { %6428 = vrcp.f32 %v5417_v48 }
0x4ae5   :  { %v6429_v42 = vpop.eup %6428 }
0x4ae6   :  { %v5431_v49 = vsub.f32 1.0, %v6429_v42  ;;  %v5437_v21 = vmul.f32 %v6429_v42, %v8711_v29 }
0x4b36   :  { %v5422_v60 = vpop.permute.xlu1 %5421 }
0x4b37   :  { %v5424_v44 = vmul.f32 %v6429_v42, %v5422_v60 }
0x4b39   :  { %5426 = vrot.lane.b32.xlu1 %v5424_v44, %s6455_s28 }
0x4bab   :  { %v5427_v37 = vpop.permute.xlu1 %5426 }
0x4bac   :  { %v5429_v28 = vadd.f32 %v5427_v37, %v5409_v18 }
0x4bae   :  { %6430 = vtanh.f32 %v5429_v28 }
0x4bbb   :  { %v6431_v55 = vpop.eup %6430 }
0x4bbc   :  { %5433 = vrot.lane.b32.xlu1 %v6431_v55, %s6456_s30 }
0x4c2e   :  { %v5434_v25 = vpop.permute.xlu1 %5433 }
0x4c2f   :  { %v5436_v61 = vmul.f32 %v5434_v25, %v5431_v49 }
0x4c31   :  { %v5438_v46 = vadd.f32 %v5437_v21, %v5436_v61 }
0x4c33   :  { %5444 = vrot.lane.b32.xlu1 %v5438_v46, %s6456_s30 }
0x4ca5   :  { %v5445_v47 = vpop.permute.xlu1 %5444 }
0x4ca6   :  { %6102 = vmatmul.mubr.msk.f32.vlgmr.msra.gmra.mxu1 %vm142_vm0, %v5445_v47 }
0x4d66   :  { %v5514_v36 = vpop.f32.mrf.mxu1 }
0x4d67   :  { %5519 = vrot.lane.b32.xlu1 %v5514_v36, %s6456_s30 }
0x4d68   :  { %v6103_v35 = vpop.f32.mrf.mxu1 }
0x4d6b   :  { %2892 = vrot.lane.b32.xlu1 %v9112_v16, %s6457_s6 }
0x4d6f   :  { %3772 = vrot.lane.b32.xlu1 %v9113_v54, %s6457_s6 }
0x4d73   :  { %4210 = vrot.lane.b32.xlu1 %v9114_v7, %s6457_s6 }
0x4d77   :  { %4648 = vrot.lane.b32.xlu1 %v8637_v14, %s6457_s6 }
0x4d7b   :  { %5086 = vrot.lane.b32.xlu1 %v8731_v11, %s6457_s6 }
0x4dd9   :  { %v5520_v29 = vpop.permute.xlu1 %5519 }
0x4dda   :  { %v5522_v41 = vadd.f32 %v5520_v29, %v5409_v18 }
0x4ddc   :  { %5524 = vrot.lane.b32.xlu1 %v5522_v41, %s6457_s6 }
0x4ddd   :  { %v2893_v39 = vpop.permute.xlu1 %2892 }
0x4dde   :  { %5612 = vst.msk [vmem:[%s8989_s19 + $0x8] sm:$0xff] %vm142_vm0, %v2893_v39 }
0x4de1   :  { %v3773_v30 = vpop.permute.xlu1 %3772 }
0x4de2   :  { %5622 = vst.msk [vmem:[%s8989_s19 + $0x18] sm:$0xff] %vm142_vm0, %v3773_v30 }
0x4de5   :  { %v4211_v14 = vpop.permute.xlu1 %4210 }
0x4de6   :  { %5627 = vst.msk [vmem:[%s8989_s19 + $0x20] sm:$0xff] %vm142_vm0, %v4211_v14 }
0x4de9   :  { %v4649_v11 = vpop.permute.xlu1 %4648 }
0x4dea   :  { %5632 = vst.msk [vmem:[%s8989_s19 + $0x28] sm:$0xff] %vm142_vm0, %v4649_v11 }
0x4ded   :  { %v5087_v58 = vpop.permute.xlu1 %5086 }
0x4dee   :  { %5637 = vst.msk [vmem:[%s8989_s19 + $0x30] sm:$0xff] %vm142_vm0, %v5087_v58 }
0x4e4e   :  { %v5525_v5 = vpop.permute.xlu1 %5524 }
0x4e4f   :  { %5642 = vst.msk [vmem:[%s8989_s19 + $0x38] sm:$0xff] %vm142_vm0, %v5525_v5 }

</bundles_post_ra>
